<compile_context>
chip_gen: v7x
topology: tpu7x:2x2x1
jax: 0.10.0
libtpu: 0.0.40
codegen_flags: <defaults>
</compile_context>

<pallas_src>
import math
from functools import partial

import jax
import jax.numpy as jnp
from jax.experimental import pallas as pl
from jax.experimental.pallas import tpu as pltpu

THRESH = 0.5            # spiking threshold
DECAY = 0.25            # membrane decay
BN_EPS = 1e-5
LANE = 128
VMEM_LIMIT = 32 * 1024 * 1024   # explicit budget; safe on v5e/v6e (128MiB) and v7x (64MiB)


def _pad_to_lane(c):
    return max(LANE, ((c + LANE - 1) // LANE) * LANE)


def _row_tile(n, target=512):
    for t in (target, 512, 256, 128, 64, 32, 16, 8):
        if t <= n and n % t == 0:
            return t
    return n   # fall back to the full (untiled) dim — still a legal block


# ---------------------------------------------------------------------------
# Kernel 1: fused (BN affine) + LIF spiking neuron.
# Grid = (row tiles [parallel], time [arbitrary]); membrane state lives in VMEM scratch,
# is re-initialized at t == 0 of every row tile and carries the reset already applied.
# ---------------------------------------------------------------------------
def _bn_lif_kernel(x_ref, scale_ref, bias_ref, o_ref, mem_ref):
    t = pl.program_id(1)
    x = x_ref[0].astype(jnp.float32) * scale_ref[...] + bias_ref[...]   # [TM, C]

    @pl.when(t == 0)
    def _():
        mem_ref[...] = x

    @pl.when(t > 0)
    def _():
        mem_ref[...] = mem_ref[...] * DECAY + x     # mem_ref already holds reset membrane

    spike = (mem_ref[...] > THRESH).astype(jnp.float32)
    o_ref[0] = spike.astype(o_ref.dtype)            # bf16 spikes (exact 0/1) feed the MXU
    mem_ref[...] = mem_ref[...] * (1.0 - spike)     # store reset membrane for next step


def bn_lif(x_tmc, scale, bias):
    """x_tmc: [T, M, Cp] f32, scale/bias: [1, Cp] f32 -> bf16 spikes [T, M, Cp]."""
    T, M, Cp = x_tmc.shape
    TM = _row_tile(M, 512)
    return pl.pallas_call(
        _bn_lif_kernel,
        out_shape=jax.ShapeDtypeStruct((T, M, Cp), jnp.bfloat16),
        grid=(M // TM, T),
        in_specs=[
            pl.BlockSpec((1, TM, Cp), lambda m, t: (t, m, 0)),
            pl.BlockSpec((1, Cp), lambda m, t: (0, 0)),
            pl.BlockSpec((1, Cp), lambda m, t: (0, 0)),
        ],
        out_specs=pl.BlockSpec((1, TM, Cp), lambda m, t: (t, m, 0)),
        scratch_shapes=[pltpu.VMEM((TM, Cp), jnp.float32)],
        compiler_params=pltpu.CompilerParams(
            dimension_semantics=("parallel", "arbitrary"),
            vmem_limit_bytes=VMEM_LIMIT),
    )(x_tmc, scale, bias)


# ---------------------------------------------------------------------------
# Kernel 2: KxK conv as K*K shifted-window matmuls over a halo-padded image tile,
# plus per-tile partial BN statistics (sum, sum of squares).
# ---------------------------------------------------------------------------
def _make_conv_kxk_kernel(K, H, W):
    def kernel(sp_ref, w_ref, o_ref, st_ref):
        Cp = sp_ref.shape[3]
        Cop = o_ref.shape[2]
        acc = jnp.zeros((H * W, Cop), jnp.float32)
        for dy in range(K):
            for dx in range(K):
                patch = sp_ref[0, dy:dy + H, dx:dx + W, :].reshape(H * W, Cp)   # bf16
                acc = acc + jnp.dot(patch, w_ref[dy * K + dx],
                                    preferred_element_type=jnp.float32)
        o_ref[0] = acc
        s = jnp.sum(acc, axis=0, keepdims=True)
        ss = jnp.sum(acc * acc, axis=0, keepdims=True)
        st_ref[0] = jnp.concatenate([s, ss], axis=0)
    return kernel


def conv_kxk_stats(sp, w, H, W):
    """sp: [T*B, H+2p, W+2p, Cp] bf16, w: [K*K, Cp, Cop] bf16 ->
       (conv out [T*B, H*W, Cop] f32, partial stats [T*B, 2, Cop] f32)."""
    TB, Hp, Wp, Cp = sp.shape
    KK, _, Cop = w.shape
    kernel = _make_conv_kxk_kernel(int(round(KK ** 0.5)), H, W)
    return pl.pallas_call(
        kernel,
        out_shape=(jax.ShapeDtypeStruct((TB, H * W, Cop), jnp.float32),
                   jax.ShapeDtypeStruct((TB, 2, Cop), jnp.float32)),
        grid=(TB,),
        in_specs=[
            pl.BlockSpec((1, Hp, Wp, Cp), lambda i: (i, 0, 0, 0)),
            pl.BlockSpec((KK, Cp, Cop), lambda i: (0, 0, 0)),
        ],
        out_specs=(pl.BlockSpec((1, H * W, Cop), lambda i: (i, 0, 0)),
                   pl.BlockSpec((1, 2, Cop), lambda i: (i, 0, 0))),
        compiler_params=pltpu.CompilerParams(
            dimension_semantics=("parallel",),
            vmem_limit_bytes=VMEM_LIMIT),
    )(sp, w)


# ---------------------------------------------------------------------------
# Kernel 3: 1x1 conv (row-tiled matmul) + per-tile partial BN statistics.
# ---------------------------------------------------------------------------
def _matmul_stats_kernel(a_ref, w_ref, o_ref, st_ref):
    acc = jnp.dot(a_ref[...], w_ref[...], preferred_element_type=jnp.float32)  # [TN, Cop]
    o_ref[...] = acc
    s = jnp.sum(acc, axis=0, keepdims=True)
    ss = jnp.sum(acc * acc, axis=0, keepdims=True)
    st_ref[0] = jnp.concatenate([s, ss], axis=0)


def conv1x1_stats(a, w):
    """a: [N, Cp] bf16 spikes, w: [Cp, Cop] bf16 -> ([N, Cop] f32, [N//TN, 2, Cop] f32)."""
    N, Cp = a.shape
    Cop = w.shape[1]
    TN = _row_tile(N, 512)
    nt = N // TN
    return pl.pallas_call(
        _matmul_stats_kernel,
        out_shape=(jax.ShapeDtypeStruct((N, Cop), jnp.float32),
                   jax.ShapeDtypeStruct((nt, 2, Cop), jnp.float32)),
        grid=(nt,),
        in_specs=[
            pl.BlockSpec((TN, Cp), lambda i: (i, 0)),
            pl.BlockSpec((Cp, Cop), lambda i: (0, 0)),
        ],
        out_specs=(pl.BlockSpec((TN, Cop), lambda i: (i, 0)),
                   pl.BlockSpec((1, 2, Cop), lambda i: (i, 0, 0))),
        compiler_params=pltpu.CompilerParams(
            dimension_semantics=("parallel",),
            vmem_limit_bytes=VMEM_LIMIT),
    )(a, w)


# ---------------------------------------------------------------------------
# Kernel 4: tiled BN affine (final normalize pass).
# ---------------------------------------------------------------------------
def _affine_kernel(x_ref, scale_ref, bias_ref, o_ref):
    o_ref[...] = x_ref[...] * scale_ref[...] + bias_ref[...]


def bn_apply(x, scale, bias):
    N, C = x.shape
    TN = _row_tile(N, 1024)
    return pl.pallas_call(
        _affine_kernel,
        out_shape=jax.ShapeDtypeStruct((N, C), jnp.float32),
        grid=(N // TN,),
        in_specs=[pl.BlockSpec((TN, C), lambda i: (i, 0)),
                  pl.BlockSpec((1, C), lambda i: (0, 0)),
                  pl.BlockSpec((1, C), lambda i: (0, 0))],
        out_specs=pl.BlockSpec((TN, C), lambda i: (i, 0)),
        compiler_params=pltpu.CompilerParams(
            dimension_semantics=("parallel",),
            vmem_limit_bytes=VMEM_LIMIT),
    )(x, scale, bias)


def bn_finalize(partial_stats, gamma, beta, n_rows):
    """Reduce per-tile (sum, sumsq) -> fused scale/bias (training-mode batch stats, biased var)."""
    s = jnp.sum(partial_stats[:, 0, :], axis=0)
    ss = jnp.sum(partial_stats[:, 1, :], axis=0)
    mean = s / n_rows
    var = ss / n_rows - mean * mean
    inv = jax.lax.rsqrt(var + BN_EPS)
    scale = (gamma[0] * inv).reshape(1, -1)
    bias = (beta[0] - mean * gamma[0] * inv).reshape(1, -1)
    return scale, bias


# ---------------------------------------------------------------------------
# Parameter init (deterministic, synthetic; matches torch layer shapes, pre-padded / bf16)
# ---------------------------------------------------------------------------
def init_params(key, in_ch, out_ch, ksize=3):
    Cpi = _pad_to_lane(in_ch)
    Cpo = _pad_to_lane(out_ch)
    K = ksize
    k1, k2, k3, k4, k5, k6 = jax.random.split(key, 6)

    # torch Conv2d layouts: dconv [in, in, K, K] (groups ignored by the reference), pconv [out, in, 1, 1]
    wd_t = jax.random.normal(k1, (in_ch, in_ch, K, K), jnp.float32) / math.sqrt(in_ch * K * K)
    wp_t = jax.random.normal(k2, (out_ch, in_ch, 1, 1), jnp.float32) / math.sqrt(in_ch)

    wd = jnp.transpose(wd_t, (2, 3, 1, 0)).reshape(K * K, in_ch, in_ch)      # [kh*kw, cin, cout]
    wd = jnp.pad(wd, ((0, 0), (0, Cpi - in_ch), (0, Cpi - in_ch))).astype(jnp.bfloat16)

    wp = jnp.transpose(wp_t[:, :, 0, 0], (1, 0))                             # [cin, cout]
    wp = jnp.pad(wp, ((0, Cpi - in_ch), (0, Cpo - out_ch))).astype(jnp.bfloat16)

    def bn_pair(kg, kb, c, cp):
        g = 1.0 + 0.1 * jax.random.normal(kg, (c,), jnp.float32)
        b = 0.1 * jax.random.normal(kb, (c,), jnp.float32)
        g = jnp.pad(g, (0, cp - c), constant_values=1.0).reshape(1, cp)
        b = jnp.pad(b, (0, cp - c)).reshape(1, cp)
        return g, b

    g_d, b_d = bn_pair(k3, k4, in_ch, Cpi)
    g_p, b_p = bn_pair(k5, k6, out_ch, Cpo)
    return dict(w_d=wd, w_p=wp, g_d=g_d, b_d=b_d, g_p=g_p, b_p=b_p)


# ---------------------------------------------------------------------------
# Snn_DWConv forward
# ---------------------------------------------------------------------------
@partial(jax.jit, static_argnames=("out_ch",))
def snn_dwconv_forward(x, params, out_ch):
    T, B, Cin, H, W = x.shape
    KK = params["w_d"].shape[0]
    K = int(round(KK ** 0.5))
    pad = (K - 1) // 2
    Cpi = params["w_d"].shape[1]        # padded in channels (= dconv out channels)
    Cpo = params["w_p"].shape[1]        # padded out channels
    TB, M = T * B, B * H * W
    N = T * M

    # public NCHW -> internal channels-last + lane-dense channel padding (interface tax only)
    x_cl = jnp.transpose(x, (0, 1, 3, 4, 2))
    x_cl = jnp.pad(x_cl, ((0, 0), (0, 0), (0, 0), (0, 0), (0, Cpi - Cin)))
    x_tmc = x_cl.reshape(T, M, Cpi)

    ident_s = jnp.ones((1, Cpi), jnp.float32)
    ident_b = jnp.zeros((1, Cpi), jnp.float32)

    # ---- dconv: mem_update -> KxK conv -> BN (stats) ----
    s1 = bn_lif(x_tmc, ident_s, ident_b)                                  # bf16 spikes
    sp = jnp.pad(s1.reshape(TB, H, W, Cpi),
                 ((0, 0), (pad, pad), (pad, pad), (0, 0)))                # halo pad only
    c1, st1 = conv_kxk_stats(sp, params["w_d"], H, W)                     # [TB, H*W, Cpi] f32
    scale1, bias1 = bn_finalize(st1, params["g_d"], params["b_d"], N)

    # ---- pconv: (BN1 affine fused into mem_update) -> 1x1 conv -> BN ----
    s2 = bn_lif(c1.reshape(T, M, Cpi), scale1, bias1)                     # bf16 spikes
    c2, st2 = conv1x1_stats(s2.reshape(N, Cpi), params["w_p"])            # [N, Cpo] f32
    scale2, bias2 = bn_finalize(st2, params["g_p"], params["b_p"], N)
    y = bn_apply(c2, scale2, bias2)                                       # [N, Cpo] f32

    y = y.reshape(T, B, H, W, Cpo)[..., :out_ch]
    return jnp.transpose(y, (0, 1, 4, 2, 3))                              # back to [T, B, C, H, W]


if __name__ == "__main__":
    key = jax.random.PRNGKey(0)
    k_x, k_p = jax.random.split(key)

    # small shapes: T=4 timesteps, batch=2, in=4 channels, out=8 channels, 16x16 spatial, 3x3 dconv
    T, B, Cin, Cout, H, W, K = 4, 2, 4, 8, 16, 16, 3
    x = jax.random.normal(k_x, (T, B, Cin, H, W), jnp.float32)
    params = init_params(k_p, in_ch=Cin, out_ch=Cout, ksize=K)

    y = snn_dwconv_forward(x, params, out_ch=Cout)
    y = jax.block_until_ready(y)

    assert y.shape == (T, B, Cout, H, W)
    assert bool(jnp.all(jnp.isfinite(y)))
    print("KERNEL_OK")
</pallas_src>

<mosaic_0001>
module attributes {stable_mosaic.version = 11 : i64} {
  func.func @_bn_lif_kernel(%arg0: i32, %arg1: i32, %arg2: memref<1x512x128xf32, #tpu.memory_space<vmem>>, %arg3: memref<1x128xf32, #tpu.memory_space<vmem>>, %arg4: memref<1x128xf32, #tpu.memory_space<vmem>>, %arg5: memref<1x512x128xbf16, #tpu.memory_space<vmem>>, %arg6: memref<512x128xf32, #tpu.memory_space<vmem>>) attributes {dimension_semantics = [#tpu.dimension_semantics<parallel>, #tpu.dimension_semantics<arbitrary>], iteration_bounds = array<i64: 1, 4>, scalar_prefetch = 0 : i64, scratch_operands = 1 : i64, tpu.core_type = #tpu.core_type<tc>, window_params = [{transform_indices = @transform_0, window_bounds = array<i64: 1, 512, 128>}, {pipeline_mode = #tpu.pipeline_mode<synchronous>, transform_indices = @transform_1, window_bounds = array<i64: 1, 128>}, {pipeline_mode = #tpu.pipeline_mode<synchronous>, transform_indices = @transform_2, window_bounds = array<i64: 1, 128>}, {transform_indices = @transform_3, window_bounds = array<i64: 1, 512, 128>}]} {
    %c0 = arith.constant 0 : index
    %c0_0 = arith.constant 0 : index
    %c0_1 = arith.constant 0 : index
    %0 = vector.load %arg2[%c0, %c0_0, %c0_1] : memref<1x512x128xf32, #tpu.memory_space<vmem>>, vector<1x512x128xf32>
    %1 = vector.shape_cast %0 : vector<1x512x128xf32> to vector<512x128xf32>
    %c0_2 = arith.constant 0 : index
    %c0_3 = arith.constant 0 : index
    %2 = vector.load %arg3[%c0_2, %c0_3] : memref<1x128xf32, #tpu.memory_space<vmem>>, vector<1x128xf32>
    %3 = vector.broadcast %2 : vector<1x128xf32> to vector<512x128xf32>
    %4 = arith.mulf %1, %3 : vector<512x128xf32>
    %c0_4 = arith.constant 0 : index
    %c0_5 = arith.constant 0 : index
    %5 = vector.load %arg4[%c0_4, %c0_5] : memref<1x128xf32, #tpu.memory_space<vmem>>, vector<1x128xf32>
    %6 = vector.broadcast %5 : vector<1x128xf32> to vector<512x128xf32>
    %7 = arith.addf %4, %6 : vector<512x128xf32>
    %c0_i32 = arith.constant 0 : i32
    %8 = arith.cmpi eq, %arg1, %c0_i32 : i32
    %9 = arith.extui %8 : i1 to i32
    %c0_i32_6 = arith.constant 0 : i32
    %10 = arith.cmpi ne, %9, %c0_i32_6 : i32
    scf.if %10 {
      %c0_19 = arith.constant 0 : index
      %c0_20 = arith.constant 0 : index
      %28 = vector.load %arg6[%c0_19, %c0_20] : memref<512x128xf32, #tpu.memory_space<vmem>>, vector<512x128xf32>
      tpu.vector_store %arg6[%c0_19, %c0_20], %7 {strides = array<i32>} : memref<512x128xf32, #tpu.memory_space<vmem>>, vector<512x128xf32>,
    } else {
    }
    %c0_i32_7 = arith.constant 0 : i32
    %11 = arith.cmpi sgt, %arg1, %c0_i32_7 : i32
    %12 = arith.extui %11 : i1 to i32
    %c0_i32_8 = arith.constant 0 : i32
    %13 = arith.cmpi ne, %12, %c0_i32_8 : i32
    scf.if %13 {
      %c0_19 = arith.constant 0 : index
      %c0_20 = arith.constant 0 : index
      %28 = vector.load %arg6[%c0_19, %c0_20] : memref<512x128xf32, #tpu.memory_space<vmem>>, vector<512x128xf32>
      %cst_21 = arith.constant 2.500000e-01 : f32
      %29 = vector.broadcast %cst_21 : f32 to vector<512x128xf32>
      %30 = arith.mulf %28, %29 : vector<512x128xf32>
      %31 = arith.addf %30, %7 : vector<512x128xf32>
      %c0_22 = arith.constant 0 : index
      %c0_23 = arith.constant 0 : index
      %32 = vector.load %arg6[%c0_22, %c0_23] : memref<512x128xf32, #tpu.memory_space<vmem>>, vector<512x128xf32>
      tpu.vector_store %arg6[%c0_22, %c0_23], %31 {strides = array<i32>} : memref<512x128xf32, #tpu.memory_space<vmem>>, vector<512x128xf32>,
    } else {
    }
    %c0_9 = arith.constant 0 : index
    %c0_10 = arith.constant 0 : index
    %14 = vector.load %arg6[%c0_9, %c0_10] : memref<512x128xf32, #tpu.memory_space<vmem>>, vector<512x128xf32>
    %cst = arith.constant 5.000000e-01 : f32
    %15 = vector.broadcast %cst : f32 to vector<512x128xf32>
    %16 = arith.cmpf ogt, %14, %15 : vector<512x128xf32>
    %17 = arith.extui %16 : vector<512x128xi1> to vector<512x128xi32>
    %18 = arith.sitofp %17 : vector<512x128xi32> to vector<512x128xf32>
    %19 = arith.truncf %18 : vector<512x128xf32> to vector<512x128xbf16>
    %c0_11 = arith.constant 0 : index
    %c0_12 = arith.constant 0 : index
    %c0_13 = arith.constant 0 : index
    %20 = vector.load %arg5[%c0_11, %c0_12, %c0_13] : memref<1x512x128xbf16, #tpu.memory_space<vmem>>, vector<1x512x128xbf16>
    %21 = vector.shape_cast %20 : vector<1x512x128xbf16> to vector<512x128xbf16>
    %22 = vector.shape_cast %19 : vector<512x128xbf16> to vector<1x512x128xbf16>
    tpu.vector_store %arg5[%c0_11, %c0_12, %c0_13], %22 {strides = array<i32>} : memref<1x512x128xbf16, #tpu.memory_space<vmem>>, vector<1x512x128xbf16>,
    %c0_14 = arith.constant 0 : index
    %c0_15 = arith.constant 0 : index
    %23 = vector.load %arg6[%c0_14, %c0_15] : memref<512x128xf32, #tpu.memory_space<vmem>>, vector<512x128xf32>
    %cst_16 = arith.constant 1.000000e+00 : f32
    %24 = vector.broadcast %cst_16 : f32 to vector<512x128xf32>
    %25 = arith.subf %24, %18 : vector<512x128xf32>
    %26 = arith.mulf %23, %25 : vector<512x128xf32>
    %c0_17 = arith.constant 0 : index
    %c0_18 = arith.constant 0 : index
    %27 = vector.load %arg6[%c0_17, %c0_18] : memref<512x128xf32, #tpu.memory_space<vmem>>, vector<512x128xf32>
    tpu.vector_store %arg6[%c0_17, %c0_18], %26 {strides = array<i32>} : memref<512x128xf32, #tpu.memory_space<vmem>>, vector<512x128xf32>,
    return
  }
  func.func @transform_0(%arg0: i32, %arg1: i32) -> (i32, i32, i32) {
    %c0_i32 = arith.constant 0 : i32
    %c0_i32_0 = arith.constant 0 : i32
    return %arg1, %arg0, %c0_i32 : i32, i32, i32
  }
  func.func @transform_1(%arg0: i32, %arg1: i32) -> (i32, i32) {
    %c0_i32 = arith.constant 0 : i32
    %c0_i32_0 = arith.constant 0 : i32
    %c0_i32_1 = arith.constant 0 : i32
    return %c0_i32, %c0_i32_0 : i32, i32
  }
  func.func @transform_2(%arg0: i32, %arg1: i32) -> (i32, i32) {
    %c0_i32 = arith.constant 0 : i32
    %c0_i32_0 = arith.constant 0 : i32
    %c0_i32_1 = arith.constant 0 : i32
    return %c0_i32, %c0_i32_0 : i32, i32
  }
  func.func @transform_3(%arg0: i32, %arg1: i32) -> (i32, i32, i32) {
    %c0_i32 = arith.constant 0 : i32
    %c0_i32_0 = arith.constant 0 : i32
    return %arg1, %arg0, %c0_i32 : i32, i32, i32
  }
}

module attributes {stable_mosaic.version = 11 : i64} {
  func.func @kernel(%arg0: i32, %arg1: memref<1x18x18x128xbf16, #tpu.memory_space<vmem>>, %arg2: memref<9x128x128xbf16, #tpu.memory_space<vmem>>, %arg3: memref<1x256x128xf32, #tpu.memory_space<vmem>>, %arg4: memref<1x2x128xf32, #tpu.memory_space<vmem>>) attributes {dimension_semantics = [#tpu.dimension_semantics<parallel>], iteration_bounds = array<i64: 8>, scalar_prefetch = 0 : i64, scratch_operands = 0 : i64, tpu.core_type = #tpu.core_type<tc>, window_params = [{transform_indices = @transform_0, window_bounds = array<i64: 1, 18, 18, 128>}, {pipeline_mode = #tpu.pipeline_mode<synchronous>, transform_indices = @transform_1, window_bounds = array<i64: 9, 128, 128>}, {transform_indices = @transform_2, window_bounds = array<i64: 1, 256, 128>}, {transform_indices = @transform_3, window_bounds = array<i64: 1, 2, 128>}]} {
    %cst = arith.constant 0.000000e+00 : f32
    %0 = vector.broadcast %cst : f32 to vector<256x128xf32>
    %c0 = arith.constant 0 : index
    %c0_0 = arith.constant 0 : index
    %c0_1 = arith.constant 0 : index
    %c0_2 = arith.constant 0 : index
    %1 = vector.load %arg1[%c0, %c0_0, %c0_1, %c0_2] : memref<1x18x18x128xbf16, #tpu.memory_space<vmem>>, vector<1x16x16x128xbf16>
    %2 = vector.shape_cast %1 : vector<1x16x16x128xbf16> to vector<16x16x128xbf16>
    %3 = vector.shape_cast %2 : vector<16x16x128xbf16> to vector<256x128xbf16>
    %c0_3 = arith.constant 0 : index
    %c0_4 = arith.constant 0 : index
    %c0_5 = arith.constant 0 : index
    %4 = vector.load %arg2[%c0_3, %c0_4, %c0_5] : memref<9x128x128xbf16, #tpu.memory_space<vmem>>, vector<1x128x128xbf16>
    %5 = vector.shape_cast %4 : vector<1x128x128xbf16> to vector<128x128xbf16>
    %cst_6 = arith.constant dense<0.000000e+00> : vector<256x128xf32>
    %6 = tpu.matmul %3, %5, %cst_6 {dimension_numbers = #tpu.dot_dimension_numbers<[1], [0], [0], [1], [0, 0, 1, 1], [], []>} : vector<256x128xbf16>, vector<128x128xbf16>, vector<256x128xf32> -> vector<256x128xf32>
    %7 = arith.addf %0, %6 : vector<256x128xf32>
    %c0_7 = arith.constant 0 : index
    %c0_8 = arith.constant 0 : index
    %c1 = arith.constant 1 : index
    %c0_9 = arith.constant 0 : index
    %8 = vector.load %arg1[%c0_7, %c0_8, %c1, %c0_9] : memref<1x18x18x128xbf16, #tpu.memory_space<vmem>>, vector<1x16x16x128xbf16>
    %9 = vector.shape_cast %8 : vector<1x16x16x128xbf16> to vector<16x16x128xbf16>
    %10 = vector.shape_cast %9 : vector<16x16x128xbf16> to vector<256x128xbf16>
    %c1_10 = arith.constant 1 : index
    %c0_11 = arith.constant 0 : index
    %c0_12 = arith.constant 0 : index
    %11 = vector.load %arg2[%c1_10, %c0_11, %c0_12] : memref<9x128x128xbf16, #tpu.memory_space<vmem>>, vector<1x128x128xbf16>
    %12 = vector.shape_cast %11 : vector<1x128x128xbf16> to vector<128x128xbf16>
    %cst_13 = arith.constant dense<0.000000e+00> : vector<256x128xf32>
    %13 = tpu.matmul %10, %12, %cst_13 {dimension_numbers = #tpu.dot_dimension_numbers<[1], [0], [0], [1], [0, 0, 1, 1], [], []>} : vector<256x128xbf16>, vector<128x128xbf16>, vector<256x128xf32> -> vector<256x128xf32>
    %14 = arith.addf %7, %13 : vector<256x128xf32>
    %c0_14 = arith.constant 0 : index
    %c0_15 = arith.constant 0 : index
    %c2 = arith.constant 2 : index
    %c0_16 = arith.constant 0 : index
    %15 = vector.load %arg1[%c0_14, %c0_15, %c2, %c0_16] : memref<1x18x18x128xbf16, #tpu.memory_space<vmem>>, vector<1x16x16x128xbf16>
    %16 = vector.shape_cast %15 : vector<1x16x16x128xbf16> to vector<16x16x128xbf16>
    %17 = vector.shape_cast %16 : vector<16x16x128xbf16> to vector<256x128xbf16>
    %c2_17 = arith.constant 2 : index
    %c0_18 = arith.constant 0 : index
    %c0_19 = arith.constant 0 : index
    %18 = vector.load %arg2[%c2_17, %c0_18, %c0_19] : memref<9x128x128xbf16, #tpu.memory_space<vmem>>, vector<1x128x128xbf16>
    %19 = vector.shape_cast %18 : vector<1x128x128xbf16> to vector<128x128xbf16>
    %cst_20 = arith.constant dense<0.000000e+00> : vector<256x128xf32>
    %20 = tpu.matmul %17, %19, %cst_20 {dimension_numbers = #tpu.dot_dimension_numbers<[1], [0], [0], [1], [0, 0, 1, 1], [], []>} : vector<256x128xbf16>, vector<128x128xbf16>, vector<256x128xf32> -> vector<256x128xf32>
    %21 = arith.addf %14, %20 : vector<256x128xf32>
    %c0_21 = arith.constant 0 : index
    %c1_22 = arith.constant 1 : index
    %c0_23 = arith.constant 0 : index
    %c0_24 = arith.constant 0 : index
    %22 = vector.load %arg1[%c0_21, %c1_22, %c0_23, %c0_24] : memref<1x18x18x128xbf16, #tpu.memory_space<vmem>>, vector<1x16x16x128xbf16>
    %23 = vector.shape_cast %22 : vector<1x16x16x128xbf16> to vector<16x16x128xbf16>
    %24 = vector.shape_cast %23 : vector<16x16x128xbf16> to vector<256x128xbf16>
    %c3 = arith.constant 3 : index
    %c0_25 = arith.constant 0 : index
    %c0_26 = arith.constant 0 : index
    %25 = vector.load %arg2[%c3, %c0_25, %c0_26] : memref<9x128x128xbf16, #tpu.memory_space<vmem>>, vector<1x128x128xbf16>
    %26 = vector.shape_cast %25 : vector<1x128x128xbf16> to vector<128x128xbf16>
    %cst_27 = arith.constant dense<0.000000e+00> : vector<256x128xf32>
    %27 = tpu.matmul %24, %26, %cst_27 {dimension_numbers = #tpu.dot_dimension_numbers<[1], [0], [0], [1], [0, 0, 1, 1], [], []>} : vector<256x128xbf16>, vector<128x128xbf16>, vector<256x128xf32> -> vector<256x128xf32>
    %28 = arith.addf %21, %27 : vector<256x128xf32>
    %c0_28 = arith.constant 0 : index
    %c1_29 = arith.constant 1 : index
    %c1_30 = arith.constant 1 : index
    %c0_31 = arith.constant 0 : index
    %29 = vector.load %arg1[%c0_28, %c1_29, %c1_30, %c0_31] : memref<1x18x18x128xbf16, #tpu.memory_space<vmem>>, vector<1x16x16x128xbf16>
    %30 = vector.shape_cast %29 : vector<1x16x16x128xbf16> to vector<16x16x128xbf16>
    %31 = vector.shape_cast %30 : vector<16x16x128xbf16> to vector<256x128xbf16>
    %c4 = arith.constant 4 : index
    %c0_32 = arith.constant 0 : index
    %c0_33 = arith.constant 0 : index
    %32 = vector.load %arg2[%c4, %c0_32, %c0_33] : memref<9x128x128xbf16, #tpu.memory_space<vmem>>, vector<1x128x128xbf16>
    %33 = vector.shape_cast %32 : vector<1x128x128xbf16> to vector<128x128xbf16>
    %cst_34 = arith.constant dense<0.000000e+00> : vector<256x128xf32>
    %34 = tpu.matmul %31, %33, %cst_34 {dimension_numbers = #tpu.dot_dimension_numbers<[1], [0], [0], [1], [0, 0, 1, 1], [], []>} : vector<256x128xbf16>, vector<128x128xbf16>, vector<256x128xf32> -> vector<256x128xf32>
    %35 = arith.addf %28, %34 : vector<256x128xf32>
    %c0_35 = arith.constant 0 : index
    %c1_36 = arith.constant 1 : index
    %c2_37 = arith.constant 2 : index
    %c0_38 = arith.constant 0 : index
    %36 = vector.load %arg1[%c0_35, %c1_36, %c2_37, %c0_38] : memref<1x18x18x128xbf16, #tpu.memory_space<vmem>>, vector<1x16x16x128xbf16>
    %37 = vector.shape_cast %36 : vector<1x16x16x128xbf16> to vector<16x16x128xbf16>
    %38 = vector.shape_cast %37 : vector<16x16x128xbf16> to vector<256x128xbf16>
    %c5 = arith.constant 5 : index
    %c0_39 = arith.constant 0 : index
    %c0_40 = arith.constant 0 : index
    %39 = vector.load %arg2[%c5, %c0_39, %c0_40] : memref<9x128x128xbf16, #tpu.memory_space<vmem>>, vector<1x128x128xbf16>
    %40 = vector.shape_cast %39 : vector<1x128x128xbf16> to vector<128x128xbf16>
    %cst_41 = arith.constant dense<0.000000e+00> : vector<256x128xf32>
    %41 = tpu.matmul %38, %40, %cst_41 {dimension_numbers = #tpu.dot_dimension_numbers<[1], [0], [0], [1], [0, 0, 1, 1], [], []>} : vector<256x128xbf16>, vector<128x128xbf16>, vector<256x128xf32> -> vector<256x128xf32>
    %42 = arith.addf %35, %41 : vector<256x128xf32>
    %c0_42 = arith.constant 0 : index
    %c2_43 = arith.constant 2 : index
    %c0_44 = arith.constant 0 : index
    %c0_45 = arith.constant 0 : index
    %43 = vector.load %arg1[%c0_42, %c2_43, %c0_44, %c0_45] : memref<1x18x18x128xbf16, #tpu.memory_space<vmem>>, vector<1x16x16x128xbf16>
    %44 = vector.shape_cast %43 : vector<1x16x16x128xbf16> to vector<16x16x128xbf16>
    %45 = vector.shape_cast %44 : vector<16x16x128xbf16> to vector<256x128xbf16>
    %c6 = arith.constant 6 : index
    %c0_46 = arith.constant 0 : index
    %c0_47 = arith.constant 0 : index
    %46 = vector.load %arg2[%c6, %c0_46, %c0_47] : memref<9x128x128xbf16, #tpu.memory_space<vmem>>, vector<1x128x128xbf16>
    %47 = vector.shape_cast %46 : vector<1x128x128xbf16> to vector<128x128xbf16>
    %cst_48 = arith.constant dense<0.000000e+00> : vector<256x128xf32>
    %48 = tpu.matmul %45, %47, %cst_48 {dimension_numbers = #tpu.dot_dimension_numbers<[1], [0], [0], [1], [0, 0, 1, 1], [], []>} : vector<256x128xbf16>, vector<128x128xbf16>, vector<256x128xf32> -> vector<256x128xf32>
    %49 = arith.addf %42, %48 : vector<256x128xf32>
    %c0_49 = arith.constant 0 : index
    %c2_50 = arith.constant 2 : index
    %c1_51 = arith.constant 1 : index
    %c0_52 = arith.constant 0 : index
    %50 = vector.load %arg1[%c0_49, %c2_50, %c1_51, %c0_52] : memref<1x18x18x128xbf16, #tpu.memory_space<vmem>>, vector<1x16x16x128xbf16>
    %51 = vector.shape_cast %50 : vector<1x16x16x128xbf16> to vector<16x16x128xbf16>
    %52 = vector.shape_cast %51 : vector<16x16x128xbf16> to vector<256x128xbf16>
    %c7 = arith.constant 7 : index
    %c0_53 = arith.constant 0 : index
    %c0_54 = arith.constant 0 : index
    %53 = vector.load %arg2[%c7, %c0_53, %c0_54] : memref<9x128x128xbf16, #tpu.memory_space<vmem>>, vector<1x128x128xbf16>
    %54 = vector.shape_cast %53 : vector<1x128x128xbf16> to vector<128x128xbf16>
    %cst_55 = arith.constant dense<0.000000e+00> : vector<256x128xf32>
    %55 = tpu.matmul %52, %54, %cst_55 {dimension_numbers = #tpu.dot_dimension_numbers<[1], [0], [0], [1], [0, 0, 1, 1], [], []>} : vector<256x128xbf16>, vector<128x128xbf16>, vector<256x128xf32> -> vector<256x128xf32>
    %56 = arith.addf %49, %55 : vector<256x128xf32>
    %c0_56 = arith.constant 0 : index
    %c2_57 = arith.constant 2 : index
    %c2_58 = arith.constant 2 : index
    %c0_59 = arith.constant 0 : index
    %57 = vector.load %arg1[%c0_56, %c2_57, %c2_58, %c0_59] : memref<1x18x18x128xbf16, #tpu.memory_space<vmem>>, vector<1x16x16x128xbf16>
    %58 = vector.shape_cast %57 : vector<1x16x16x128xbf16> to vector<16x16x128xbf16>
    %59 = vector.shape_cast %58 : vector<16x16x128xbf16> to vector<256x128xbf16>
    %c8 = arith.constant 8 : index
    %c0_60 = arith.constant 0 : index
    %c0_61 = arith.constant 0 : index
    %60 = vector.load %arg2[%c8, %c0_60, %c0_61] : memref<9x128x128xbf16, #tpu.memory_space<vmem>>, vector<1x128x128xbf16>
    %61 = vector.shape_cast %60 : vector<1x128x128xbf16> to vector<128x128xbf16>
    %cst_62 = arith.constant dense<0.000000e+00> : vector<256x128xf32>
    %62 = tpu.matmul %59, %61, %cst_62 {dimension_numbers = #tpu.dot_dimension_numbers<[1], [0], [0], [1], [0, 0, 1, 1], [], []>} : vector<256x128xbf16>, vector<128x128xbf16>, vector<256x128xf32> -> vector<256x128xf32>
    %63 = arith.addf %56, %62 : vector<256x128xf32>
    %c0_63 = arith.constant 0 : index
    %c0_64 = arith.constant 0 : index
    %c0_65 = arith.constant 0 : index
    %64 = vector.load %arg3[%c0_63, %c0_64, %c0_65] : memref<1x256x128xf32, #tpu.memory_space<vmem>>, vector<1x256x128xf32>
    %65 = vector.shape_cast %64 : vector<1x256x128xf32> to vector<256x128xf32>
    %66 = vector.shape_cast %63 : vector<256x128xf32> to vector<1x256x128xf32>
    tpu.vector_store %arg3[%c0_63, %c0_64, %c0_65], %66 {strides = array<i32>} : memref<1x256x128xf32, #tpu.memory_space<vmem>>, vector<1x256x128xf32>,
    %cst_66 = arith.constant dense<0.000000e+00> : vector<128xf32>
    %67 = vector.multi_reduction <add>, %63, %cst_66 [0] : vector<256x128xf32> to vector<128xf32>
    %68 = vector.shape_cast %67 : vector<128xf32> to vector<1x128xf32>
    %69 = arith.mulf %63, %63 : vector<256x128xf32>
    %cst_67 = arith.constant dense<0.000000e+00> : vector<128xf32>
    %70 = vector.multi_reduction <add>, %69, %cst_67 [0] : vector<256x128xf32> to vector<128xf32>
    %71 = vector.shape_cast %70 : vector<128xf32> to vector<1x128xf32>
    %72 = tpu.concatenate %68, %71 in 0 : vector<1x128xf32>, vector<1x128xf32> -> vector<2x128xf32>
    %c0_68 = arith.constant 0 : index
    %c0_69 = arith.constant 0 : index
    %c0_70 = arith.constant 0 : index
    %73 = vector.load %arg4[%c0_68, %c0_69, %c0_70] : memref<1x2x128xf32, #tpu.memory_space<vmem>>, vector<1x2x128xf32>
    %74 = vector.shape_cast %73 : vector<1x2x128xf32> to vector<2x128xf32>
    %75 = vector.shape_cast %72 : vector<2x128xf32> to vector<1x2x128xf32>
    tpu.vector_store %arg4[%c0_68, %c0_69, %c0_70], %75 {strides = array<i32>} : memref<1x2x128xf32, #tpu.memory_space<vmem>>, vector<1x2x128xf32>,
    return
  }
  func.func @transform_0(%arg0: i32) -> (i32, i32, i32, i32) {
    %c0_i32 = arith.constant 0 : i32
    %c0_i32_0 = arith.constant 0 : i32
    %c0_i32_1 = arith.constant 0 : i32
    %c0_i32_2 = arith.constant 0 : i32
    return %arg0, %c0_i32, %c0_i32_0, %c0_i32_1 : i32, i32, i32, i32
  }
  func.func @transform_1(%arg0: i32) -> (i32, i32, i32) {
    %c0_i32 = arith.constant 0 : i32
    %c0_i32_0 = arith.constant 0 : i32
    %c0_i32_1 = arith.constant 0 : i32
    %c0_i32_2 = arith.constant 0 : i32
    return %c0_i32, %c0_i32_0, %c0_i32_1 : i32, i32, i32
  }
  func.func @transform_2(%arg0: i32) -> (i32, i32, i32) {
    %c0_i32 = arith.constant 0 : i32
    %c0_i32_0 = arith.constant 0 : i32
    %c0_i32_1 = arith.constant 0 : i32
    return %arg0, %c0_i32, %c0_i32_0 : i32, i32, i32
  }
  func.func @transform_3(%arg0: i32) -> (i32, i32, i32) {
    %c0_i32 = arith.constant 0 : i32
    %c0_i32_0 = arith.constant 0 : i32
    %c0_i32_1 = arith.constant 0 : i32
    return %arg0, %c0_i32, %c0_i32_0 : i32, i32, i32
  }
}

module attributes {stable_mosaic.version = 11 : i64} {
  func.func @_matmul_stats_kernel(%arg0: i32, %arg1: memref<512x128xbf16, #tpu.memory_space<vmem>>, %arg2: memref<128x128xbf16, #tpu.memory_space<vmem>>, %arg3: memref<512x128xf32, #tpu.memory_space<vmem>>, %arg4: memref<1x2x128xf32, #tpu.memory_space<vmem>>) attributes {dimension_semantics = [#tpu.dimension_semantics<parallel>], iteration_bounds = array<i64: 4>, scalar_prefetch = 0 : i64, scratch_operands = 0 : i64, tpu.core_type = #tpu.core_type<tc>, window_params = [{transform_indices = @transform_0, window_bounds = array<i64: 512, 128>}, {pipeline_mode = #tpu.pipeline_mode<synchronous>, transform_indices = @transform_1, window_bounds = array<i64: 128, 128>}, {transform_indices = @transform_2, window_bounds = array<i64: 512, 128>}, {transform_indices = @transform_3, window_bounds = array<i64: 1, 2, 128>}]} {
    %c0 = arith.constant 0 : index
    %c0_0 = arith.constant 0 : index
    %0 = vector.load %arg1[%c0, %c0_0] : memref<512x128xbf16, #tpu.memory_space<vmem>>, vector<512x128xbf16>
    %c0_1 = arith.constant 0 : index
    %c0_2 = arith.constant 0 : index
    %1 = vector.load %arg2[%c0_1, %c0_2] : memref<128x128xbf16, #tpu.memory_space<vmem>>, vector<128x128xbf16>
    %cst = arith.constant dense<0.000000e+00> : vector<512x128xf32>
    %2 = tpu.matmul %0, %1, %cst {dimension_numbers = #tpu.dot_dimension_numbers<[1], [0], [0], [1], [0, 0, 1, 1], [], []>} : vector<512x128xbf16>, vector<128x128xbf16>, vector<512x128xf32> -> vector<512x128xf32>
    %c0_3 = arith.constant 0 : index
    %c0_4 = arith.constant 0 : index
    %3 = vector.load %arg3[%c0_3, %c0_4] : memref<512x128xf32, #tpu.memory_space<vmem>>, vector<512x128xf32>
    tpu.vector_store %arg3[%c0_3, %c0_4], %2 {strides = array<i32>} : memref<512x128xf32, #tpu.memory_space<vmem>>, vector<512x128xf32>,
    %cst_5 = arith.constant dense<0.000000e+00> : vector<128xf32>
    %4 = vector.multi_reduction <add>, %2, %cst_5 [0] : vector<512x128xf32> to vector<128xf32>
    %5 = vector.shape_cast %4 : vector<128xf32> to vector<1x128xf32>
    %6 = arith.mulf %2, %2 : vector<512x128xf32>
    %cst_6 = arith.constant dense<0.000000e+00> : vector<128xf32>
    %7 = vector.multi_reduction <add>, %6, %cst_6 [0] : vector<512x128xf32> to vector<128xf32>
    %8 = vector.shape_cast %7 : vector<128xf32> to vector<1x128xf32>
    %9 = tpu.concatenate %5, %8 in 0 : vector<1x128xf32>, vector<1x128xf32> -> vector<2x128xf32>
    %c0_7 = arith.constant 0 : index
    %c0_8 = arith.constant 0 : index
    %c0_9 = arith.constant 0 : index
    %10 = vector.load %arg4[%c0_7, %c0_8, %c0_9] : memref<1x2x128xf32, #tpu.memory_space<vmem>>, vector<1x2x128xf32>
    %11 = vector.shape_cast %10 : vector<1x2x128xf32> to vector<2x128xf32>
    %12 = vector.shape_cast %9 : vector<2x128xf32> to vector<1x2x128xf32>
    tpu.vector_store %arg4[%c0_7, %c0_8, %c0_9], %12 {strides = array<i32>} : memref<1x2x128xf32, #tpu.memory_space<vmem>>, vector<1x2x128xf32>,
    return
  }
  func.func @transform_0(%arg0: i32) -> (i32, i32) {
    %c0_i32 = arith.constant 0 : i32
    %c0_i32_0 = arith.constant 0 : i32
    return %arg0, %c0_i32 : i32, i32
  }
  func.func @transform_1(%arg0: i32) -> (i32, i32) {
    %c0_i32 = arith.constant 0 : i32
    %c0_i32_0 = arith.constant 0 : i32
    %c0_i32_1 = arith.constant 0 : i32
    return %c0_i32, %c0_i32_0 : i32, i32
  }
  func.func @transform_2(%arg0: i32) -> (i32, i32) {
    %c0_i32 = arith.constant 0 : i32
    %c0_i32_0 = arith.constant 0 : i32
    return %arg0, %c0_i32 : i32, i32
  }
  func.func @transform_3(%arg0: i32) -> (i32, i32, i32) {
    %c0_i32 = arith.constant 0 : i32
    %c0_i32_0 = arith.constant 0 : i32
    %c0_i32_1 = arith.constant 0 : i32
    return %arg0, %c0_i32, %c0_i32_0 : i32, i32, i32
  }
}

module attributes {stable_mosaic.version = 11 : i64} {
  func.func @_affine_kernel(%arg0: i32, %arg1: memref<1024x128xf32, #tpu.memory_space<vmem>>, %arg2: memref<1x128xf32, #tpu.memory_space<vmem>>, %arg3: memref<1x128xf32, #tpu.memory_space<vmem>>, %arg4: memref<1024x128xf32, #tpu.memory_space<vmem>>) attributes {dimension_semantics = [#tpu.dimension_semantics<parallel>], iteration_bounds = array<i64: 2>, scalar_prefetch = 0 : i64, scratch_operands = 0 : i64, tpu.core_type = #tpu.core_type<tc>, window_params = [{transform_indices = @transform_0, window_bounds = array<i64: 1024, 128>}, {pipeline_mode = #tpu.pipeline_mode<synchronous>, transform_indices = @transform_1, window_bounds = array<i64: 1, 128>}, {pipeline_mode = #tpu.pipeline_mode<synchronous>, transform_indices = @transform_2, window_bounds = array<i64: 1, 128>}, {transform_indices = @transform_3, window_bounds = array<i64: 1024, 128>}]} {
    %c0 = arith.constant 0 : index
    %c0_0 = arith.constant 0 : index
    %0 = vector.load %arg1[%c0, %c0_0] : memref<1024x128xf32, #tpu.memory_space<vmem>>, vector<1024x128xf32>
    %c0_1 = arith.constant 0 : index
    %c0_2 = arith.constant 0 : index
    %1 = vector.load %arg2[%c0_1, %c0_2] : memref<1x128xf32, #tpu.memory_space<vmem>>, vector<1x128xf32>
    %2 = vector.broadcast %1 : vector<1x128xf32> to vector<1024x128xf32>
    %3 = arith.mulf %0, %2 : vector<1024x128xf32>
    %c0_3 = arith.constant 0 : index
    %c0_4 = arith.constant 0 : index
    %4 = vector.load %arg3[%c0_3, %c0_4] : memref<1x128xf32, #tpu.memory_space<vmem>>, vector<1x128xf32>
    %5 = vector.broadcast %4 : vector<1x128xf32> to vector<1024x128xf32>
    %6 = arith.addf %3, %5 : vector<1024x128xf32>
    %c0_5 = arith.constant 0 : index
    %c0_6 = arith.constant 0 : index
    %7 = vector.load %arg4[%c0_5, %c0_6] : memref<1024x128xf32, #tpu.memory_space<vmem>>, vector<1024x128xf32>
    tpu.vector_store %arg4[%c0_5, %c0_6], %6 {strides = array<i32>} : memref<1024x128xf32, #tpu.memory_space<vmem>>, vector<1024x128xf32>,
    return
  }
  func.func @transform_0(%arg0: i32) -> (i32, i32) {
    %c0_i32 = arith.constant 0 : i32
    %c0_i32_0 = arith.constant 0 : i32
    return %arg0, %c0_i32 : i32, i32
  }
  func.func @transform_1(%arg0: i32) -> (i32, i32) {
    %c0_i32 = arith.constant 0 : i32
    %c0_i32_0 = arith.constant 0 : i32
    %c0_i32_1 = arith.constant 0 : i32
    return %c0_i32, %c0_i32_0 : i32, i32
  }
  func.func @transform_2(%arg0: i32) -> (i32, i32) {
    %c0_i32 = arith.constant 0 : i32
    %c0_i32_0 = arith.constant 0 : i32
    %c0_i32_1 = arith.constant 0 : i32
    return %c0_i32, %c0_i32_0 : i32, i32
  }
  func.func @transform_3(%arg0: i32) -> (i32, i32) {
    %c0_i32 = arith.constant 0 : i32
    %c0_i32_0 = arith.constant 0 : i32
    return %arg0, %c0_i32 : i32, i32
  }
}

</mosaic_0001>

<bundles_post_ra>
// kernel: snn_dwconv_forward.5
= control target key start
LH: loop header
LB: loop body
LE: loop exit
PB: predicated region body
PF: predicated region fallthrough
CT: control target
= control target key end

     0   :  { %s2069_s12 = smov 0   ;;  %s2071_s13 = smov 0   ;;  %s3420_s0 = inlined_call_operand.vmem [shape: f32[4,512,128], index: 0, kind: input, shape index: {}]   ;;  %s3421_s1 = inlined_call_operand.vmem [shape: f32[1,128], index: 1, kind: input, shape index: {}]   ;;  %s3422_s2 = inlined_call_operand.vmem [shape: f32[1,128], index: 2, kind: input, shape index: {}]   ;;  %s3423_s3 = inlined_call_operand.vmem [shape: bf16[4,512,128], index: 3, kind: output, shape index: {}]  }
   0x1   :  { %s2073_s14 = smov 0  }
   0x2 LB: > { %s22_s15 = sadd.s32 1, %s2042_s13  ;;  %p1667_p0 = scmp.ge.s32.totalorder %s2046_s14, 1  ;;  %s2046_s14 = sphi %s2073_s14, %s13_s14   ;;  %s2042_s13 = sphi %s2071_s13, %s3792_s13   ;;  %s2038_s12 = sphi %s2069_s12, %s3791_s12  }
   0x3   : > { %p23_p1 = scmp.ge.s32.totalorder %s22_s15, 4  ;;  %p158_p2 = scmp.lt.s32.totalorder %s2046_s14, 5 }
   0x5   : > { %s3794_s15 = smov (%p23_p1, %s22_s15), 0  ;;  %p159_p3 = pnand %p1667_p0, %p158_p2 }
   0x7   : > { %162 = sbr.rel (%p159_p3) target bundleno = 228 (0xe4), region = 32 }
   0xe   : > { %p191_p4 = scmp.lt.s32.totalorder %s2038_s12, 3  ;;  %v2094_v0 = vld [vmem:[%s3421_s1] ss:$0 sm:$0xff]  ;;  %p1674_p5 = scmp.ne.s32.totalorder %s2038_s12, 0 }
   0xf   : > { %v2109_v1 = vld [vmem:[%s3422_s2] ss:$0 sm:$0xff] }
  0x10   : > { %s192_s16 = scalar_select %p191_p4, %s2038_s12, 3 }
  0x12   : > { %s1806_s17 = sshll.u32 %s192_s16, 9  ;;  %s1807_s18 = sshll.u32 %s192_s16, 8 }
  0x13   : > { %s2099_s23 = scalar_lea.vmem %s3420_s0, %s1806_s17  ;;  %s2104_s26 = scalar_lea.vmem %s3423_s3, %s1807_s18 }
  0x14   : > { %v210_v2 = vld [vmem:[%s2099_s23] sm:$0xff]  ;;  %v211_v3 = vld [vmem:[%s2099_s23 + $0x8] sm:$0xff]  ;;  %v212_v4 = vld [vmem:[%s2099_s23 + $0x10] sm:$0xff] }
  0x15   : > { %v213_v5 = vld [vmem:[%s2099_s23 + $0x18] sm:$0xff]  ;;  %v214_v6 = vld [vmem:[%s2099_s23 + $0x20] sm:$0xff]  ;;  %v215_v7 = vld [vmem:[%s2099_s23 + $0x28] sm:$0xff]  ;;  %v281_v8 = vmul.f32 %v2094_v0, %v210_v2  ;;  %v282_v9 = vmul.f32 %v2094_v0, %v211_v3  ;;  %v283_v10 = vmul.f32 %v2094_v0, %v212_v4 }
  0x16   : > { %v216_v11 = vld [vmem:[%s2099_s23 + $0x30] sm:$0xff]  ;;  %v217_v12 = vld [vmem:[%s2099_s23 + $0x38] sm:$0xff]  ;;  %v218_v13 = vld [vmem:[%s2099_s23 + $0x40] sm:$0xff]  ;;  %v284_v14 = vmul.f32 %v2094_v0, %v213_v5  ;;  %v285_v15 = vmul.f32 %v2094_v0, %v214_v6  ;;  %v286_v16 = vmul.f32 %v2094_v0, %v215_v7 }
  0x17   : > { %v219_v17 = vld [vmem:[%s2099_s23 + $0x48] sm:$0xff]  ;;  %v220_v18 = vld [vmem:[%s2099_s23 + $0x50] sm:$0xff]  ;;  %v221_v19 = vld [vmem:[%s2099_s23 + $0x58] sm:$0xff]  ;;  %v287_v20 = vmul.f32 %v2094_v0, %v216_v11  ;;  %v288_v21 = vmul.f32 %v2094_v0, %v217_v12  ;;  %v289_v22 = vmul.f32 %v2094_v0, %v218_v13  ;;  %v2133_v23 = vadd.f32 %v2109_v1, %v281_v8 }
  0x18   : > { %v222_v24 = vld [vmem:[%s2099_s23 + $0x60] sm:$0xff]  ;;  %v223_v25 = vld [vmem:[%s2099_s23 + $0x68] sm:$0xff]  ;;  %v224_v26 = vld [vmem:[%s2099_s23 + $0x70] sm:$0xff]  ;;  %v290_v27 = vmul.f32 %v2094_v0, %v219_v17  ;;  %v2140_v28 = vmul.f32 %v2094_v0, %v220_v18  ;;  %v2143_v29 = vmul.f32 %v2094_v0, %v221_v19  ;;  %v2146_v30 = vadd.f32 %v2109_v1, %v282_v9 }
  0x19   : > { %v225_v31 = vld [vmem:[%s2099_s23 + $0x78] sm:$0xff]  ;;  %v226_v32 = vld [vmem:[%s2099_s23 + $0x80] sm:$0xff]  ;;  %v227_v33 = vld [vmem:[%s2099_s23 + $0x88] sm:$0xff]  ;;  %v2152_v34 = vmul.f32 %v2094_v0, %v222_v24  ;;  %v2155_v35 = vmul.f32 %v2094_v0, %v223_v25  ;;  %v2158_v36 = vmul.f32 %v2094_v0, %v224_v26  ;;  %v2161_v37 = vadd.f32 %v2109_v1, %v283_v10  ;;  %420 = vst [vmem:[#allocation2] sm:$0xff] (!%p1674_p5), %v2133_v23 }
  0x1a   : > { %v228_v38 = vld [vmem:[%s2099_s23 + $0x90] sm:$0xff]  ;;  %v229_v39 = vld [vmem:[%s2099_s23 + $0x98] sm:$0xff]  ;;  %v230_v40 = vld [vmem:[%s2099_s23 + $0xa0] sm:$0xff]  ;;  %v2167_v41 = vmul.f32 %v2094_v0, %v225_v31  ;;  %v2170_v42 = vmul.f32 %v2094_v0, %v226_v32  ;;  %v2173_v43 = vmul.f32 %v2094_v0, %v227_v33  ;;  %v2176_v44 = vadd.f32 %v2109_v1, %v284_v14  ;;  %421 = vst [vmem:[#allocation2 + $0x8] sm:$0xff] (!%p1674_p5), %v2146_v30 }
  0x1b   : > { %v231_v45 = vld [vmem:[%s2099_s23 + $0xa8] sm:$0xff]  ;;  %v232_v46 = vld [vmem:[%s2099_s23 + $0xb0] sm:$0xff]  ;;  %v233_v47 = vld [vmem:[%s2099_s23 + $0xb8] sm:$0xff]  ;;  %v2182_v48 = vmul.f32 %v2094_v0, %v228_v38  ;;  %v2185_v49 = vmul.f32 %v2094_v0, %v229_v39  ;;  %v2188_v50 = vmul.f32 %v2094_v0, %v230_v40  ;;  %v2191_v51 = vadd.f32 %v2109_v1, %v285_v15  ;;  %422 = vst [vmem:[#allocation2 + $0x10] sm:$0xff] (!%p1674_p5), %v2161_v37 }
  0x1c   : > { %v234_v52 = vld [vmem:[%s2099_s23 + $0xc0] sm:$0xff]  ;;  %v235_v53 = vld [vmem:[%s2099_s23 + $0xc8] sm:$0xff]  ;;  %v236_v54 = vld [vmem:[%s2099_s23 + $0xd0] sm:$0xff]  ;;  %v2197_v55 = vmul.f32 %v2094_v0, %v231_v45  ;;  %v2200_v56 = vmul.f32 %v2094_v0, %v232_v46  ;;  %v2203_v57 = vmul.f32 %v2094_v0, %v233_v47  ;;  %v2206_v58 = vadd.f32 %v2109_v1, %v286_v16  ;;  %423 = vst [vmem:[#allocation2 + $0x18] sm:$0xff] (!%p1674_p5), %v2176_v44 }
  0x1d   : > { %v237_v59 = vld [vmem:[%s2099_s23 + $0xd8] sm:$0xff]  ;;  %v238_v60 = vld [vmem:[%s2099_s23 + $0xe0] sm:$0xff]  ;;  %v239_v61 = vld [vmem:[%s2099_s23 + $0xe8] sm:$0xff]  ;;  %v2212_v62 = vmul.f32 %v2094_v0, %v234_v52  ;;  %v2215_v63 = vmul.f32 %v2094_v0, %v235_v53  ;;  %v2218_v2 = vmul.f32 %v2094_v0, %v236_v54  ;;  %v2221_v3 = vadd.f32 %v2109_v1, %v287_v20  ;;  %424 = vst [vmem:[#allocation2 + $0x20] sm:$0xff] (!%p1674_p5), %v2191_v51 }
  0x1e   : > { %v240_v4 = vld [vmem:[%s2099_s23 + $0xf0] sm:$0xff]  ;;  %v241_v5 = vld [vmem:[%s2099_s23 + $0xf8] sm:$0xff]  ;;  %v242_v6 = vld [vmem:[%s2099_s23 + $0x100] sm:$0xff]  ;;  %v2227_v7 = vmul.f32 %v2094_v0, %v237_v59  ;;  %v2230_v8 = vmul.f32 %v2094_v0, %v238_v60  ;;  %v2233_v9 = vmul.f32 %v2094_v0, %v239_v61  ;;  %v2236_v10 = vadd.f32 %v2109_v1, %v288_v21  ;;  %425 = vst [vmem:[#allocation2 + $0x28] sm:$0xff] (!%p1674_p5), %v2206_v58 }
  0x1f   : > { %v243_v11 = vld [vmem:[%s2099_s23 + $0x108] sm:$0xff]  ;;  %v244_v12 = vld [vmem:[%s2099_s23 + $0x110] sm:$0xff]  ;;  %v245_v13 = vld [vmem:[%s2099_s23 + $0x118] sm:$0xff]  ;;  %v2242_v14 = vmul.f32 %v2094_v0, %v240_v4  ;;  %v2245_v15 = vmul.f32 %v2094_v0, %v241_v5  ;;  %v2248_v16 = vmul.f32 %v2094_v0, %v242_v6  ;;  %v2251_v17 = vadd.f32 %v2109_v1, %v289_v22  ;;  %426 = vst [vmem:[#allocation2 + $0x30] sm:$0xff] (!%p1674_p5), %v2221_v3 }
  0x20   : > { %3516 = vst [vmem:[#allocation3_spill] sm:$0xff] %v2236_v10  ;;  %v246_v18 = vld [vmem:[%s2099_s23 + $0x120] sm:$0xff]  ;;  %v247_v19 = vld [vmem:[%s2099_s23 + $0x128] sm:$0xff]  ;;  %v248_v20 = vld [vmem:[%s2099_s23 + $0x130] sm:$0xff]  ;;  %v2257_v21 = vmul.f32 %v2094_v0, %v243_v11  ;;  %v2260_v24 = vmul.f32 %v2094_v0, %v244_v12  ;;  %v2263_v25 = vmul.f32 %v2094_v0, %v245_v13  ;;  %v2266_v26 = vadd.f32 %v2109_v1, %v290_v27 }
  0x21   : > { %3517 = vst [vmem:[#allocation4_spill] sm:$0xff] %v2251_v17  ;;  %v249_v22 = vld [vmem:[%s2099_s23 + $0x138] sm:$0xff]  ;;  %v250_v31 = vld [vmem:[%s2099_s23 + $0x140] sm:$0xff]  ;;  %v251_v32 = vld [vmem:[%s2099_s23 + $0x148] sm:$0xff]  ;;  %v2272_v33 = vmul.f32 %v2094_v0, %v246_v18  ;;  %v2275_v38 = vmul.f32 %v2094_v0, %v247_v19  ;;  %v2278_v39 = vmul.f32 %v2094_v0, %v248_v20  ;;  %v2282_v40 = vadd.f32 %v2109_v1, %v2140_v28 }
  0x22   : > { %3518 = vst [vmem:[#allocation5_spill] sm:$0xff] %v2266_v26  ;;  %v252_v27 = vld [vmem:[%s2099_s23 + $0x150] sm:$0xff]  ;;  %v253_v45 = vld [vmem:[%s2099_s23 + $0x158] sm:$0xff]  ;;  %v254_v46 = vld [vmem:[%s2099_s23 + $0x160] sm:$0xff]  ;;  %v2288_v47 = vmul.f32 %v2094_v0, %v249_v22  ;;  %v2291_v52 = vmul.f32 %v2094_v0, %v250_v31  ;;  %v2294_v53 = vmul.f32 %v2094_v0, %v251_v32  ;;  %v2298_v54 = vadd.f32 %v2109_v1, %v2143_v29 }
  0x23   : > { %3519 = vst [vmem:[#allocation6_spill] sm:$0xff] %v2282_v40  ;;  %v255_v28 = vld [vmem:[%s2099_s23 + $0x168] sm:$0xff]  ;;  %v256_v59 = vld [vmem:[%s2099_s23 + $0x170] sm:$0xff]  ;;  %v257_v60 = vld [vmem:[%s2099_s23 + $0x178] sm:$0xff]  ;;  %v2304_v61 = vmul.f32 %v2094_v0, %v252_v27  ;;  %v2307_v4 = vmul.f32 %v2094_v0, %v253_v45  ;;  %v2310_v5 = vmul.f32 %v2094_v0, %v254_v46  ;;  %v2314_v6 = vadd.f32 %v2109_v1, %v2152_v34 }
  0x24   : > { %3520 = vst [vmem:[#allocation7_spill] sm:$0xff] %v2298_v54  ;;  %v258_v29 = vld [vmem:[%s2099_s23 + $0x180] sm:$0xff]  ;;  %v259_v11 = vld [vmem:[%s2099_s23 + $0x188] sm:$0xff]  ;;  %v260_v12 = vld [vmem:[%s2099_s23 + $0x190] sm:$0xff]  ;;  %v2320_v13 = vmul.f32 %v2094_v0, %v255_v28  ;;  %v2323_v18 = vmul.f32 %v2094_v0, %v256_v59  ;;  %v2326_v19 = vmul.f32 %v2094_v0, %v257_v60  ;;  %v2330_v20 = vadd.f32 %v2109_v1, %v2155_v35 }
  0x25   : > { %3521 = vst [vmem:[#allocation8_spill] sm:$0xff] %v2314_v6  ;;  %v261_v34 = vld [vmem:[%s2099_s23 + $0x198] sm:$0xff]  ;;  %v262_v22 = vld [vmem:[%s2099_s23 + $0x1a0] sm:$0xff]  ;;  %v263_v31 = vld [vmem:[%s2099_s23 + $0x1a8] sm:$0xff]  ;;  %v329_v32 = vmul.f32 %v2094_v0, %v258_v29  ;;  %v330_v27 = vmul.f32 %v2094_v0, %v259_v11  ;;  %v331_v45 = vmul.f32 %v2094_v0, %v260_v12  ;;  %v2340_v46 = vadd.f32 %v2109_v1, %v2158_v36 }
  0x26   : > { %3522 = vst [vmem:[#allocation9_spill] sm:$0xff] %v2330_v20  ;;  %v264_v28 = vld [vmem:[%s2099_s23 + $0x1b0] sm:$0xff]  ;;  %v265_v35 = vld [vmem:[%s2099_s23 + $0x1b8] sm:$0xff]  ;;  %v266_v59 = vld [vmem:[%s2099_s23 + $0x1c0] sm:$0xff]  ;;  %v332_v60 = vmul.f32 %v2094_v0, %v261_v34  ;;  %v333_v20 = vmul.f32 %v2094_v0, %v262_v22  ;;  %v334_v29 = vmul.f32 %v2094_v0, %v263_v31  ;;  %v2350_v11 = vadd.f32 %v2109_v1, %v2167_v41 }
  0x27   : > { %3523 = vst [vmem:[#allocation10_spill] sm:$0xff] %v2340_v46  ;;  %v267_v12 = vld [vmem:[%s2099_s23 + $0x1c8] sm:$0xff]  ;;  %v268_v6 = vld [vmem:[%s2099_s23 + $0x1d0] sm:$0xff]  ;;  %v269_v36 = vld [vmem:[%s2099_s23 + $0x1d8] sm:$0xff]  ;;  %v335_v46 = vmul.f32 %v2094_v0, %v264_v28  ;;  %v336_v54 = vmul.f32 %v2094_v0, %v265_v35  ;;  %v337_v40 = vmul.f32 %v2094_v0, %v266_v59  ;;  %v2360_v34 = vadd.f32 %v2109_v1, %v2170_v42 }
  0x28   : > { %3524 = vst [vmem:[#allocation11_spill] sm:$0xff] %v2350_v11  ;;  %v270_v22 = vld [vmem:[%s2099_s23 + $0x1e0] sm:$0xff]  ;;  %v271_v31 = vld [vmem:[%s2099_s23 + $0x1e8] sm:$0xff]  ;;  %v272_v26 = vld [vmem:[%s2099_s23 + $0x1f0] sm:$0xff]  ;;  %v338_v17 = vmul.f32 %v2094_v0, %v267_v12  ;;  %v339_v41 = vmul.f32 %v2094_v0, %v268_v6  ;;  %v340_v11 = vmul.f32 %v2094_v0, %v269_v36  ;;  %v2370_v28 = vadd.f32 %v2109_v1, %v2173_v43 }
  0x29   : > { %3525 = vst [vmem:[#allocation12_spill] sm:$0xff] %v2360_v34  ;;  %v273_v35 = vld [vmem:[%s2099_s23 + $0x1f8] sm:$0xff]  ;;  %v341_v59 = vmul.f32 %v2094_v0, %v270_v22  ;;  %v342_v10 = vmul.f32 %v2094_v0, %v271_v31  ;;  %v343_v42 = vmul.f32 %v2094_v0, %v272_v26  ;;  %v2378_v34 = vadd.f32 %v2109_v1, %v2182_v48 }
  0x2a   : > { %v344_v12 = vmul.f32 %v2094_v0, %v273_v35  ;;  %v2383_v6 = vadd.f32 %v2109_v1, %v2185_v49  ;;  %v2387_v43 = vadd.f32 %v2109_v1, %v2188_v50  ;;  %v2391_v36 = vadd.f32 %v2109_v1, %v2197_v55  ;;  %437 = vst [vmem:[#allocation2 + $0x88] sm:$0xff] (!%p1674_p5), %v2370_v28 }
  0x2b   : > { %v2395_v26 = vadd.f32 %v2109_v1, %v2200_v56  ;;  %v2399_v48 = vadd.f32 %v2109_v1, %v2203_v57  ;;  %v2403_v0 = vadd.f32 %v2109_v1, %v2212_v62  ;;  %v2407_v49 = vadd.f32 %v2109_v1, %v2215_v63  ;;  %v3544_v31 = vld [vmem:[#allocation7_spill] sm:$0xff] (!%p1674_p5)  ;;  %438 = vst [vmem:[#allocation2 + $0x90] sm:$0xff] (!%p1674_p5), %v2378_v34 }
  0x2c   : > { %v2411_v50 = vadd.f32 %v2109_v1, %v2218_v2  ;;  %v2415_v55 = vadd.f32 %v2109_v1, %v2227_v7  ;;  %v2419_v56 = vadd.f32 %v2109_v1, %v2230_v8  ;;  %v2423_v57 = vadd.f32 %v2109_v1, %v2233_v9  ;;  %431 = vst [vmem:[#allocation2 + $0x58] sm:$0xff] (!%p1674_p5), %v3544_v31 }
  0x2d   : > { %v2427_v62 = vadd.f32 %v2109_v1, %v2242_v14  ;;  %v2431_v63 = vadd.f32 %v2109_v1, %v2245_v15  ;;  %v2435_v2 = vadd.f32 %v2109_v1, %v2248_v16  ;;  %v2439_v7 = vadd.f32 %v2109_v1, %v2257_v21  ;;  %v3546_v35 = vld [vmem:[#allocation9_spill] sm:$0xff] (!%p1674_p5)  ;;  %439 = vst [vmem:[#allocation2 + $0x98] sm:$0xff] (!%p1674_p5), %v2383_v6 }
  0x2e   : > { %v2443_v8 = vadd.f32 %v2109_v1, %v2260_v24  ;;  %v2447_v9 = vadd.f32 %v2109_v1, %v2263_v25  ;;  %v2451_v14 = vadd.f32 %v2109_v1, %v2272_v33  ;;  %v2455_v15 = vadd.f32 %v2109_v1, %v2275_v38  ;;  %433 = vst [vmem:[#allocation2 + $0x68] sm:$0xff] (!%p1674_p5), %v3546_v35 }
  0x2f   : > { %v2459_v16 = vadd.f32 %v2109_v1, %v2278_v39  ;;  %v2463_v21 = vadd.f32 %v2109_v1, %v2288_v47  ;;  %v2467_v24 = vadd.f32 %v2109_v1, %v2291_v52  ;;  %v2471_v25 = vadd.f32 %v2109_v1, %v2294_v53  ;;  %440 = vst [vmem:[#allocation2 + $0xa0] sm:$0xff] (!%p1674_p5), %v2387_v43 }
  0x30   : > { %v2475_v33 = vadd.f32 %v2109_v1, %v2304_v61  ;;  %v2479_v38 = vadd.f32 %v2109_v1, %v2307_v4  ;;  %v2483_v39 = vadd.f32 %v2109_v1, %v2310_v5  ;;  %v2487_v47 = vadd.f32 %v2109_v1, %v2320_v13  ;;  %441 = vst [vmem:[#allocation2 + $0xa8] sm:$0xff] (!%p1674_p5), %v2391_v36 }
  0x31   : > { %v2491_v52 = vadd.f32 %v2109_v1, %v2323_v18  ;;  %v2495_v53 = vadd.f32 %v2109_v1, %v2326_v19  ;;  %v2498_v61 = vadd.f32 %v2109_v1, %v329_v32  ;;  %v2501_v4 = vadd.f32 %v2109_v1, %v330_v27  ;;  %442 = vst [vmem:[#allocation2 + $0xb0] sm:$0xff] (!%p1674_p5), %v2395_v26 }
  0x32   : > { %v2504_v5 = vadd.f32 %v2109_v1, %v331_v45  ;;  %v2507_v13 = vadd.f32 %v2109_v1, %v332_v60  ;;  %v2510_v22 = vadd.f32 %v2109_v1, %v333_v20  ;;  %v2513_v18 = vadd.f32 %v2109_v1, %v334_v29  ;;  %443 = vst [vmem:[#allocation2 + $0xb8] sm:$0xff] (!%p1674_p5), %v2399_v48 }
  0x33   : > { %v2516_v19 = vadd.f32 %v2109_v1, %v335_v46  ;;  %v2519_v32 = vadd.f32 %v2109_v1, %v336_v54  ;;  %v2522_v27 = vadd.f32 %v2109_v1, %v337_v40  ;;  %v2525_v45 = vadd.f32 %v2109_v1, %v338_v17  ;;  %v3542_v17 = vld [vmem:[#allocation5_spill] sm:$0xff] (!%p1674_p5)  ;;  %444 = vst [vmem:[#allocation2 + $0xc0] sm:$0xff] (!%p1674_p5), %v2403_v0 }
  0x34   : > { %3526 = vst [vmem:[#allocation13_spill] sm:$0xff] %v2504_v5  ;;  %3527 = vst [vmem:[#allocation14_spill] sm:$0xff] %v2507_v13  ;;  %v2528_v60 = vadd.f32 %v2109_v1, %v339_v41  ;;  %v2531_v20 = vadd.f32 %v2109_v1, %v340_v11  ;;  %v2534_v29 = vadd.f32 %v2109_v1, %v341_v59  ;;  %419 = sbr.rel (%p1674_p5) target bundleno = 83 (0x53), region = 36  ;;  %v3543_v11 = vld [vmem:[#allocation6_spill] sm:$0xff] (!%p1674_p5)  ;;  %v3545_v41 = vld [vmem:[#allocation8_spill] sm:$0xff] (!%p1674_p5) }
  0x35   : > { %3528 = vst [vmem:[#allocation15_spill] sm:$0xff] %v2510_v22  ;;  %3529 = vst [vmem:[#allocation16_spill] sm:$0xff] %v2513_v18  ;;  %v2537_v46 = vadd.f32 %v2109_v1, %v342_v10  ;;  %v2540_v54 = vadd.f32 %v2109_v1, %v343_v42  ;;  %v2543_v40 = vadd.f32 %v2109_v1, %v344_v12  ;;  %v3540_v10 = vld [vmem:[#allocation3_spill] sm:$0xff] (!%p1674_p5)  ;;  %v3541_v1 = vld [vmem:[#allocation4_spill] sm:$0xff] (!%p1674_p5) }
  0x36   : > { %3530 = vst [vmem:[#allocation17_spill] sm:$0xff] %v2516_v19  ;;  %3531 = vst [vmem:[#allocation18_spill] sm:$0xff] %v2519_v32  ;;  %v3547_v59 = vld [vmem:[#allocation10_spill] sm:$0xff] (!%p1674_p5)  ;;  %v3548_v42 = vld [vmem:[#allocation11_spill] sm:$0xff] (!%p1674_p5) }
  0x37   : > { %3532 = vst [vmem:[#allocation19_spill] sm:$0xff] %v2522_v27  ;;  %3533 = vst [vmem:[#allocation20_spill] sm:$0xff] %v2525_v45  ;;  %v3549_v12 = vld [vmem:[#allocation12_spill] sm:$0xff] (!%p1674_p5) }
  0x38   : > { %3534 = vst [vmem:[#allocation21_spill] sm:$0xff] %v2528_v60  ;;  %3535 = vst [vmem:[#allocation22_spill] sm:$0xff] %v2531_v20 }
  0x39   : > { %3536 = vst [vmem:[#allocation23_spill] sm:$0xff] %v2534_v29  ;;  %3537 = vst [vmem:[#allocation24_spill] sm:$0xff] %v2537_v46 }
  0x3a   : > { %3538 = vst [vmem:[#allocation25_spill] sm:$0xff] %v2540_v54  ;;  %3539 = vst [vmem:[#allocation26_spill] sm:$0xff] %v2543_v40 }
  0x3b   : > { %427 = vst [vmem:[#allocation2 + $0x38] sm:$0xff] %v3540_v10  ;;  %428 = vst [vmem:[#allocation2 + $0x40] sm:$0xff] %v3541_v1 }
  0x3c   : > { %429 = vst [vmem:[#allocation2 + $0x48] sm:$0xff] %v3542_v17  ;;  %430 = vst [vmem:[#allocation2 + $0x50] sm:$0xff] %v3543_v11 }
  0x3d   : > { %432 = vst [vmem:[#allocation2 + $0x60] sm:$0xff] %v3545_v41  ;;  %434 = vst [vmem:[#allocation2 + $0x70] sm:$0xff] %v3547_v59 }
  0x3e   : > { %435 = vst [vmem:[#allocation2 + $0x78] sm:$0xff] %v3548_v42  ;;  %436 = vst [vmem:[#allocation2 + $0x80] sm:$0xff] %v3549_v12 }
  0x3f   : > { %445 = vst [vmem:[#allocation2 + $0xc8] sm:$0xff] %v2407_v49  ;;  %446 = vst [vmem:[#allocation2 + $0xd0] sm:$0xff] %v2411_v50 }
  0x40   : > { %447 = vst [vmem:[#allocation2 + $0xd8] sm:$0xff] %v2415_v55  ;;  %448 = vst [vmem:[#allocation2 + $0xe0] sm:$0xff] %v2419_v56 }
  0x41   : > { %449 = vst [vmem:[#allocation2 + $0xe8] sm:$0xff] %v2423_v57  ;;  %450 = vst [vmem:[#allocation2 + $0xf0] sm:$0xff] %v2427_v62 }
  0x42   : > { %451 = vst [vmem:[#allocation2 + $0xf8] sm:$0xff] %v2431_v63  ;;  %452 = vst [vmem:[#allocation2 + $0x100] sm:$0xff] %v2435_v2 }
  0x43   : > { %453 = vst [vmem:[#allocation2 + $0x108] sm:$0xff] %v2439_v7  ;;  %454 = vst [vmem:[#allocation2 + $0x110] sm:$0xff] %v2443_v8 }
  0x44   : > { %455 = vst [vmem:[#allocation2 + $0x118] sm:$0xff] %v2447_v9  ;;  %456 = vst [vmem:[#allocation2 + $0x120] sm:$0xff] %v2451_v14 }
  0x45   : > { %457 = vst [vmem:[#allocation2 + $0x128] sm:$0xff] %v2455_v15  ;;  %458 = vst [vmem:[#allocation2 + $0x130] sm:$0xff] %v2459_v16 }
  0x46   : > { %459 = vst [vmem:[#allocation2 + $0x138] sm:$0xff] %v2463_v21  ;;  %460 = vst [vmem:[#allocation2 + $0x140] sm:$0xff] %v2467_v24 }
  0x47   : > { %461 = vst [vmem:[#allocation2 + $0x148] sm:$0xff] %v2471_v25  ;;  %462 = vst [vmem:[#allocation2 + $0x150] sm:$0xff] %v2475_v33 }
  0x48   : > { %463 = vst [vmem:[#allocation2 + $0x158] sm:$0xff] %v2479_v38  ;;  %464 = vst [vmem:[#allocation2 + $0x160] sm:$0xff] %v2483_v39 }
  0x49   : > { %465 = vst [vmem:[#allocation2 + $0x168] sm:$0xff] %v2487_v47  ;;  %466 = vst [vmem:[#allocation2 + $0x170] sm:$0xff] %v2491_v52 }
  0x4a   : > { %467 = vst [vmem:[#allocation2 + $0x178] sm:$0xff] %v2495_v53  ;;  %468 = vst [vmem:[#allocation2 + $0x180] sm:$0xff] %v2498_v61 }
  0x4b   : > { %469 = vst [vmem:[#allocation2 + $0x188] sm:$0xff] %v2501_v4  ;;  %470 = vst [vmem:[#allocation2 + $0x190] sm:$0xff] %v2504_v5 }
  0x4c   : > { %471 = vst [vmem:[#allocation2 + $0x198] sm:$0xff] %v2507_v13  ;;  %472 = vst [vmem:[#allocation2 + $0x1a0] sm:$0xff] %v2510_v22 }
  0x4d   : > { %473 = vst [vmem:[#allocation2 + $0x1a8] sm:$0xff] %v2513_v18  ;;  %474 = vst [vmem:[#allocation2 + $0x1b0] sm:$0xff] %v2516_v19 }
  0x4e   : > { %475 = vst [vmem:[#allocation2 + $0x1b8] sm:$0xff] %v2519_v32  ;;  %476 = vst [vmem:[#allocation2 + $0x1c0] sm:$0xff] %v2522_v27 }
  0x4f   : > { %477 = vst [vmem:[#allocation2 + $0x1c8] sm:$0xff] %v2525_v45  ;;  %478 = vst [vmem:[#allocation2 + $0x1d0] sm:$0xff] %v2528_v60 }
  0x50   : > { %479 = vst [vmem:[#allocation2 + $0x1d8] sm:$0xff] %v2531_v20  ;;  %480 = vst [vmem:[#allocation2 + $0x1e0] sm:$0xff] %v2534_v29 }
  0x51   : > { %481 = vst [vmem:[#allocation2 + $0x1e8] sm:$0xff] %v2537_v46  ;;  %482 = vst [vmem:[#allocation2 + $0x1f0] sm:$0xff] %v2540_v54 }
  0x52   : > { %483 = vst [vmem:[#allocation2 + $0x1f8] sm:$0xff] %v2543_v40 }
  0x53 PF: > { %p1675_p6 = scmp.le.s32.totalorder %s2038_s12, 0 }
  0x54   : > { %v488_v10 = vld [vmem:[#allocation2] sm:$0xff] (!%p1675_p6)  ;;  %v489_v1 = vld [vmem:[#allocation2 + $0x8] sm:$0xff] (!%p1675_p6)  ;;  %v490_v17 = vld [vmem:[#allocation2 + $0x10] sm:$0xff] (!%p1675_p6) }
  0x55   : > { %487 = sbr.rel (%p1675_p6) target bundleno = 126 (0x7e), region = 40  ;;  %v552_v11 = vmul.f32 (!%p1675_p6), 0.25, %v488_v10  ;;  %v553_v31 = vmul.f32 (!%p1675_p6), 0.25, %v489_v1  ;;  %v554_v41 = vmul.f32 (!%p1675_p6), 0.25, %v490_v17  ;;  %v491_v35 = vld [vmem:[#allocation2 + $0x18] sm:$0xff] (!%p1675_p6)  ;;  %v492_v59 = vld [vmem:[#allocation2 + $0x20] sm:$0xff] (!%p1675_p6) }
  0x56   : > { %v493_v42 = vld [vmem:[#allocation2 + $0x28] sm:$0xff] (!%p1675_p6)  ;;  %v555_v12 = vmul.f32 (!%p1675_p6), 0.25, %v491_v35  ;;  %v556_v29 = vmul.f32 (!%p1675_p6), 0.25, %v492_v59  ;;  %v494_v20 = vld [vmem:[#allocation2 + $0x30] sm:$0xff] (!%p1675_p6)  ;;  %v499_v1 = vld [vmem:[#allocation2 + $0x58] sm:$0xff] (!%p1675_p6) }
  0x57   : > { %v557_v46 = vmul.f32 (!%p1675_p6), 0.25, %v493_v42  ;;  %v616_v40 = vadd.f32 (!%p1675_p6), %v552_v11, %v2133_v23  ;;  %v617_v45 = vadd.f32 (!%p1675_p6), %v553_v31, %v2146_v30  ;;  %v618_v27 = vadd.f32 (!%p1675_p6), %v554_v41, %v2161_v37  ;;  %v497_v19 = vld [vmem:[#allocation2 + $0x48] sm:$0xff] (!%p1675_p6)  ;;  %v498_v10 = vld [vmem:[#allocation2 + $0x50] sm:$0xff] (!%p1675_p6)  ;;  %v500_v42 = vld [vmem:[#allocation2 + $0x60] sm:$0xff] (!%p1675_p6) }
  0x58   : > { %v558_v32 = vmul.f32 (!%p1675_p6), 0.25, %v494_v20  ;;  %v619_v17 = vadd.f32 (!%p1675_p6), %v555_v12, %v2176_v44  ;;  %v620_v18 = vadd.f32 (!%p1675_p6), %v556_v29, %v2191_v51  ;;  %v501_v22 = vld [vmem:[#allocation2 + $0x68] sm:$0xff] (!%p1675_p6)  ;;  %v502_v13 = vld [vmem:[#allocation2 + $0x70] sm:$0xff] (!%p1675_p6)  ;;  %v561_v37 = vmul.f32 (!%p1675_p6), 0.25, %v497_v19  ;;  %v503_v11 = vld [vmem:[#allocation2 + $0x78] sm:$0xff] (!%p1675_p6) }
  0x59   : > { %v621_v35 = vadd.f32 (!%p1675_p6), %v557_v46, %v2206_v58  ;;  %680 = vst [vmem:[#allocation2] sm:$0xff] (!%p1675_p6), %v616_v40  ;;  %681 = vst [vmem:[#allocation2 + $0x8] sm:$0xff] (!%p1675_p6), %v617_v45  ;;  %v562_v20 = vmul.f32 (!%p1675_p6), 0.25, %v498_v10  ;;  %v3550_v44 = vld [vmem:[#allocation3_spill] sm:$0xff] (!%p1675_p6)  ;;  %v563_v29 = vmul.f32 (!%p1675_p6), 0.25, %v499_v1  ;;  %v564_v58 = vmul.f32 (!%p1675_p6), 0.25, %v500_v42 }
  0x5a   : > { %v495_v54 = vld [vmem:[#allocation2 + $0x38] sm:$0xff] (!%p1675_p6)  ;;  %v496_v60 = vld [vmem:[#allocation2 + $0x40] sm:$0xff] (!%p1675_p6)  ;;  %682 = vst [vmem:[#allocation2 + $0x10] sm:$0xff] (!%p1675_p6), %v618_v27  ;;  %v622_v23 = vadd.f32 (!%p1675_p6), %v558_v32, %v2221_v3  ;;  %683 = vst [vmem:[#allocation2 + $0x18] sm:$0xff] (!%p1675_p6), %v619_v17  ;;  %v565_v46 = vmul.f32 (!%p1675_p6), 0.25, %v501_v22 }
  0x5b   : > { %v559_v59 = vmul.f32 (!%p1675_p6), 0.25, %v495_v54  ;;  %v560_v30 = vmul.f32 (!%p1675_p6), 0.25, %v496_v60  ;;  %684 = vst [vmem:[#allocation2 + $0x20] sm:$0xff] (!%p1675_p6), %v620_v18  ;;  %685 = vst [vmem:[#allocation2 + $0x28] sm:$0xff] (!%p1675_p6), %v621_v35  ;;  %v504_v54 = vld [vmem:[#allocation2 + $0x80] sm:$0xff] (!%p1675_p6)  ;;  %v505_v31 = vld [vmem:[#allocation2 + $0x88] sm:$0xff] (!%p1675_p6) }
  0x5c   : > { %v506_v41 = vld [vmem:[#allocation2 + $0x90] sm:$0xff]  ;;  %686 = vst [vmem:[#allocation2 + $0x30] sm:$0xff] %v622_v23  ;;  %v3551_v45 = vld [vmem:[#allocation4_spill] sm:$0xff]  ;;  %v3553_v32 = vld [vmem:[#allocation6_spill] sm:$0xff]  ;;  %v566_v60 = vmul.f32 0.25, %v502_v13 }
  0x5d   : > { %v623_v51 = vadd.f32 %v559_v59, %v3550_v44  ;;  %v624_v27 = vadd.f32 %v560_v30, %v3551_v45  ;;  %v3552_v40 = vld [vmem:[#allocation5_spill] sm:$0xff]  ;;  %v626_v19 = vadd.f32 %v562_v20, %v3553_v32  ;;  %v507_v12 = vld [vmem:[#allocation2 + $0x98] sm:$0xff]  ;;  %v508_v10 = vld [vmem:[#allocation2 + $0xa0] sm:$0xff]  ;;  %v567_v44 = vmul.f32 0.25, %v503_v11 }
  0x5e   : > { %v625_v3 = vadd.f32 %v561_v37, %v3552_v40  ;;  %v509_v18 = vld [vmem:[#allocation2 + $0xa8] sm:$0xff]  ;;  %v3554_v17 = vld [vmem:[#allocation7_spill] sm:$0xff]  ;;  %v3556_v22 = vld [vmem:[#allocation9_spill] sm:$0xff]  ;;  %v568_v37 = vmul.f32 0.25, %v504_v54  ;;  %v569_v20 = vmul.f32 0.25, %v505_v31  ;;  %v570_v13 = vmul.f32 0.25, %v506_v41 }
  0x5f   : > { %687 = vst [vmem:[#allocation2 + $0x38] sm:$0xff] %v623_v51  ;;  %v627_v35 = vadd.f32 %v563_v29, %v3554_v17  ;;  %v3555_v1 = vld [vmem:[#allocation8_spill] sm:$0xff]  ;;  %v629_v42 = vadd.f32 %v565_v46, %v3556_v22  ;;  %v510_v5 = vld [vmem:[#allocation2 + $0xb0] sm:$0xff]  ;;  %688 = vst [vmem:[#allocation2 + $0x40] sm:$0xff] %v624_v27  ;;  %v571_v40 = vmul.f32 0.25, %v507_v12  ;;  %v573_v32 = vmul.f32 0.25, %v509_v18 }
  0x60   : > { %v628_v59 = vadd.f32 %v564_v58, %v3555_v1  ;;  %689 = vst [vmem:[#allocation2 + $0x48] sm:$0xff] %v625_v3  ;;  %690 = vst [vmem:[#allocation2 + $0x50] sm:$0xff] %v626_v19  ;;  %v3557_v23 = vld [vmem:[#allocation10_spill] sm:$0xff]  ;;  %v3558_v51 = vld [vmem:[#allocation11_spill] sm:$0xff]  ;;  %v572_v58 = vmul.f32 0.25, %v508_v10  ;;  %v633_v19 = vadd.f32 %v569_v20, %v2370_v28  ;;  %v634_v54 = vadd.f32 %v570_v13, %v2378_v34 }
  0x61   : > { %v630_v30 = vadd.f32 %v566_v60, %v3557_v23  ;;  %v511_v45 = vld [vmem:[#allocation2 + $0xb8] sm:$0xff]  ;;  %691 = vst [vmem:[#allocation2 + $0x58] sm:$0xff] %v627_v35  ;;  %693 = vst [vmem:[#allocation2 + $0x68] sm:$0xff] %v629_v42  ;;  %v631_v29 = vadd.f32 %v567_v44, %v3558_v51  ;;  %v512_v46 = vld [vmem:[#allocation2 + $0xc0] sm:$0xff]  ;;  %v574_v31 = vmul.f32 0.25, %v510_v5  ;;  %v635_v1 = vadd.f32 %v571_v40, %v2383_v6 }
  0x62   : > { %692 = vst [vmem:[#allocation2 + $0x60] sm:$0xff] %v628_v59  ;;  %v513_v11 = vld [vmem:[#allocation2 + $0xc8] sm:$0xff]  ;;  %v514_v17 = vld [vmem:[#allocation2 + $0xd0] sm:$0xff]  ;;  %v515_v41 = vld [vmem:[#allocation2 + $0xd8] sm:$0xff]  ;;  %v636_v12 = vadd.f32 %v572_v58, %v2387_v43  ;;  %v637_v10 = vadd.f32 %v573_v32, %v2391_v36  ;;  %v575_v18 = vmul.f32 0.25, %v511_v45  ;;  %v576_v22 = vmul.f32 0.25, %v512_v46 }
  0x63   : > { %694 = vst [vmem:[#allocation2 + $0x70] sm:$0xff] %v630_v30  ;;  %v3559_v27 = vld [vmem:[#allocation12_spill] sm:$0xff]  ;;  %v516_v60 = vld [vmem:[#allocation2 + $0xe0] sm:$0xff]  ;;  %695 = vst [vmem:[#allocation2 + $0x78] sm:$0xff] %v631_v29  ;;  %v638_v28 = vadd.f32 %v574_v31, %v2395_v26  ;;  %v577_v34 = vmul.f32 0.25, %v513_v11  ;;  %v578_v5 = vmul.f32 0.25, %v514_v17 }
  0x64   : > { %v632_v3 = vadd.f32 %v568_v37, %v3559_v27  ;;  %v517_v35 = vld [vmem:[#allocation2 + $0xe8] sm:$0xff]  ;;  %v518_v59 = vld [vmem:[#allocation2 + $0xf0] sm:$0xff]  ;;  %697 = vst [vmem:[#allocation2 + $0x88] sm:$0xff] %v633_v19  ;;  %698 = vst [vmem:[#allocation2 + $0x90] sm:$0xff] %v634_v54  ;;  %v639_v6 = vadd.f32 %v575_v18, %v2399_v48  ;;  %v579_v44 = vmul.f32 0.25, %v515_v41  ;;  %v580_v43 = vmul.f32 0.25, %v516_v60 }
  0x65   : > { %v519_v42 = vld [vmem:[#allocation2 + $0xf8] sm:$0xff]  ;;  %699 = vst [vmem:[#allocation2 + $0x98] sm:$0xff] %v635_v1  ;;  %700 = vst [vmem:[#allocation2 + $0xa0] sm:$0xff] %v636_v12  ;;  %v581_v23 = vmul.f32 0.25, %v517_v35  ;;  %v520_v36 = vld [vmem:[#allocation2 + $0x100] sm:$0xff]  ;;  %v640_v20 = vadd.f32 %v576_v22, %v2403_v0  ;;  %v641_v26 = vadd.f32 %v577_v34, %v2407_v49  ;;  %v642_v13 = vadd.f32 %v578_v5, %v2411_v50 }
  0x66   : > { %696 = vst [vmem:[#allocation2 + $0x80] sm:$0xff] %v632_v3  ;;  %701 = vst [vmem:[#allocation2 + $0xa8] sm:$0xff] %v637_v10  ;;  %v521_v30 = vld [vmem:[#allocation2 + $0x108] sm:$0xff]  ;;  %v522_v37 = vld [vmem:[#allocation2 + $0x110] sm:$0xff]  ;;  %v582_v45 = vmul.f32 0.25, %v518_v59  ;;  %v643_v48 = vadd.f32 %v579_v44, %v2415_v55  ;;  %v644_v58 = vadd.f32 %v580_v43, %v2419_v56  ;;  %v583_v46 = vmul.f32 0.25, %v519_v42 }
  0x67   : > { %702 = vst [vmem:[#allocation2 + $0xb0] sm:$0xff] %v638_v28  ;;  %v523_v51 = vld [vmem:[#allocation2 + $0x118] sm:$0xff]  ;;  %v524_v29 = vld [vmem:[#allocation2 + $0x120] sm:$0xff]  ;;  %v525_v40 = vld [vmem:[#allocation2 + $0x128] sm:$0xff]  ;;  %v645_v32 = vadd.f32 %v581_v23, %v2423_v57  ;;  %v584_v49 = vmul.f32 0.25, %v520_v36  ;;  %v585_v50 = vmul.f32 0.25, %v521_v30 }
  0x68   : > { %703 = vst [vmem:[#allocation2 + $0xb8] sm:$0xff] %v639_v6  ;;  %v526_v11 = vld [vmem:[#allocation2 + $0x130] sm:$0xff]  ;;  %704 = vst [vmem:[#allocation2 + $0xc0] sm:$0xff] %v640_v20  ;;  %v646_v0 = vadd.f32 %v582_v45, %v2427_v62  ;;  %v586_v17 = vmul.f32 0.25, %v522_v37  ;;  %v527_v27 = vld [vmem:[#allocation2 + $0x138] sm:$0xff]  ;;  %v647_v55 = vadd.f32 %v583_v46, %v2431_v63  ;;  %v587_v3 = vmul.f32 0.25, %v523_v51 }
  0x69   : > { %705 = vst [vmem:[#allocation2 + $0xc8] sm:$0xff] %v641_v26  ;;  %706 = vst [vmem:[#allocation2 + $0xd0] sm:$0xff] %v642_v13  ;;  %v588_v56 = vmul.f32 0.25, %v524_v29  ;;  %v589_v19 = vmul.f32 0.25, %v525_v40  ;;  %v528_v57 = vld [vmem:[#allocation2 + $0x140] sm:$0xff]  ;;  %v529_v54 = vld [vmem:[#allocation2 + $0x148] sm:$0xff]  ;;  %v648_v41 = vadd.f32 %v584_v49, %v2435_v2  ;;  %v649_v62 = vadd.f32 %v585_v50, %v2439_v7 }
  0x6a   : > { %707 = vst [vmem:[#allocation2 + $0xd8] sm:$0xff] %v643_v48  ;;  %708 = vst [vmem:[#allocation2 + $0xe0] sm:$0xff] %v644_v58  ;;  %v530_v31 = vld [vmem:[#allocation2 + $0x150] sm:$0xff]  ;;  %v650_v60 = vadd.f32 %v586_v17, %v2443_v8  ;;  %v590_v35 = vmul.f32 0.25, %v526_v11  ;;  %v531_v1 = vld [vmem:[#allocation2 + $0x158] sm:$0xff]  ;;  %v651_v63 = vadd.f32 %v587_v3, %v2447_v9  ;;  %v591_v28 = vmul.f32 0.25, %v527_v27 }
  0x6b   : > { %709 = vst [vmem:[#allocation2 + $0xe8] sm:$0xff] %v645_v32  ;;  %710 = vst [vmem:[#allocation2 + $0xf0] sm:$0xff] %v646_v0  ;;  %v532_v12 = vld [vmem:[#allocation2 + $0x160] sm:$0xff]  ;;  %v533_v10 = vld [vmem:[#allocation2 + $0x168] sm:$0xff]  ;;  %v652_v18 = vadd.f32 %v588_v56, %v2451_v14  ;;  %v653_v59 = vadd.f32 %v589_v19, %v2455_v15  ;;  %v592_v7 = vmul.f32 0.25, %v528_v57  ;;  %v593_v8 = vmul.f32 0.25, %v529_v54 }
  0x6c   : > { %711 = vst [vmem:[#allocation2 + $0xf8] sm:$0xff] %v647_v55  ;;  %v534_v22 = vld [vmem:[#allocation2 + $0x170] sm:$0xff]  ;;  %712 = vst [vmem:[#allocation2 + $0x100] sm:$0xff] %v648_v41  ;;  %v654_v2 = vadd.f32 %v590_v35, %v2459_v16  ;;  %v594_v34 = vmul.f32 0.25, %v530_v31  ;;  %v535_v5 = vld [vmem:[#allocation2 + $0x178] sm:$0xff]  ;;  %v655_v9 = vadd.f32 %v591_v28, %v2463_v21  ;;  %v595_v42 = vmul.f32 0.25, %v531_v1 }
  0x6d   : > { %713 = vst [vmem:[#allocation2 + $0x108] sm:$0xff] %v649_v62  ;;  %714 = vst [vmem:[#allocation2 + $0x110] sm:$0xff] %v650_v60  ;;  %v596_v14 = vmul.f32 0.25, %v532_v12  ;;  %v597_v6 = vmul.f32 0.25, %v533_v10  ;;  %v536_v15 = vld [vmem:[#allocation2 + $0x180] sm:$0xff]  ;;  %v537_v44 = vld [vmem:[#allocation2 + $0x188] sm:$0xff]  ;;  %v656_v23 = vadd.f32 %v592_v7, %v2467_v24  ;;  %v657_v16 = vadd.f32 %v593_v8, %v2471_v25 }
  0x6e   : > { %715 = vst [vmem:[#allocation2 + $0x118] sm:$0xff] %v651_v63  ;;  %716 = vst [vmem:[#allocation2 + $0x120] sm:$0xff] %v652_v18  ;;  %v538_v43 = vld [vmem:[#allocation2 + $0x190] sm:$0xff]  ;;  %v658_v36 = vadd.f32 %v594_v34, %v2475_v33  ;;  %v598_v30 = vmul.f32 0.25, %v534_v22  ;;  %v539_v37 = vld [vmem:[#allocation2 + $0x198] sm:$0xff]  ;;  %v659_v21 = vadd.f32 %v595_v42, %v2479_v38  ;;  %v599_v51 = vmul.f32 0.25, %v535_v5 }
  0x6f   : > { %717 = vst [vmem:[#allocation2 + $0x128] sm:$0xff] %v653_v59  ;;  %718 = vst [vmem:[#allocation2 + $0x130] sm:$0xff] %v654_v2  ;;  %v540_v20 = vld [vmem:[#allocation2 + $0x1a0] sm:$0xff]  ;;  %v541_v26 = vld [vmem:[#allocation2 + $0x1a8] sm:$0xff]  ;;  %v660_v13 = vadd.f32 %v596_v14, %v2483_v39  ;;  %v661_v45 = vadd.f32 %v597_v6, %v2487_v47  ;;  %v600_v25 = vmul.f32 0.25, %v536_v15  ;;  %v601_v33 = vmul.f32 0.25, %v537_v44 }
  0x70   : > { %719 = vst [vmem:[#allocation2 + $0x138] sm:$0xff] %v655_v9  ;;  %v542_v29 = vld [vmem:[#allocation2 + $0x1b0] sm:$0xff]  ;;  %720 = vst [vmem:[#allocation2 + $0x140] sm:$0xff] %v656_v23  ;;  %v662_v24 = vadd.f32 %v598_v30, %v2491_v52  ;;  %v602_v40 = vmul.f32 0.25, %v538_v43  ;;  %v543_v48 = vld [vmem:[#allocation2 + $0x1b8] sm:$0xff]  ;;  %v663_v38 = vadd.f32 %v599_v51, %v2495_v53  ;;  %v603_v58 = vmul.f32 0.25, %v539_v37 }
  0x71   : > { %721 = vst [vmem:[#allocation2 + $0x148] sm:$0xff] %v657_v16  ;;  %722 = vst [vmem:[#allocation2 + $0x150] sm:$0xff] %v658_v36  ;;  %v604_v39 = vmul.f32 0.25, %v540_v20  ;;  %v605_v32 = vmul.f32 0.25, %v541_v26  ;;  %v544_v47 = vld [vmem:[#allocation2 + $0x1c0] sm:$0xff]  ;;  %v545_v46 = vld [vmem:[#allocation2 + $0x1c8] sm:$0xff]  ;;  %v664_v0 = vadd.f32 %v600_v25, %v2498_v61  ;;  %v665_v52 = vadd.f32 %v601_v33, %v2501_v4 }
  0x72   : > { %723 = vst [vmem:[#allocation2 + $0x158] sm:$0xff] %v659_v21  ;;  %724 = vst [vmem:[#allocation2 + $0x160] sm:$0xff] %v660_v13  ;;  %v546_v11 = vld [vmem:[#allocation2 + $0x1d0] sm:$0xff]  ;;  %v606_v17 = vmul.f32 0.25, %v542_v29  ;;  %v547_v27 = vld [vmem:[#allocation2 + $0x1d8] sm:$0xff]  ;;  %v607_v41 = vmul.f32 0.25, %v543_v48 }
  0x73   : > { %725 = vst [vmem:[#allocation2 + $0x168] sm:$0xff] %v661_v45  ;;  %726 = vst [vmem:[#allocation2 + $0x170] sm:$0xff] %v662_v24  ;;  %v3560_v49 = vld [vmem:[#allocation13_spill] sm:$0xff]  ;;  %v548_v55 = vld [vmem:[#allocation2 + $0x1e0] sm:$0xff]  ;;  %v608_v60 = vmul.f32 0.25, %v544_v47  ;;  %v609_v35 = vmul.f32 0.25, %v545_v46 }
  0x74   : > { %v666_v50 = vadd.f32 %v602_v40, %v3560_v49  ;;  %v549_v3 = vld [vmem:[#allocation2 + $0x1e8] sm:$0xff]  ;;  %727 = vst [vmem:[#allocation2 + $0x178] sm:$0xff] %v663_v38  ;;  %v3561_v56 = vld [vmem:[#allocation14_spill] sm:$0xff]  ;;  %v3562_v19 = vld [vmem:[#allocation15_spill] sm:$0xff]  ;;  %v610_v1 = vmul.f32 0.25, %v546_v11  ;;  %v611_v18 = vmul.f32 0.25, %v547_v27 }
  0x75   : > { %v667_v53 = vadd.f32 %v603_v58, %v3561_v56  ;;  %v668_v57 = vadd.f32 %v604_v39, %v3562_v19  ;;  %v3563_v54 = vld [vmem:[#allocation16_spill] sm:$0xff]  ;;  %v550_v62 = vld [vmem:[#allocation2 + $0x1f0] sm:$0xff]  ;;  %728 = vst [vmem:[#allocation2 + $0x180] sm:$0xff] %v664_v0  ;;  %729 = vst [vmem:[#allocation2 + $0x188] sm:$0xff] %v665_v52  ;;  %v612_v59 = vmul.f32 0.25, %v548_v55  ;;  %v613_v28 = vmul.f32 0.25, %v549_v3 }
  0x76   : > { %v669_v31 = vadd.f32 %v605_v32, %v3563_v54  ;;  %730 = vst [vmem:[#allocation2 + $0x190] sm:$0xff] %v666_v50  ;;  %v3564_v61 = vld [vmem:[#allocation17_spill] sm:$0xff]  ;;  %v551_v12 = vld [vmem:[#allocation2 + $0x1f8] sm:$0xff]  ;;  %v3566_v22 = vld [vmem:[#allocation19_spill] sm:$0xff]  ;;  %v614_v9 = vmul.f32 0.25, %v550_v62 }
  0x77   : > { %v670_v4 = vadd.f32 %v606_v17, %v3564_v61  ;;  %731 = vst [vmem:[#allocation2 + $0x198] sm:$0xff] %v667_v53  ;;  %732 = vst [vmem:[#allocation2 + $0x1a0] sm:$0xff] %v668_v57  ;;  %v3565_v10 = vld [vmem:[#allocation18_spill] sm:$0xff]  ;;  %v672_v2 = vadd.f32 %v608_v60, %v3566_v22  ;;  %v3567_v7 = vld [vmem:[#allocation20_spill] sm:$0xff]  ;;  %v615_v23 = vmul.f32 0.25, %v551_v12 }
  0x78   : > { %733 = vst [vmem:[#allocation2 + $0x1a8] sm:$0xff] %v669_v31  ;;  %v671_v63 = vadd.f32 %v607_v41, %v3565_v10  ;;  %v673_v8 = vadd.f32 %v609_v35, %v3567_v7  ;;  %v3568_v34 = vld [vmem:[#allocation21_spill] sm:$0xff]  ;;  %v3569_v42 = vld [vmem:[#allocation22_spill] sm:$0xff]  ;;  %v3570_v6 = vld [vmem:[#allocation23_spill] sm:$0xff] }
  0x79   : > { %734 = vst [vmem:[#allocation2 + $0x1b0] sm:$0xff] %v670_v4  ;;  %v674_v5 = vadd.f32 %v610_v1, %v3568_v34  ;;  %v675_v14 = vadd.f32 %v611_v18, %v3569_v42  ;;  %v676_v15 = vadd.f32 %v612_v59, %v3570_v6  ;;  %v3571_v44 = vld [vmem:[#allocation24_spill] sm:$0xff]  ;;  %736 = vst [vmem:[#allocation2 + $0x1c0] sm:$0xff] %v672_v2  ;;  %v3572_v16 = vld [vmem:[#allocation25_spill] sm:$0xff] }
  0x7a   : > { %735 = vst [vmem:[#allocation2 + $0x1b8] sm:$0xff] %v671_v63  ;;  %v677_v43 = vadd.f32 %v613_v28, %v3571_v44  ;;  %737 = vst [vmem:[#allocation2 + $0x1c8] sm:$0xff] %v673_v8  ;;  %v678_v36 = vadd.f32 %v614_v9, %v3572_v16  ;;  %v3573_v30 = vld [vmem:[#allocation26_spill] sm:$0xff] }
  0x7b   : > { %738 = vst [vmem:[#allocation2 + $0x1d0] sm:$0xff] %v674_v5  ;;  %739 = vst [vmem:[#allocation2 + $0x1d8] sm:$0xff] %v675_v14  ;;  %v679_v37 = vadd.f32 %v615_v23, %v3573_v30 }
  0x7c   : > { %740 = vst [vmem:[#allocation2 + $0x1e0] sm:$0xff] %v676_v15  ;;  %741 = vst [vmem:[#allocation2 + $0x1e8] sm:$0xff] %v677_v43 }
  0x7d   : > { %742 = vst [vmem:[#allocation2 + $0x1f0] sm:$0xff] %v678_v36  ;;  %743 = vst [vmem:[#allocation2 + $0x1f8] sm:$0xff] %v679_v37 }
  0x7e PF: > { %v3448_v29 = vmov 0.0   ;;  %v2702_v48 = vld [vmem:[#allocation2 + $0x38] sm:$0xff]  ;;  %v2716_v0 = vld [vmem:[#allocation2 + $0x40] sm:$0xff]  ;;  %v2725_v49 = vld [vmem:[#allocation2 + $0x48] sm:$0xff] }
  0x7f   : > { %vm815_vm7 = vcmp.gt.f32.partialorder %v2702_v48, 0.5  ;;  %v2727_v50 = vld [vmem:[#allocation2 + $0x50] sm:$0xff]  ;;  %v2740_v56 = vld [vmem:[#allocation2 + $0x58] sm:$0xff]  ;;  %vm816_vm8 = vcmp.gt.f32.partialorder %v2716_v0, 0.5  ;;  %vm817_vm9 = vcmp.gt.f32.partialorder %v2725_v49, 0.5  ;;  %v2752_v41 = vld [vmem:[#allocation2 + $0x60] sm:$0xff] }
  0x80   : > { %v2738_v3 = vsel %vm815_vm7, 1.0, %v3448_v29  ;;  %vm818_vm10 = vcmp.gt.f32.partialorder %v2727_v50, 0.5  ;;  %v2754_v62 = vld [vmem:[#allocation2 + $0x68] sm:$0xff]  ;;  %v2759_v61 = vsel %vm816_vm8, 1.0, %v3448_v29  ;;  %v2762_v4 = vsel %vm817_vm9, 1.0, %v3448_v29  ;;  %v2768_v35 = vld [vmem:[#allocation2 + $0x70] sm:$0xff] }
  0x81   : > { %vm819_vm11 = vcmp.gt.f32.partialorder %v2740_v56, 0.5  ;;  %v2766_v60 = vsel %vm818_vm10, 1.0, %v3448_v29  ;;  %v2770_v1 = vld [vmem:[#allocation2 + $0x78] sm:$0xff]  ;;  %v1885_v12 = vpack.c.bf16 %v2762_v4, %v2759_v61  ;;  %vm820_vm12 = vcmp.gt.f32.partialorder %v2752_v41, 0.5  ;;  %v2784_v2 = vld [vmem:[#allocation2 + $0x80] sm:$0xff]  ;;  %v2793_v8 = vld [vmem:[#allocation2 + $0x88] sm:$0xff] }
  0x82   : > { %v2675_v20 = vld [vmem:[#allocation2] sm:$0xff]  ;;  %v2677_v26 = vld [vmem:[#allocation2 + $0x8] sm:$0xff]  ;;  %v2777_v18 = vsel %vm819_vm11, 1.0, %v3448_v29  ;;  %vm821_vm13 = vcmp.gt.f32.partialorder %v2754_v62, 0.5  ;;  %v2789_v7 = vsel %vm820_vm12, 1.0, %v3448_v29  ;;  %vm822_vm14 = vcmp.gt.f32.partialorder %v2768_v35, 0.5 }
  0x83   : > { %v2679_v21 = vld [vmem:[#allocation2 + $0x10] sm:$0xff]  ;;  %vm808_vm0 = vcmp.gt.f32.partialorder %v2675_v20, 0.5  ;;  %vm809_vm1 = vcmp.gt.f32.partialorder %v2677_v26, 0.5  ;;  %v2683_v13 = vld [vmem:[#allocation2 + $0x18] sm:$0xff]  ;;  %v1888_v59 = vpack.c.bf16 %v2777_v18, %v2766_v60  ;;  %1971 = vst [vmem:[%s2104_s26 + $0x20] sm:$0xff] %v1885_v12   ;;  %vm823_vm15 = vcmp.gt.f32.partialorder %v2770_v1, 0.5 }
  0x84   : > { %vm810_vm2 = vcmp.gt.f32.partialorder %v2679_v21, 0.5  ;;  %v2686_v45 = vld [vmem:[#allocation2 + $0x20] sm:$0xff]  ;;  %v2688_v51 = vld [vmem:[#allocation2 + $0x28] sm:$0xff]  ;;  %v2691_v24 = vsel %vm808_vm0, 1.0, %v3448_v29  ;;  %v2694_v25 = vsel %vm809_vm1, 1.0, %v3448_v29  ;;  %vm811_vm3 = vcmp.gt.f32.partialorder %v2683_v13, 0.5 }
  0x85   : > { %v2698_v33 = vsel %vm810_vm2, 1.0, %v3448_v29  ;;  %v2700_v40 = vld [vmem:[#allocation2 + $0x30] sm:$0xff]  ;;  %v1873_v38 = vpack.c.bf16 %v2694_v25, %v2691_v24  ;;  %v2709_v32 = vsel %vm811_vm3, 1.0, %v3448_v29  ;;  %vm812_vm4 = vcmp.gt.f32.partialorder %v2686_v45, 0.5  ;;  %1972 = vst [vmem:[%s2104_s26 + $0x28] sm:$0xff] %v1888_v59   ;;  %v2808_v6 = vld [vmem:[#allocation2 + $0x98] sm:$0xff] }
  0x86   : > { %v1876_v47 = vpack.c.bf16 %v2709_v32, %v2698_v33  ;;  %vm813_vm5 = vcmp.gt.f32.partialorder %v2688_v51, 0.5  ;;  %v2721_v52 = vsel %vm812_vm4, 1.0, %v3448_v29  ;;  %vm814_vm6 = vcmp.gt.f32.partialorder %v2700_v40, 0.5  ;;  %v2795_v34 = vld [vmem:[#allocation2 + $0x90] sm:$0xff]  ;;  %v2820_v36 = vld [vmem:[#allocation2 + $0xa0] sm:$0xff]  ;;  %v2822_v30 = vld [vmem:[#allocation2 + $0xa8] sm:$0xff] }
  0x87   : > { %1874 = vst [vmem:[%s2104_s26] sm:$0xff] %v1873_v38   ;;  %v2731_v17 = vsel %vm813_vm5, 1.0, %v3448_v29  ;;  %v2735_v55 = vsel %vm814_vm6, 1.0, %v3448_v29  ;;  %v2799_v5 = vsel %vm821_vm13, 1.0, %v3448_v29  ;;  %v2803_v42 = vsel %vm822_vm14, 1.0, %v3448_v29  ;;  %v2852_v9 = vld [vmem:[#allocation2 + $0xc0] sm:$0xff]  ;;  %v2863_v22 = vld [vmem:[#allocation2 + $0xd0] sm:$0xff] }
  0x88   : > { %1968 = vst [vmem:[%s2104_s26 + $0x8] sm:$0xff] %v1876_v47   ;;  %v1879_v53 = vpack.c.bf16 %v2731_v17, %v2721_v52  ;;  %v1882_v57 = vpack.c.bf16 %v2738_v3, %v2735_v55  ;;  %v2806_v14 = vsel %vm823_vm15, 1.0, %v3448_v29  ;;  %v1891_v15 = vpack.c.bf16 %v2799_v5, %v2789_v7  ;;  %3574 = vst [vmem:[#allocation3_spill] sm:$0xff] %v2852_v9  ;;  %v2876_v63 = vld [vmem:[#allocation2 + $0xd8] sm:$0xff]  ;;  %v2888_v19 = vld [vmem:[#allocation2 + $0xe0] sm:$0xff] }
  0x89   : > { %v1894_v43 = vpack.c.bf16 %v2806_v14, %v2803_v42  ;;  %vm824_vm0 = vcmp.gt.f32.partialorder %v2784_v2, 0.5  ;;  %vm825_vm1 = vcmp.gt.f32.partialorder %v2793_v8, 0.5  ;;  %vm826_vm2 = vcmp.gt.f32.partialorder %v2795_v34, 0.5  ;;  %3576 = vst [vmem:[#allocation5_spill] sm:$0xff] %v2863_v22  ;;  %3577 = vst [vmem:[#allocation6_spill] sm:$0xff] %v2876_v63  ;;  %v2890_v27 = vld [vmem:[#allocation2 + $0xe8] sm:$0xff] }
  0x8a   : > { %1969 = vst [vmem:[%s2104_s26 + $0x10] sm:$0xff] %v1879_v53   ;;  %1970 = vst [vmem:[%s2104_s26 + $0x18] sm:$0xff] %v1882_v57   ;;  %v2827_v37 = vsel %vm824_vm0, 1.0, %v3448_v29  ;;  %v2830_v38 = vsel %vm825_vm1, 1.0, %v3448_v29  ;;  %vm827_vm3 = vcmp.gt.f32.partialorder %v2808_v6, 0.5  ;;  %v2834_v47 = vsel %vm826_vm2, 1.0, %v3448_v29 }
  0x8b   : > { %1973 = vst [vmem:[%s2104_s26 + $0x30] sm:$0xff] %v1891_v15   ;;  %1974 = vst [vmem:[%s2104_s26 + $0x38] sm:$0xff] %v1894_v43   ;;  %v2836_v53 = vld [vmem:[#allocation2 + $0xb0] sm:$0xff]  ;;  %v2838_v57 = vld [vmem:[#allocation2 + $0xb8] sm:$0xff]  ;;  %v1897_v12 = vpack.c.bf16 %v2830_v38, %v2827_v37  ;;  %v2845_v43 = vsel %vm827_vm3, 1.0, %v3448_v29  ;;  %vm828_vm4 = vcmp.gt.f32.partialorder %v2820_v36, 0.5 }
  0x8c   : > { %v1900_v16 = vpack.c.bf16 %v2845_v43, %v2834_v47  ;;  %vm829_vm5 = vcmp.gt.f32.partialorder %v2822_v30, 0.5  ;;  %v2857_v59 = vsel %vm828_vm4, 1.0, %v3448_v29  ;;  %vm830_vm6 = vcmp.gt.f32.partialorder %v2836_v53, 0.5  ;;  %v2861_v15 = vld [vmem:[#allocation2 + $0xc8] sm:$0xff]  ;;  %3578 = vst [vmem:[#allocation7_spill] sm:$0xff] %v2888_v19  ;;  %3579 = vst [vmem:[#allocation8_spill] sm:$0xff] %v2890_v27 }
  0x8d   : > { %1975 = vst [vmem:[%s2104_s26 + $0x40] sm:$0xff] %v1897_v12   ;;  %vm831_vm7 = vcmp.gt.f32.partialorder %v2838_v57, 0.5  ;;  %3575 = vst [vmem:[#allocation4_spill] sm:$0xff] %v2861_v15  ;;  %v2867_v44 = vsel %vm829_vm5, 1.0, %v3448_v29  ;;  %v2871_v23 = vsel %vm830_vm6, 1.0, %v3448_v29  ;;  %vm832_vm8 = vcmp.gt.f32.partialorder %v2852_v9, 0.5 }
  0x8e   : > { %1976 = vst [vmem:[%s2104_s26 + $0x48] sm:$0xff] %v1900_v16   ;;  %v2874_v28 = vsel %vm831_vm7, 1.0, %v3448_v29  ;;  %v1903_v10 = vpack.c.bf16 %v2867_v44, %v2857_v59  ;;  %vm833_vm9 = vcmp.gt.f32.partialorder %v2861_v15, 0.5  ;;  %vm834_vm10 = vcmp.gt.f32.partialorder %v2863_v22, 0.5  ;;  %v2904_v11 = vld [vmem:[#allocation2 + $0xf0] sm:$0xff]  ;;  %v2906_v46 = vld [vmem:[#allocation2 + $0xf8] sm:$0xff] }
  0x8f   : > { %v1906_v31 = vpack.c.bf16 %v2874_v28, %v2871_v23  ;;  %v2895_v16 = vsel %vm832_vm8, 1.0, %v3448_v29  ;;  %v2898_v54 = vsel %vm833_vm9, 1.0, %v3448_v29  ;;  %vm835_vm11 = vcmp.gt.f32.partialorder %v2876_v63, 0.5  ;;  %3583 = vst [vmem:[#allocation12_spill] sm:$0xff] %v2904_v11  ;;  %3584 = vst [vmem:[#allocation13_spill] sm:$0xff] %v2906_v46  ;;  %v2920_v9 = vld [vmem:[#allocation2 + $0x100] sm:$0xff] }
  0x90   : > { %1977 = vst [vmem:[%s2104_s26 + $0x50] sm:$0xff] %v1903_v10   ;;  %3580 = vst [vmem:[#allocation9_spill] sm:$0xff] %v2895_v16  ;;  %v2902_v12 = vsel %vm834_vm10, 1.0, %v3448_v29  ;;  %v1909_v10 = vpack.c.bf16 %v2898_v54, %v2895_v16  ;;  %v2913_v58 = vsel %vm835_vm11, 1.0, %v3448_v29  ;;  %vm836_vm12 = vcmp.gt.f32.partialorder %v2888_v19, 0.5  ;;  %v2929_v39 = vld [vmem:[#allocation2 + $0x108] sm:$0xff] }
  0x91   : > { %1978 = vst [vmem:[%s2104_s26 + $0x58] sm:$0xff] %v1906_v31   ;;  %3581 = vst [vmem:[#allocation10_spill] sm:$0xff] %v2898_v54  ;;  %v1912_v63 = vpack.c.bf16 %v2913_v58, %v2902_v12  ;;  %vm837_vm13 = vcmp.gt.f32.partialorder %v2890_v27, 0.5  ;;  %v2925_v31 = vsel %vm836_vm12, 1.0, %v3448_v29  ;;  %vm838_vm14 = vcmp.gt.f32.partialorder %v2904_v11, 0.5  ;;  %v2931_v54 = vld [vmem:[#allocation2 + $0x110] sm:$0xff] }
  0x92   : > { %3582 = vst [vmem:[#allocation11_spill] sm:$0xff] %v2902_v12  ;;  %3585 = vst [vmem:[#allocation14_spill] sm:$0xff] %v2913_v58  ;;  %vm839_vm15 = vcmp.gt.f32.partialorder %v2906_v46, 0.5  ;;  %v2935_v15 = vsel %vm837_vm13, 1.0, %v3448_v29  ;;  %v2939_v22 = vsel %vm838_vm14, 1.0, %v3448_v29  ;;  %v2944_v11 = vld [vmem:[#allocation2 + $0x118] sm:$0xff] }
  0x93   : > { %3586 = vst [vmem:[#allocation15_spill] sm:$0xff] %v2920_v9  ;;  %1979 = vst [vmem:[%s2104_s26 + $0x60] sm:$0xff] %v1909_v10   ;;  %v2942_v27 = vsel %vm839_vm15, 1.0, %v3448_v29  ;;  %v1915_v46 = vpack.c.bf16 %v2935_v15, %v2925_v31  ;;  %vm840_vm0 = vcmp.gt.f32.partialorder %v2920_v9, 0.5  ;;  %vm841_vm1 = vcmp.gt.f32.partialorder %v2929_v39, 0.5  ;;  %v2956_v29 = vld [vmem:[#allocation2 + $0x120] sm:$0xff] }
  0x94   : > { %3587 = vst [vmem:[#allocation16_spill] sm:$0xff] %v2925_v31  ;;  %3588 = vst [vmem:[#allocation17_spill] sm:$0xff] %v2929_v39  ;;  %v1918_v19 = vpack.c.bf16 %v2942_v27, %v2939_v22  ;;  %vm842_vm2 = vcmp.gt.f32.partialorder %v2931_v54, 0.5  ;;  %v2958_v12 = vld [vmem:[#allocation2 + $0x128] sm:$0xff]  ;;  %vm843_vm3 = vcmp.gt.f32.partialorder %v2944_v11, 0.5  ;;  %v2972_v39 = vld [vmem:[#allocation2 + $0x130] sm:$0xff] }
  0x95   : > { %3589 = vst [vmem:[#allocation18_spill] sm:$0xff] %v2931_v54  ;;  %1980 = vst [vmem:[%s2104_s26 + $0x68] sm:$0xff] %v1912_v63   ;;  %v3596_v63 = vmov 0.0   ;;  %v2974_v54 = vld [vmem:[#allocation2 + $0x138] sm:$0xff]  ;;  %vm844_vm4 = vcmp.gt.f32.partialorder %v2956_v29, 0.5  ;;  %v2988_v16 = vld [vmem:[#allocation2 + $0x140] sm:$0xff] }
  0x96   : > { %3590 = vst [vmem:[#allocation19_spill] sm:$0xff] %v2935_v15  ;;  %3591 = vst [vmem:[#allocation20_spill] sm:$0xff] %v2939_v22  ;;  %v2963_v15 = vsel %vm840_vm0, 1.0, %v3596_v63  ;;  %v2966_v58 = vsel %vm841_vm1, 1.0, %v3596_v63  ;;  %v2970_v10 = vsel %vm842_vm2, 1.0, %v3596_v63  ;;  %vm845_vm5 = vcmp.gt.f32.partialorder %v2958_v12, 0.5 }
  0x97   : > { %3592 = vst [vmem:[#allocation21_spill] sm:$0xff] %v2942_v27  ;;  %3593 = vst [vmem:[#allocation22_spill] sm:$0xff] %v2944_v11  ;;  %v2981_v27 = vsel %vm843_vm3, 1.0, %v3596_v63  ;;  %vm846_vm6 = vcmp.gt.f32.partialorder %v2972_v39, 0.5  ;;  %vm847_vm7 = vcmp.gt.f32.partialorder %v2974_v54, 0.5  ;;  %v2997_v9 = vld [vmem:[#allocation2 + $0x148] sm:$0xff] }
  0x98   : > { %3594 = vst [vmem:[#allocation23_spill] sm:$0xff] %v2956_v29  ;;  %3595 = vst [vmem:[#allocation24_spill] sm:$0xff] %v2958_v12  ;;  %v1924_v11 = vpack.c.bf16 %v2981_v27, %v2970_v10  ;;  %v3003_v31 = vsel %vm845_vm5, 1.0, %v3596_v63  ;;  %v3007_v22 = vsel %vm846_vm6, 1.0, %v3596_v63  ;;  %v3010_v12 = vsel %vm847_vm7, 1.0, %v3596_v63 }
  0x99   : > { %1981 = vst [vmem:[%s2104_s26 + $0x70] sm:$0xff] %v1915_v46   ;;  %1982 = vst [vmem:[%s2104_s26 + $0x78] sm:$0xff] %v1918_v19   ;;  %v1921_v46 = vpack.c.bf16 %v2966_v58, %v2963_v15  ;;  %v2993_v19 = vsel %vm844_vm4, 1.0, %v3596_v63  ;;  %v1930_v29 = vpack.c.bf16 %v3010_v12, %v3007_v22  ;;  %vm848_vm8 = vcmp.gt.f32.partialorder %v2988_v16, 0.5 }
  0x9a   : > { %3597 = vst [vmem:[#allocation25_spill] sm:$0xff] %v2963_v15  ;;  %3598 = vst [vmem:[#allocation26_spill] sm:$0xff] %v2966_v58  ;;  %v2999_v58 = vld [vmem:[#allocation2 + $0x150] sm:$0xff]  ;;  %vm849_vm9 = vcmp.gt.f32.partialorder %v2997_v9, 0.5  ;;  %v3026_v15 = vld [vmem:[#allocation2 + $0x168] sm:$0xff] }
  0x9b   : > { %3599 = vst [vmem:[#allocation27_spill] sm:$0xff] %v2970_v10  ;;  %3600 = vst [vmem:[#allocation28_spill] sm:$0xff] %v2972_v39  ;;  %v3012_v39 = vld [vmem:[#allocation2 + $0x158] sm:$0xff]  ;;  %vm850_vm10 = vcmp.gt.f32.partialorder %v2999_v58, 0.5  ;;  %v3024_v10 = vld [vmem:[#allocation2 + $0x160] sm:$0xff]  ;;  %vm853_vm13 = vcmp.gt.f32.partialorder %v3026_v15, 0.5 }
  0x9c   : > { %3601 = vst [vmem:[#allocation29_spill] sm:$0xff] %v2974_v54  ;;  %3602 = vst [vmem:[#allocation30_spill] sm:$0xff] %v2981_v27  ;;  %v1927_v54 = vpack.c.bf16 %v3003_v31, %v2993_v19  ;;  %v3034_v27 = vsel %vm849_vm9, 1.0, %v3596_v63  ;;  %vm851_vm11 = vcmp.gt.f32.partialorder %v3012_v39, 0.5  ;;  %vm852_vm12 = vcmp.gt.f32.partialorder %v3024_v10, 0.5 }
  0x9d   : > { %3603 = vst [vmem:[#allocation31_spill] sm:$0xff] %v2988_v16  ;;  %1983 = vst [vmem:[%s2104_s26 + $0x80] sm:$0xff] %v1921_v46   ;;  %v3038_v46 = vsel %vm850_vm10, 1.0, %v3596_v63  ;;  %v3065_v16 = vld [vmem:[#allocation2 + $0x188] sm:$0xff] }
  0x9e   : > { %3604 = vst [vmem:[#allocation32_spill] sm:$0xff] %v2993_v19  ;;  %3605 = vst [vmem:[#allocation33_spill] sm:$0xff] %v2997_v9  ;;  %v3040_v9 = vld [vmem:[#allocation2 + $0x170] sm:$0xff]  ;;  %v3056_v19 = vld [vmem:[#allocation2 + $0x180] sm:$0xff]  ;;  %vm857_vm1 = vcmp.gt.f32.partialorder %v3065_v16, 0.5 }
  0x9f   : > { %3606 = vst [vmem:[#allocation34_spill] sm:$0xff] %v2999_v58  ;;  %1984 = vst [vmem:[%s2104_s26 + $0x88] sm:$0xff] %v1924_v11   ;;  %v3031_v11 = vsel %vm848_vm8, 1.0, %v3596_v63  ;;  %v3042_v58 = vld [vmem:[#allocation2 + $0x178] sm:$0xff]  ;;  %vm854_vm14 = vcmp.gt.f32.partialorder %v3040_v9, 0.5  ;;  %vm856_vm0 = vcmp.gt.f32.partialorder %v3056_v19, 0.5 }
  0xa0   : > { %3607 = vst [vmem:[#allocation35_spill] sm:$0xff] %v3003_v31  ;;  %3608 = vst [vmem:[#allocation36_spill] sm:$0xff] %v3007_v22  ;;  %vm855_vm15 = vcmp.gt.f32.partialorder %v3042_v58, 0.5  ;;  %v3071_v31 = vsel %vm853_vm13, 1.0, %v3596_v63  ;;  %v3075_v22 = vsel %vm854_vm14, 1.0, %v3596_v63 }
  0xa1   : > { %3609 = vst [vmem:[#allocation37_spill] sm:$0xff] %v3010_v12  ;;  %3610 = vst [vmem:[#allocation38_spill] sm:$0xff] %v3012_v39  ;;  %v3049_v12 = vsel %vm851_vm11, 1.0, %v3596_v63 }
  0xa2   : > { %3611 = vst [vmem:[#allocation39_spill] sm:$0xff] %v3024_v10  ;;  %3612 = vst [vmem:[#allocation40_spill] sm:$0xff] %v3026_v15  ;;  %v1936_v39 = vpack.c.bf16 %v3049_v12, %v3038_v46  ;;  %v3078_v15 = vsel %vm855_vm15, 1.0, %v3596_v63 }
  0xa3   : > { %1985 = vst [vmem:[%s2104_s26 + $0x90] sm:$0xff] %v1927_v54   ;;  %1986 = vst [vmem:[%s2104_s26 + $0x98] sm:$0xff] %v1930_v29   ;;  %v1933_v54 = vpack.c.bf16 %v3034_v27, %v3031_v11  ;;  %v3061_v29 = vsel %vm852_vm12, 1.0, %v3596_v63  ;;  %v1942_v10 = vpack.c.bf16 %v3078_v15, %v3075_v22 }
  0xa4   : > { %3613 = vst [vmem:[#allocation41_spill] sm:$0xff] %v3031_v11  ;;  %3614 = vst [vmem:[#allocation42_spill] sm:$0xff] %v3034_v27  ;;  %v3067_v27 = vld [vmem:[#allocation2 + $0x190] sm:$0xff]  ;;  %v3094_v11 = vld [vmem:[#allocation2 + $0x1a8] sm:$0xff] }
  0xa5   : > { %3615 = vst [vmem:[#allocation43_spill] sm:$0xff] %v3038_v46  ;;  %3616 = vst [vmem:[#allocation44_spill] sm:$0xff] %v3040_v9  ;;  %v3080_v9 = vld [vmem:[#allocation2 + $0x198] sm:$0xff]  ;;  %vm858_vm2 = vcmp.gt.f32.partialorder %v3067_v27, 0.5  ;;  %v3092_v46 = vld [vmem:[#allocation2 + $0x1a0] sm:$0xff]  ;;  %vm861_vm5 = vcmp.gt.f32.partialorder %v3094_v11, 0.5 }
  0xa6   : > { %3617 = vst [vmem:[#allocation45_spill] sm:$0xff] %v3042_v58  ;;  %3618 = vst [vmem:[#allocation46_spill] sm:$0xff] %v3049_v12  ;;  %v1939_v58 = vpack.c.bf16 %v3071_v31, %v3061_v29  ;;  %v3102_v12 = vsel %vm857_vm1, 1.0, %v3596_v63  ;;  %vm859_vm3 = vcmp.gt.f32.partialorder %v3080_v9, 0.5  ;;  %vm860_vm4 = vcmp.gt.f32.partialorder %v3092_v46, 0.5 }
  0xa7   : > { %3619 = vst [vmem:[#allocation47_spill] sm:$0xff] %v3056_v19  ;;  %1987 = vst [vmem:[%s2104_s26 + $0xa0] sm:$0xff] %v1933_v54   ;;  %v3106_v54 = vsel %vm858_vm2, 1.0, %v3596_v63  ;;  %v3133_v19 = vld [vmem:[#allocation2 + $0x1c8] sm:$0xff] }
  0xa8   : > { %3620 = vst [vmem:[#allocation48_spill] sm:$0xff] %v3061_v29  ;;  %3621 = vst [vmem:[#allocation49_spill] sm:$0xff] %v3065_v16  ;;  %v3108_v16 = vld [vmem:[#allocation2 + $0x1b0] sm:$0xff]  ;;  %v3124_v29 = vld [vmem:[#allocation2 + $0x1c0] sm:$0xff]  ;;  %vm865_vm9 = vcmp.gt.f32.partialorder %v3133_v19, 0.5 }
  0xa9   : > { %3622 = vst [vmem:[#allocation50_spill] sm:$0xff] %v3067_v27  ;;  %1988 = vst [vmem:[%s2104_s26 + $0xa8] sm:$0xff] %v1936_v39   ;;  %v3099_v39 = vsel %vm856_vm0, 1.0, %v3596_v63  ;;  %v3110_v27 = vld [vmem:[#allocation2 + $0x1b8] sm:$0xff]  ;;  %vm862_vm6 = vcmp.gt.f32.partialorder %v3108_v16, 0.5  ;;  %vm864_vm8 = vcmp.gt.f32.partialorder %v3124_v29, 0.5 }
  0xaa   : > { %3623 = vst [vmem:[#allocation51_spill] sm:$0xff] %v3071_v31  ;;  %3624 = vst [vmem:[#allocation52_spill] sm:$0xff] %v3075_v22  ;;  %vm863_vm7 = vcmp.gt.f32.partialorder %v3110_v27, 0.5  ;;  %v3139_v31 = vsel %vm861_vm5, 1.0, %v3596_v63  ;;  %v3143_v22 = vsel %vm862_vm6, 1.0, %v3596_v63 }
  0xab   : > { %3625 = vst [vmem:[#allocation53_spill] sm:$0xff] %v3078_v15  ;;  %3626 = vst [vmem:[#allocation54_spill] sm:$0xff] %v3080_v9  ;;  %v3117_v15 = vsel %vm859_vm3, 1.0, %v3596_v63 }
  0xac   : > { %3627 = vst [vmem:[#allocation55_spill] sm:$0xff] %v3092_v46  ;;  %3628 = vst [vmem:[#allocation56_spill] sm:$0xff] %v3094_v11  ;;  %v1948_v9 = vpack.c.bf16 %v3117_v15, %v3106_v54  ;;  %v3146_v11 = vsel %vm863_vm7, 1.0, %v3596_v63 }
  0xad   : > { %1989 = vst [vmem:[%s2104_s26 + $0xb0] sm:$0xff] %v1939_v58   ;;  %1990 = vst [vmem:[%s2104_s26 + $0xb8] sm:$0xff] %v1942_v10   ;;  %v1945_v58 = vpack.c.bf16 %v3102_v12, %v3099_v39  ;;  %v3129_v10 = vsel %vm860_vm4, 1.0, %v3596_v63  ;;  %v1954_v46 = vpack.c.bf16 %v3146_v11, %v3143_v22 }
  0xae   : > { %3629 = vst [vmem:[#allocation57_spill] sm:$0xff] %v3099_v39  ;;  %3630 = vst [vmem:[#allocation58_spill] sm:$0xff] %v3102_v12  ;;  %v3135_v12 = vld [vmem:[#allocation2 + $0x1d0] sm:$0xff]  ;;  %v3162_v39 = vld [vmem:[#allocation2 + $0x1e8] sm:$0xff] }
  0xaf   : > { %3631 = vst [vmem:[#allocation59_spill] sm:$0xff] %v3106_v54  ;;  %3632 = vst [vmem:[#allocation60_spill] sm:$0xff] %v3108_v16  ;;  %v3148_v16 = vld [vmem:[#allocation2 + $0x1d8] sm:$0xff]  ;;  %vm866_vm10 = vcmp.gt.f32.partialorder %v3135_v12, 0.5  ;;  %v3160_v54 = vld [vmem:[#allocation2 + $0x1e0] sm:$0xff]  ;;  %vm869_vm13 = vcmp.gt.f32.partialorder %v3162_v39, 0.5 }
  0xb0   : > { %3633 = vst [vmem:[#allocation61_spill] sm:$0xff] %v3110_v27  ;;  %3634 = vst [vmem:[#allocation62_spill] sm:$0xff] %v3117_v15  ;;  %v1951_v27 = vpack.c.bf16 %v3139_v31, %v3129_v10  ;;  %v3170_v15 = vsel %vm865_vm9, 1.0, %v3596_v63  ;;  %vm867_vm11 = vcmp.gt.f32.partialorder %v3148_v16, 0.5  ;;  %vm868_vm12 = vcmp.gt.f32.partialorder %v3160_v54, 0.5 }
  0xb1   : > { %3635 = vst [vmem:[#allocation63_spill] sm:$0xff] %v3124_v29  ;;  %1991 = vst [vmem:[%s2104_s26 + $0xc0] sm:$0xff] %v1945_v58   ;;  %v3174_v58 = vsel %vm866_vm10, 1.0, %v3596_v63  ;;  %v3201_v29 = vsel %vm869_vm13, 1.0, %v3596_v63 }
  0xb2   : > { %3636 = vst [vmem:[#allocation64_spill] sm:$0xff] %v3129_v10  ;;  %3637 = vst [vmem:[#allocation65_spill] sm:$0xff] %v3133_v19  ;;  %v3178_v19 = vld [vmem:[#allocation2 + $0x1f8] sm:$0xff]  ;;  %v3195_v10 = vsel %vm868_vm12, 1.0, %v3596_v63 }
  0xb3   : > { %3638 = vst [vmem:[#allocation66_spill] sm:$0xff] %v3135_v12  ;;  %1992 = vst [vmem:[%s2104_s26 + $0xc8] sm:$0xff] %v1948_v9   ;;  %v3167_v9 = vsel %vm864_vm8, 1.0, %v3596_v63  ;;  %v3176_v12 = vld [vmem:[#allocation2 + $0x1f0] sm:$0xff]  ;;  %vm871_vm15 = vcmp.gt.f32.partialorder %v3178_v19, 0.5 }
  0xb4   : > { %3639 = vst [vmem:[#allocation67_spill] sm:$0xff] %v3139_v31  ;;  %3640 = vst [vmem:[#allocation68_spill] sm:$0xff] %v3143_v22  ;;  %vm870_vm14 = vcmp.gt.f32.partialorder %v3176_v12, 0.5  ;;  %v3651_v31 = vsub.f32 1.0, %v2691_v24 }
  0xb5   : > { %3641 = vst [vmem:[#allocation69_spill] sm:$0xff] %v3146_v11  ;;  %3642 = vst [vmem:[#allocation70_spill] sm:$0xff] %v3148_v16  ;;  %v3185_v11 = vsel %vm867_vm11, 1.0, %v3596_v63  ;;  %v3205_v22 = vsel %vm870_vm14, 1.0, %v3596_v63 }
  0xb6   : > { %3643 = vst [vmem:[#allocation71_spill] sm:$0xff] %v3160_v54  ;;  %3644 = vst [vmem:[#allocation72_spill] sm:$0xff] %v3162_v39  ;;  %v1960_v16 = vpack.c.bf16 %v3185_v11, %v3174_v58  ;;  %v1448_v54 = vmul.f32 %v3651_v31, %v2675_v20  ;;  %v3655_v39 = vsub.f32 1.0, %v2721_v52  ;;  %v3656_v20 = vsub.f32 1.0, %v2731_v17  ;;  %v3679_v31 = vld [vmem:[#allocation10_spill] sm:$0xff] }
  0xb7   : > { %1993 = vst [vmem:[%s2104_s26 + $0xd0] sm:$0xff] %v1951_v27   ;;  %1994 = vst [vmem:[%s2104_s26 + $0xd8] sm:$0xff] %v1954_v46   ;;  %v1957_v27 = vpack.c.bf16 %v3170_v15, %v3167_v9  ;;  %v1963_v46 = vpack.c.bf16 %v3201_v29, %v3195_v10 }
  0xb8   : > { %3645 = vst [vmem:[#allocation73_spill] sm:$0xff] %v3174_v58  ;;  %3646 = vst [vmem:[#allocation74_spill] sm:$0xff] %v3176_v12  ;;  %v3654_v12 = vsub.f32 1.0, %v2709_v32  ;;  %v1453_v24 = vmul.f32 %v3656_v20, %v2688_v51  ;;  %v3661_v51 = vsub.f32 1.0, %v2766_v60  ;;  %v3667_v60 = vsub.f32 1.0, %v2827_v37 }
  0xb9   : > { %3647 = vst [vmem:[#allocation75_spill] sm:$0xff] %v3178_v19  ;;  %3648 = vst [vmem:[#allocation76_spill] sm:$0xff] %v3185_v11  ;;  %v3673_v37 = vsub.f32 1.0, %v2871_v23 }
  0xba   : > { %1995 = vst [vmem:[%s2104_s26 + $0xe0] sm:$0xff] %v1957_v27   ;;  %3649 = vst [vmem:[#allocation77_spill] sm:$0xff] %v3195_v10  ;;  %v3208_v27 = vsel %vm871_vm15, 1.0, %v3596_v63  ;;  %v3652_v63 = vsub.f32 1.0, %v2694_v25  ;;  %v3653_v10 = vsub.f32 1.0, %v2698_v33  ;;  %v1458_v17 = vmul.f32 %v3661_v51, %v2727_v50  ;;  %v3699_v51 = vld [vmem:[#allocation15_spill] sm:$0xff] }
  0xbb   : > { %1996 = vst [vmem:[%s2104_s26 + $0xe8] sm:$0xff] %v1960_v16   ;;  %3650 = vst [vmem:[#allocation78_spill] sm:$0xff] %v3208_v27  ;;  %v1966_v19 = vpack.c.bf16 %v3208_v27, %v3205_v22  ;;  %v1451_v16 = vmul.f32 %v3654_v12, %v2683_v13  ;;  %v1452_v27 = vmul.f32 %v3655_v39, %v2686_v45  ;;  %v3659_v13 = vsub.f32 1.0, %v2759_v61  ;;  %v3678_v12 = vld [vmem:[#allocation4_spill] sm:$0xff]  ;;  %v3685_v39 = vld [vmem:[#allocation14_spill] sm:$0xff] }
  0xbc   : > { %v1449_v11 = vmul.f32 %v3652_v63, %v2677_v26  ;;  %v1450_v58 = vmul.f32 %v3653_v10, %v2679_v21  ;;  %1997 = vst [vmem:[%s2104_s26 + $0xf0] sm:$0xff] %v1963_v46   ;;  %v3657_v26 = vsub.f32 1.0, %v2735_v55  ;;  %1512 = vst [vmem:[#allocation2] sm:$0xff] %v1448_v54  ;;  %v3658_v21 = vsub.f32 1.0, %v2738_v3  ;;  %v3684_v54 = vld [vmem:[#allocation6_spill] sm:$0xff]  ;;  %v3687_v10 = vld [vmem:[#allocation7_spill] sm:$0xff] }
  0xbd   : > { %1998 = vst [vmem:[%s2104_s26 + $0xf8] sm:$0xff] %v1966_v19   ;;  %v1456_v32 = vmul.f32 %v3659_v13, %v2716_v0  ;;  %v3660_v45 = vsub.f32 1.0, %v2762_v4  ;;  %1515 = vst [vmem:[#allocation2 + $0x18] sm:$0xff] %v1451_v16  ;;  %v3663_v55 = vsub.f32 1.0, %v2789_v7  ;;  %v3664_v3 = vsub.f32 1.0, %v2799_v5  ;;  %v3681_v19 = vld [vmem:[#allocation5_spill] sm:$0xff] }
  0xbe   : > { %v1454_v25 = vmul.f32 %v3657_v26, %v2700_v40  ;;  %1513 = vst [vmem:[#allocation2 + $0x8] sm:$0xff] %v1449_v11  ;;  %1514 = vst [vmem:[#allocation2 + $0x10] sm:$0xff] %v1450_v58  ;;  %v1455_v33 = vmul.f32 %v3658_v21, %v2702_v48  ;;  %v3662_v40 = vsub.f32 1.0, %v2777_v18  ;;  %v3665_v61 = vsub.f32 1.0, %v2803_v42  ;;  %v3682_v11 = vld [vmem:[#allocation11_spill] sm:$0xff]  ;;  %v3688_v58 = vld [vmem:[#allocation16_spill] sm:$0xff] }
  0xbf   : > { %v1457_v52 = vmul.f32 %v3660_v45, %v2725_v49  ;;  %1516 = vst [vmem:[#allocation2 + $0x20] sm:$0xff] %v1452_v27  ;;  %1517 = vst [vmem:[#allocation2 + $0x28] sm:$0xff] %v1453_v24  ;;  %v1460_v0 = vmul.f32 %v3663_v55, %v2752_v41  ;;  %v1461_v49 = vmul.f32 %v3664_v3, %v2754_v62  ;;  %v3666_v4 = vsub.f32 1.0, %v2806_v14  ;;  %v3690_v16 = vld [vmem:[#allocation8_spill] sm:$0xff]  ;;  %v3691_v63 = vld [vmem:[#allocation19_spill] sm:$0xff] }
  0xc0   : > { %1518 = vst [vmem:[#allocation2 + $0x30] sm:$0xff] %v1454_v25  ;;  %v1459_v48 = vmul.f32 %v3662_v40, %v2740_v56  ;;  %v1462_v50 = vmul.f32 %v3665_v61, %v2768_v35  ;;  %1519 = vst [vmem:[#allocation2 + $0x38] sm:$0xff] %v1455_v33  ;;  %v1464_v41 = vmul.f32 %v3667_v60, %v2784_v2  ;;  %v3668_v18 = vsub.f32 1.0, %v2830_v38  ;;  %v3693_v26 = vld [vmem:[#allocation12_spill] sm:$0xff]  ;;  %v3696_v13 = vld [vmem:[#allocation13_spill] sm:$0xff] }
  0xc1   : > { %1520 = vst [vmem:[#allocation2 + $0x40] sm:$0xff] %v1456_v32  ;;  %1521 = vst [vmem:[#allocation2 + $0x48] sm:$0xff] %v1457_v52  ;;  %v1463_v56 = vmul.f32 %v3666_v4, %v2770_v1  ;;  %v3669_v7 = vsub.f32 1.0, %v2834_v47  ;;  %v3670_v5 = vsub.f32 1.0, %v2845_v43  ;;  %v3671_v42 = vsub.f32 1.0, %v2857_v59  ;;  %v3675_v47 = vld [vmem:[#allocation3_spill] sm:$0xff] }
  0xc2   : > { %1522 = vst [vmem:[#allocation2 + $0x50] sm:$0xff] %v1458_v17  ;;  %v1465_v62 = vmul.f32 %v3668_v18, %v2793_v8  ;;  %1523 = vst [vmem:[#allocation2 + $0x58] sm:$0xff] %v1459_v48  ;;  %v3672_v14 = vsub.f32 1.0, %v2867_v44  ;;  %v3674_v38 = vsub.f32 1.0, %v2874_v28  ;;  %v3676_v43 = vld [vmem:[#allocation9_spill] sm:$0xff]  ;;  %v3680_v44 = vsub.f32 1.0, %v3679_v31 }
  0xc3   : > { %v1466_v35 = vmul.f32 %v3669_v7, %v2795_v34  ;;  %1524 = vst [vmem:[#allocation2 + $0x60] sm:$0xff] %v1460_v0  ;;  %1525 = vst [vmem:[#allocation2 + $0x68] sm:$0xff] %v1461_v49  ;;  %v1467_v1 = vmul.f32 %v3670_v5, %v2808_v6  ;;  %v1468_v2 = vmul.f32 %v3671_v42, %v2820_v36  ;;  %v3677_v59 = vsub.f32 1.0, %v3676_v43  ;;  %v3694_v25 = vld [vmem:[#allocation20_spill] sm:$0xff]  ;;  %v3697_v32 = vld [vmem:[#allocation21_spill] sm:$0xff] }
  0xc4   : > { %1526 = vst [vmem:[#allocation2 + $0x70] sm:$0xff] %v1462_v50  ;;  %v1469_v8 = vmul.f32 %v3672_v14, %v2822_v30  ;;  %v1470_v34 = vmul.f32 %v3673_v37, %v2836_v53  ;;  %1527 = vst [vmem:[#allocation2 + $0x78] sm:$0xff] %v1463_v56  ;;  %v1471_v6 = vmul.f32 %v3674_v38, %v2838_v57  ;;  %v3683_v23 = vsub.f32 1.0, %v3682_v11  ;;  %v3700_v17 = vld [vmem:[#allocation25_spill] sm:$0xff]  ;;  %v3703_v0 = vld [vmem:[#allocation26_spill] sm:$0xff] }
  0xc5   : > { %1528 = vst [vmem:[#allocation2 + $0x80] sm:$0xff] %v1464_v41  ;;  %1529 = vst [vmem:[#allocation2 + $0x88] sm:$0xff] %v1465_v62  ;;  %v1472_v36 = vmul.f32 %v3677_v59, %v3675_v47  ;;  %v1473_v30 = vmul.f32 %v3680_v44, %v3678_v12  ;;  %v3686_v28 = vsub.f32 1.0, %v3685_v39  ;;  %v3689_v46 = vsub.f32 1.0, %v3688_v58  ;;  %v3702_v55 = vld [vmem:[#allocation17_spill] sm:$0xff]  ;;  %v3705_v61 = vld [vmem:[#allocation18_spill] sm:$0xff] }
  0xc6   : > { %1530 = vst [vmem:[#allocation2 + $0x90] sm:$0xff] %v1466_v35  ;;  %v1474_v53 = vmul.f32 %v3683_v23, %v3681_v19  ;;  %1531 = vst [vmem:[#allocation2 + $0x98] sm:$0xff] %v1467_v1  ;;  %v3692_v20 = vsub.f32 1.0, %v3691_v63  ;;  %v3695_v21 = vsub.f32 1.0, %v3694_v25  ;;  %v3698_v45 = vsub.f32 1.0, %v3697_v32  ;;  %v3706_v50 = vld [vmem:[#allocation27_spill] sm:$0xff] }
  0xc7   : > { %1532 = vst [vmem:[#allocation2 + $0xa0] sm:$0xff] %v1468_v2  ;;  %1533 = vst [vmem:[#allocation2 + $0xa8] sm:$0xff] %v1469_v8  ;;  %v1475_v57 = vmul.f32 %v3686_v28, %v3684_v54  ;;  %v1476_v27 = vmul.f32 %v3689_v46, %v3687_v10  ;;  %v3701_v40 = vsub.f32 1.0, %v3700_v17  ;;  %v3704_v3 = vsub.f32 1.0, %v3703_v0  ;;  %v3708_v60 = vld [vmem:[#allocation22_spill] sm:$0xff]  ;;  %v3711_v7 = vld [vmem:[#allocation23_spill] sm:$0xff] }
  0xc8   : > { %1534 = vst [vmem:[#allocation2 + $0xb0] sm:$0xff] %v1470_v34  ;;  %v1477_v24 = vmul.f32 %v3692_v20, %v3690_v16  ;;  %v1478_v33 = vmul.f32 %v3695_v21, %v3693_v26  ;;  %1535 = vst [vmem:[#allocation2 + $0xb8] sm:$0xff] %v1471_v6  ;;  %v1479_v52 = vmul.f32 %v3698_v45, %v3696_v13  ;;  %v3707_v4 = vsub.f32 1.0, %v3706_v50  ;;  %v3709_v41 = vld [vmem:[#allocation30_spill] sm:$0xff]  ;;  %v3712_v35 = vld [vmem:[#allocation32_spill] sm:$0xff] }
  0xc9   : > { %1536 = vst [vmem:[#allocation2 + $0xc0] sm:$0xff] %v1472_v36  ;;  %1537 = vst [vmem:[#allocation2 + $0xc8] sm:$0xff] %v1473_v30  ;;  %v1480_v48 = vmul.f32 %v3701_v40, %v3699_v51  ;;  %v1481_v49 = vmul.f32 %v3704_v3, %v3702_v55  ;;  %v3710_v18 = vsub.f32 1.0, %v3709_v41  ;;  %v3713_v5 = vsub.f32 1.0, %v3712_v35  ;;  %v3714_v42 = vld [vmem:[#allocation24_spill] sm:$0xff]  ;;  %v3715_v2 = vld [vmem:[#allocation35_spill] sm:$0xff] }
  0xca   : > { %1538 = vst [vmem:[#allocation2 + $0xd0] sm:$0xff] %v1474_v53  ;;  %v1482_v56 = vmul.f32 %v3707_v4, %v3705_v61  ;;  %1539 = vst [vmem:[#allocation2 + $0xd8] sm:$0xff] %v1475_v57  ;;  %v3716_v14 = vsub.f32 1.0, %v3715_v2  ;;  %v3717_v37 = vld [vmem:[#allocation28_spill] sm:$0xff]  ;;  %v3720_v47 = vld [vmem:[#allocation29_spill] sm:$0xff] }
  0xcb   : > { %1540 = vst [vmem:[#allocation2 + $0xe0] sm:$0xff] %v1476_v27  ;;  %1541 = vst [vmem:[#allocation2 + $0xe8] sm:$0xff] %v1477_v24  ;;  %v1483_v62 = vmul.f32 %v3710_v18, %v3708_v60  ;;  %v1484_v1 = vmul.f32 %v3713_v5, %v3711_v7  ;;  %v3718_v34 = vld [vmem:[#allocation36_spill] sm:$0xff]  ;;  %v3721_v43 = vld [vmem:[#allocation37_spill] sm:$0xff] }
  0xcc   : > { %1542 = vst [vmem:[#allocation2 + $0xf0] sm:$0xff] %v1478_v33  ;;  %v1485_v8 = vmul.f32 %v3716_v14, %v3714_v42  ;;  %v3719_v38 = vsub.f32 1.0, %v3718_v34  ;;  %1543 = vst [vmem:[#allocation2 + $0xf8] sm:$0xff] %v1479_v52  ;;  %v3722_v59 = vsub.f32 1.0, %v3721_v43  ;;  %v3723_v12 = vld [vmem:[#allocation31_spill] sm:$0xff]  ;;  %v3724_v31 = vld [vmem:[#allocation41_spill] sm:$0xff] }
  0xcd   : > { %1544 = vst [vmem:[#allocation2 + $0x100] sm:$0xff] %v1480_v48  ;;  %1545 = vst [vmem:[#allocation2 + $0x108] sm:$0xff] %v1481_v49  ;;  %v3725_v44 = vsub.f32 1.0, %v3724_v31  ;;  %v3726_v19 = vld [vmem:[#allocation33_spill] sm:$0xff]  ;;  %v3727_v11 = vld [vmem:[#allocation42_spill] sm:$0xff] }
  0xce   : > { %v1486_v6 = vmul.f32 %v3719_v38, %v3717_v37  ;;  %1546 = vst [vmem:[#allocation2 + $0x110] sm:$0xff] %v1482_v56  ;;  %v1487_v36 = vmul.f32 %v3722_v59, %v3720_v47  ;;  %v3728_v23 = vsub.f32 1.0, %v3727_v11  ;;  %v3729_v54 = vld [vmem:[#allocation34_spill] sm:$0xff]  ;;  %v3730_v39 = vld [vmem:[#allocation43_spill] sm:$0xff]  ;;  %1547 = vst [vmem:[#allocation2 + $0x118] sm:$0xff] %v1483_v62  ;;  %v3772_v11 = vsub.f32 1.0, %v3167_v9 }
  0xcf   : > { %v1488_v30 = vmul.f32 %v3725_v44, %v3723_v12  ;;  %v3731_v28 = vsub.f32 1.0, %v3730_v39  ;;  %1548 = vst [vmem:[#allocation2 + $0x120] sm:$0xff] %v1484_v1  ;;  %1549 = vst [vmem:[#allocation2 + $0x128] sm:$0xff] %v1485_v8  ;;  %v3732_v10 = vld [vmem:[#allocation38_spill] sm:$0xff]  ;;  %v3735_v16 = vld [vmem:[#allocation39_spill] sm:$0xff] }
  0xd0   : > { %v1489_v53 = vmul.f32 %v3728_v23, %v3726_v19  ;;  %1550 = vst [vmem:[#allocation2 + $0x130] sm:$0xff] %v1486_v6  ;;  %v3733_v58 = vld [vmem:[#allocation46_spill] sm:$0xff]  ;;  %v3736_v63 = vld [vmem:[#allocation48_spill] sm:$0xff]  ;;  %v3739_v25 = vld [vmem:[#allocation51_spill] sm:$0xff] }
  0xd1   : > { %v1490_v57 = vmul.f32 %v3731_v28, %v3729_v54  ;;  %v3734_v46 = vsub.f32 1.0, %v3733_v58  ;;  %v3737_v20 = vsub.f32 1.0, %v3736_v63  ;;  %v3738_v26 = vld [vmem:[#allocation40_spill] sm:$0xff]  ;;  %v3740_v21 = vsub.f32 1.0, %v3739_v25  ;;  %1551 = vst [vmem:[#allocation2 + $0x138] sm:$0xff] %v1487_v36  ;;  %1552 = vst [vmem:[#allocation2 + $0x140] sm:$0xff] %v1488_v30 }
  0xd2   : > { %v3741_v13 = vld [vmem:[#allocation44_spill] sm:$0xff]  ;;  %1553 = vst [vmem:[#allocation2 + $0x148] sm:$0xff] %v1489_v53  ;;  %v3744_v51 = vld [vmem:[#allocation45_spill] sm:$0xff]  ;;  %v3747_v55 = vld [vmem:[#allocation47_spill] sm:$0xff]  ;;  %v3774_v54 = vsub.f32 1.0, %v3170_v15  ;;  %v3785_v15 = vsub.f32 1.0, %v3201_v29 }
  0xd3   : > { %v1491_v27 = vmul.f32 %v3734_v46, %v3732_v10  ;;  %v1492_v24 = vmul.f32 %v3737_v20, %v3735_v16  ;;  %v1493_v33 = vmul.f32 %v3740_v21, %v3738_v26  ;;  %v3742_v32 = vld [vmem:[#allocation52_spill] sm:$0xff]  ;;  %1554 = vst [vmem:[#allocation2 + $0x150] sm:$0xff] %v1490_v57  ;;  %v3745_v17 = vld [vmem:[#allocation53_spill] sm:$0xff]  ;;  %v3751_v50 = vld [vmem:[#allocation58_spill] sm:$0xff] }
  0xd4   : > { %v3743_v45 = vsub.f32 1.0, %v3742_v32  ;;  %v3746_v40 = vsub.f32 1.0, %v3745_v17  ;;  %v3748_v0 = vld [vmem:[#allocation57_spill] sm:$0xff]  ;;  %v3752_v4 = vsub.f32 1.0, %v3751_v50  ;;  %v3753_v60 = vld [vmem:[#allocation50_spill] sm:$0xff]  ;;  %v3754_v41 = vld [vmem:[#allocation59_spill] sm:$0xff] }
  0xd5   : > { %v3749_v3 = vsub.f32 1.0, %v3748_v0  ;;  %v3750_v61 = vld [vmem:[#allocation49_spill] sm:$0xff]  ;;  %v3755_v18 = vsub.f32 1.0, %v3754_v41  ;;  %1555 = vst [vmem:[#allocation2 + $0x158] sm:$0xff] %v1491_v27  ;;  %1556 = vst [vmem:[#allocation2 + $0x160] sm:$0xff] %v1492_v24  ;;  %v3756_v7 = vld [vmem:[#allocation54_spill] sm:$0xff] }
  0xd6   : > { %v1494_v52 = vmul.f32 %v3743_v45, %v3741_v13  ;;  %v1495_v48 = vmul.f32 %v3746_v40, %v3744_v51  ;;  %v1497_v56 = vmul.f32 %v3752_v4, %v3750_v61  ;;  %1557 = vst [vmem:[#allocation2 + $0x168] sm:$0xff] %v1493_v33  ;;  %v3757_v35 = vld [vmem:[#allocation62_spill] sm:$0xff]  ;;  %v3759_v42 = vld [vmem:[#allocation55_spill] sm:$0xff]  ;;  %v3760_v2 = vld [vmem:[#allocation64_spill] sm:$0xff]  ;;  %v3787_v13 = vsub.f32 1.0, %v3205_v22 }
  0xd7   : > { %v1496_v49 = vmul.f32 %v3749_v3, %v3747_v55  ;;  %v1498_v62 = vmul.f32 %v3755_v18, %v3753_v60  ;;  %v3758_v5 = vsub.f32 1.0, %v3757_v35  ;;  %v3761_v14 = vsub.f32 1.0, %v3760_v2  ;;  %v3762_v37 = vld [vmem:[#allocation56_spill] sm:$0xff]  ;;  %v3763_v34 = vld [vmem:[#allocation67_spill] sm:$0xff]  ;;  %v3768_v12 = vld [vmem:[#allocation61_spill] sm:$0xff] }
  0xd8   : > { %1558 = vst [vmem:[#allocation2 + $0x170] sm:$0xff] %v1494_v52  ;;  %v3764_v38 = vsub.f32 1.0, %v3763_v34  ;;  %v3765_v47 = vld [vmem:[#allocation60_spill] sm:$0xff]  ;;  %1559 = vst [vmem:[#allocation2 + $0x178] sm:$0xff] %v1495_v48  ;;  %v3769_v31 = vld [vmem:[#allocation69_spill] sm:$0xff] }
  0xd9   : > { %v1499_v1 = vmul.f32 %v3758_v5, %v3756_v7  ;;  %v1500_v8 = vmul.f32 %v3761_v14, %v3759_v42  ;;  %v3766_v43 = vld [vmem:[#allocation68_spill] sm:$0xff]  ;;  %1560 = vst [vmem:[#allocation2 + $0x180] sm:$0xff] %v1496_v49  ;;  %1561 = vst [vmem:[#allocation2 + $0x188] sm:$0xff] %v1497_v56  ;;  %v3770_v44 = vsub.f32 1.0, %v3769_v31  ;;  %v3771_v19 = vld [vmem:[#allocation63_spill] sm:$0xff] }
  0xda   : > { %v1501_v6 = vmul.f32 %v3764_v38, %v3762_v37  ;;  %v3767_v59 = vsub.f32 1.0, %v3766_v43  ;;  %1562 = vst [vmem:[#allocation2 + $0x190] sm:$0xff] %v1498_v62  ;;  %v1504_v23 = vmul.f32 %v3772_v11, %v3771_v19  ;;  %v3773_v53 = vld [vmem:[#allocation65_spill] sm:$0xff]  ;;  %v3775_v28 = vld [vmem:[#allocation66_spill] sm:$0xff]  ;;  %v3779_v27 = vld [vmem:[#allocation76_spill] sm:$0xff] }
  0xdb   : > { %v1503_v30 = vmul.f32 %v3770_v44, %v3768_v12  ;;  %v1505_v39 = vmul.f32 %v3774_v54, %v3773_v53  ;;  %v3776_v57 = vld [vmem:[#allocation73_spill] sm:$0xff]  ;;  %1563 = vst [vmem:[#allocation2 + $0x198] sm:$0xff] %v1499_v1  ;;  %1564 = vst [vmem:[#allocation2 + $0x1a0] sm:$0xff] %v1500_v8  ;;  %v3778_v46 = vld [vmem:[#allocation70_spill] sm:$0xff]  ;;  %v3780_v16 = vsub.f32 1.0, %v3779_v27 }
  0xdc   : > { %v1502_v36 = vmul.f32 %v3767_v59, %v3765_v47  ;;  %v3777_v10 = vsub.f32 1.0, %v3776_v57  ;;  %1565 = vst [vmem:[#allocation2 + $0x1a8] sm:$0xff] %v1501_v6  ;;  %v3781_v20 = vld [vmem:[#allocation71_spill] sm:$0xff]  ;;  %v3782_v24 = vld [vmem:[#allocation77_spill] sm:$0xff]  ;;  %v3784_v25 = vld [vmem:[#allocation72_spill] sm:$0xff] }
  0xdd   : > { %v1507_v63 = vmul.f32 %v3780_v16, %v3778_v46  ;;  %v3783_v9 = vsub.f32 1.0, %v3782_v24  ;;  %v1509_v21 = vmul.f32 %v3785_v15, %v3784_v25  ;;  %v3786_v33 = vld [vmem:[#allocation74_spill] sm:$0xff]  ;;  %1567 = vst [vmem:[#allocation2 + $0x1b8] sm:$0xff] %v1503_v30  ;;  %1568 = vst [vmem:[#allocation2 + $0x1c0] sm:$0xff] %v1504_v23  ;;  %v3788_v45 = vld [vmem:[#allocation75_spill] sm:$0xff] }
  0xde   : > { %v1506_v58 = vmul.f32 %v3777_v10, %v3775_v28  ;;  %1566 = vst [vmem:[#allocation2 + $0x1b0] sm:$0xff] %v1502_v36  ;;  %v1510_v32 = vmul.f32 %v3787_v13, %v3786_v33  ;;  %1569 = vst [vmem:[#allocation2 + $0x1c8] sm:$0xff] %v1505_v39  ;;  %v3789_v52 = vld [vmem:[#allocation78_spill] sm:$0xff] }
  0xdf   : > { %v1508_v26 = vmul.f32 %v3783_v9, %v3781_v20  ;;  %v3790_v51 = vsub.f32 1.0, %v3789_v52  ;;  %1571 = vst [vmem:[#allocation2 + $0x1d8] sm:$0xff] %v1507_v63  ;;  %1573 = vst [vmem:[#allocation2 + $0x1e8] sm:$0xff] %v1509_v21 }
  0xe0   : > { %1570 = vst [vmem:[#allocation2 + $0x1d0] sm:$0xff] %v1506_v58  ;;  %1574 = vst [vmem:[#allocation2 + $0x1f0] sm:$0xff] %v1510_v32 }
  0xe1   : > { %v1511_v17 = vmul.f32 %v3790_v51, %v3788_v45  ;;  %1572 = vst [vmem:[#allocation2 + $0x1e0] sm:$0xff] %v1508_v26 }
  0xe3   : > { %1575 = vst [vmem:[#allocation2 + $0x1f8] sm:$0xff] %v1511_v17 }
  0xe4 PF: > { %s13_s14 = sadd.s32 1, %s2046_s14   ;;  %s3791_s12 = smov %s2042_s13 }
  0xe5   : > { %p10_p7 = scmp.ge.s32.totalorder %s13_s14, 6   ;;  %s3792_s13 = smov %s3794_s15 }
  0xe7   :  { %12 = sbr.rel (!%p10_p7) target bundleno = 2 (0x2), region = 70 }

// kernel: snn_dwconv_forward.8
= control target key start
LH: loop header
LB: loop body
LE: loop exit
PB: predicated region body
PF: predicated region fallthrough
CT: control target
= control target key end

     0   :  { %s1415_s12 = smov 0   ;;  %s1760_s0 = inlined_call_operand.vmem [shape: bf16[2048,128], index: 0, kind: input, shape index: {}]   ;;  %s1761_s1 = inlined_call_operand.vmem [shape: bf16[128,128], index: 1, kind: input, shape index: {}]   ;;  %s1762_s2 = inlined_call_operand.vmem [shape: f32[2048,128], index: 2, kind: output, shape index: {0}]   ;;  %s1763_s3 = inlined_call_operand.vmem [shape: f32[4,2,128], index: 3, kind: output, shape index: {1}]  }
   0x1 LB: > { %s1421_s13 = sadd.s32 4294967295, %s1393_s12   ;;  %p1155_p0 = scmp.ge.s32.totalorder %s1393_s12, 1  ;;  %s1393_s12 = sphi %s1415_s12, %s14_s12  }
   0x2   : > { %p141_p1 = scmp.lt.s32.totalorder %s1393_s12, 5 }
   0x4   : > { %p142_p2 = pnand %p1155_p0, %p141_p1 }
   0x5   : > { %v1347_v0 = vld [vmem:[%s1761_s1] sm:$0xff] (!%p142_p2)   ;;  %s1156_s16 = sshll.u32 (!%p142_p2), %s1421_s13, 6  ;;  %v1348_v1 = vld [vmem:[%s1761_s1 + $0x8] sm:$0xff] (!%p142_p2)   ;;  %v1349_v2 = vld [vmem:[%s1761_s1 + $0x10] sm:$0xff] (!%p142_p2)   ;;  %p181_p4 = scmp.lt.s32.totalorder (!%p142_p2), %s1421_s13, 3  ;;  %vm1061_vm0 = vcmask (!%p142_p2), 1040384  }
   0x6   : > { %145 = sbr.rel (%p142_p2) target bundleno = 395 (0x18b), region = 28  ;;  %p170_p3 = scmp.lt.s32.totalorder (!%p142_p2), %s1156_s16, 255  ;;  %1243 = vmatprep.subr.bf16.mxu0 (!%p142_p2), %v1347_v0  ;;  %1323 = vmatprep.subr.bf16.mxu1 (!%p142_p2), %v1347_v0  ;;  %v1350_v3 = vld [vmem:[%s1761_s1 + $0x18] sm:$0xff] (!%p142_p2)   ;;  %v1351_v5 = vld [vmem:[%s1761_s1 + $0x20] sm:$0xff] (!%p142_p2)   ;;  %v1352_v6 = vld [vmem:[%s1761_s1 + $0x28] sm:$0xff] (!%p142_p2)  }
   0x7   : > { %1244 = vmatpush3.bf16.msra.mxu0 (!%p142_p2), %v1347_v0  ;;  %1331 = vmatpush3.bf16.msra.mxu1 (!%p142_p2), %v1347_v0  ;;  %v1353_v7 = vld [vmem:[%s1761_s1 + $0x30] sm:$0xff] (!%p142_p2)   ;;  %v1354_v8 = vld [vmem:[%s1761_s1 + $0x38] sm:$0xff] (!%p142_p2)  }
   0x8   : > { %1245 = vmatprep.subr.bf16.mxu0 (!%p142_p2), %v1348_v1  ;;  %1324 = vmatprep.subr.bf16.mxu1 (!%p142_p2), %v1348_v1 }
   0xb   : > { %1246 = vmatpush3.bf16.msra.mxu0 (!%p142_p2), %v1348_v1  ;;  %1332 = vmatpush3.bf16.msra.mxu1 (!%p142_p2), %v1348_v1 }
   0xc   : > { %1247 = vmatprep.subr.bf16.mxu0 (!%p142_p2), %v1349_v2  ;;  %1325 = vmatprep.subr.bf16.mxu1 (!%p142_p2), %v1349_v2 }
   0xd   : > { %s1765_s16 = smov (!%p170_p3, %s1156_s16), 255  ;;  %s1767_s13 = smov (!%p181_p4, %s1421_s13), 3 }
   0xe   : > { %s1157_s21 = sshll.u32 %s1765_s16, 2  ;;  %s1159_s8 = sshll.u32 %s1765_s16, 3 }
   0xf   : > { %s1441_s24 = scalar_lea.vmem %s1760_s0, %s1157_s21  ;;  %1248 = vmatpush3.bf16.msra.mxu0 %v1349_v2  ;;  %1333 = vmatpush3.bf16.msra.mxu1 %v1349_v2  ;;  %s1494_s11 = scalar_lea.vmem %s1762_s2, %s1159_s8 }
  0x10   : > { %v1355_v4 = vld [vmem:[%s1441_s24] sm:$0xff]   ;;  %1249 = vmatprep.subr.bf16.mxu0 %v1350_v3  ;;  %1326 = vmatprep.subr.bf16.mxu1 %v1350_v3  ;;  %v1356_v10 = vld [vmem:[%s1441_s24 + $0x8] sm:$0xff]   ;;  %v1357_v11 = vld [vmem:[%s1441_s24 + $0x10] sm:$0xff]   ;;  %s1160_s14 = sshll.u32 %s1767_s13, 1 }
  0x11   : > { %1259 = vmatprep.mubr.bf16.mxu0 %v1355_v4  ;;  %v1371_v9 = vld [vmem:[%s1441_s24 + $0x80] sm:$0xff]   ;;  %v1372_v12 = vld [vmem:[%s1441_s24 + $0x88] sm:$0xff]   ;;  %v1373_v13 = vld [vmem:[%s1441_s24 + $0x90] sm:$0xff]   ;;  %s184_s17 = scalar_lea.vmem %s1763_s3, %s1160_s14 }
  0x12   : > { %1291 = vmatprep.mubr.bf16.mxu1 %v1371_v9  ;;  %v1358_v14 = vld [vmem:[%s1441_s24 + $0x18] sm:$0xff]   ;;  %v1359_v15 = vld [vmem:[%s1441_s24 + $0x20] sm:$0xff]   ;;  %v1360_v18 = vld [vmem:[%s1441_s24 + $0x28] sm:$0xff]  }
  0x13   : > { %1250 = vmatpush3.bf16.msra.mxu0 %v1350_v3  ;;  %1334 = vmatpush3.bf16.msra.mxu1 %v1350_v3  ;;  %v1374_v16 = vld [vmem:[%s1441_s24 + $0x98] sm:$0xff]   ;;  %v1375_v17 = vld [vmem:[%s1441_s24 + $0xa0] sm:$0xff]   ;;  %v1376_v19 = vld [vmem:[%s1441_s24 + $0xa8] sm:$0xff]  }
  0x14   : > { %1251 = vmatprep.subr.bf16.mxu0 %v1351_v5  ;;  %1327 = vmatprep.subr.bf16.mxu1 %v1351_v5  ;;  %v1361_v20 = vld [vmem:[%s1441_s24 + $0x30] sm:$0xff]   ;;  %v1362_v22 = vld [vmem:[%s1441_s24 + $0x38] sm:$0xff]   ;;  %v1363_v24 = vld [vmem:[%s1441_s24 + $0x40] sm:$0xff]  }
  0x15   : > { %v1377_v21 = vld [vmem:[%s1441_s24 + $0xb0] sm:$0xff]   ;;  %v1378_v23 = vld [vmem:[%s1441_s24 + $0xb8] sm:$0xff]   ;;  %v1379_v25 = vld [vmem:[%s1441_s24 + $0xc0] sm:$0xff]  }
  0x16   : > { %v1364_v26 = vld [vmem:[%s1441_s24 + $0x48] sm:$0xff]   ;;  %v1365_v28 = vld [vmem:[%s1441_s24 + $0x50] sm:$0xff]   ;;  %v1366_v30 = vld [vmem:[%s1441_s24 + $0x58] sm:$0xff]  }
  0x17   : > { %1252 = vmatpush3.bf16.msra.mxu0 %v1351_v5  ;;  %1335 = vmatpush3.bf16.msra.mxu1 %v1351_v5  ;;  %v1380_v27 = vld [vmem:[%s1441_s24 + $0xc8] sm:$0xff]   ;;  %v1381_v29 = vld [vmem:[%s1441_s24 + $0xd0] sm:$0xff]   ;;  %v1382_v31 = vld [vmem:[%s1441_s24 + $0xd8] sm:$0xff]  }
  0x18   : > { %1253 = vmatprep.subr.bf16.mxu0 %v1352_v6  ;;  %1328 = vmatprep.subr.bf16.mxu1 %v1352_v6  ;;  %v1367_v32 = vld [vmem:[%s1441_s24 + $0x60] sm:$0xff]   ;;  %v1368_v34 = vld [vmem:[%s1441_s24 + $0x68] sm:$0xff]   ;;  %v1369_v36 = vld [vmem:[%s1441_s24 + $0x70] sm:$0xff]  }
  0x19   : > { %v1383_v33 = vld [vmem:[%s1441_s24 + $0xe0] sm:$0xff]   ;;  %v1384_v35 = vld [vmem:[%s1441_s24 + $0xe8] sm:$0xff]   ;;  %v1385_v37 = vld [vmem:[%s1441_s24 + $0xf0] sm:$0xff]  }
  0x1a   : > { %v1370_v38 = vld [vmem:[%s1441_s24 + $0x78] sm:$0xff]  }
  0x1b   : > { %1254 = vmatpush3.bf16.msra.mxu0 %v1352_v6  ;;  %1336 = vmatpush3.bf16.msra.mxu1 %v1352_v6  ;;  %v1386_v39 = vld [vmem:[%s1441_s24 + $0xf8] sm:$0xff]  }
  0x1c   : > { %1255 = vmatprep.subr.bf16.mxu0 %v1353_v7  ;;  %1329 = vmatprep.subr.bf16.mxu1 %v1353_v7 }
  0x1f   : > { %1256 = vmatpush3.bf16.msra.mxu0 %v1353_v7  ;;  %1337 = vmatpush3.bf16.msra.mxu1 %v1353_v7 }
  0x20   : > { %1257 = vmatprep.subr.bf16.mxu0 %v1354_v8  ;;  %1330 = vmatprep.subr.bf16.mxu1 %v1354_v8 }
  0x23   : > { %1258 = vmatpush3.bf16.msra.mxu0 %v1354_v8  ;;  %1338 = vmatpush3.bf16.msra.mxu1 %v1354_v8 }
  0x26   : > { %1260 = vmatmul.mubr.bf16.vlgmr.msra.gmra.mrb[0].mxu0 %v1356_v10  ;;  %1292 = vmatmul.mubr.bf16.vlgmr.msra.gmra.mrb[0].mxu1 %v1372_v12 }
  0x27   : > { %1263 = vmatprep.mubr.bf16.mxu0 %v1357_v11  ;;  %1295 = vmatprep.mubr.bf16.mxu1 %v1373_v13 }
  0x2e   : > { %1264 = vmatmul.mubr.bf16.gmra.mrb[4].mxu0 %v1358_v14  ;;  %1296 = vmatmul.mubr.bf16.gmra.mrb[4].mxu1 %v1374_v16 }
  0x2f   : > { %1267 = vmatprep.mubr.bf16.mxu0 %v1359_v15  ;;  %1299 = vmatprep.mubr.bf16.mxu1 %v1375_v17 }
  0x36   : > { %1268 = vmatmul.mubr.bf16.gmra.mrb[8].mxu0 %v1360_v18  ;;  %1300 = vmatmul.mubr.bf16.gmra.mrb[8].mxu1 %v1376_v19 }
  0x37   : > { %1271 = vmatprep.mubr.bf16.mxu0 %v1361_v20  ;;  %1303 = vmatprep.mubr.bf16.mxu1 %v1377_v21 }
  0x3e   : > { %1272 = vmatmul.mubr.bf16.gmra.mrb[12].mxu0 %v1362_v22  ;;  %1304 = vmatmul.mubr.bf16.gmra.mrb[12].mxu1 %v1378_v23 }
  0x3f   : > { %1275 = vmatprep.mubr.bf16.mxu0 %v1363_v24  ;;  %1307 = vmatprep.mubr.bf16.mxu1 %v1379_v25 }
  0x46   : > { %1276 = vmatmul.mubr.bf16.gmra.mrb[16].mxu0 %v1364_v26  ;;  %1308 = vmatmul.mubr.bf16.gmra.mrb[16].mxu1 %v1380_v27 }
  0x47   : > { %1279 = vmatprep.mubr.bf16.mxu0 %v1365_v28  ;;  %1311 = vmatprep.mubr.bf16.mxu1 %v1381_v29 }
  0x4e   : > { %1280 = vmatmul.mubr.bf16.gmra.mrb[20].mxu0 %v1366_v30  ;;  %1312 = vmatmul.mubr.bf16.gmra.mrb[20].mxu1 %v1382_v31 }
  0x4f   : > { %1283 = vmatprep.mubr.bf16.mxu0 %v1367_v32  ;;  %1315 = vmatprep.mubr.bf16.mxu1 %v1383_v33 }
  0x56   : > { %1284 = vmatmul.mubr.bf16.gmra.mrb[24].mxu0 %v1368_v34  ;;  %1316 = vmatmul.mubr.bf16.gmra.mrb[24].mxu1 %v1384_v35 }
  0x57   : > { %1287 = vmatprep.mubr.bf16.mxu0 %v1369_v36  ;;  %1319 = vmatprep.mubr.bf16.mxu1 %v1385_v37 }
  0x5e   : > { %1288 = vmatmul.mubr.bf16.gmra.mrb[28].mxu0 %v1370_v38  ;;  %1320 = vmatmul.mubr.bf16.gmra.mrb[28].mxu1 %v1386_v39 }
  0xf9   : > { %v1261_v40 = vpop.f32.mrb[0].mxu0  ;;  %v1496_v41 = vpop.f32.mrb[0].mxu1 }
  0xfa   : > { %797 = vst [vmem:[%s1494_s11 + $0x10] sm:$0xff] %v1261_v40  ;;  %v540_v42 = vpop.f32.mrb[1].mxu0  ;;  %829 = vst [vmem:[%s1494_s11 + $0x110] sm:$0xff] %v1496_v41  ;;  %v1501_v43 = vpop.f32.mrb[1].mxu1  ;;  %v930_v51 = vmul.f32 %v1261_v40, %v1261_v40 }
  0xfb   : > { %795 = vst [vmem:[%s1494_s11] sm:$0xff] %v540_v42  ;;  %v1262_v44 = vpop.f32.mrb[2].mxu0  ;;  %827 = vst [vmem:[%s1494_s11 + $0x100] sm:$0xff] %v1501_v43  ;;  %v1506_v45 = vpop.f32.mrb[2].mxu1  ;;  %v928_v48 = vmul.f32 %v540_v42, %v540_v42 }
  0xfc   : > { %798 = vst [vmem:[%s1494_s11 + $0x18] sm:$0xff] %v1262_v44  ;;  %v543_v46 = vpop.f32.mrb[3].mxu0  ;;  %830 = vst [vmem:[%s1494_s11 + $0x118] sm:$0xff] %v1506_v45  ;;  %v1511_v47 = vpop.f32.mrb[3].mxu1  ;;  %v931_v54 = vmul.f32 %v1262_v44, %v1262_v44 }
  0xfd   : > { %796 = vst [vmem:[%s1494_s11 + $0x8] sm:$0xff] %v543_v46  ;;  %v859_v49 = vadd.f32 %v543_v46, %v540_v42  ;;  %v929_v50 = vmul.f32 %v543_v46, %v543_v46  ;;  %828 = vst [vmem:[%s1494_s11 + $0x108] sm:$0xff] %v1511_v47 }
  0xff   : > { %v860_v52 = vadd.f32 %v1261_v40, %v859_v49  ;;  %v992_v53 = vadd.f32 %v929_v50, %v928_v48 }
 0x101   : > { %v993_v55 = vadd.f32 %v992_v53, %v930_v51  ;;  %v1265_v56 = vpop.f32.mrb[4].mxu0  ;;  %v861_v57 = vadd.f32 %v1262_v44, %v860_v52  ;;  %v1516_v58 = vpop.f32.mrb[4].mxu1 }
 0x102   : > { %801 = vst [vmem:[%s1494_s11 + $0x30] sm:$0xff] %v1265_v56  ;;  %v556_v59 = vpop.f32.mrb[5].mxu0  ;;  %833 = vst [vmem:[%s1494_s11 + $0x130] sm:$0xff] %v1516_v58  ;;  %v1521_v60 = vpop.f32.mrb[5].mxu1  ;;  %v934_v7 = vmul.f32 %v1265_v56, %v1265_v56 }
 0x103   : > { %799 = vst [vmem:[%s1494_s11 + $0x20] sm:$0xff] %v556_v59  ;;  %v862_v61 = vadd.f32 %v861_v57, %v556_v59  ;;  %v932_v62 = vmul.f32 %v556_v59, %v556_v59  ;;  %v994_v63 = vadd.f32 %v993_v55, %v931_v54  ;;  %v1266_v0 = vpop.f32.mrb[6].mxu0  ;;  %831 = vst [vmem:[%s1494_s11 + $0x120] sm:$0xff] %v1521_v60  ;;  %v1526_v1 = vpop.f32.mrb[6].mxu1 }
 0x104   : > { %802 = vst [vmem:[%s1494_s11 + $0x38] sm:$0xff] %v1266_v0  ;;  %v559_v2 = vpop.f32.mrb[7].mxu0  ;;  %834 = vst [vmem:[%s1494_s11 + $0x138] sm:$0xff] %v1526_v1  ;;  %v1531_v3 = vpop.f32.mrb[7].mxu1  ;;  %v935_v10 = vmul.f32 %v1266_v0, %v1266_v0 }
 0x105   : > { %v995_v4 = vadd.f32 %v994_v63, %v932_v62  ;;  %800 = vst [vmem:[%s1494_s11 + $0x28] sm:$0xff] %v559_v2  ;;  %v863_v5 = vadd.f32 %v862_v61, %v559_v2  ;;  %v933_v6 = vmul.f32 %v559_v2, %v559_v2  ;;  %832 = vst [vmem:[%s1494_s11 + $0x128] sm:$0xff] %v1531_v3 }
 0x107   : > { %v864_v8 = vadd.f32 %v1265_v56, %v863_v5  ;;  %v996_v9 = vadd.f32 %v995_v4, %v933_v6 }
 0x109   : > { %v997_v11 = vadd.f32 %v996_v9, %v934_v7  ;;  %v1269_v12 = vpop.f32.mrb[8].mxu0  ;;  %v865_v13 = vadd.f32 %v1266_v0, %v864_v8  ;;  %v1536_v14 = vpop.f32.mrb[8].mxu1 }
 0x10a   : > { %805 = vst [vmem:[%s1494_s11 + $0x50] sm:$0xff] %v1269_v12  ;;  %v572_v15 = vpop.f32.mrb[9].mxu0  ;;  %837 = vst [vmem:[%s1494_s11 + $0x150] sm:$0xff] %v1536_v14  ;;  %v1541_v16 = vpop.f32.mrb[9].mxu1  ;;  %v938_v27 = vmul.f32 %v1269_v12, %v1269_v12 }
 0x10b   : > { %803 = vst [vmem:[%s1494_s11 + $0x40] sm:$0xff] %v572_v15  ;;  %v866_v17 = vadd.f32 %v865_v13, %v572_v15  ;;  %v936_v18 = vmul.f32 %v572_v15, %v572_v15  ;;  %v998_v19 = vadd.f32 %v997_v11, %v935_v10  ;;  %v1270_v20 = vpop.f32.mrb[10].mxu0  ;;  %835 = vst [vmem:[%s1494_s11 + $0x140] sm:$0xff] %v1541_v16  ;;  %v1546_v21 = vpop.f32.mrb[10].mxu1 }
 0x10c   : > { %806 = vst [vmem:[%s1494_s11 + $0x58] sm:$0xff] %v1270_v20  ;;  %v575_v22 = vpop.f32.mrb[11].mxu0  ;;  %838 = vst [vmem:[%s1494_s11 + $0x158] sm:$0xff] %v1546_v21  ;;  %v1551_v23 = vpop.f32.mrb[11].mxu1  ;;  %v939_v30 = vmul.f32 %v1270_v20, %v1270_v20 }
 0x10d   : > { %v999_v24 = vadd.f32 %v998_v19, %v936_v18  ;;  %804 = vst [vmem:[%s1494_s11 + $0x48] sm:$0xff] %v575_v22  ;;  %v867_v25 = vadd.f32 %v866_v17, %v575_v22  ;;  %v937_v26 = vmul.f32 %v575_v22, %v575_v22  ;;  %836 = vst [vmem:[%s1494_s11 + $0x148] sm:$0xff] %v1551_v23 }
 0x10f   : > { %v868_v28 = vadd.f32 %v1269_v12, %v867_v25  ;;  %v1000_v29 = vadd.f32 %v999_v24, %v937_v26 }
 0x111   : > { %v1001_v31 = vadd.f32 %v1000_v29, %v938_v27  ;;  %v1273_v32 = vpop.f32.mrb[12].mxu0  ;;  %v869_v33 = vadd.f32 %v1270_v20, %v868_v28  ;;  %v1556_v34 = vpop.f32.mrb[12].mxu1 }
 0x112   : > { %809 = vst [vmem:[%s1494_s11 + $0x70] sm:$0xff] %v1273_v32  ;;  %v588_v35 = vpop.f32.mrb[13].mxu0  ;;  %841 = vst [vmem:[%s1494_s11 + $0x170] sm:$0xff] %v1556_v34  ;;  %v1561_v36 = vpop.f32.mrb[13].mxu1  ;;  %v942_v51 = vmul.f32 %v1273_v32, %v1273_v32 }
 0x113   : > { %807 = vst [vmem:[%s1494_s11 + $0x60] sm:$0xff] %v588_v35  ;;  %v870_v37 = vadd.f32 %v869_v33, %v588_v35  ;;  %v940_v38 = vmul.f32 %v588_v35, %v588_v35  ;;  %v1002_v39 = vadd.f32 %v1001_v31, %v939_v30  ;;  %v1274_v40 = vpop.f32.mrb[14].mxu0  ;;  %839 = vst [vmem:[%s1494_s11 + $0x160] sm:$0xff] %v1561_v36  ;;  %v1566_v42 = vpop.f32.mrb[14].mxu1 }
 0x114   : > { %810 = vst [vmem:[%s1494_s11 + $0x78] sm:$0xff] %v1274_v40  ;;  %v591_v44 = vpop.f32.mrb[15].mxu0  ;;  %842 = vst [vmem:[%s1494_s11 + $0x178] sm:$0xff] %v1566_v42  ;;  %v1571_v46 = vpop.f32.mrb[15].mxu1  ;;  %v943_v54 = vmul.f32 %v1274_v40, %v1274_v40 }
 0x115   : > { %v1003_v48 = vadd.f32 %v1002_v39, %v940_v38  ;;  %808 = vst [vmem:[%s1494_s11 + $0x68] sm:$0xff] %v591_v44  ;;  %v871_v49 = vadd.f32 %v870_v37, %v591_v44  ;;  %v941_v50 = vmul.f32 %v591_v44, %v591_v44  ;;  %840 = vst [vmem:[%s1494_s11 + $0x168] sm:$0xff] %v1571_v46 }
 0x117   : > { %v872_v52 = vadd.f32 %v1273_v32, %v871_v49  ;;  %v1004_v53 = vadd.f32 %v1003_v48, %v941_v50 }
 0x119   : > { %v1005_v55 = vadd.f32 %v1004_v53, %v942_v51  ;;  %v1277_v56 = vpop.f32.mrb[16].mxu0  ;;  %v873_v57 = vadd.f32 %v1274_v40, %v872_v52  ;;  %v1576_v59 = vpop.f32.mrb[16].mxu1 }
 0x11a   : > { %813 = vst [vmem:[%s1494_s11 + $0x90] sm:$0xff] %v1277_v56  ;;  %v604_v61 = vpop.f32.mrb[17].mxu0  ;;  %845 = vst [vmem:[%s1494_s11 + $0x190] sm:$0xff] %v1576_v59  ;;  %v1581_v62 = vpop.f32.mrb[17].mxu1  ;;  %v946_v11 = vmul.f32 %v1277_v56, %v1277_v56 }
 0x11b   : > { %811 = vst [vmem:[%s1494_s11 + $0x80] sm:$0xff] %v604_v61  ;;  %v874_v63 = vadd.f32 %v873_v57, %v604_v61  ;;  %v944_v0 = vmul.f32 %v604_v61, %v604_v61  ;;  %v1006_v2 = vadd.f32 %v1005_v55, %v943_v54  ;;  %v1278_v4 = vpop.f32.mrb[18].mxu0  ;;  %843 = vst [vmem:[%s1494_s11 + $0x180] sm:$0xff] %v1581_v62  ;;  %v1586_v5 = vpop.f32.mrb[18].mxu1 }
 0x11c   : > { %814 = vst [vmem:[%s1494_s11 + $0x98] sm:$0xff] %v1278_v4  ;;  %v607_v6 = vpop.f32.mrb[19].mxu0  ;;  %846 = vst [vmem:[%s1494_s11 + $0x198] sm:$0xff] %v1586_v5  ;;  %v1591_v7 = vpop.f32.mrb[19].mxu1  ;;  %v947_v15 = vmul.f32 %v1278_v4, %v1278_v4 }
 0x11d   : > { %v1007_v8 = vadd.f32 %v1006_v2, %v944_v0  ;;  %812 = vst [vmem:[%s1494_s11 + $0x88] sm:$0xff] %v607_v6  ;;  %v875_v9 = vadd.f32 %v874_v63, %v607_v6  ;;  %v945_v10 = vmul.f32 %v607_v6, %v607_v6  ;;  %844 = vst [vmem:[%s1494_s11 + $0x188] sm:$0xff] %v1591_v7 }
 0x11f   : > { %v876_v12 = vadd.f32 %v1277_v56, %v875_v9  ;;  %v1008_v13 = vadd.f32 %v1007_v8, %v945_v10 }
 0x121   : > { %v1009_v17 = vadd.f32 %v1008_v13, %v946_v11  ;;  %v1281_v18 = vpop.f32.mrb[20].mxu0  ;;  %v877_v19 = vadd.f32 %v1278_v4, %v876_v12  ;;  %v1596_v20 = vpop.f32.mrb[20].mxu1 }
 0x122   : > { %817 = vst [vmem:[%s1494_s11 + $0xb0] sm:$0xff] %v1281_v18  ;;  %v620_v22 = vpop.f32.mrb[21].mxu0  ;;  %849 = vst [vmem:[%s1494_s11 + $0x1b0] sm:$0xff] %v1596_v20  ;;  %v1601_v24 = vpop.f32.mrb[21].mxu1  ;;  %v950_v37 = vmul.f32 %v1281_v18, %v1281_v18 }
 0x123   : > { %815 = vst [vmem:[%s1494_s11 + $0xa0] sm:$0xff] %v620_v22  ;;  %v878_v25 = vadd.f32 %v877_v19, %v620_v22  ;;  %v948_v26 = vmul.f32 %v620_v22, %v620_v22  ;;  %v1010_v27 = vadd.f32 %v1009_v17, %v947_v15  ;;  %v1282_v28 = vpop.f32.mrb[22].mxu0  ;;  %847 = vst [vmem:[%s1494_s11 + $0x1a0] sm:$0xff] %v1601_v24  ;;  %v1606_v29 = vpop.f32.mrb[22].mxu1 }
 0x124   : > { %818 = vst [vmem:[%s1494_s11 + $0xb8] sm:$0xff] %v1282_v28  ;;  %v623_v30 = vpop.f32.mrb[23].mxu0  ;;  %850 = vst [vmem:[%s1494_s11 + $0x1b8] sm:$0xff] %v1606_v29  ;;  %v1611_v31 = vpop.f32.mrb[23].mxu1  ;;  %v951_v40 = vmul.f32 %v1282_v28, %v1282_v28 }
 0x125   : > { %v1011_v32 = vadd.f32 %v1010_v27, %v948_v26  ;;  %816 = vst [vmem:[%s1494_s11 + $0xa8] sm:$0xff] %v623_v30  ;;  %v879_v33 = vadd.f32 %v878_v25, %v623_v30  ;;  %v949_v35 = vmul.f32 %v623_v30, %v623_v30  ;;  %848 = vst [vmem:[%s1494_s11 + $0x1a8] sm:$0xff] %v1611_v31 }
 0x127   : > { %v880_v38 = vadd.f32 %v1281_v18, %v879_v33  ;;  %v1012_v39 = vadd.f32 %v1011_v32, %v949_v35 }
 0x129   : > { %v1013_v44 = vadd.f32 %v1012_v39, %v950_v37  ;;  %v1285_v48 = vpop.f32.mrb[24].mxu0  ;;  %v881_v49 = vadd.f32 %v1282_v28, %v880_v38  ;;  %v1616_v50 = vpop.f32.mrb[24].mxu1 }
 0x12a   : > { %821 = vst [vmem:[%s1494_s11 + $0xd0] sm:$0xff] %v1285_v48  ;;  %v636_v51 = vpop.f32.mrb[25].mxu0  ;;  %853 = vst [vmem:[%s1494_s11 + $0x1d0] sm:$0xff] %v1616_v50  ;;  %v1621_v52 = vpop.f32.mrb[25].mxu1  ;;  %v954_v6 = vmul.f32 %v1285_v48, %v1285_v48 }
 0x12b   : > { %819 = vst [vmem:[%s1494_s11 + $0xc0] sm:$0xff] %v636_v51  ;;  %v882_v53 = vadd.f32 %v881_v49, %v636_v51  ;;  %v952_v54 = vmul.f32 %v636_v51, %v636_v51  ;;  %v1014_v55 = vadd.f32 %v1013_v44, %v951_v40  ;;  %v1286_v56 = vpop.f32.mrb[26].mxu0  ;;  %851 = vst [vmem:[%s1494_s11 + $0x1c0] sm:$0xff] %v1621_v52  ;;  %v1626_v57 = vpop.f32.mrb[26].mxu1 }
 0x12c   : > { %822 = vst [vmem:[%s1494_s11 + $0xd8] sm:$0xff] %v1286_v56  ;;  %v639_v61 = vpop.f32.mrb[27].mxu0  ;;  %854 = vst [vmem:[%s1494_s11 + $0x1d8] sm:$0xff] %v1626_v57  ;;  %v1631_v63 = vpop.f32.mrb[27].mxu1  ;;  %v955_v10 = vmul.f32 %v1286_v56, %v1286_v56  ;;  %v960_v49 = vmul.f32 %v1501_v43, %v1501_v43 }
 0x12d   : > { %v1015_v0 = vadd.f32 %v1014_v55, %v952_v54  ;;  %820 = vst [vmem:[%s1494_s11 + $0xc8] sm:$0xff] %v639_v61  ;;  %v883_v2 = vadd.f32 %v882_v53, %v639_v61  ;;  %v953_v4 = vmul.f32 %v639_v61, %v639_v61  ;;  %852 = vst [vmem:[%s1494_s11 + $0x1c8] sm:$0xff] %v1631_v63 }
 0x12e   : > { %v962_v61 = vmul.f32 %v1496_v41, %v1496_v41 }
 0x12f   : > { %v884_v8 = vadd.f32 %v1285_v48, %v883_v2  ;;  %v1016_v9 = vadd.f32 %v1015_v0, %v953_v4  ;;  %v963_v4 = vmul.f32 %v1506_v45, %v1506_v45 }
 0x131   : > { %v1017_v11 = vadd.f32 %v1016_v9, %v954_v6  ;;  %v1289_v12 = vpop.f32.mrb[28].mxu0  ;;  %v885_v13 = vadd.f32 %v1286_v56, %v884_v8  ;;  %v1636_v15 = vpop.f32.mrb[28].mxu1  ;;  %v961_v56 = vmul.f32 %v1511_v47, %v1511_v47 }
 0x132   : > { %825 = vst [vmem:[%s1494_s11 + $0xf0] sm:$0xff] %v1289_v12  ;;  %v652_v17 = vpop.f32.mrb[29].mxu0  ;;  %857 = vst [vmem:[%s1494_s11 + $0x1f0] sm:$0xff] %v1636_v15  ;;  %v1641_v18 = vpop.f32.mrb[29].mxu1  ;;  %v958_v37 = vmul.f32 %v1289_v12, %v1289_v12 }
 0x133   : > { %823 = vst [vmem:[%s1494_s11 + $0xe0] sm:$0xff] %v652_v17  ;;  %v886_v19 = vadd.f32 %v885_v13, %v652_v17  ;;  %v956_v22 = vmul.f32 %v652_v17, %v652_v17  ;;  %v1018_v25 = vadd.f32 %v1017_v11, %v955_v10  ;;  %v1290_v26 = vpop.f32.mrb[30].mxu0  ;;  %855 = vst [vmem:[%s1494_s11 + $0x1e0] sm:$0xff] %v1641_v18  ;;  %v1646_v27 = vpop.f32.mrb[30].mxu1 }
 0x134   : > { %826 = vst [vmem:[%s1494_s11 + $0xf8] sm:$0xff] %v1290_v26  ;;  %v655_v28 = vpop.f32.mrb[31].mxu0  ;;  %858 = vst [vmem:[%s1494_s11 + $0x1f8] sm:$0xff] %v1646_v27  ;;  %v1651_v30 = vpop.f32.mrb[31].mxu1  ;;  %v959_v40 = vmul.f32 %v1290_v26, %v1290_v26 }
 0x135   : > { %v1019_v32 = vadd.f32 %v1018_v25, %v956_v22  ;;  %824 = vst [vmem:[%s1494_s11 + $0xe8] sm:$0xff] %v655_v28  ;;  %v887_v33 = vadd.f32 %v886_v19, %v655_v28  ;;  %v957_v35 = vmul.f32 %v655_v28, %v655_v28  ;;  %856 = vst [vmem:[%s1494_s11 + $0x1e8] sm:$0xff] %v1651_v30 }
 0x137   : > { %v888_v38 = vadd.f32 %v1289_v12, %v887_v33  ;;  %v1020_v39 = vadd.f32 %v1019_v32, %v957_v35  ;;  %v965_v12 = vmul.f32 %v1531_v3, %v1531_v3  ;;  %v969_v32 = vmul.f32 %v1551_v23, %v1551_v23 }
 0x139   : > { %v1021_v44 = vadd.f32 %v1020_v39, %v958_v37  ;;  %v889_v48 = vadd.f32 %v1290_v26, %v888_v38 }
 0x13b   : > { %v890_v51 = vadd.f32 %v889_v48, %v1501_v43  ;;  %v1022_v53 = vadd.f32 %v1021_v44, %v959_v40  ;;  %v964_v43 = vmul.f32 %v1521_v60, %v1521_v60  ;;  %v973_v48 = vmul.f32 %v1571_v46, %v1571_v46 }
 0x13d   : > { %v1023_v54 = vadd.f32 %v1022_v53, %v960_v49  ;;  %v891_v55 = vadd.f32 %v890_v51, %v1511_v47 }
 0x13f   : > { %v892_v0 = vadd.f32 %v1496_v41, %v891_v55  ;;  %v1024_v2 = vadd.f32 %v1023_v54, %v961_v56  ;;  %v966_v41 = vmul.f32 %v1516_v58, %v1516_v58 }
 0x141   : > { %v1025_v6 = vadd.f32 %v1024_v2, %v962_v61  ;;  %v893_v8 = vadd.f32 %v1506_v45, %v892_v0  ;;  %v967_v45 = vmul.f32 %v1526_v1, %v1526_v1  ;;  %v977_v0 = vmul.f32 %v1591_v7, %v1591_v7 }
 0x143   : > { %v894_v9 = vadd.f32 %v893_v8, %v1521_v60  ;;  %v1026_v10 = vadd.f32 %v1025_v6, %v963_v4  ;;  %v968_v60 = vmul.f32 %v1541_v16, %v1541_v16 }
 0x145   : > { %v1027_v11 = vadd.f32 %v1026_v10, %v964_v43  ;;  %v895_v47 = vadd.f32 %v894_v9, %v1531_v3 }
 0x147   : > { %v896_v13 = vadd.f32 %v1516_v58, %v895_v47  ;;  %v1028_v17 = vadd.f32 %v1027_v11, %v965_v12  ;;  %v970_v58 = vmul.f32 %v1536_v14, %v1536_v14  ;;  %v981_v11 = vmul.f32 %v1611_v31, %v1611_v31 }
 0x149   : > { %v1029_v19 = vadd.f32 %v1028_v17, %v966_v41  ;;  %v897_v22 = vadd.f32 %v1526_v1, %v896_v13  ;;  %v971_v1 = vmul.f32 %v1546_v21, %v1546_v21 }
 0x14b   : > { %v898_v25 = vadd.f32 %v897_v22, %v1541_v16  ;;  %v1030_v26 = vadd.f32 %v1029_v19, %v967_v45  ;;  %v972_v16 = vmul.f32 %v1561_v36, %v1561_v36  ;;  %v985_v22 = vmul.f32 %v1631_v63, %v1631_v63 }
 0x14d   : > { %v1031_v28 = vadd.f32 %v1030_v26, %v968_v60  ;;  %v899_v3 = vadd.f32 %v898_v25, %v1551_v23 }
 0x14f   : > { %v900_v33 = vadd.f32 %v1536_v14, %v899_v3  ;;  %v1032_v35 = vadd.f32 %v1031_v28, %v969_v32  ;;  %v974_v14 = vmul.f32 %v1556_v34, %v1556_v34  ;;  %v988_v28 = vmul.f32 %v1641_v18, %v1641_v18 }
 0x151   : > { %v1033_v37 = vadd.f32 %v1032_v35, %v970_v58  ;;  %v901_v38 = vadd.f32 %v1546_v21, %v900_v33  ;;  %v975_v21 = vmul.f32 %v1566_v42, %v1566_v42  ;;  %v990_v33 = vmul.f32 %v1636_v15, %v1636_v15 }
 0x153   : > { %v902_v39 = vadd.f32 %v901_v38, %v1561_v36  ;;  %v1034_v40 = vadd.f32 %v1033_v37, %v971_v1  ;;  %v976_v36 = vmul.f32 %v1581_v62, %v1581_v62 }
 0x155   : > { %v1035_v44 = vadd.f32 %v1034_v40, %v972_v16  ;;  %v903_v23 = vadd.f32 %v902_v39, %v1571_v46 }
 0x157   : > { %v904_v49 = vadd.f32 %v1556_v34, %v903_v23  ;;  %v1036_v51 = vadd.f32 %v1035_v44, %v973_v48  ;;  %v978_v34 = vmul.f32 %v1576_v59, %v1576_v59 }
 0x159   : > { %v1037_v53 = vadd.f32 %v1036_v51, %v974_v14  ;;  %v905_v54 = vadd.f32 %v1566_v42, %v904_v49  ;;  %v979_v42 = vmul.f32 %v1586_v5, %v1586_v5 }
 0x15b   : > { %v906_v55 = vadd.f32 %v905_v54, %v1581_v62  ;;  %v1038_v56 = vadd.f32 %v1037_v53, %v975_v21  ;;  %v980_v62 = vmul.f32 %v1601_v24, %v1601_v24 }
 0x15d   : > { %v1039_v61 = vadd.f32 %v1038_v56, %v976_v36  ;;  %v907_v46 = vadd.f32 %v906_v55, %v1591_v7 }
 0x15f   : > { %v908_v2 = vadd.f32 %v1576_v59, %v907_v46  ;;  %v1040_v4 = vadd.f32 %v1039_v61, %v977_v0  ;;  %v982_v59 = vmul.f32 %v1596_v20, %v1596_v20 }
 0x161   : > { %v1041_v6 = vadd.f32 %v1040_v4, %v978_v34  ;;  %v909_v8 = vadd.f32 %v1586_v5, %v908_v2  ;;  %v983_v5 = vmul.f32 %v1606_v29, %v1606_v29 }
 0x163   : > { %v910_v43 = vadd.f32 %v909_v8, %v1601_v24  ;;  %v1042_v9 = vadd.f32 %v1041_v6, %v979_v42  ;;  %v984_v24 = vmul.f32 %v1621_v52, %v1621_v52 }
 0x165   : > { %v1043_v10 = vadd.f32 %v1042_v9, %v980_v62  ;;  %v911_v7 = vadd.f32 %v910_v43, %v1611_v31 }
 0x167   : > { %v912_v47 = vadd.f32 %v1596_v20, %v911_v7  ;;  %v1044_v12 = vadd.f32 %v1043_v10, %v981_v11  ;;  %v986_v20 = vmul.f32 %v1616_v50, %v1616_v50 }
 0x169   : > { %v1045_v41 = vadd.f32 %v1044_v12, %v982_v59  ;;  %v913_v13 = vadd.f32 %v1606_v29, %v912_v47  ;;  %v987_v29 = vmul.f32 %v1626_v57, %v1626_v57 }
 0x16b   : > { %v914_v17 = vadd.f32 %v913_v13, %v1621_v52  ;;  %v1046_v45 = vadd.f32 %v1045_v41, %v983_v5 }
 0x16d   : > { %v1047_v19 = vadd.f32 %v1046_v45, %v984_v24  ;;  %v915_v31 = vadd.f32 %v914_v17, %v1631_v63 }
 0x16f   : > { %v916_v60 = vadd.f32 %v1616_v50, %v915_v31  ;;  %v1048_v25 = vadd.f32 %v1047_v19, %v985_v22  ;;  %v989_v50 = vmul.f32 %v1651_v30, %v1651_v30 }
 0x171   : > { %v1049_v26 = vadd.f32 %v1048_v25, %v986_v20  ;;  %v917_v52 = vadd.f32 %v1626_v57, %v916_v60  ;;  %v991_v57 = vmul.f32 %v1646_v27, %v1646_v27 }
 0x173   : > { %v918_v3 = vadd.f32 %v917_v52, %v1641_v18  ;;  %v1050_v32 = vadd.f32 %v1049_v26, %v987_v29 }
 0x175   : > { %v1051_v63 = vadd.f32 %v1050_v32, %v988_v28  ;;  %v919_v58 = vadd.f32 %v918_v3, %v1651_v30 }
 0x177   : > { %v920_v35 = vadd.f32 %v1636_v15, %v919_v58  ;;  %v1052_v1 = vadd.f32 %v1051_v63, %v989_v50 }
 0x179   : > { %v921_v37 = vadd.f32 %v1646_v27, %v920_v35  ;;  %v1053_v18 = vadd.f32 %v1052_v1, %v990_v33 }
 0x17b   : > { %v922_v38 = vrot.slane %v921_v37, 4  ;;  %v1054_v16 = vadd.f32 %v1053_v18, %v991_v57 }
 0x17d   : > { %v923_v39 = vadd.f32 %v922_v38, %v921_v37  ;;  %v1055_v40 = vrot.slane %v1054_v16, 4 }
 0x17f   : > { %v924_v44 = vrot.slane %v923_v39, 2  ;;  %v1056_v23 = vadd.f32 %v1055_v40, %v1054_v16 }
 0x181   : > { %v925_v30 = vadd.f32 %v924_v44, %v923_v39  ;;  %v1057_v48 = vrot.slane %v1056_v23, 2 }
 0x183   : > { %v926_v14 = vrot.slane %v925_v30, 1  ;;  %v1058_v49 = vadd.f32 %v1057_v48, %v1056_v23 }
 0x185   : > { %v1059_v15 = vrot.slane %v1058_v49, 1  ;;  %v927_v27 = vadd.f32 %v926_v14, %v925_v30 }
 0x187   : > { %v1060_v51 = vadd.f32 %v1059_v15, %v1058_v49 }
 0x189   : > { %v1062_v21 = vsel %vm1061_vm0, %v927_v27, %v1060_v51 }
 0x18a   : > { %1063 = vst [vmem:[%s184_s17] sm:$0x3] %v1062_v21 }
 0x18b PF: > { %s14_s12 = sadd.s32 1, %s1393_s12  }
 0x18c   : > { %p11_p5 = scmp.ge.s32.totalorder %s14_s12, 6  }
 0x18e   :  { %13 = sbr.rel (!%p11_p5) target bundleno = 1 (0x1), region = 70 }

// kernel: snn_dwconv_forward.9
= control target key start
LH: loop header
LB: loop body
LE: loop exit
PB: predicated region body
PF: predicated region fallthrough
CT: control target
= control target key end

     0   :  { %s805_s12 = smov 0   ;;  %s1348_s0 = inlined_call_operand.vmem [shape: f32[2048,128], index: 0, kind: input, shape index: {}]   ;;  %s1349_s1 = inlined_call_operand.vmem [shape: f32[1,128], index: 1, kind: input, shape index: {}]   ;;  %s1350_s2 = inlined_call_operand.vmem [shape: f32[1,128], index: 2, kind: input, shape index: {}]   ;;  %s1351_s3 = inlined_call_operand.vmem [shape: f32[2048,128], index: 3, kind: output, shape index: {}]  }
   0x1 LB: > { %s756_s13 = sadd.s32 4294967295, %s783_s12   ;;  %p760_p0 = scmp.ge.s32.totalorder %s783_s12, 1  ;;  %s783_s12 = sphi %s805_s12, %s13_s12  }
   0x2   : > { %p138_p1 = scmp.lt.s32.totalorder %s783_s12, 3 }
   0x4   : > { %p139_p2 = pnand %p760_p0, %p138_p1 }
   0x5   : > { %s761_s14 = sshll.u32 (!%p139_p2), %s756_s13, 7  ;;  %v816_v0 = vld [vmem:[%s1349_s1] ss:$0 sm:$0xff] (!%p139_p2) }
   0x6   : > { %142 = sbr.rel (%p139_p2) target bundleno = 97 (0x61), region = 32  ;;  %p163_p3 = scmp.lt.s32.totalorder (!%p139_p2), %s761_s14, 255  ;;  %v826_v1 = vld [vmem:[%s1350_s2] ss:$0 sm:$0xff] (!%p139_p2) }
   0xd   : > { %s1353_s14 = smov (!%p163_p3, %s761_s14), 255 }
   0xe   : > { %s762_s15 = sshll.u32 %s1353_s14, 3 }
   0xf   : > { %s821_s20 = scalar_lea.vmem %s1348_s0, %s762_s15  ;;  %s840_s25 = scalar_lea.vmem %s1351_s3, %s762_s15 }
  0x10   : > { %v174_v2 = vld [vmem:[%s821_s20] sm:$0xff]  ;;  %v175_v3 = vld [vmem:[%s821_s20 + $0x8] sm:$0xff]  ;;  %v176_v4 = vld [vmem:[%s821_s20 + $0x10] sm:$0xff] }
  0x11   : > { %v309_v5 = vmul.f32 %v816_v0, %v174_v2  ;;  %v310_v6 = vmul.f32 %v816_v0, %v175_v3  ;;  %v311_v7 = vmul.f32 %v816_v0, %v176_v4  ;;  %v177_v8 = vld [vmem:[%s821_s20 + $0x18] sm:$0xff]  ;;  %v178_v9 = vld [vmem:[%s821_s20 + $0x20] sm:$0xff]  ;;  %v179_v10 = vld [vmem:[%s821_s20 + $0x28] sm:$0xff] }
  0x12   : > { %v312_v11 = vmul.f32 %v816_v0, %v177_v8  ;;  %v313_v12 = vmul.f32 %v816_v0, %v178_v9  ;;  %v314_v13 = vmul.f32 %v816_v0, %v179_v10  ;;  %v180_v14 = vld [vmem:[%s821_s20 + $0x30] sm:$0xff]  ;;  %v181_v15 = vld [vmem:[%s821_s20 + $0x38] sm:$0xff]  ;;  %v182_v16 = vld [vmem:[%s821_s20 + $0x40] sm:$0xff] }
  0x13   : > { %v444_v17 = vadd.f32 %v826_v1, %v309_v5  ;;  %v445_v18 = vadd.f32 %v826_v1, %v310_v6  ;;  %v446_v19 = vadd.f32 %v826_v1, %v311_v7  ;;  %v315_v20 = vmul.f32 %v816_v0, %v180_v14  ;;  %v183_v21 = vld [vmem:[%s821_s20 + $0x48] sm:$0xff]  ;;  %v184_v22 = vld [vmem:[%s821_s20 + $0x50] sm:$0xff]  ;;  %v185_v23 = vld [vmem:[%s821_s20 + $0x58] sm:$0xff] }
  0x14   : > { %v447_v24 = vadd.f32 %v826_v1, %v312_v11  ;;  %v448_v25 = vadd.f32 %v826_v1, %v313_v12  ;;  %v449_v26 = vadd.f32 %v826_v1, %v314_v13  ;;  %v316_v27 = vmul.f32 %v816_v0, %v181_v15  ;;  %v186_v28 = vld [vmem:[%s821_s20 + $0x60] sm:$0xff]  ;;  %v187_v29 = vld [vmem:[%s821_s20 + $0x68] sm:$0xff]  ;;  %v188_v30 = vld [vmem:[%s821_s20 + $0x70] sm:$0xff] }
  0x15   : > { %572 = vst [vmem:[%s840_s25] sm:$0xff] %v444_v17  ;;  %573 = vst [vmem:[%s840_s25 + $0x8] sm:$0xff] %v445_v18  ;;  %v450_v31 = vadd.f32 %v826_v1, %v315_v20  ;;  %v317_v32 = vmul.f32 %v816_v0, %v182_v16  ;;  %v318_v33 = vmul.f32 %v816_v0, %v183_v21  ;;  %v189_v35 = vld [vmem:[%s821_s20 + $0x78] sm:$0xff]  ;;  %v190_v40 = vld [vmem:[%s821_s20 + $0x80] sm:$0xff] }
  0x16   : > { %574 = vst [vmem:[%s840_s25 + $0x10] sm:$0xff] %v446_v19  ;;  %v319_v34 = vmul.f32 %v816_v0, %v184_v22  ;;  %575 = vst [vmem:[%s840_s25 + $0x18] sm:$0xff] %v447_v24  ;;  %v451_v36 = vadd.f32 %v826_v1, %v316_v27  ;;  %v320_v37 = vmul.f32 %v816_v0, %v185_v23  ;;  %v191_v41 = vld [vmem:[%s821_s20 + $0x88] sm:$0xff]  ;;  %v192_v42 = vld [vmem:[%s821_s20 + $0x90] sm:$0xff] }
  0x17   : > { %576 = vst [vmem:[%s840_s25 + $0x20] sm:$0xff] %v448_v25  ;;  %577 = vst [vmem:[%s840_s25 + $0x28] sm:$0xff] %v449_v26  ;;  %v321_v38 = vmul.f32 %v816_v0, %v186_v28  ;;  %v322_v39 = vmul.f32 %v816_v0, %v187_v29  ;;  %v452_v43 = vadd.f32 %v826_v1, %v317_v32  ;;  %v193_v47 = vld [vmem:[%s821_s20 + $0x98] sm:$0xff]  ;;  %v194_v48 = vld [vmem:[%s821_s20 + $0xa0] sm:$0xff] }
  0x18   : > { %578 = vst [vmem:[%s840_s25 + $0x30] sm:$0xff] %v450_v31  ;;  %v453_v44 = vadd.f32 %v826_v1, %v318_v33  ;;  %v454_v45 = vadd.f32 %v826_v1, %v319_v34  ;;  %v323_v46 = vmul.f32 %v816_v0, %v188_v30  ;;  %v195_v49 = vld [vmem:[%s821_s20 + $0xa8] sm:$0xff]  ;;  %579 = vst [vmem:[%s840_s25 + $0x38] sm:$0xff] %v451_v36  ;;  %v196_v54 = vld [vmem:[%s821_s20 + $0xb0] sm:$0xff] }
  0x19   : > { %v455_v50 = vadd.f32 %v826_v1, %v320_v37  ;;  %v456_v51 = vadd.f32 %v826_v1, %v321_v38  ;;  %v457_v52 = vadd.f32 %v826_v1, %v322_v39  ;;  %v324_v53 = vmul.f32 %v816_v0, %v189_v35  ;;  %580 = vst [vmem:[%s840_s25 + $0x40] sm:$0xff] %v452_v43  ;;  %v197_v59 = vld [vmem:[%s821_s20 + $0xb8] sm:$0xff]  ;;  %v198_v2 = vld [vmem:[%s821_s20 + $0xc0] sm:$0xff]  ;;  %v199_v3 = vld [vmem:[%s821_s20 + $0xc8] sm:$0xff] }
  0x1a   : > { %581 = vst [vmem:[%s840_s25 + $0x48] sm:$0xff] %v453_v44  ;;  %582 = vst [vmem:[%s840_s25 + $0x50] sm:$0xff] %v454_v45  ;;  %v458_v55 = vadd.f32 %v826_v1, %v323_v46  ;;  %v325_v56 = vmul.f32 %v816_v0, %v190_v40  ;;  %v326_v57 = vmul.f32 %v816_v0, %v191_v41  ;;  %v200_v4 = vld [vmem:[%s821_s20 + $0xd0] sm:$0xff]  ;;  %v201_v9 = vld [vmem:[%s821_s20 + $0xd8] sm:$0xff] }
  0x1b   : > { %v327_v58 = vmul.f32 %v816_v0, %v192_v42  ;;  %583 = vst [vmem:[%s840_s25 + $0x58] sm:$0xff] %v455_v50  ;;  %584 = vst [vmem:[%s840_s25 + $0x60] sm:$0xff] %v456_v51  ;;  %v459_v60 = vadd.f32 %v826_v1, %v324_v53  ;;  %v328_v61 = vmul.f32 %v816_v0, %v193_v47  ;;  %v202_v10 = vld [vmem:[%s821_s20 + $0xe0] sm:$0xff]  ;;  %v203_v11 = vld [vmem:[%s821_s20 + $0xe8] sm:$0xff] }
  0x1c   : > { %585 = vst [vmem:[%s840_s25 + $0x68] sm:$0xff] %v457_v52  ;;  %v329_v62 = vmul.f32 %v816_v0, %v194_v48  ;;  %v330_v63 = vmul.f32 %v816_v0, %v195_v49  ;;  %586 = vst [vmem:[%s840_s25 + $0x70] sm:$0xff] %v458_v55  ;;  %v460_v5 = vadd.f32 %v826_v1, %v325_v56  ;;  %v204_v16 = vld [vmem:[%s821_s20 + $0xf0] sm:$0xff]  ;;  %v205_v21 = vld [vmem:[%s821_s20 + $0xf8] sm:$0xff] }
  0x1d   : > { %v461_v6 = vadd.f32 %v826_v1, %v326_v57  ;;  %v462_v7 = vadd.f32 %v826_v1, %v327_v58  ;;  %v331_v8 = vmul.f32 %v816_v0, %v196_v54  ;;  %587 = vst [vmem:[%s840_s25 + $0x78] sm:$0xff] %v459_v60  ;;  %v463_v12 = vadd.f32 %v826_v1, %v328_v61  ;;  %v206_v26 = vld [vmem:[%s821_s20 + $0x100] sm:$0xff]  ;;  %v207_v27 = vld [vmem:[%s821_s20 + $0x108] sm:$0xff]  ;;  %v208_v28 = vld [vmem:[%s821_s20 + $0x110] sm:$0xff] }
  0x1e   : > { %v464_v13 = vadd.f32 %v826_v1, %v329_v62  ;;  %v465_v14 = vadd.f32 %v826_v1, %v330_v63  ;;  %v332_v15 = vmul.f32 %v816_v0, %v197_v59  ;;  %588 = vst [vmem:[%s840_s25 + $0x80] sm:$0xff] %v460_v5  ;;  %v333_v18 = vmul.f32 %v816_v0, %v198_v2  ;;  %v209_v33 = vld [vmem:[%s821_s20 + $0x118] sm:$0xff]  ;;  %v210_v34 = vld [vmem:[%s821_s20 + $0x120] sm:$0xff]  ;;  %v211_v35 = vld [vmem:[%s821_s20 + $0x128] sm:$0xff] }
  0x1f   : > { %589 = vst [vmem:[%s840_s25 + $0x88] sm:$0xff] %v461_v6  ;;  %590 = vst [vmem:[%s840_s25 + $0x90] sm:$0xff] %v462_v7  ;;  %v466_v17 = vadd.f32 %v826_v1, %v331_v8  ;;  %v334_v19 = vmul.f32 %v816_v0, %v199_v3  ;;  %v335_v20 = vmul.f32 %v816_v0, %v200_v4  ;;  %v212_v40 = vld [vmem:[%s821_s20 + $0x130] sm:$0xff]  ;;  %v213_v45 = vld [vmem:[%s821_s20 + $0x138] sm:$0xff] }
  0x20   : > { %591 = vst [vmem:[%s840_s25 + $0x98] sm:$0xff] %v463_v12  ;;  %592 = vst [vmem:[%s840_s25 + $0xa0] sm:$0xff] %v464_v13  ;;  %v467_v22 = vadd.f32 %v826_v1, %v332_v15  ;;  %v336_v23 = vmul.f32 %v816_v0, %v201_v9  ;;  %v337_v24 = vmul.f32 %v816_v0, %v202_v10  ;;  %v214_v50 = vld [vmem:[%s821_s20 + $0x140] sm:$0xff]  ;;  %v215_v51 = vld [vmem:[%s821_s20 + $0x148] sm:$0xff] }
  0x21   : > { %593 = vst [vmem:[%s840_s25 + $0xa8] sm:$0xff] %v465_v14  ;;  %v338_v25 = vmul.f32 %v816_v0, %v203_v11  ;;  %594 = vst [vmem:[%s840_s25 + $0xb0] sm:$0xff] %v466_v17  ;;  %v468_v29 = vadd.f32 %v826_v1, %v333_v18  ;;  %v469_v30 = vadd.f32 %v826_v1, %v334_v19  ;;  %v216_v52 = vld [vmem:[%s821_s20 + $0x150] sm:$0xff]  ;;  %v217_v57 = vld [vmem:[%s821_s20 + $0x158] sm:$0xff] }
  0x22   : > { %v470_v31 = vadd.f32 %v826_v1, %v335_v20  ;;  %v339_v32 = vmul.f32 %v816_v0, %v204_v16  ;;  %595 = vst [vmem:[%s840_s25 + $0xb8] sm:$0xff] %v467_v22  ;;  %v471_v36 = vadd.f32 %v826_v1, %v336_v23  ;;  %v472_v37 = vadd.f32 %v826_v1, %v337_v24  ;;  %v218_v58 = vld [vmem:[%s821_s20 + $0x160] sm:$0xff]  ;;  %v219_v59 = vld [vmem:[%s821_s20 + $0x168] sm:$0xff]  ;;  %v220_v2 = vld [vmem:[%s821_s20 + $0x170] sm:$0xff] }
  0x23   : > { %v473_v38 = vadd.f32 %v826_v1, %v338_v25  ;;  %v340_v39 = vmul.f32 %v816_v0, %v205_v21  ;;  %596 = vst [vmem:[%s840_s25 + $0xc0] sm:$0xff] %v468_v29  ;;  %597 = vst [vmem:[%s840_s25 + $0xc8] sm:$0xff] %v469_v30  ;;  %v341_v42 = vmul.f32 %v816_v0, %v206_v26  ;;  %v221_v7 = vld [vmem:[%s821_s20 + $0x178] sm:$0xff]  ;;  %v222_v12 = vld [vmem:[%s821_s20 + $0x180] sm:$0xff] }
  0x24   : > { %598 = vst [vmem:[%s840_s25 + $0xd0] sm:$0xff] %v470_v31  ;;  %v474_v41 = vadd.f32 %v826_v1, %v339_v32  ;;  %v342_v43 = vmul.f32 %v816_v0, %v207_v27  ;;  %v343_v44 = vmul.f32 %v816_v0, %v208_v28  ;;  %599 = vst [vmem:[%s840_s25 + $0xd8] sm:$0xff] %v471_v36  ;;  %v223_v13 = vld [vmem:[%s821_s20 + $0x188] sm:$0xff]  ;;  %v224_v14 = vld [vmem:[%s821_s20 + $0x190] sm:$0xff] }
  0x25   : > { %600 = vst [vmem:[%s840_s25 + $0xe0] sm:$0xff] %v472_v37  ;;  %601 = vst [vmem:[%s840_s25 + $0xe8] sm:$0xff] %v473_v38  ;;  %v475_v46 = vadd.f32 %v826_v1, %v340_v39  ;;  %v344_v47 = vmul.f32 %v816_v0, %v209_v33  ;;  %v345_v48 = vmul.f32 %v816_v0, %v210_v34  ;;  %v225_v19 = vld [vmem:[%s821_s20 + $0x198] sm:$0xff]  ;;  %v226_v20 = vld [vmem:[%s821_s20 + $0x1a0] sm:$0xff] }
  0x26   : > { %v346_v49 = vmul.f32 %v816_v0, %v211_v35  ;;  %602 = vst [vmem:[%s840_s25 + $0xf0] sm:$0xff] %v474_v41  ;;  %v476_v53 = vadd.f32 %v826_v1, %v341_v42  ;;  %v477_v54 = vadd.f32 %v826_v1, %v342_v43  ;;  %v478_v55 = vadd.f32 %v826_v1, %v343_v44  ;;  %v227_v21 = vld [vmem:[%s821_s20 + $0x1a8] sm:$0xff]  ;;  %v228_v26 = vld [vmem:[%s821_s20 + $0x1b0] sm:$0xff]  ;;  %v229_v31 = vld [vmem:[%s821_s20 + $0x1b8] sm:$0xff] }
  0x27   : > { %v347_v56 = vmul.f32 %v816_v0, %v212_v40  ;;  %603 = vst [vmem:[%s840_s25 + $0xf8] sm:$0xff] %v475_v46  ;;  %v479_v60 = vadd.f32 %v826_v1, %v344_v47  ;;  %v480_v61 = vadd.f32 %v826_v1, %v345_v48  ;;  %v348_v63 = vmul.f32 %v816_v0, %v213_v45  ;;  %v230_v36 = vld [vmem:[%s821_s20 + $0x1c0] sm:$0xff]  ;;  %v231_v37 = vld [vmem:[%s821_s20 + $0x1c8] sm:$0xff]  ;;  %v232_v38 = vld [vmem:[%s821_s20 + $0x1d0] sm:$0xff] }
  0x28   : > { %v481_v62 = vadd.f32 %v826_v1, %v346_v49  ;;  %604 = vst [vmem:[%s840_s25 + $0x100] sm:$0xff] %v476_v53  ;;  %605 = vst [vmem:[%s840_s25 + $0x108] sm:$0xff] %v477_v54  ;;  %v349_v4 = vmul.f32 %v816_v0, %v214_v50  ;;  %v350_v5 = vmul.f32 %v816_v0, %v215_v51  ;;  %v233_v43 = vld [vmem:[%s821_s20 + $0x1d8] sm:$0xff]  ;;  %v234_v44 = vld [vmem:[%s821_s20 + $0x1e0] sm:$0xff] }
  0x29   : > { %606 = vst [vmem:[%s840_s25 + $0x110] sm:$0xff] %v478_v55  ;;  %v482_v3 = vadd.f32 %v826_v1, %v347_v56  ;;  %v351_v6 = vmul.f32 %v816_v0, %v216_v52  ;;  %607 = vst [vmem:[%s840_s25 + $0x118] sm:$0xff] %v479_v60  ;;  %v483_v8 = vadd.f32 %v826_v1, %v348_v63  ;;  %v235_v45 = vld [vmem:[%s821_s20 + $0x1e8] sm:$0xff]  ;;  %v236_v50 = vld [vmem:[%s821_s20 + $0x1f0] sm:$0xff] }
  0x2a   : > { %608 = vst [vmem:[%s840_s25 + $0x120] sm:$0xff] %v480_v61  ;;  %609 = vst [vmem:[%s840_s25 + $0x128] sm:$0xff] %v481_v62  ;;  %v352_v9 = vmul.f32 %v816_v0, %v217_v57  ;;  %v353_v10 = vmul.f32 %v816_v0, %v218_v58  ;;  %v354_v11 = vmul.f32 %v816_v0, %v219_v59  ;;  %v237_v55 = vld [vmem:[%s821_s20 + $0x1f8] sm:$0xff]  ;;  %v238_v60 = vld [vmem:[%s821_s20 + $0x200] sm:$0xff] }
  0x2b   : > { %610 = vst [vmem:[%s840_s25 + $0x130] sm:$0xff] %v482_v3  ;;  %v484_v15 = vadd.f32 %v826_v1, %v349_v4  ;;  %v485_v16 = vadd.f32 %v826_v1, %v350_v5  ;;  %v486_v17 = vadd.f32 %v826_v1, %v351_v6  ;;  %v355_v18 = vmul.f32 %v816_v0, %v220_v2  ;;  %v239_v61 = vld [vmem:[%s821_s20 + $0x208] sm:$0xff]  ;;  %v240_v62 = vld [vmem:[%s821_s20 + $0x210] sm:$0xff]  ;;  %v241_v5 = vld [vmem:[%s821_s20 + $0x218] sm:$0xff] }
  0x2c   : > { %611 = vst [vmem:[%s840_s25 + $0x138] sm:$0xff] %v483_v8  ;;  %v487_v22 = vadd.f32 %v826_v1, %v352_v9  ;;  %v488_v23 = vadd.f32 %v826_v1, %v353_v10  ;;  %v489_v24 = vadd.f32 %v826_v1, %v354_v11  ;;  %v356_v25 = vmul.f32 %v816_v0, %v221_v7  ;;  %v242_v6 = vld [vmem:[%s821_s20 + $0x220] sm:$0xff]  ;;  %v243_v7 = vld [vmem:[%s821_s20 + $0x228] sm:$0xff] }
  0x2d   : > { %612 = vst [vmem:[%s840_s25 + $0x140] sm:$0xff] %v484_v15  ;;  %613 = vst [vmem:[%s840_s25 + $0x148] sm:$0xff] %v485_v16  ;;  %v490_v27 = vadd.f32 %v826_v1, %v355_v18  ;;  %v357_v28 = vmul.f32 %v816_v0, %v222_v12  ;;  %v358_v29 = vmul.f32 %v816_v0, %v223_v13  ;;  %v244_v12 = vld [vmem:[%s821_s20 + $0x230] sm:$0xff] }
  0x2e   : > { %614 = vst [vmem:[%s840_s25 + $0x150] sm:$0xff] %v486_v17  ;;  %v359_v30 = vmul.f32 %v816_v0, %v224_v14  ;;  %615 = vst [vmem:[%s840_s25 + $0x158] sm:$0xff] %v487_v22  ;;  %v491_v32 = vadd.f32 %v826_v1, %v356_v25  ;;  %v360_v33 = vmul.f32 %v816_v0, %v225_v19  ;;  %v245_v17 = vld [vmem:[%s821_s20 + $0x238] sm:$0xff]  ;;  %v246_v22 = vld [vmem:[%s821_s20 + $0x240] sm:$0xff] }
  0x2f   : > { %616 = vst [vmem:[%s840_s25 + $0x160] sm:$0xff] %v488_v23  ;;  %617 = vst [vmem:[%s840_s25 + $0x168] sm:$0xff] %v489_v24  ;;  %v361_v34 = vmul.f32 %v816_v0, %v226_v20  ;;  %v362_v35 = vmul.f32 %v816_v0, %v227_v21  ;;  %v492_v39 = vadd.f32 %v826_v1, %v357_v28  ;;  %v247_v23 = vld [vmem:[%s821_s20 + $0x248] sm:$0xff]  ;;  %v248_v24 = vld [vmem:[%s821_s20 + $0x250] sm:$0xff] }
  0x30   : > { %618 = vst [vmem:[%s840_s25 + $0x170] sm:$0xff] %v490_v27  ;;  %v493_v40 = vadd.f32 %v826_v1, %v358_v29  ;;  %v494_v41 = vadd.f32 %v826_v1, %v359_v30  ;;  %v363_v42 = vmul.f32 %v816_v0, %v228_v26  ;;  %619 = vst [vmem:[%s840_s25 + $0x178] sm:$0xff] %v491_v32  ;;  %v249_v29 = vld [vmem:[%s821_s20 + $0x258] sm:$0xff]  ;;  %v250_v30 = vld [vmem:[%s821_s20 + $0x260] sm:$0xff] }
  0x31   : > { %v495_v46 = vadd.f32 %v826_v1, %v360_v33  ;;  %v496_v47 = vadd.f32 %v826_v1, %v361_v34  ;;  %v497_v48 = vadd.f32 %v826_v1, %v362_v35  ;;  %v364_v49 = vmul.f32 %v816_v0, %v229_v31  ;;  %620 = vst [vmem:[%s840_s25 + $0x180] sm:$0xff] %v492_v39  ;;  %v251_v31 = vld [vmem:[%s821_s20 + $0x268] sm:$0xff] }
  0x32   : > { %621 = vst [vmem:[%s840_s25 + $0x188] sm:$0xff] %v493_v40  ;;  %622 = vst [vmem:[%s840_s25 + $0x190] sm:$0xff] %v494_v41  ;;  %v498_v51 = vadd.f32 %v826_v1, %v363_v42  ;;  %v365_v52 = vmul.f32 %v816_v0, %v230_v36  ;;  %v366_v53 = vmul.f32 %v816_v0, %v231_v37  ;;  %v252_v36 = vld [vmem:[%s821_s20 + $0x270] sm:$0xff]  ;;  %v253_v41 = vld [vmem:[%s821_s20 + $0x278] sm:$0xff] }
  0x33   : > { %v367_v54 = vmul.f32 %v816_v0, %v232_v38  ;;  %623 = vst [vmem:[%s840_s25 + $0x198] sm:$0xff] %v495_v46  ;;  %624 = vst [vmem:[%s840_s25 + $0x1a0] sm:$0xff] %v496_v47  ;;  %v499_v56 = vadd.f32 %v826_v1, %v364_v49  ;;  %v368_v57 = vmul.f32 %v816_v0, %v233_v43  ;;  %v254_v46 = vld [vmem:[%s821_s20 + $0x280] sm:$0xff]  ;;  %v255_v47 = vld [vmem:[%s821_s20 + $0x288] sm:$0xff] }
  0x34   : > { %625 = vst [vmem:[%s840_s25 + $0x1a8] sm:$0xff] %v497_v48  ;;  %v369_v58 = vmul.f32 %v816_v0, %v234_v44  ;;  %v370_v59 = vmul.f32 %v816_v0, %v235_v45  ;;  %626 = vst [vmem:[%s840_s25 + $0x1b0] sm:$0xff] %v498_v51  ;;  %v500_v63 = vadd.f32 %v826_v1, %v365_v52  ;;  %v256_v48 = vld [vmem:[%s821_s20 + $0x290] sm:$0xff] }
  0x35   : > { %v501_v2 = vadd.f32 %v826_v1, %v366_v53  ;;  %v502_v3 = vadd.f32 %v826_v1, %v367_v54  ;;  %v371_v4 = vmul.f32 %v816_v0, %v236_v50  ;;  %627 = vst [vmem:[%s840_s25 + $0x1b8] sm:$0xff] %v499_v56  ;;  %v503_v8 = vadd.f32 %v826_v1, %v368_v57  ;;  %v257_v53 = vld [vmem:[%s821_s20 + $0x298] sm:$0xff]  ;;  %v258_v54 = vld [vmem:[%s821_s20 + $0x2a0] sm:$0xff] }
  0x36   : > { %v504_v9 = vadd.f32 %v826_v1, %v369_v58  ;;  %v505_v10 = vadd.f32 %v826_v1, %v370_v59  ;;  %v372_v11 = vmul.f32 %v816_v0, %v237_v55  ;;  %628 = vst [vmem:[%s840_s25 + $0x1c0] sm:$0xff] %v500_v63  ;;  %v373_v14 = vmul.f32 %v816_v0, %v238_v60  ;;  %v259_v55 = vld [vmem:[%s821_s20 + $0x2a8] sm:$0xff]  ;;  %v260_v60 = vld [vmem:[%s821_s20 + $0x2b0] sm:$0xff] }
  0x37   : > { %629 = vst [vmem:[%s840_s25 + $0x1c8] sm:$0xff] %v501_v2  ;;  %630 = vst [vmem:[%s840_s25 + $0x1d0] sm:$0xff] %v502_v3  ;;  %v506_v13 = vadd.f32 %v826_v1, %v371_v4  ;;  %v374_v15 = vmul.f32 %v816_v0, %v239_v61  ;;  %v375_v16 = vmul.f32 %v816_v0, %v240_v62  ;;  %v261_v3 = vld [vmem:[%s821_s20 + $0x2b8] sm:$0xff] }
  0x38   : > { %631 = vst [vmem:[%s840_s25 + $0x1d8] sm:$0xff] %v503_v8  ;;  %632 = vst [vmem:[%s840_s25 + $0x1e0] sm:$0xff] %v504_v9  ;;  %v507_v18 = vadd.f32 %v826_v1, %v372_v11  ;;  %v376_v19 = vmul.f32 %v816_v0, %v241_v5  ;;  %v377_v20 = vmul.f32 %v816_v0, %v242_v6  ;;  %v262_v8 = vld [vmem:[%s821_s20 + $0x2c0] sm:$0xff]  ;;  %v263_v9 = vld [vmem:[%s821_s20 + $0x2c8] sm:$0xff] }
  0x39   : > { %633 = vst [vmem:[%s840_s25 + $0x1e8] sm:$0xff] %v505_v10  ;;  %v378_v21 = vmul.f32 %v816_v0, %v243_v7  ;;  %634 = vst [vmem:[%s840_s25 + $0x1f0] sm:$0xff] %v506_v13  ;;  %v508_v25 = vadd.f32 %v826_v1, %v373_v14  ;;  %v509_v26 = vadd.f32 %v826_v1, %v374_v15  ;;  %v264_v10 = vld [vmem:[%s821_s20 + $0x2d0] sm:$0xff]  ;;  %v265_v15 = vld [vmem:[%s821_s20 + $0x2d8] sm:$0xff] }
  0x3a   : > { %v510_v27 = vadd.f32 %v826_v1, %v375_v16  ;;  %v379_v28 = vmul.f32 %v816_v0, %v244_v12  ;;  %635 = vst [vmem:[%s840_s25 + $0x1f8] sm:$0xff] %v507_v18  ;;  %v511_v32 = vadd.f32 %v826_v1, %v376_v19  ;;  %v512_v33 = vadd.f32 %v826_v1, %v377_v20  ;;  %v266_v16 = vld [vmem:[%s821_s20 + $0x2e0] sm:$0xff] }
  0x3b   : > { %v513_v34 = vadd.f32 %v826_v1, %v378_v21  ;;  %v380_v35 = vmul.f32 %v816_v0, %v245_v17  ;;  %636 = vst [vmem:[%s840_s25 + $0x200] sm:$0xff] %v508_v25  ;;  %637 = vst [vmem:[%s840_s25 + $0x208] sm:$0xff] %v509_v26  ;;  %v381_v38 = vmul.f32 %v816_v0, %v246_v22  ;;  %v267_v17 = vld [vmem:[%s821_s20 + $0x2e8] sm:$0xff]  ;;  %v268_v22 = vld [vmem:[%s821_s20 + $0x2f0] sm:$0xff] }
  0x3c   : > { %638 = vst [vmem:[%s840_s25 + $0x210] sm:$0xff] %v510_v27  ;;  %v514_v37 = vadd.f32 %v826_v1, %v379_v28  ;;  %v382_v39 = vmul.f32 %v816_v0, %v247_v23  ;;  %v383_v40 = vmul.f32 %v816_v0, %v248_v24  ;;  %639 = vst [vmem:[%s840_s25 + $0x218] sm:$0xff] %v511_v32  ;;  %v269_v27 = vld [vmem:[%s821_s20 + $0x2f8] sm:$0xff]  ;;  %v270_v32 = vld [vmem:[%s821_s20 + $0x300] sm:$0xff] }
  0x3d   : > { %640 = vst [vmem:[%s840_s25 + $0x220] sm:$0xff] %v512_v33  ;;  %641 = vst [vmem:[%s840_s25 + $0x228] sm:$0xff] %v513_v34  ;;  %v515_v42 = vadd.f32 %v826_v1, %v380_v35  ;;  %v384_v43 = vmul.f32 %v816_v0, %v249_v29  ;;  %v385_v44 = vmul.f32 %v816_v0, %v250_v30  ;;  %v271_v33 = vld [vmem:[%s821_s20 + $0x308] sm:$0xff]  ;;  %v272_v34 = vld [vmem:[%s821_s20 + $0x310] sm:$0xff] }
  0x3e   : > { %v386_v45 = vmul.f32 %v816_v0, %v251_v31  ;;  %642 = vst [vmem:[%s840_s25 + $0x230] sm:$0xff] %v514_v37  ;;  %v516_v49 = vadd.f32 %v826_v1, %v381_v38  ;;  %v517_v50 = vadd.f32 %v826_v1, %v382_v39  ;;  %v518_v51 = vadd.f32 %v826_v1, %v383_v40  ;;  %v273_v39 = vld [vmem:[%s821_s20 + $0x318] sm:$0xff]  ;;  %v274_v40 = vld [vmem:[%s821_s20 + $0x320] sm:$0xff] }
  0x3f   : > { %v387_v52 = vmul.f32 %v816_v0, %v252_v36  ;;  %643 = vst [vmem:[%s840_s25 + $0x238] sm:$0xff] %v515_v42  ;;  %v519_v56 = vadd.f32 %v826_v1, %v384_v43  ;;  %v520_v57 = vadd.f32 %v826_v1, %v385_v44  ;;  %v388_v59 = vmul.f32 %v816_v0, %v253_v41  ;;  %v275_v41 = vld [vmem:[%s821_s20 + $0x328] sm:$0xff] }
  0x40   : > { %v521_v58 = vadd.f32 %v826_v1, %v386_v45  ;;  %644 = vst [vmem:[%s840_s25 + $0x240] sm:$0xff] %v516_v49  ;;  %645 = vst [vmem:[%s840_s25 + $0x248] sm:$0xff] %v517_v50  ;;  %v389_v62 = vmul.f32 %v816_v0, %v254_v46  ;;  %v390_v63 = vmul.f32 %v816_v0, %v255_v47  ;;  %v276_v46 = vld [vmem:[%s821_s20 + $0x330] sm:$0xff] }
  0x41   : > { %646 = vst [vmem:[%s840_s25 + $0x250] sm:$0xff] %v518_v51  ;;  %v522_v61 = vadd.f32 %v826_v1, %v387_v52  ;;  %v391_v2 = vmul.f32 %v816_v0, %v256_v48  ;;  %647 = vst [vmem:[%s840_s25 + $0x258] sm:$0xff] %v519_v56  ;;  %v523_v4 = vadd.f32 %v826_v1, %v388_v59  ;;  %v277_v51 = vld [vmem:[%s821_s20 + $0x338] sm:$0xff]  ;;  %v278_v56 = vld [vmem:[%s821_s20 + $0x340] sm:$0xff] }
  0x42   : > { %648 = vst [vmem:[%s840_s25 + $0x260] sm:$0xff] %v520_v57  ;;  %649 = vst [vmem:[%s840_s25 + $0x268] sm:$0xff] %v521_v58  ;;  %v392_v5 = vmul.f32 %v816_v0, %v257_v53  ;;  %v393_v6 = vmul.f32 %v816_v0, %v258_v54  ;;  %v394_v7 = vmul.f32 %v816_v0, %v259_v55  ;;  %v279_v57 = vld [vmem:[%s821_s20 + $0x348] sm:$0xff]  ;;  %v280_v58 = vld [vmem:[%s821_s20 + $0x350] sm:$0xff] }
  0x43   : > { %650 = vst [vmem:[%s840_s25 + $0x270] sm:$0xff] %v522_v61  ;;  %v524_v11 = vadd.f32 %v826_v1, %v389_v62  ;;  %v525_v12 = vadd.f32 %v826_v1, %v390_v63  ;;  %v526_v13 = vadd.f32 %v826_v1, %v391_v2  ;;  %v395_v14 = vmul.f32 %v816_v0, %v260_v60  ;;  %v281_v63 = vld [vmem:[%s821_s20 + $0x358] sm:$0xff]  ;;  %v282_v2 = vld [vmem:[%s821_s20 + $0x360] sm:$0xff] }
  0x44   : > { %651 = vst [vmem:[%s840_s25 + $0x278] sm:$0xff] %v523_v4  ;;  %v527_v18 = vadd.f32 %v826_v1, %v392_v5  ;;  %v528_v19 = vadd.f32 %v826_v1, %v393_v6  ;;  %v529_v20 = vadd.f32 %v826_v1, %v394_v7  ;;  %v396_v21 = vmul.f32 %v816_v0, %v261_v3  ;;  %v283_v3 = vld [vmem:[%s821_s20 + $0x368] sm:$0xff] }
  0x45   : > { %652 = vst [vmem:[%s840_s25 + $0x280] sm:$0xff] %v524_v11  ;;  %653 = vst [vmem:[%s840_s25 + $0x288] sm:$0xff] %v525_v12  ;;  %v530_v23 = vadd.f32 %v826_v1, %v395_v14  ;;  %v397_v24 = vmul.f32 %v816_v0, %v262_v8  ;;  %v398_v25 = vmul.f32 %v816_v0, %v263_v9  ;;  %v284_v8 = vld [vmem:[%s821_s20 + $0x370] sm:$0xff] }
  0x46   : > { %654 = vst [vmem:[%s840_s25 + $0x290] sm:$0xff] %v526_v13  ;;  %v399_v26 = vmul.f32 %v816_v0, %v264_v10  ;;  %655 = vst [vmem:[%s840_s25 + $0x298] sm:$0xff] %v527_v18  ;;  %v531_v28 = vadd.f32 %v826_v1, %v396_v21  ;;  %v400_v29 = vmul.f32 %v816_v0, %v265_v15  ;;  %v285_v13 = vld [vmem:[%s821_s20 + $0x378] sm:$0xff]  ;;  %v286_v18 = vld [vmem:[%s821_s20 + $0x380] sm:$0xff] }
  0x47   : > { %656 = vst [vmem:[%s840_s25 + $0x2a0] sm:$0xff] %v528_v19  ;;  %657 = vst [vmem:[%s840_s25 + $0x2a8] sm:$0xff] %v529_v20  ;;  %v401_v30 = vmul.f32 %v816_v0, %v266_v16  ;;  %v402_v31 = vmul.f32 %v816_v0, %v267_v17  ;;  %v532_v35 = vadd.f32 %v826_v1, %v397_v24  ;;  %v287_v19 = vld [vmem:[%s821_s20 + $0x388] sm:$0xff]  ;;  %v288_v20 = vld [vmem:[%s821_s20 + $0x390] sm:$0xff] }
  0x48   : > { %658 = vst [vmem:[%s840_s25 + $0x2b0] sm:$0xff] %v530_v23  ;;  %v533_v36 = vadd.f32 %v826_v1, %v398_v25  ;;  %v534_v37 = vadd.f32 %v826_v1, %v399_v26  ;;  %v403_v38 = vmul.f32 %v816_v0, %v268_v22  ;;  %659 = vst [vmem:[%s840_s25 + $0x2b8] sm:$0xff] %v531_v28  ;;  %v289_v25 = vld [vmem:[%s821_s20 + $0x398] sm:$0xff]  ;;  %v290_v26 = vld [vmem:[%s821_s20 + $0x3a0] sm:$0xff] }
  0x49   : > { %v535_v42 = vadd.f32 %v826_v1, %v400_v29  ;;  %v536_v43 = vadd.f32 %v826_v1, %v401_v30  ;;  %v537_v44 = vadd.f32 %v826_v1, %v402_v31  ;;  %v404_v45 = vmul.f32 %v816_v0, %v269_v27  ;;  %660 = vst [vmem:[%s840_s25 + $0x2c0] sm:$0xff] %v532_v35  ;;  %v291_v27 = vld [vmem:[%s821_s20 + $0x3a8] sm:$0xff] }
  0x4a   : > { %661 = vst [vmem:[%s840_s25 + $0x2c8] sm:$0xff] %v533_v36  ;;  %662 = vst [vmem:[%s840_s25 + $0x2d0] sm:$0xff] %v534_v37  ;;  %v538_v47 = vadd.f32 %v826_v1, %v403_v38  ;;  %v405_v48 = vmul.f32 %v816_v0, %v270_v32  ;;  %v406_v49 = vmul.f32 %v816_v0, %v271_v33  ;;  %v292_v32 = vld [vmem:[%s821_s20 + $0x3b0] sm:$0xff]  ;;  %v293_v37 = vld [vmem:[%s821_s20 + $0x3b8] sm:$0xff] }
  0x4b   : > { %v407_v50 = vmul.f32 %v816_v0, %v272_v34  ;;  %663 = vst [vmem:[%s840_s25 + $0x2d8] sm:$0xff] %v535_v42  ;;  %664 = vst [vmem:[%s840_s25 + $0x2e0] sm:$0xff] %v536_v43  ;;  %v539_v52 = vadd.f32 %v826_v1, %v404_v45  ;;  %v408_v53 = vmul.f32 %v816_v0, %v273_v39  ;;  %v294_v42 = vld [vmem:[%s821_s20 + $0x3c0] sm:$0xff]  ;;  %v295_v43 = vld [vmem:[%s821_s20 + $0x3c8] sm:$0xff] }
  0x4c   : > { %665 = vst [vmem:[%s840_s25 + $0x2e8] sm:$0xff] %v537_v44  ;;  %v409_v54 = vmul.f32 %v816_v0, %v274_v40  ;;  %v410_v55 = vmul.f32 %v816_v0, %v275_v41  ;;  %666 = vst [vmem:[%s840_s25 + $0x2f0] sm:$0xff] %v538_v47  ;;  %v540_v59 = vadd.f32 %v826_v1, %v405_v48  ;;  %v296_v44 = vld [vmem:[%s821_s20 + $0x3d0] sm:$0xff] }
  0x4d   : > { %v541_v60 = vadd.f32 %v826_v1, %v406_v49  ;;  %v542_v61 = vadd.f32 %v826_v1, %v407_v50  ;;  %v411_v62 = vmul.f32 %v816_v0, %v276_v46  ;;  %667 = vst [vmem:[%s840_s25 + $0x2f8] sm:$0xff] %v539_v52  ;;  %v543_v4 = vadd.f32 %v826_v1, %v408_v53  ;;  %v297_v49 = vld [vmem:[%s821_s20 + $0x3d8] sm:$0xff]  ;;  %v298_v50 = vld [vmem:[%s821_s20 + $0x3e0] sm:$0xff] }
  0x4e   : > { %v544_v5 = vadd.f32 %v826_v1, %v409_v54  ;;  %v545_v6 = vadd.f32 %v826_v1, %v410_v55  ;;  %v412_v7 = vmul.f32 %v816_v0, %v277_v51  ;;  %668 = vst [vmem:[%s840_s25 + $0x300] sm:$0xff] %v540_v59  ;;  %v413_v10 = vmul.f32 %v816_v0, %v278_v56  ;;  %v299_v51 = vld [vmem:[%s821_s20 + $0x3e8] sm:$0xff]  ;;  %v300_v56 = vld [vmem:[%s821_s20 + $0x3f0] sm:$0xff] }
  0x4f   : > { %669 = vst [vmem:[%s840_s25 + $0x308] sm:$0xff] %v541_v60  ;;  %670 = vst [vmem:[%s840_s25 + $0x310] sm:$0xff] %v542_v61  ;;  %v546_v9 = vadd.f32 %v826_v1, %v411_v62  ;;  %v414_v11 = vmul.f32 %v816_v0, %v279_v57  ;;  %v415_v12 = vmul.f32 %v816_v0, %v280_v58  ;;  %v301_v61 = vld [vmem:[%s821_s20 + $0x3f8] sm:$0xff] }
  0x50   : > { %671 = vst [vmem:[%s840_s25 + $0x318] sm:$0xff] %v543_v4  ;;  %672 = vst [vmem:[%s840_s25 + $0x320] sm:$0xff] %v544_v5  ;;  %v547_v14 = vadd.f32 %v826_v1, %v412_v7  ;;  %v416_v15 = vmul.f32 %v816_v0, %v281_v63  ;;  %v417_v16 = vmul.f32 %v816_v0, %v282_v2 }
  0x51   : > { %673 = vst [vmem:[%s840_s25 + $0x328] sm:$0xff] %v545_v6  ;;  %v418_v17 = vmul.f32 %v816_v0, %v283_v3  ;;  %674 = vst [vmem:[%s840_s25 + $0x330] sm:$0xff] %v546_v9  ;;  %v548_v21 = vadd.f32 %v826_v1, %v413_v10  ;;  %v549_v22 = vadd.f32 %v826_v1, %v414_v11 }
  0x52   : > { %v550_v23 = vadd.f32 %v826_v1, %v415_v12  ;;  %v419_v24 = vmul.f32 %v816_v0, %v284_v8  ;;  %675 = vst [vmem:[%s840_s25 + $0x338] sm:$0xff] %v547_v14  ;;  %v551_v28 = vadd.f32 %v826_v1, %v416_v15  ;;  %v552_v29 = vadd.f32 %v826_v1, %v417_v16 }
  0x53   : > { %v553_v30 = vadd.f32 %v826_v1, %v418_v17  ;;  %v420_v31 = vmul.f32 %v816_v0, %v285_v13  ;;  %676 = vst [vmem:[%s840_s25 + $0x340] sm:$0xff] %v548_v21  ;;  %677 = vst [vmem:[%s840_s25 + $0x348] sm:$0xff] %v549_v22  ;;  %v421_v34 = vmul.f32 %v816_v0, %v286_v18 }
  0x54   : > { %678 = vst [vmem:[%s840_s25 + $0x350] sm:$0xff] %v550_v23  ;;  %v554_v33 = vadd.f32 %v826_v1, %v419_v24  ;;  %v422_v35 = vmul.f32 %v816_v0, %v287_v19  ;;  %v423_v36 = vmul.f32 %v816_v0, %v288_v20  ;;  %679 = vst [vmem:[%s840_s25 + $0x358] sm:$0xff] %v551_v28 }
  0x55   : > { %680 = vst [vmem:[%s840_s25 + $0x360] sm:$0xff] %v552_v29  ;;  %681 = vst [vmem:[%s840_s25 + $0x368] sm:$0xff] %v553_v30  ;;  %v555_v38 = vadd.f32 %v826_v1, %v420_v31  ;;  %v424_v39 = vmul.f32 %v816_v0, %v289_v25  ;;  %v425_v40 = vmul.f32 %v816_v0, %v290_v26 }
  0x56   : > { %v426_v41 = vmul.f32 %v816_v0, %v291_v27  ;;  %682 = vst [vmem:[%s840_s25 + $0x370] sm:$0xff] %v554_v33  ;;  %v556_v45 = vadd.f32 %v826_v1, %v421_v34  ;;  %v557_v46 = vadd.f32 %v826_v1, %v422_v35  ;;  %v558_v47 = vadd.f32 %v826_v1, %v423_v36 }
  0x57   : > { %v427_v48 = vmul.f32 %v816_v0, %v292_v32  ;;  %683 = vst [vmem:[%s840_s25 + $0x378] sm:$0xff] %v555_v38  ;;  %v559_v52 = vadd.f32 %v826_v1, %v424_v39  ;;  %v560_v53 = vadd.f32 %v826_v1, %v425_v40  ;;  %v428_v55 = vmul.f32 %v816_v0, %v293_v37 }
  0x58   : > { %v561_v54 = vadd.f32 %v826_v1, %v426_v41  ;;  %684 = vst [vmem:[%s840_s25 + $0x380] sm:$0xff] %v556_v45  ;;  %685 = vst [vmem:[%s840_s25 + $0x388] sm:$0xff] %v557_v46  ;;  %v429_v58 = vmul.f32 %v816_v0, %v294_v42  ;;  %v430_v59 = vmul.f32 %v816_v0, %v295_v43 }
  0x59   : > { %686 = vst [vmem:[%s840_s25 + $0x390] sm:$0xff] %v558_v47  ;;  %v562_v57 = vadd.f32 %v826_v1, %v427_v48  ;;  %v431_v60 = vmul.f32 %v816_v0, %v296_v44  ;;  %687 = vst [vmem:[%s840_s25 + $0x398] sm:$0xff] %v559_v52  ;;  %v563_v62 = vadd.f32 %v826_v1, %v428_v55 }
  0x5a   : > { %688 = vst [vmem:[%s840_s25 + $0x3a0] sm:$0xff] %v560_v53  ;;  %689 = vst [vmem:[%s840_s25 + $0x3a8] sm:$0xff] %v561_v54  ;;  %v432_v63 = vmul.f32 %v816_v0, %v297_v49  ;;  %v433_v2 = vmul.f32 %v816_v0, %v298_v50  ;;  %v434_v3 = vmul.f32 %v816_v0, %v299_v51 }
  0x5b   : > { %690 = vst [vmem:[%s840_s25 + $0x3b0] sm:$0xff] %v562_v57  ;;  %v564_v4 = vadd.f32 %v826_v1, %v429_v58  ;;  %v565_v5 = vadd.f32 %v826_v1, %v430_v59  ;;  %v566_v6 = vadd.f32 %v826_v1, %v431_v60  ;;  %v435_v7 = vmul.f32 %v816_v0, %v300_v56 }
  0x5c   : > { %691 = vst [vmem:[%s840_s25 + $0x3b8] sm:$0xff] %v563_v62  ;;  %v567_v8 = vadd.f32 %v826_v1, %v432_v63  ;;  %v568_v9 = vadd.f32 %v826_v1, %v433_v2  ;;  %v569_v10 = vadd.f32 %v826_v1, %v434_v3  ;;  %v436_v11 = vmul.f32 %v816_v0, %v301_v61 }
  0x5d   : > { %692 = vst [vmem:[%s840_s25 + $0x3c0] sm:$0xff] %v564_v4  ;;  %693 = vst [vmem:[%s840_s25 + $0x3c8] sm:$0xff] %v565_v5  ;;  %v570_v12 = vadd.f32 %v826_v1, %v435_v7 }
  0x5e   : > { %694 = vst [vmem:[%s840_s25 + $0x3d0] sm:$0xff] %v566_v6  ;;  %695 = vst [vmem:[%s840_s25 + $0x3d8] sm:$0xff] %v567_v8  ;;  %v571_v13 = vadd.f32 %v826_v1, %v436_v11 }
  0x5f   : > { %696 = vst [vmem:[%s840_s25 + $0x3e0] sm:$0xff] %v568_v9  ;;  %697 = vst [vmem:[%s840_s25 + $0x3e8] sm:$0xff] %v569_v10 }
  0x60   : > { %698 = vst [vmem:[%s840_s25 + $0x3f0] sm:$0xff] %v570_v12  ;;  %699 = vst [vmem:[%s840_s25 + $0x3f8] sm:$0xff] %v571_v13 }
  0x61 PF: > { %s13_s12 = sadd.s32 1, %s783_s12  }
  0x62   : > { %p10_p4 = scmp.ge.s32.totalorder %s13_s12, 4  }
  0x64   :  { %12 = sbr.rel (!%p10_p4) target bundleno = 1 (0x1), region = 62 }

// kernel: snn_dwconv_forward.6
= control target key start
LH: loop header
LB: loop body
LE: loop exit
PB: predicated region body
PF: predicated region fallthrough
CT: control target
= control target key end

     0   :  { %s6962_s12 = smov 0   ;;  %s8794_s0 = inlined_call_operand.vmem [shape: bf16[8,18,18,128], index: 0, kind: input, shape index: {}]   ;;  %s8795_s1 = inlined_call_operand.vmem [shape: bf16[9,128,128], index: 1, kind: input, shape index: {}]   ;;  %s8796_s2 = inlined_call_operand.vmem [shape: f32[8,256,128], index: 2, kind: output, shape index: {0}]   ;;  %s8797_s3 = inlined_call_operand.vmem [shape: f32[8,2,128], index: 3, kind: output, shape index: {1}]  }
   0x1 LB: > { %s5219_s13 = sadd.s32 4294967295, %s6940_s12   ;;  %p5223_p0 = scmp.ge.s32.totalorder %s6940_s12, 1  ;;  %s6940_s12 = sphi %s6962_s12, %s14_s12  }
   0x2   : > { %p140_p1 = scmp.lt.s32.totalorder %s6940_s12, 9 }
   0x4   : > { %p141_p2 = pnand %p5223_p0, %p140_p1 }
   0x6   : > { %144 = sbr.rel (%p141_p2) target bundleno = 604 (0x25c), region = 28 }
   0xd   : > { %v6744_v0 = vld [vmem:[%s8795_s1 + $0x40] sm:$0xff]   ;;  %p168_p3 = scmp.lt.s32.totalorder %s5219_s13, 7  ;;  %v6746_v2 = vld [vmem:[%s8795_s1 + $0x48] sm:$0xff]   ;;  %v6748_v4 = vld [vmem:[%s8795_s1 + $0x50] sm:$0xff]   ;;  %vm247_vm0 = vsmask.f32 3328 }
   0xe   : > { %v6745_v1 = vld [vmem:[%s8795_s1 + $0x100] sm:$0xff]   ;;  %6031 = vmatprep.subr.bf16.mxu1 %v6744_v0  ;;  %v6747_v3 = vld [vmem:[%s8795_s1 + $0x108] sm:$0xff]   ;;  %v6749_v5 = vld [vmem:[%s8795_s1 + $0x110] sm:$0xff]   ;;  %vm248_vm1 = vsmask.f32 7440  ;;  %vm1277_vm3 = vcmask 1042432  }
   0xf   : > { %6223 = vmatprep.subr.bf16.mxu0 %v6745_v1  ;;  %6032 = vmatpush3.bf16.msra.mxu1 %v6744_v0  ;;  %s8865_s13 = smov (!%p168_p3, %s5219_s13), 7  ;;  %v6750_v6 = vld [vmem:[%s8795_s1 + $0x58] sm:$0xff]   ;;  %v6752_v8 = vld [vmem:[%s8795_s1 + $0x60] sm:$0xff]   ;;  %v6754_v10 = vld [vmem:[%s8795_s1 + $0x68] sm:$0xff]   ;;  %vm1278_vm4 = vcmask 1046532   ;;  %vm5130_vm6 = vcmask 1040384  }
  0x10   : > { %6224 = vmatpush3.bf16.msra.mxu0 %v6745_v1  ;;  %6033 = vmatprep.subr.bf16.mxu1 %v6746_v2  ;;  %v6751_v7 = vld [vmem:[%s8795_s1 + $0x118] sm:$0xff]   ;;  %s6735_s30 = smul.u32 216, %s8865_s13  ;;  %v6753_v9 = vld [vmem:[%s8795_s1 + $0x120] sm:$0xff]   ;;  %v6755_v11 = vld [vmem:[%s8795_s1 + $0x128] sm:$0xff]   ;;  %s5227_s9 = sshll.u32 %s8865_s13, 1 }
  0x11   : > { %6225 = vmatprep.subr.bf16.mxu0 %v6747_v3  ;;  %v6756_v25 = vld [vmem:[%s8795_s1 + $0x70] sm:$0xff]   ;;  %v6758_v36 = vld [vmem:[%s8795_s1 + $0x78] sm:$0xff]   ;;  %vm7038_vm2 = vmor %vm247_vm0, %vm248_vm1  ;;  %s181_s15 = scalar_lea.vmem %s8797_s3, %s5227_s9 }
  0x12   : > { %s7006_s10 = scalar_lea.vmem %s8794_s0, %s6735_s30  ;;  %v6757_v30 = vld [vmem:[%s8795_s1 + $0x130] sm:$0xff]   ;;  %v6759_v51 = vld [vmem:[%s8795_s1 + $0x138] sm:$0xff]   ;;  %vm7284_vm5 = vmor %vm1277_vm3, %vm1278_vm4 }
  0x13   : > { %6034 = vmatpush3.bf16.msra.mxu1 %v6746_v2  ;;  %v183_v12 = vld [vmem:[%s7006_s10] sm:$0xf]  ;;  %v184_v13 = vld [vmem:[%s7006_s10 + $0x4] sm:$0xf]  ;;  %v231_v14 = vld [vmem:[%s7006_s10 + $0x8] sm:$0x1] }
  0x14   : > { %6226 = vmatpush3.bf16.msra.mxu0 %v6747_v3  ;;  %6035 = vmatprep.subr.bf16.mxu1 %v6748_v4  ;;  %v251_v15 = vshrl.u32 %v183_v12, 16  ;;  %v254_v16 = vshll.u32 %v183_v12, 16  ;;  %v260_v17 = vshll.u32 %v184_v13, 16  ;;  %v264_v18 = vshrl.u32 %v184_v13, 16  ;;  %v5420_v20 = vld [vmem:[%s7006_s10 + $0xc] sm:$0xf] }
  0x15   : > { %6227 = vmatprep.subr.bf16.mxu0 %v6749_v5  ;;  %v270_v19 = vshll.u32 %v231_v14, 16  ;;  %v7019_v23 = vld [vmem:[%s7006_s10 + $0x10] sm:$0xf]  ;;  %v7022_v24 = vld [vmem:[%s7006_s10 + $0x14] sm:$0x1]  ;;  %v2150_v29 = vshrl.u32 %v5420_v20, 16 }
  0x16   : > { %v253_v21 = vrot.slane %v251_v15, 4  ;;  %v256_v22 = vrot.slane %v254_v16, 5  ;;  %v262_v26 = vrot.slane %v260_v17, 5  ;;  %v266_v27 = vrot.slane %v264_v18, 4  ;;  %v185_v35 = vld [vmem:[%s7006_s10 + $0xc] sm:$0xf] }
  0x17   : > { %6036 = vmatpush3.bf16.msra.mxu1 %v6748_v4  ;;  %v272_v28 = vrot.slane %v270_v19, 5  ;;  %v2153_v32 = vshll.u32 %v5420_v20, 16  ;;  %v2159_v33 = vshll.u32 %v7019_v23, 16  ;;  %v2163_v34 = vshrl.u32 %v7019_v23, 16  ;;  %v186_v42 = vld [vmem:[%s7006_s10 + $0x10] sm:$0xf] }
  0x18   : > { %6228 = vmatpush3.bf16.msra.mxu0 %v6749_v5  ;;  %6037 = vmatprep.subr.bf16.mxu1 %v6750_v6  ;;  %v257_v31 = vor.u32 %v256_v22, %v253_v21  ;;  %v267_v38 = vor.u32 %v266_v27, %v262_v26  ;;  %v2152_v39 = vrot.slane %v2150_v29, 4  ;;  %v2169_v40 = vshll.u32 %v7022_v24, 16  ;;  %v232_v55 = vld [vmem:[%s7006_s10 + $0x14] sm:$0x1]  ;;  %v5423_v57 = vld [vmem:[%s7006_s10 + $0x18] sm:$0xf] }
  0x19   : > { %6229 = vmatprep.subr.bf16.mxu0 %v6751_v7  ;;  %v2924_v41 = vrot.slane %v7022_v24, 5  ;;  %v2155_v44 = vrot.slane %v2153_v32, 5  ;;  %v2161_v45 = vrot.slane %v2159_v33, 5  ;;  %v2165_v46 = vrot.slane %v2163_v34, 4  ;;  %v7055_v62 = vld [vmem:[%s7006_s10 + $0x1c] sm:$0xf] }
  0x1a   : > { %v258_v43 = vrot.slane %v257_v31, 4  ;;  %v268_v47 = vrot.slane %v267_v38, 4  ;;  %v2171_v48 = vrot.slane %v2169_v40, 5  ;;  %v275_v49 = vshrl.u32 %v185_v35, 16  ;;  %v6760_v3 = vld [vmem:[%s8795_s1] sm:$0xff]  }
  0x1b   : > { %6038 = vmatpush3.bf16.msra.mxu1 %v6750_v6  ;;  %v278_v50 = vshll.u32 %v185_v35, 16  ;;  %v2156_v53 = vor.u32 %v2155_v44, %v2152_v39  ;;  %v2166_v54 = vor.u32 %v2165_v46, %v2161_v45  ;;  %v284_v56 = vshll.u32 %v186_v42, 16  ;;  %v7063_v4 = vld [vmem:[%s8795_s1 + $0x140] sm:$0xff]   ;;  %v187_v21 = vld [vmem:[%s7006_s10 + $0x18] sm:$0xf]  ;;  %v6763_v46 = vld [vmem:[%s8795_s1 + $0x8] sm:$0xff]  }
  0x1c   : > { %6230 = vmatpush3.bf16.msra.mxu0 %v6751_v7  ;;  %6039 = vmatprep.subr.bf16.mxu1 %v6752_v8  ;;  %v263_v52 = vsel %vm7038_vm2, %v258_v43, %v262_v26  ;;  %v273_v58 = vsel %vm7038_vm2, %v268_v47, %v272_v28  ;;  %v277_v59 = vrot.slane %v275_v49, 4  ;;  %v288_v61 = vshrl.u32 %v186_v42, 16  ;;  %v188_v28 = vld [vmem:[%s7006_s10 + $0x1c] sm:$0xf]  ;;  %v233_v33 = vld [vmem:[%s7006_s10 + $0x20] sm:$0x1] }
  0x1d   : > { %6231 = vmatprep.subr.bf16.mxu0 %v6753_v9  ;;  %v280_v60 = vrot.slane %v278_v50, 5  ;;  %v5244_v63 = vcombine.low %v263_v52, %v273_v58  ;;  %v2157_v0 = vrot.slane %v2156_v53, 4  ;;  %v2167_v1 = vrot.slane %v2166_v54, 4  ;;  %v5426_v39 = vld [vmem:[%s7006_s10 + $0x24] sm:$0xf] }
  0x1e   : > { %v286_v2 = vrot.slane %v284_v56, 5  ;;  %v290_v6 = vrot.slane %v288_v61, 4  ;;  %v294_v7 = vshll.u32 %v232_v55, 16  ;;  %v2177_v12 = vshll.u32 %v5423_v57, 16  ;;  %v189_v52 = vld [vmem:[%s7006_s10 + $0x24] sm:$0xf] }
  0x1f   : > { %6040 = vmatpush3.bf16.msra.mxu1 %v6752_v8  ;;  %v281_v5 = vor.u32 %v280_v60, %v277_v59  ;;  %v7066_v8 = vld [vmem:[%s7006_s10 + $0x20] sm:$0x1]  ;;  %6047 = vmatprep.mubr.bf16.mxu1 %v5244_v63  ;;  %v2183_v19 = vshll.u32 %v7055_v62, 16  ;;  %v2187_v20 = vshrl.u32 %v7055_v62, 16  ;;  %v2928_v27 = vrot.slane %v7055_v62, 5  ;;  %v6762_v63 = vld [vmem:[%s8795_s1 + $0x148] sm:$0xff]  }
  0x20   : > { %6232 = vmatpush3.bf16.msra.mxu0 %v6753_v9  ;;  %6041 = vmatprep.subr.bf16.mxu1 %v6754_v10  ;;  %v2162_v9 = vsel %vm7038_vm2, %v2157_v0, %v2161_v45  ;;  %v291_v15 = vor.u32 %v290_v6, %v286_v2  ;;  %v296_v16 = vrot.slane %v294_v7, 5  ;;  %v2179_v18 = vrot.slane %v2177_v12, 5  ;;  %v7091_v45 = vld [vmem:[%s7006_s10 + $0x28] sm:$0xf] }
  0x21   : > { %6233 = vmatprep.subr.bf16.mxu0 %v6755_v11  ;;  %v282_v14 = vrot.slane %v281_v5, 4  ;;  %v2193_v26 = vshll.u32 %v7066_v8, 16  ;;  %v2189_v31 = vrot.slane %v2187_v20, 4  ;;  %v2931_v32 = vrot.slane %v7066_v8, 5  ;;  %v190_v5 = vld [vmem:[%s7006_s10 + $0x28] sm:$0xf] }
  0x22   : > { %v299_v38 = vshrl.u32 %v187_v21, 16  ;;  %v302_v44 = vshll.u32 %v187_v21, 16  ;;  %v312_v49 = vshrl.u32 %v188_v28, 16  ;;  %v318_v50 = vshll.u32 %v233_v33, 16  ;;  %v7122_v33 = vld [vmem:[%s7006_s10 + $0x34] sm:$0xf] }
  0x23   : > { %6042 = vmatpush3.bf16.msra.mxu1 %v6754_v10  ;;  %v2172_v10 = vsel %vm7038_vm2, %v2167_v1, %v2171_v48  ;;  %v287_v22 = vsel %vm7038_vm2, %v282_v14, %v286_v2  ;;  %v2195_v35 = vrot.slane %v2193_v26, 5  ;;  %v308_v48 = vshll.u32 %v188_v28, 16 }
  0x24   : > { %6234 = vmatpush3.bf16.msra.mxu0 %v6755_v11  ;;  %6043 = vmatprep.subr.bf16.mxu1 %v6756_v25  ;;  %v2174_v11 = vshrl.u32 %v5423_v57, 16  ;;  %v5484_v13 = vcombine.low %v2162_v9, %v2172_v10  ;;  %v301_v47 = vrot.slane %v299_v38, 4  ;;  %v304_v55 = vrot.slane %v302_v44, 5 }
  0x25   : > { %6235 = vmatprep.subr.bf16.mxu0 %v6757_v30  ;;  %v2198_v56 = vshrl.u32 %v5426_v39, 16  ;;  %v310_v57 = vrot.slane %v308_v48, 5  ;;  %v314_v58 = vrot.slane %v312_v49, 4  ;;  %v320_v59 = vrot.slane %v318_v50, 5  ;;  %v6765_v48 = vld [vmem:[%s8795_s1 + $0x158] sm:$0xff]  }
  0x26   : > { %v2176_v17 = vrot.slane %v2174_v11, 4  ;;  %6239 = vmatprep.mubr.bf16.mxu0 %v5484_v13  ;;  %v2201_v60 = vshll.u32 %v5426_v39, 16  ;;  %v305_v0 = vor.u32 %v304_v55, %v301_v47  ;;  %v2207_v2 = vshll.u32 %v7091_v45, 16  ;;  %v234_v11 = vld [vmem:[%s7006_s10 + $0x2c] sm:$0x1] }
  0x27   : > { %6044 = vmatpush3.bf16.msra.mxu1 %v6756_v25  ;;  %v292_v25 = vrot.slane %v291_v15, 4  ;;  %v2200_v1 = vrot.slane %v2198_v56, 4  ;;  %v315_v7 = vor.u32 %v314_v58, %v310_v57  ;;  %v2211_v10 = vshrl.u32 %v7091_v45, 16 }
  0x28   : > { %6236 = vmatpush3.bf16.msra.mxu0 %v6757_v30  ;;  %6045 = vmatprep.subr.bf16.mxu1 %v6758_v36  ;;  %v2180_v29 = vor.u32 %v2179_v18, %v2176_v17  ;;  %v2185_v30 = vrot.slane %v2183_v19, 5  ;;  %v2203_v9 = vrot.slane %v2201_v60, 5  ;;  %v306_v12 = vrot.slane %v305_v0, 4  ;;  %v6772_v60 = vld [vmem:[%s8795_s1 + $0x20] sm:$0xff]  }
  0x29   : > { %6237 = vmatprep.subr.bf16.mxu0 %v6759_v51  ;;  %v297_v34 = vsel %vm7038_vm2, %v292_v25, %v296_v16  ;;  %v2209_v13 = vrot.slane %v2207_v2, 5  ;;  %v323_v15 = vshrl.u32 %v189_v52, 16  ;;  %v5429_v16 = vld [vmem:[%s7006_s10 + $0x30] sm:$0xf]  ;;  %v316_v17 = vrot.slane %v315_v7, 4 }
  0x2a   : > { %v5245_v40 = vcombine.low %v287_v22, %v297_v34  ;;  %v2181_v42 = vrot.slane %v2180_v29, 4  ;;  %v2190_v43 = vor.u32 %v2189_v31, %v2185_v30  ;;  %v2204_v18 = vor.u32 %v2203_v9, %v2200_v1  ;;  %v6769_v34 = vld [vmem:[%s8795_s1 + $0x18] sm:$0xff]  }
  0x2b   : > { %6046 = vmatpush3.bf16.msra.mxu1 %v6758_v36  ;;  %v7087_v36 = vrot.slane %v2928_v27, 4  ;;  %v2213_v19 = vrot.slane %v2211_v10, 4  ;;  %v326_v20 = vshll.u32 %v189_v52, 16  ;;  %v311_v21 = vsel %vm7038_vm2, %v306_v12, %v310_v57  ;;  %v235_v2 = vld [vmem:[%s7006_s10 + $0x38] sm:$0x1] }
  0x2c   : > { %6238 = vmatpush3.bf16.msra.mxu0 %v6759_v51  ;;  %6079 = vmatprep.subr.bf16.mxu1 %v6760_v3  ;;  %v7097_v51 = vld [vmem:[%s7006_s10 + $0x2c] sm:$0x1]  ;;  %v2186_v53 = vsel %vm7038_vm2, %v2181_v42, %v2185_v30  ;;  %v2191_v54 = vrot.slane %v2190_v43, 4  ;;  %v325_v25 = vrot.slane %v323_v15, 4  ;;  %v332_v26 = vshll.u32 %v190_v5, 16 }
  0x2d   : > { %6271 = vmatprep.subr.bf16.mxu0 %v7063_v4  ;;  %v2217_v14 = vshll.u32 %v7097_v51, 16  ;;  %v321_v28 = vsel %vm7038_vm2, %v316_v17, %v320_v59  ;;  %v2205_v29 = vrot.slane %v2204_v18, 4  ;;  %v2214_v30 = vor.u32 %v2213_v19, %v2209_v13  ;;  %v192_v59 = vld [vmem:[%s7006_s10 + $0x34] sm:$0xf]  ;;  %v5432_v9 = vld [vmem:[%s7006_s10 + $0x3c] sm:$0xf] }
  0x2e   : > { %6048 = vmatmul.mubr.bf16.vlgmr.msra.gmra.mrb[0].mxu1 %v5245_v40  ;;  %v2196_v61 = vsel %vm7038_vm2, %v2191_v54, %v2195_v35  ;;  %v328_v31 = vrot.slane %v326_v20, 5  ;;  %v5246_v35 = vcombine.low %v311_v21, %v321_v28  ;;  %v334_v38 = vrot.slane %v332_v26, 5  ;;  %v191_v54 = vld [vmem:[%s7006_s10 + $0x30] sm:$0xf]  ;;  %v7156_v19 = vld [vmem:[%s7006_s10 + $0x40] sm:$0xf] }
  0x2f   : > { %6080 = vmatpush3.bf16.msra.mxu1 %v6760_v3  ;;  %v6766_v3 = vld [vmem:[%s8795_s1 + $0x10] sm:$0xff]   ;;  %v5485_v6 = vcombine.low %v2186_v53, %v2196_v61  ;;  %v2219_v22 = vrot.slane %v2217_v14, 5  ;;  %v336_v39 = vshrl.u32 %v190_v5, 16  ;;  %v342_v40 = vshll.u32 %v234_v11, 16  ;;  %v6774_v14 = vld [vmem:[%s8795_s1 + $0x28] sm:$0xff]   ;;  %v6767_v20 = vld [vmem:[%s8795_s1 + $0x160] sm:$0xff]  }
  0x30   : > { %6081 = vmatprep.subr.bf16.mxu1 %v6763_v46  ;;  %v2210_v42 = vsel %vm7038_vm2, %v2205_v29, %v2209_v13  ;;  %v2215_v43 = vrot.slane %v2214_v30, 4  ;;  %v329_v44 = vor.u32 %v328_v31, %v325_v25  ;;  %v2222_v47 = vshrl.u32 %v5429_v16, 16  ;;  %6051 = vmatprep.mubr.bf16.mxu1 %v5246_v35  ;;  %v7164_v28 = vld [vmem:[%s7006_s10 + $0x44] sm:$0x1]  ;;  %v6776_v35 = vld [vmem:[%s8795_s1 + $0x30] sm:$0xff]  }
  0x31   : > { %6240 = vmatmul.mubr.bf16.vlgmr.msra.gmra.mrb[0].mxu0 %v5485_v6  ;;  %v338_v49 = vrot.slane %v336_v39, 4  ;;  %v344_v50 = vrot.slane %v342_v40, 5  ;;  %v2225_v52 = vshll.u32 %v5429_v16, 16  ;;  %v2231_v53 = vshll.u32 %v7122_v33, 16 }
  0x32   : > { %6272 = vmatpush3.bf16.msra.mxu0 %v7063_v4  ;;  %v6764_v4 = vld [vmem:[%s8795_s1 + $0x150] sm:$0xff]   ;;  %v2220_v55 = vsel %vm7038_vm2, %v2215_v43, %v2219_v22  ;;  %v330_v56 = vrot.slane %v329_v44, 4  ;;  %v2224_v57 = vrot.slane %v2222_v47, 4  ;;  %v2235_v58 = vshrl.u32 %v7122_v33, 16 }
  0x33   : > { %6082 = vmatpush3.bf16.msra.mxu1 %v6763_v46  ;;  %6273 = vmatprep.subr.bf16.mxu0 %v6762_v63  ;;  %v7133_v46 = vld [vmem:[%s7006_s10 + $0x38] sm:$0x1]  ;;  %v5486_v61 = vcombine.low %v2210_v42, %v2220_v55  ;;  %v2227_v0 = vrot.slane %v2225_v52, 5  ;;  %v2233_v1 = vrot.slane %v2231_v53, 5  ;;  %v347_v7 = vshrl.u32 %v191_v54, 16 }
  0x34   : > { %6083 = vmatprep.subr.bf16.mxu1 %v6766_v3  ;;  %v335_v5 = vsel %vm7038_vm2, %v330_v56, %v334_v38  ;;  %v2241_v6 = vshll.u32 %v7133_v46, 16  ;;  %v350_v12 = vshll.u32 %v191_v54, 16  ;;  %v356_v13 = vshll.u32 %v192_v59, 16  ;;  %v194_v55 = vld [vmem:[%s7006_s10 + $0x40] sm:$0xf] }
  0x35   : > { %6243 = vmatprep.mubr.bf16.mxu0 %v5486_v61  ;;  %v2228_v11 = vor.u32 %v2227_v0, %v2224_v57  ;;  %v349_v17 = vrot.slane %v347_v7, 4  ;;  %v360_v18 = vshrl.u32 %v192_v59, 16  ;;  %v2246_v40 = vshrl.u32 %v5432_v9, 16 }
  0x36   : > { %6274 = vmatpush3.bf16.msra.mxu0 %v6762_v63  ;;  %v339_v63 = vor.u32 %v338_v49, %v334_v38  ;;  %v2243_v16 = vrot.slane %v2241_v6, 5  ;;  %v352_v25 = vrot.slane %v350_v12, 5  ;;  %v358_v26 = vrot.slane %v356_v13, 5 }
  0x37   : > { %6084 = vmatpush3.bf16.msra.mxu1 %v6766_v3  ;;  %6275 = vmatprep.subr.bf16.mxu0 %v6764_v4  ;;  %v2237_v3 = vrot.slane %v2235_v58, 4  ;;  %v2229_v22 = vrot.slane %v2228_v11, 4  ;;  %v362_v31 = vrot.slane %v360_v18, 4  ;;  %v2249_v42 = vshll.u32 %v5432_v9, 16  ;;  %v5435_v9 = vld [vmem:[%s7006_s10 + $0x48] sm:$0xf] }
  0x38   : > { %6085 = vmatprep.subr.bf16.mxu1 %v6769_v34  ;;  %v340_v10 = vrot.slane %v339_v63, 4  ;;  %v353_v39 = vor.u32 %v352_v25, %v349_v17  ;;  %v2255_v49 = vshll.u32 %v7156_v19, 16  ;;  %v2248_v53 = vrot.slane %v2246_v40, 4  ;;  %v236_v63 = vld [vmem:[%s7006_s10 + $0x44] sm:$0x1] }
  0x39   : > { %v2238_v15 = vor.u32 %v2237_v3, %v2233_v1  ;;  %v2234_v38 = vsel %vm7038_vm2, %v2229_v22, %v2233_v1  ;;  %v363_v44 = vor.u32 %v362_v31, %v358_v26  ;;  %v2251_v54 = vrot.slane %v2249_v42, 5  ;;  %v7197_v22 = vld [vmem:[%s7006_s10 + $0x50] sm:$0x1]  ;;  %v6771_v31 = vld [vmem:[%s8795_s1 + $0x178] sm:$0xff]  }
  0x3a   : > { %6276 = vmatpush3.bf16.msra.mxu0 %v6764_v4  ;;  %v345_v21 = vsel %vm7038_vm2, %v340_v10, %v344_v50  ;;  %v366_v4 = vshll.u32 %v235_v2, 16  ;;  %v354_v52 = vrot.slane %v353_v39, 4  ;;  %v2257_v57 = vrot.slane %v2255_v49, 5  ;;  %v6778_v2 = vld [vmem:[%s8795_s1 + $0x38] sm:$0xff]  }
  0x3b   : > { %6086 = vmatpush3.bf16.msra.mxu1 %v6769_v34  ;;  %6277 = vmatprep.subr.bf16.mxu0 %v6765_v48  ;;  %v5247_v29 = vcombine.low %v335_v5, %v345_v21  ;;  %v2239_v30 = vrot.slane %v2238_v15, 4  ;;  %v193_v34 = vld [vmem:[%s7006_s10 + $0x3c] sm:$0xf]  ;;  %v364_v56 = vrot.slane %v363_v44, 4  ;;  %v2259_v58 = vshrl.u32 %v7156_v19, 16  ;;  %v6770_v15 = vld [vmem:[%s8795_s1 + $0x170] sm:$0xff]  }
  0x3c   : > { %6087 = vmatprep.subr.bf16.mxu1 %v6772_v60  ;;  %v368_v47 = vrot.slane %v366_v4, 5  ;;  %v2265_v59 = vshll.u32 %v7164_v28, 16  ;;  %v2252_v61 = vor.u32 %v2251_v54, %v2248_v53  ;;  %v371_v0 = vshrl.u32 %v193_v34, 16  ;;  %v7208_v4 = vld [vmem:[%s8795_s1 + $0x80] sm:$0xff]   ;;  %v196_v53 = vld [vmem:[%s7006_s10 + $0x4c] sm:$0xf] }
  0x3d   : > { %6052 = vmatmul.mubr.bf16.gmra.mrb[4].mxu1 %v5247_v29  ;;  %v2244_v43 = vsel %vm7038_vm2, %v2239_v30, %v2243_v16  ;;  %v374_v1 = vshll.u32 %v193_v34, 16  ;;  %v2261_v3 = vrot.slane %v2259_v58, 4  ;;  %v380_v7 = vshll.u32 %v194_v55, 16  ;;  %v195_v30 = vld [vmem:[%s7006_s10 + $0x48] sm:$0xf] }
  0x3e   : > { %6278 = vmatpush3.bf16.msra.mxu0 %v6765_v48  ;;  %v5487_v50 = vcombine.low %v2234_v38, %v2244_v43  ;;  %v6768_v48 = vld [vmem:[%s8795_s1 + $0x168] sm:$0xff]   ;;  %v369_v5 = vsel %vm7038_vm2, %v364_v56, %v368_v47  ;;  %v2267_v6 = vrot.slane %v2265_v59, 5  ;;  %v2253_v11 = vrot.slane %v2252_v61, 4  ;;  %v237_v54 = vld [vmem:[%s7006_s10 + $0x50] sm:$0x1] }
  0x3f   : > { %6088 = vmatpush3.bf16.msra.mxu1 %v6772_v60  ;;  %6279 = vmatprep.subr.bf16.mxu0 %v6767_v20  ;;  %v359_v60 = vsel %vm7038_vm2, %v354_v52, %v358_v26  ;;  %v373_v12 = vrot.slane %v371_v0, 4  ;;  %v376_v13 = vrot.slane %v374_v1, 5  ;;  %v2262_v16 = vor.u32 %v2261_v3, %v2257_v57  ;;  %v5438_v58 = vld [vmem:[%s7006_s10 + $0x54] sm:$0xf]  ;;  %v7222_v0 = vld [vmem:[%s7006_s10 + $0x58] sm:$0xf] }
  0x40   : > { %6089 = vmatprep.subr.bf16.mxu1 %v6774_v14  ;;  %6244 = vmatmul.mubr.bf16.gmra.mrb[4].mxu0 %v5487_v50  ;;  %v5248_v10 = vcombine.low %v359_v60, %v369_v5  ;;  %v382_v17 = vrot.slane %v380_v7, 5  ;;  %v384_v18 = vshrl.u32 %v194_v55, 16  ;;  %v390_v21 = vshll.u32 %v236_v63, 16 }
  0x41   : > { %v377_v25 = vor.u32 %v376_v13, %v373_v12  ;;  %v2270_v26 = vshrl.u32 %v5435_v9, 16  ;;  %v2273_v29 = vshll.u32 %v5435_v9, 16  ;;  %v2263_v34 = vrot.slane %v2262_v16, 4 }
  0x42   : > { %6280 = vmatpush3.bf16.msra.mxu0 %v6767_v20  ;;  %6055 = vmatprep.mubr.bf16.mxu1 %v5248_v10  ;;  %v2258_v20 = vsel %vm7038_vm2, %v2253_v11, %v2257_v57  ;;  %v392_v38 = vrot.slane %v390_v21, 5  ;;  %v2289_v52 = vshll.u32 %v7197_v22, 16  ;;  %v395_v61 = vshrl.u32 %v195_v30, 16 }
  0x43   : > { %6090 = vmatpush3.bf16.msra.mxu1 %v6774_v14  ;;  %v7191_v14 = vld [vmem:[%s7006_s10 + $0x4c] sm:$0xf]  ;;  %6281 = vmatprep.subr.bf16.mxu0 %v6768_v48  ;;  %v378_v40 = vrot.slane %v377_v25, 4  ;;  %v2272_v42 = vrot.slane %v2270_v26, 4  ;;  %v2275_v43 = vrot.slane %v2273_v29, 5  ;;  %v2268_v47 = vsel %vm7038_vm2, %v2263_v34, %v2267_v6  ;;  %v7227_v6 = vld [vmem:[%s8795_s1 + $0x180] sm:$0xff]  }
  0x44   : > { %6091 = vmatprep.subr.bf16.mxu1 %v6776_v35  ;;  %v2279_v39 = vshll.u32 %v7191_v14, 16  ;;  %v2283_v44 = vshrl.u32 %v7191_v14, 16  ;;  %v5488_v55 = vcombine.low %v2258_v20, %v2268_v47  ;;  %v2291_v60 = vrot.slane %v2289_v52, 5  ;;  %v7234_v20 = vld [vmem:[%s7006_s10 + $0x5c] sm:$0x1] }
  0x45   : > { %v2276_v56 = vor.u32 %v2275_v43, %v2272_v42  ;;  %v398_v63 = vshll.u32 %v195_v30, 16  ;;  %v408_v3 = vshrl.u32 %v196_v53, 16  ;;  %v397_v9 = vrot.slane %v395_v61, 4  ;;  %v198_v43 = vld [vmem:[%s7006_s10 + $0x58] sm:$0xf] }
  0x46   : > { %6282 = vmatpush3.bf16.msra.mxu0 %v6768_v48  ;;  %v2281_v50 = vrot.slane %v2279_v39, 5  ;;  %v383_v48 = vsel %vm7038_vm2, %v378_v40, %v382_v17  ;;  %v2285_v57 = vrot.slane %v2283_v44, 4  ;;  %6247 = vmatprep.mubr.bf16.mxu0 %v5488_v55  ;;  %v414_v11 = vshll.u32 %v237_v54, 16  ;;  %v5441_v52 = vld [vmem:[%s7006_s10 + $0x60] sm:$0xf] }
  0x47   : > { %6092 = vmatpush3.bf16.msra.mxu1 %v6776_v35  ;;  %v386_v35 = vrot.slane %v384_v18, 4  ;;  %6283 = vmatprep.subr.bf16.mxu0 %v6770_v15  ;;  %v2277_v1 = vrot.slane %v2276_v56, 4  ;;  %v400_v10 = vrot.slane %v398_v63, 5  ;;  %v410_v18 = vrot.slane %v408_v3, 4 }
  0x48   : > { %6093 = vmatprep.subr.bf16.mxu1 %v6778_v2  ;;  %v2286_v5 = vor.u32 %v2285_v57, %v2281_v50  ;;  %v416_v21 = vrot.slane %v414_v11, 5  ;;  %v2294_v25 = vshrl.u32 %v5438_v58, 16  ;;  %v2297_v29 = vshll.u32 %v5438_v58, 16 }
  0x49   : > { %v387_v49 = vor.u32 %v386_v35, %v382_v17  ;;  %v2282_v13 = vsel %vm7038_vm2, %v2277_v1, %v2281_v50  ;;  %v401_v17 = vor.u32 %v400_v10, %v397_v9  ;;  %v2303_v30 = vshll.u32 %v7222_v0, 16  ;;  %v197_v35 = vld [vmem:[%s7006_s10 + $0x54] sm:$0xf]  ;;  %v238_v50 = vld [vmem:[%s7006_s10 + $0x5c] sm:$0x1] }
  0x4a   : > { %6284 = vmatpush3.bf16.msra.mxu0 %v6770_v15  ;;  %v2287_v15 = vrot.slane %v2286_v5, 4  ;;  %v2307_v34 = vshrl.u32 %v7222_v0, 16  ;;  %v2296_v42 = vrot.slane %v2294_v25, 4  ;;  %v419_v55 = vshrl.u32 %v197_v35, 16  ;;  %v7262_v25 = vld [vmem:[%s7006_s10 + $0x60] sm:$0xf] }
  0x4b   : > { %6094 = vmatpush3.bf16.msra.mxu1 %v6778_v2  ;;  %v388_v59 = vrot.slane %v387_v49, 4  ;;  %v404_v2 = vshll.u32 %v196_v53, 16  ;;  %6285 = vmatprep.subr.bf16.mxu0 %v6771_v31  ;;  %v402_v39 = vrot.slane %v401_v17, 4  ;;  %v2305_v44 = vrot.slane %v2303_v30, 5  ;;  %v7258_v17 = vld [vmem:[%s7006_s10 + $0x68] sm:$0x1] }
  0x4c   : > { %6127 = vmatprep.subr.bf16.mxu1 %v7208_v4  ;;  %v2292_v26 = vsel %vm7038_vm2, %v2287_v15, %v2291_v60  ;;  %v2309_v47 = vrot.slane %v2307_v34, 4  ;;  %v2313_v49 = vshll.u32 %v7234_v20, 16  ;;  %v7249_v60 = vld [vmem:[%s7006_s10 + $0x64] sm:$0xf]  ;;  %v421_v63 = vrot.slane %v419_v55, 4 }
  0x4d   : > { %v393_v7 = vsel %vm7038_vm2, %v388_v59, %v392_v38  ;;  %v406_v16 = vrot.slane %v404_v2, 5  ;;  %v5489_v38 = vcombine.low %v2282_v13, %v2292_v26  ;;  %v428_v59 = vshll.u32 %v198_v43, 16 }
  0x4e   : > { %v5249_v12 = vcombine.low %v383_v48, %v393_v7  ;;  %6286 = vmatpush3.bf16.msra.mxu0 %v6771_v31  ;;  %v2299_v31 = vrot.slane %v2297_v29, 5  ;;  %v422_v48 = vshll.u32 %v197_v35, 16  ;;  %v2310_v57 = vor.u32 %v2309_v47, %v2305_v44  ;;  %v7265_v35 = vld [vmem:[%s7006_s10 + $0x64] sm:$0xf] }
  0x4f   : > { %6319 = vmatprep.subr.bf16.mxu0 %v7227_v6  ;;  %v411_v40 = vor.u32 %v410_v18, %v406_v16  ;;  %6248 = vmatmul.mubr.bf16.gmra.mrb[8].mxu0 %v5489_v38  ;;  %v407_v53 = vsel %vm7038_vm2, %v402_v39, %v406_v16  ;;  %v2315_v58 = vrot.slane %v2313_v49, 5  ;;  %v432_v5 = vshrl.u32 %v198_v43, 16  ;;  %v239_v43 = vld [vmem:[%s7006_s10 + $0x68] sm:$0x1] }
  0x50   : > { %6056 = vmatmul.mubr.bf16.gmra.mrb[8].mxu1 %v5249_v12  ;;  %v2300_v56 = vor.u32 %v2299_v31, %v2296_v42  ;;  %v424_v1 = vrot.slane %v422_v48, 5  ;;  %v2311_v7 = vrot.slane %v2310_v57, 4  ;;  %v430_v9 = vrot.slane %v428_v59, 5 }
  0x51   : > { %v412_v54 = vrot.slane %v411_v40, 4  ;;  %v434_v11 = vrot.slane %v432_v5, 4  ;;  %v438_v12 = vshll.u32 %v238_v50, 16  ;;  %v2318_v13 = vshrl.u32 %v5441_v52, 16  ;;  %v5508_v50 = vld [vmem:[%s7006_s10 + $0xc] sm:$0xe] }
  0x52   : > { %v2301_v3 = vrot.slane %v2300_v56, 4  ;;  %v425_v10 = vor.u32 %v424_v1, %v421_v63  ;;  %v2316_v16 = vsel %vm7038_vm2, %v2311_v7, %v2315_v58  ;;  %v2321_v18 = vshll.u32 %v5441_v52, 16  ;;  %v7280_v5 = vld [vmem:[%s7006_s10 + $0x6c] sm:$0xf] }
  0x53   : > { %v417_v61 = vsel %vm7038_vm2, %v412_v54, %v416_v21  ;;  %v2327_v21 = vshll.u32 %v7249_v60, 16  ;;  %v435_v30 = vor.u32 %v434_v11, %v430_v9  ;;  %v440_v34 = vrot.slane %v438_v12, 5 }
  0x54   : > { %v5250_v2 = vcombine.low %v407_v53, %v417_v61  ;;  %v2306_v15 = vsel %vm7038_vm2, %v2301_v3, %v2305_v44  ;;  %v426_v29 = vrot.slane %v425_v10, 4  ;;  %v2320_v38 = vrot.slane %v2318_v13, 4 }
  0x55   : > { %v5490_v26 = vcombine.low %v2306_v15, %v2316_v16  ;;  %v2323_v39 = vrot.slane %v2321_v18, 5  ;;  %v2329_v40 = vrot.slane %v2327_v21, 5  ;;  %v2331_v42 = vshrl.u32 %v7249_v60, 16  ;;  %v7292_v21 = vld [vmem:[%s7006_s10 + $0x70] sm:$0xf] }
  0x56   : > { %6059 = vmatprep.mubr.bf16.mxu1 %v5250_v2  ;;  %v431_v31 = vsel %vm7038_vm2, %v426_v29, %v430_v9  ;;  %v436_v44 = vrot.slane %v435_v30, 4  ;;  %v2337_v47 = vshll.u32 %v7258_v17, 16  ;;  %v443_v49 = vshrl.u32 %v7262_v25, 16  ;;  %v6862_v9 = vld [vmem:[%s7006_s10 + $0xb4] sm:$0xff]  }
  0x57   : > { %6251 = vmatprep.mubr.bf16.mxu0 %v5490_v26  ;;  %v2324_v52 = vor.u32 %v2323_v39, %v2320_v38  ;;  %v2333_v53 = vrot.slane %v2331_v42, 4  ;;  %v446_v54 = vshll.u32 %v7262_v25, 16  ;;  %v452_v55 = vshll.u32 %v7265_v35, 16 }
  0x58   : > { %v441_v48 = vsel %vm7038_vm2, %v436_v44, %v440_v34  ;;  %v2339_v56 = vrot.slane %v2337_v47, 5  ;;  %v445_v57 = vrot.slane %v443_v49, 4  ;;  %v456_v58 = vshrl.u32 %v7265_v35, 16  ;;  %v7303_v47 = vld [vmem:[%s7006_s10 + $0x78] sm:$0xf] }
  0x59   : > { %v5251_v59 = vcombine.low %v431_v31, %v441_v48  ;;  %v2325_v61 = vrot.slane %v2324_v52, 4  ;;  %v2334_v63 = vor.u32 %v2333_v53, %v2329_v40  ;;  %v448_v1 = vrot.slane %v446_v54, 5  ;;  %v7314_v54 = vld [vmem:[%s7006_s10 + $0x7c] sm:$0xf] }
  0x5a   : > { %v454_v2 = vrot.slane %v452_v55, 5  ;;  %v458_v3 = vrot.slane %v456_v58, 4  ;;  %v462_v7 = vshll.u32 %v239_v43, 16  ;;  %v5524_v10 = vrot.slane %v5508_v50, 9  ;;  %v241_v58 = vld [vmem:[%s7006_s10 + $0x80] sm:$0x1] }
  0x5b   : > { %6060 = vmatmul.mubr.bf16.gmra.mrb[12].mxu1 %v5251_v59  ;;  %v2330_v11 = vsel %vm7038_vm2, %v2325_v61, %v2329_v40  ;;  %v2335_v12 = vrot.slane %v2334_v63, 4  ;;  %v449_v13 = vor.u32 %v448_v1, %v445_v57  ;;  %v2921_v15 = vrot.slane %v7019_v23, 5  ;;  %v240_v40 = vld [vmem:[%s7006_s10 + $0x74] sm:$0x1]  ;;  %v5509_v23 = vld [vmem:[%s7006_s10 + $0x18] sm:$0xe] }
  0x5c   : > { %v459_v16 = vor.u32 %v458_v3, %v454_v2  ;;  %v464_v18 = vrot.slane %v462_v7, 5  ;;  %v467_v26 = vshrl.u32 %v7280_v5, 16  ;;  %v470_v29 = vshll.u32 %v7280_v5, 16 }
  0x5d   : > { %v2340_v30 = vsel %vm7038_vm2, %v2335_v12, %v2339_v56  ;;  %v450_v34 = vrot.slane %v449_v13, 4  ;;  %v2922_v38 = vsel %vm7284_vm5, %v5524_v10, %v2921_v15  ;;  %v2923_v39 = vrot.slane %v2921_v15, 4  ;;  %v5510_v13 = vld [vmem:[%s7006_s10 + $0x24] sm:$0xe] }
  0x5e   : > { %v5491_v42 = vcombine.low %v2330_v11, %v2340_v30  ;;  %v460_v43 = vrot.slane %v459_v16, 4  ;;  %v469_v31 = vrot.slane %v467_v26, 4  ;;  %v472_v44 = vrot.slane %v470_v29, 5  ;;  %v7336_v16 = vld [vmem:[%s7006_s10 + $0x84] sm:$0xf]  ;;  %v6775_v29 = vld [vmem:[%s8795_s1 + $0x188] sm:$0xff]  }
  0x5f   : > { %v455_v49 = vsel %vm7038_vm2, %v450_v34, %v454_v2  ;;  %v2925_v50 = vsel %vm7284_vm5, %v2923_v39, %v2924_v41  ;;  %v476_v52 = vshll.u32 %v7292_v21, 16  ;;  %v480_v53 = vshrl.u32 %v7292_v21, 16 }
  0x60   : > { %6252 = vmatmul.mubr.bf16.gmra.mrb[12].mxu0 %v5491_v42  ;;  %v465_v55 = vsel %vm7038_vm2, %v460_v43, %v464_v18  ;;  %v5556_v48 = vcombine.low %v2922_v38, %v2925_v50  ;;  %v473_v56 = vor.u32 %v472_v44, %v469_v31  ;;  %v486_v57 = vshll.u32 %v240_v40, 16  ;;  %v7344_v40 = vld [vmem:[%s7006_s10 + $0x88] sm:$0xf]  ;;  %v242_v31 = vld [vmem:[%s7006_s10 + $0x8c] sm:$0x1] }
  0x61   : > { %v5252_v59 = vcombine.low %v455_v49, %v465_v55  ;;  %v478_v24 = vrot.slane %v476_v52, 5  ;;  %v482_v61 = vrot.slane %v480_v53, 4  ;;  %v5525_v63 = vrot.slane %v5509_v23, 9 }
  0x62   : > { %6287 = vmatprep.mubr.bf16.mxu0 %v5556_v48  ;;  %v474_v41 = vrot.slane %v473_v56, 4  ;;  %v488_v1 = vrot.slane %v486_v57, 5  ;;  %v2932_v2 = vsel %vm7284_vm5, %v7087_v36, %v2931_v32  ;;  %v491_v3 = vshrl.u32 %v7303_v47, 16 }
  0x63   : > { %6063 = vmatprep.mubr.bf16.mxu1 %v5252_v59  ;;  %v483_v7 = vor.u32 %v482_v61, %v478_v24  ;;  %v2929_v10 = vsel %vm7284_vm5, %v5525_v63, %v2928_v27  ;;  %v494_v11 = vshll.u32 %v7303_v47, 16  ;;  %v500_v12 = vshll.u32 %v7314_v54, 16 }
  0x64   : > { %v479_v8 = vsel %vm7038_vm2, %v474_v41, %v478_v24  ;;  %v5557_v15 = vcombine.low %v2929_v10, %v2932_v2  ;;  %v493_v32 = vrot.slane %v491_v3, 4  ;;  %v504_v36 = vshrl.u32 %v7314_v54, 16  ;;  %v7365_v2 = vld [vmem:[%s7006_s10 + $0x90] sm:$0xf]  ;;  %v7368_v3 = vld [vmem:[%s7006_s10 + $0x94] sm:$0xf] }
  0x65   : > { %v484_v62 = vrot.slane %v483_v7, 4  ;;  %v496_v18 = vrot.slane %v494_v11, 5  ;;  %v502_v26 = vrot.slane %v500_v12, 5  ;;  %v510_v27 = vshll.u32 %v241_v58, 16 }
  0x66   : > { %v506_v30 = vrot.slane %v504_v36, 4  ;;  %v5526_v34 = vrot.slane %v5510_v13, 9  ;;  %v2935_v38 = vrot.slane %v7091_v45, 5  ;;  %v2938_v39 = vrot.slane %v7097_v51, 5  ;;  %v5511_v45 = vld [vmem:[%s7006_s10 + $0x30] sm:$0xe] }
  0x67   : > { %v489_v23 = vsel %vm7038_vm2, %v484_v62, %v488_v1  ;;  %v497_v42 = vor.u32 %v496_v18, %v493_v32  ;;  %v512_v43 = vrot.slane %v510_v27, 5  ;;  %v515_v44 = vshrl.u32 %v7336_v16, 16  ;;  %v243_v62 = vld [vmem:[%s7006_s10 + $0x98] sm:$0x1] }
  0x68   : > { %v5253_v49 = vcombine.low %v479_v8, %v489_v23  ;;  %6288 = vmatmul.mubr.bf16.vlgmr.msra.gmra.mrb[0].mxu0 %v5557_v15  ;;  %v507_v50 = vor.u32 %v506_v30, %v502_v26  ;;  %v2936_v52 = vsel %vm7284_vm5, %v5526_v34, %v2935_v38  ;;  %v2937_v53 = vrot.slane %v2935_v38, 4  ;;  %v6779_v30 = vld [vmem:[%s8795_s1 + $0x198] sm:$0xff]  }
  0x69   : > { %6320 = vmatpush3.bf16.msra.mxu0 %v7227_v6  ;;  %v498_v51 = vrot.slane %v497_v42, 4  ;;  %v517_v55 = vrot.slane %v515_v44, 4  ;;  %v518_v48 = vshll.u32 %v7336_v16, 16  ;;  %v524_v56 = vshll.u32 %v7344_v40, 16  ;;  %v6777_v6 = vld [vmem:[%s8795_s1 + $0x190] sm:$0xff]  }
  0x6a   : > { %6064 = vmatmul.mubr.bf16.gmra.mrb[16].mxu1 %v5253_v49  ;;  %v508_v57 = vrot.slane %v507_v50, 4  ;;  %v2939_v58 = vsel %vm7284_vm5, %v2937_v53, %v2938_v39  ;;  %v528_v59 = vshrl.u32 %v7344_v40, 16  ;;  %v534_v24 = vshll.u32 %v242_v31, 16  ;;  %6321 = vmatprep.subr.bf16.mxu0 %v6775_v29  ;;  %v5512_v38 = vld [vmem:[%s7006_s10 + $0x3c] sm:$0xe] }
  0x6b   : > { %v503_v61 = vsel %vm7038_vm2, %v498_v51, %v502_v26  ;;  %v5558_v63 = vcombine.low %v2936_v52, %v2939_v58  ;;  %v520_v41 = vrot.slane %v518_v48, 5  ;;  %v526_v1 = vrot.slane %v524_v56, 5  ;;  %v7386_v31 = vld [vmem:[%s7006_s10 + $0x9c] sm:$0xf]  ;;  %v7395_v48 = vld [vmem:[%s7006_s10 + $0xa0] sm:$0xf] }
  0x6c   : > { %v513_v7 = vsel %vm7038_vm2, %v508_v57, %v512_v43  ;;  %v530_v10 = vrot.slane %v528_v59, 4  ;;  %v536_v11 = vrot.slane %v534_v24, 5  ;;  %v5527_v12 = vrot.slane %v5511_v45, 9  ;;  %v6783_v56 = vld [vmem:[%s8795_s1 + $0x1a0] sm:$0xff]  }
  0x6d   : > { %v5254_v13 = vcombine.low %v503_v61, %v513_v7  ;;  %6291 = vmatprep.mubr.bf16.mxu0 %v5558_v63  ;;  %v521_v8 = vor.u32 %v520_v41, %v517_v55  ;;  %v2942_v15 = vrot.slane %v7122_v33, 5  ;;  %v2945_v32 = vrot.slane %v7133_v46, 5  ;;  %6322 = vmatpush3.bf16.msra.mxu0 %v6775_v29  ;;  %v244_v61 = vld [vmem:[%s7006_s10 + $0xa4] sm:$0x1] }
  0x6e   : > { %v531_v36 = vor.u32 %v530_v10, %v526_v1  ;;  %v539_v18 = vshrl.u32 %v7365_v2, 16  ;;  %v542_v26 = vshll.u32 %v7365_v2, 16  ;;  %v548_v27 = vshll.u32 %v7368_v3, 16  ;;  %6323 = vmatprep.subr.bf16.mxu0 %v6777_v6 }
  0x6f   : > { %6067 = vmatprep.mubr.bf16.mxu1 %v5254_v13  ;;  %v522_v34 = vrot.slane %v521_v8, 4  ;;  %v2943_v33 = vsel %vm7284_vm5, %v5527_v12, %v2942_v15  ;;  %v2944_v46 = vrot.slane %v2942_v15, 4  ;;  %v552_v29 = vshrl.u32 %v7368_v3, 16  ;;  %v5513_v15 = vld [vmem:[%s7006_s10 + $0x48] sm:$0xe] }
  0x70   : > { %v532_v39 = vrot.slane %v531_v36, 4  ;;  %v541_v23 = vrot.slane %v539_v18, 4  ;;  %v544_v42 = vrot.slane %v542_v26, 5  ;;  %v550_v43 = vrot.slane %v548_v27, 5  ;;  %v7420_v27 = vld [vmem:[%s7006_s10 + $0xa8] sm:$0xf] }
  0x71   : > { %v527_v44 = vsel %vm7038_vm2, %v522_v34, %v526_v1  ;;  %v2946_v49 = vsel %vm7284_vm5, %v2944_v46, %v2945_v32  ;;  %v554_v50 = vrot.slane %v552_v29, 4  ;;  %v558_v52 = vshll.u32 %v243_v62, 16  ;;  %6324 = vmatpush3.bf16.msra.mxu0 %v6777_v6  ;;  %v6787_v32 = vld [vmem:[%s8795_s1 + $0x1a8] sm:$0xff]  }
  0x72   : > { %v537_v53 = vsel %vm7038_vm2, %v532_v39, %v536_v11  ;;  %v5559_v45 = vcombine.low %v2943_v33, %v2946_v49  ;;  %v545_v51 = vor.u32 %v544_v42, %v541_v23  ;;  %v5528_v55 = vrot.slane %v5512_v38, 9  ;;  %6325 = vmatprep.subr.bf16.mxu0 %v6779_v30  ;;  %v7423_v29 = vld [vmem:[%s7006_s10 + $0xac] sm:$0xf] }
  0x73   : > { %v5255_v57 = vcombine.low %v527_v44, %v537_v53  ;;  %v555_v58 = vor.u32 %v554_v50, %v550_v43  ;;  %v560_v59 = vrot.slane %v558_v52, 5  ;;  %v2949_v24 = vrot.slane %v7156_v19, 5  ;;  %v5514_v53 = vld [vmem:[%s7006_s10 + $0x54] sm:$0xe] }
  0x74   : > { %6292 = vmatmul.mubr.bf16.gmra.mrb[4].mxu0 %v5559_v45  ;;  %v546_v6 = vrot.slane %v545_v51, 4  ;;  %v2952_v63 = vrot.slane %v7164_v28, 5  ;;  %v563_v41 = vshrl.u32 %v7386_v31, 16  ;;  %v566_v1 = vshll.u32 %v7386_v31, 16  ;;  %v6791_v45 = vld [vmem:[%s8795_s1 + $0x1b0] sm:$0xff]  }
  0x75   : > { %6068 = vmatmul.mubr.bf16.gmra.mrb[20].mxu1 %v5255_v57  ;;  %v556_v7 = vrot.slane %v555_v58, 4  ;;  %v2950_v10 = vsel %vm7284_vm5, %v5528_v55, %v2949_v24  ;;  %v2951_v11 = vrot.slane %v2949_v24, 4  ;;  %v572_v12 = vshll.u32 %v7395_v48, 16  ;;  %6326 = vmatpush3.bf16.msra.mxu0 %v6779_v30 }
  0x76   : > { %v551_v19 = vsel %vm7038_vm2, %v546_v6, %v550_v43  ;;  %v565_v13 = vrot.slane %v563_v41, 4  ;;  %v568_v28 = vrot.slane %v566_v1, 5  ;;  %v576_v8 = vshrl.u32 %v7395_v48, 16  ;;  %6327 = vmatprep.subr.bf16.mxu0 %v6783_v56  ;;  %v245_v43 = vld [vmem:[%s7006_s10 + $0xb0] sm:$0x1] }
  0x77   : > { %v561_v36 = vsel %vm7038_vm2, %v556_v7, %v560_v59  ;;  %v2953_v62 = vsel %vm7284_vm5, %v2951_v11, %v2952_v63  ;;  %v574_v18 = vrot.slane %v572_v12, 5  ;;  %v582_v26 = vshll.u32 %v244_v61, 16  ;;  %v7443_v41 = vld [vmem:[%s7006_s10 + $0xb4] sm:$0xf]  ;;  %v7448_v12 = vld [vmem:[%s7006_s10 + $0xb8] sm:$0xf] }
  0x78   : > { %v5256_v30 = vcombine.low %v551_v19, %v561_v36  ;;  %v5560_v34 = vcombine.low %v2950_v10, %v2953_v62  ;;  %v569_v33 = vor.u32 %v568_v28, %v565_v13  ;;  %v578_v46 = vrot.slane %v576_v8, 4  ;;  %v246_v19 = vld [vmem:[%s7006_s10 + $0xbc] sm:$0x1] }
  0x79   : > { %v584_v38 = vrot.slane %v582_v26, 5  ;;  %v5529_v39 = vrot.slane %v5513_v15, 9  ;;  %v2956_v23 = vrot.slane %v7191_v14, 5  ;;  %v2959_v42 = vrot.slane %v7197_v22, 5  ;;  %6328 = vmatpush3.bf16.msra.mxu0 %v6783_v56  ;;  %v6795_v13 = vld [vmem:[%s8795_s1 + $0x1b8] sm:$0xff]  }
  0x7a   : > { %6071 = vmatprep.mubr.bf16.mxu1 %v5256_v30  ;;  %6295 = vmatprep.mubr.bf16.mxu0 %v5560_v34  ;;  %v570_v44 = vrot.slane %v569_v33, 4  ;;  %v579_v49 = vor.u32 %v578_v46, %v574_v18  ;;  %v587_v50 = vshrl.u32 %v7420_v27, 16  ;;  %v590_v52 = vshll.u32 %v7420_v27, 16  ;;  %v5515_v30 = vld [vmem:[%s7006_s10 + $0x60] sm:$0xe] }
  0x7b   : > { %v2957_v14 = vsel %vm7284_vm5, %v5529_v39, %v2956_v23  ;;  %v2958_v22 = vrot.slane %v2956_v23, 4  ;;  %v596_v51 = vshll.u32 %v7423_v29, 16  ;;  %v600_v55 = vshrl.u32 %v7423_v29, 16  ;;  %6329 = vmatprep.subr.bf16.mxu0 %v6787_v32  ;;  %v5445_v39 = vld [vmem:[%s7006_s10 + $0x70] sm:$0xf] }
  0x7c   : > { %v575_v56 = vsel %vm7038_vm2, %v570_v44, %v574_v18  ;;  %v580_v57 = vrot.slane %v579_v49, 4  ;;  %v589_v58 = vrot.slane %v587_v50, 4  ;;  %v592_v59 = vrot.slane %v590_v52, 5  ;;  %v7470_v44 = vld [vmem:[%s8795_s1 + $0x1c0] sm:$0xff]  }
  0x7d   : > { %v2960_v24 = vsel %vm7284_vm5, %v2958_v22, %v2959_v42  ;;  %v598_v61 = vrot.slane %v596_v51, 5  ;;  %v602_v6 = vrot.slane %v600_v55, 4  ;;  %v606_v63 = vshll.u32 %v245_v43, 16  ;;  %6330 = vmatpush3.bf16.msra.mxu0 %v6787_v32  ;;  %v5516_v43 = vld [vmem:[%s7006_s10 + $0x6c] sm:$0xe] }
  0x7e   : > { %v585_v1 = vsel %vm7038_vm2, %v580_v57, %v584_v38  ;;  %v5561_v7 = vcombine.low %v2957_v14, %v2960_v24  ;;  %v593_v10 = vor.u32 %v592_v59, %v589_v58  ;;  %v5530_v11 = vrot.slane %v5514_v53, 9  ;;  %6331 = vmatprep.subr.bf16.mxu0 %v6791_v45  ;;  %v5446_v55 = vld [vmem:[%s7006_s10 + $0x74] sm:$0x1]  ;;  %v5517_v24 = vld [vmem:[%s7006_s10 + $0x78] sm:$0xe] }
  0x7f   : > { %v5257_v28 = vcombine.low %v575_v56, %v585_v1  ;;  %v603_v8 = vor.u32 %v602_v6, %v598_v61  ;;  %v608_v15 = vrot.slane %v606_v63, 5  ;;  %v2963_v32 = vrot.slane %v7222_v0, 5 }
  0x80   : > { %6296 = vmatmul.mubr.bf16.gmra.mrb[8].mxu0 %v5561_v7  ;;  %v594_v36 = vrot.slane %v593_v10, 4  ;;  %v2966_v62 = vrot.slane %v7234_v20, 5  ;;  %v611_v18 = vshrl.u32 %v7443_v41, 16  ;;  %v614_v26 = vshll.u32 %v7443_v41, 16 }
  0x81   : > { %6072 = vmatmul.mubr.bf16.gmra.mrb[24].mxu1 %v5257_v28  ;;  %v604_v34 = vrot.slane %v603_v8, 4  ;;  %v2964_v33 = vsel %vm7284_vm5, %v5530_v11, %v2963_v32  ;;  %v2965_v46 = vrot.slane %v2963_v32, 4  ;;  %v620_v38 = vshll.u32 %v7448_v12, 16  ;;  %6332 = vmatpush3.bf16.msra.mxu0 %v6791_v45  ;;  %v7483_v11 = vld [vmem:[%s7006_s10 + $0x7c] sm:$0xf] }
  0x82   : > { %v599_v0 = vsel %vm7038_vm2, %v594_v36, %v598_v61  ;;  %v613_v20 = vrot.slane %v611_v18, 4  ;;  %v616_v23 = vrot.slane %v614_v26, 5  ;;  %v624_v42 = vshrl.u32 %v7448_v12, 16  ;;  %6333 = vmatprep.subr.bf16.mxu0 %v6795_v13  ;;  %v6864_v36 = vld [vmem:[%s7006_s10] sm:$0xf] }
  0x83   : > { %v609_v49 = vsel %vm7038_vm2, %v604_v34, %v608_v15  ;;  %v2967_v50 = vsel %vm7284_vm5, %v2965_v46, %v2966_v62  ;;  %v622_v52 = vrot.slane %v620_v38, 5  ;;  %v630_v53 = vshll.u32 %v246_v19, 16  ;;  %v5451_v15 = vld [vmem:[%s7006_s10 + $0x88] sm:$0xf]  ;;  %v7498_v62 = vld [vmem:[%s7006_s10 + $0x4] sm:$0xf] }
  0x84   : > { %v5258_v45 = vcombine.low %v599_v0, %v609_v49  ;;  %v5562_v14 = vcombine.low %v2964_v33, %v2967_v50  ;;  %v617_v22 = vor.u32 %v616_v23, %v613_v20  ;;  %v626_v51 = vrot.slane %v624_v42, 4  ;;  %v5452_v26 = vld [vmem:[%s7006_s10 + $0x8c] sm:$0x1]  ;;  %v5455_v23 = vld [vmem:[%s7006_s10 + $0x98] sm:$0x1] }
  0x85   : > { %v632_v56 = vrot.slane %v630_v53, 5  ;;  %v5531_v57 = vrot.slane %v5515_v30, 9  ;;  %v2970_v58 = vrot.slane %v7249_v60, 5  ;;  %v2973_v59 = vrot.slane %v7258_v17, 5  ;;  %6334 = vmatpush3.bf16.msra.mxu0 %v6795_v13  ;;  %v7486_v17 = vld [vmem:[%s7006_s10 + $0x80] sm:$0x1] }
  0x86   : > { %6075 = vmatprep.mubr.bf16.mxu1 %v5258_v45  ;;  %6299 = vmatprep.mubr.bf16.mxu0 %v5562_v14  ;;  %v618_v61 = vrot.slane %v617_v22, 4  ;;  %v627_v6 = vor.u32 %v626_v51, %v622_v52  ;;  %v5532_v63 = vrot.slane %v5516_v43, 9  ;;  %v2977_v1 = vrot.slane %v5445_v39, 5  ;;  %v5518_v30 = vld [vmem:[%s7006_s10 + $0x84] sm:$0xe] }
  0x87   : > { %v2971_v7 = vsel %vm7284_vm5, %v5531_v57, %v2970_v58  ;;  %v2972_v10 = vrot.slane %v2970_v58, 4  ;;  %v2980_v60 = vrot.slane %v5446_v55, 5  ;;  %6367 = vmatprep.subr.bf16.mxu0 %v7470_v44  ;;  %v5268_v18 = vcombine.low %v6864_v36, %v7498_v62  ;;  %v5454_v39 = vld [vmem:[%s7006_s10 + $0x94] sm:$0xf]  ;;  %v5519_v42 = vld [vmem:[%s7006_s10 + $0x90] sm:$0xe] }
  0x88   : > { %v623_v19 = vsel %vm7038_vm2, %v618_v61, %v622_v52  ;;  %v628_v13 = vrot.slane %v627_v6, 4  ;;  %v2978_v28 = vsel %vm7284_vm5, %v5532_v63, %v2977_v1  ;;  %v2979_v8 = vrot.slane %v2977_v1, 4  ;;  %v5520_v50 = vld [vmem:[%s7006_s10 + $0x9c] sm:$0xe]  ;;  %v5457_v14 = vld [vmem:[%s7006_s10 + $0xa0] sm:$0xf] }
  0x89   : > { %v2974_v32 = vsel %vm7284_vm5, %v2972_v10, %v2973_v59  ;;  %v5533_v38 = vrot.slane %v5517_v24, 9  ;;  %v2984_v43 = vrot.slane %v7483_v11, 5  ;;  %v2987_v49 = vrot.slane %v7486_v17, 5  ;;  %v5458_v22 = vld [vmem:[%s7006_s10 + $0xa4] sm:$0x1] }
  0x8a   : > { %v633_v34 = vsel %vm7038_vm2, %v628_v13, %v632_v56  ;;  %v5563_v33 = vcombine.low %v2971_v7, %v2974_v32  ;;  %v2981_v46 = vsel %vm7284_vm5, %v2979_v8, %v2980_v60  ;;  %v5534_v52 = vrot.slane %v5518_v30, 9  ;;  %v5460_v59 = vld [vmem:[%s7006_s10 + $0xac] sm:$0xf]  ;;  %v7522_v61 = vld [vmem:[%s7006_s10 + $0x10] sm:$0xf] }
  0x8b   : > { %v5259_v0 = vcombine.low %v623_v19, %v633_v34  ;;  %v5564_v20 = vcombine.low %v2978_v28, %v2981_v46  ;;  %v2991_v53 = vrot.slane %v5451_v15, 5  ;;  %v2994_v45 = vrot.slane %v5452_v26, 5  ;;  %v6866_v24 = vld [vmem:[%s7006_s10 + $0xc] sm:$0xf]  ;;  %v6868_v8 = vld [vmem:[%s7006_s10 + $0x18] sm:$0xf] }
  0x8c   : > { %6300 = vmatmul.mubr.bf16.gmra.mrb[12].mxu0 %v5563_v33  ;;  %v2985_v51 = vsel %vm7284_vm5, %v5533_v38, %v2984_v43  ;;  %v2986_v55 = vrot.slane %v2984_v43, 4  ;;  %v2998_v58 = vrot.slane %v5454_v39, 5  ;;  %v5269_v6 = vcombine.low %v6866_v24, %v7522_v61  ;;  %v6786_v19 = vld [vmem:[%s8795_s1 + $0x88] sm:$0xff]   ;;  %v7534_v15 = vld [vmem:[%s7006_s10 + $0x1c] sm:$0xf] }
  0x8d   : > { %6076 = vmatmul.mubr.bf16.gmra.mrb[28].mxu1 %v5259_v0  ;;  %6303 = vmatprep.mubr.bf16.mxu0 %v5564_v20  ;;  %v2992_v56 = vsel %vm7284_vm5, %v5534_v52, %v2991_v53  ;;  %v2993_v57 = vrot.slane %v2991_v53, 4  ;;  %v5535_v1 = vrot.slane %v5519_v42, 9  ;;  %v3001_v7 = vrot.slane %v5455_v23, 5  ;;  %v5461_v30 = vld [vmem:[%s7006_s10 + $0xb0] sm:$0x1] }
  0x8e   : > { %6095 = vmatprep.mubr.bf16.mxu1 %v5268_v18  ;;  %v2988_v63 = vsel %vm7284_vm5, %v2986_v55, %v2987_v49  ;;  %v3000_v13 = vrot.slane %v2998_v58, 4  ;;  %v5536_v28 = vrot.slane %v5520_v50, 9  ;;  %v5270_v32 = vcombine.low %v6868_v8, %v7534_v15  ;;  %v5521_v34 = vld [vmem:[%s7006_s10 + $0xa8] sm:$0xe]  ;;  %v5463_v33 = vld [vmem:[%s7006_s10 + $0xb8] sm:$0xf] }
  0x8f   : > { %v5565_v10 = vcombine.low %v2985_v51, %v2988_v63  ;;  %v2995_v60 = vsel %vm7284_vm5, %v2993_v57, %v2994_v45  ;;  %v3005_v18 = vrot.slane %v5457_v14, 5  ;;  %v3008_v26 = vrot.slane %v5458_v22, 5  ;;  %v5464_v20 = vld [vmem:[%s7006_s10 + $0xbc] sm:$0x1]  ;;  %v5522_v23 = vld [vmem:[%s7006_s10 + $0xb4] sm:$0xe] }
  0x90   : > { %v5566_v36 = vcombine.low %v2992_v56, %v2995_v60  ;;  %v3012_v38 = vrot.slane %v5460_v59, 5  ;;  %v2999_v39 = vsel %vm7284_vm5, %v5535_v1, %v2998_v58  ;;  %v3002_v0 = vsel %vm7284_vm5, %v3000_v13, %v3001_v7  ;;  %v6790_v50 = vld [vmem:[%s8795_s1 + $0x90] sm:$0xff]   ;;  %v5466_v53 = vld [vmem:[%s7006_s10 + $0xc4] sm:$0xf]  ;;  %v7557_v51 = vld [vmem:[%s7006_s10 + $0x28] sm:$0xf] }
  0x91   : > { %v3007_v46 = vrot.slane %v3005_v18, 4  ;;  %v3006_v42 = vsel %vm7284_vm5, %v5536_v28, %v3005_v18  ;;  %v3019_v49 = vrot.slane %v5463_v33, 5  ;;  %v5537_v52 = vrot.slane %v5521_v34, 9  ;;  %v6870_v22 = vld [vmem:[%s7006_s10 + $0x24] sm:$0xf]  ;;  %v6794_v1 = vld [vmem:[%s8795_s1 + $0x98] sm:$0xff]  }
  0x92   : > { %v5567_v45 = vcombine.low %v2999_v39, %v3002_v0  ;;  %v3014_v14 = vrot.slane %v3012_v38, 4  ;;  %v5271_v55 = vcombine.low %v6870_v22, %v7557_v51  ;;  %v6872_v57 = vld [vmem:[%s7006_s10 + $0x30] sm:$0xf]  ;;  %v7562_v58 = vld [vmem:[%s7006_s10 + $0x34] sm:$0xf]  ;;  %v5538_v24 = vrot.slane %v5522_v23, 9 }
  0x93   : > { %v3009_v43 = vsel %vm7284_vm5, %v3007_v46, %v3008_v26  ;;  %v5272_v59 = vcombine.low %v6872_v57, %v7562_v58  ;;  %v3022_v63 = vrot.slane %v5464_v20, 5  ;;  %v5523_v7 = vld [vmem:[%s7006_s10 + $0xc0] sm:$0xe]  ;;  %v3013_v60 = vsel %vm7284_vm5, %v5537_v52, %v3012_v38  ;;  %v5467_v8 = vld [vmem:[%s7006_s10 + $0xc8] sm:$0x1]  ;;  %v6797_v22 = vld [vmem:[%s7006_s10 + $0x18] sm:$0xff]  }
  0x94   : > { %6304 = vmatmul.mubr.bf16.gmra.mrb[16].mxu0 %v5565_v10  ;;  %v5568_v56 = vcombine.low %v3006_v42, %v3009_v43  ;;  %v3026_v10 = vrot.slane %v5466_v53, 5  ;;  %v3020_v13 = vsel %vm7284_vm5, %v5538_v24, %v3019_v49  ;;  %v5539_v18 = vrot.slane %v5523_v7, 9  ;;  %v6874_v26 = vld [vmem:[%s7006_s10 + $0x3c] sm:$0xf]  ;;  %v6876_v39 = vld [vmem:[%s7006_s10 + $0x48] sm:$0xf] }
  0x95   : > { %6096 = vmatmul.mubr.bf16.vlgmr.msra.gmra.mrb[0].mxu1 %v5269_v6  ;;  %6307 = vmatprep.mubr.bf16.mxu0 %v5566_v36  ;;  %v3021_v6 = vrot.slane %v3019_v49, 4  ;;  %v3029_v38 = vrot.slane %v5467_v8, 5  ;;  %v7588_v0 = vld [vmem:[%s7006_s10 + $0x4c] sm:$0xf]  ;;  %v6811_v49 = vld [vmem:[%s8795_s1 + $0xb0] sm:$0xff]   ;;  %v2379_v52 = vshrl.u32 %v7483_v11, 16 }
  0x96   : > { %6128 = vmatpush3.bf16.msra.mxu1 %v7208_v4  ;;  %6099 = vmatprep.mubr.bf16.mxu1 %v5270_v32  ;;  %v3015_v4 = vrot.slane %v5461_v30, 5  ;;  %v6799_v32 = vld [vmem:[%s8795_s1 + $0xa0] sm:$0xff]   ;;  %v3028_v46 = vrot.slane %v3026_v10, 4  ;;  %v5274_v20 = vcombine.low %v6876_v39, %v7588_v0  ;;  %v6805_v23 = vld [vmem:[%s8795_s1 + $0xa8] sm:$0xff]   ;;  %v3027_v42 = vsel %vm7284_vm5, %v5539_v18, %v3026_v10  ;;  %v6803_v18 = vld [vmem:[%s7006_s10 + $0x30] sm:$0xff]  }
  0x97   : > { %6129 = vmatprep.subr.bf16.mxu1 %v6786_v19  ;;  %v3023_v28 = vsel %vm7284_vm5, %v3021_v6, %v3022_v63  ;;  %v7583_v30 = vld [vmem:[%s7006_s10 + $0x40] sm:$0xf]  ;;  %v7616_v57 = vrot.slane %v2379_v52, 4  ;;  %v6800_v6 = vld [vmem:[%s7006_s10 + $0x24] sm:$0xff]   ;;  %v1289_v7 = vrot.slane %v7522_v61, 5  ;;  %v2385_v8 = vshll.u32 %v7486_v17, 16 }
  0x98   : > { %v5273_v34 = vcombine.low %v6874_v26, %v7583_v30  ;;  %v5570_v33 = vcombine.low %v3020_v13, %v3023_v28  ;;  %v3030_v43 = vsel %vm7284_vm5, %v3028_v46, %v3029_v38  ;;  %v1229_v63 = vld [vmem:[%s7006_s10] sm:$0xe]  ;;  %v1230_v10 = vld [vmem:[%s7006_s10 + $0xc] sm:$0xe]  ;;  %v1296_v13 = vrot.slane %v7534_v15, 5 }
  0x99   : > { %v5571_v53 = vcombine.low %v3027_v42, %v3030_v43  ;;  %v1232_v61 = vld [vmem:[%s7006_s10 + $0x24] sm:$0xe]  ;;  %v5279_v15 = vcombine.low %v7336_v16, %v7344_v40  ;;  %v5280_v26 = vcombine.low %v7365_v2, %v7368_v3  ;;  %v5292_v17 = vrot.slane %v1229_v63, 9  ;;  %v6882_v38 = vld [vmem:[%s7006_s10 + $0x20] sm:$0x1]  ;;  %v6812_v2 = vld [vmem:[%s7006_s10 + $0x54] sm:$0xff]  }
  0x9a   : > { %6130 = vmatpush3.bf16.msra.mxu1 %v6786_v19  ;;  %v3016_v19 = vsel %vm7284_vm5, %v3014_v14, %v3015_v4  ;;  %v7605_v14 = vld [vmem:[%s7006_s10 + $0x58] sm:$0xf]  ;;  %v1298_v46 = vrot.slane %v1296_v13, 4  ;;  %v1299_v39 = vrot.slane %v6882_v38, 5  ;;  %v6883_v43 = vld [vmem:[%s7006_s10 + $0x2c] sm:$0x1] }
  0x9b   : > { %6131 = vmatprep.subr.bf16.mxu1 %v6790_v50  ;;  %v5569_v36 = vcombine.low %v3013_v60, %v3016_v19  ;;  %v7631_v60 = vld [vmem:[%s8795_s1 + $0xc0] sm:$0xff]   ;;  %v1231_v19 = vld [vmem:[%s7006_s10 + $0x18] sm:$0xe]  ;;  %v6886_v38 = vld [vmem:[%s7006_s10 + $0x50] sm:$0x1]  ;;  %v1331_v16 = vrot.slane %v7605_v14, 5 }
  0x9c   : > { %6308 = vmatmul.mubr.bf16.gmra.mrb[20].mxu0 %v5567_v45  ;;  %v6878_v45 = vld [vmem:[%s7006_s10 + $0x54] sm:$0xf]  ;;  %v7754_v40 = vld [vmem:[%s7006_s10 + $0x64] sm:$0xf] }
  0x9d   : > { %6100 = vmatmul.mubr.bf16.gmra.mrb[4].mxu1 %v5271_v55  ;;  %6311 = vmatprep.mubr.bf16.mxu0 %v5568_v56  ;;  %v5275_v4 = vcombine.low %v6878_v45, %v7605_v14  ;;  %v5276_v55 = vcombine.low %v7262_v25, %v7265_v35  ;;  %v6817_v56 = vld [vmem:[%s8795_s1 + $0xb8] sm:$0xff]   ;;  %v6881_v25 = vld [vmem:[%s7006_s10 + $0x14] sm:$0x1]  ;;  %v6815_v3 = vld [vmem:[%s7006_s10 + $0x60] sm:$0xff]  }
  0x9e   : > { %6103 = vmatprep.mubr.bf16.mxu1 %v5272_v59  ;;  %6132 = vmatpush3.bf16.msra.mxu1 %v6790_v50  ;;  %v2375_v50 = vshll.u32 %v7483_v11, 16  ;;  %v7619_v59 = vld [vmem:[%s7006_s10 + $0x8] sm:$0x1]  ;;  %v1292_v35 = vrot.slane %v6881_v25, 5 }
  0x9f   : > { %6133 = vmatprep.subr.bf16.mxu1 %v6794_v1  ;;  %v1285_v24 = vrot.slane %v7619_v59, 5 }
  0xa0   : > { %v7614_v11 = vrot.slane %v2375_v50, 5 }
  0xa2   : > { %6134 = vmatpush3.bf16.msra.mxu1 %v6794_v1  ;;  %v1282_v1 = vrot.slane %v7498_v62, 5  ;;  %v5277_v62 = vcombine.low %v7280_v5, %v7292_v21  ;;  %v5293_v21 = vrot.slane %v1230_v10, 9  ;;  %v5652_v10 = vld [vmem:[%s7006_s10 + $0x18] sm:$0xf] }
  0xa3   : > { %6135 = vmatprep.subr.bf16.mxu1 %v6799_v32 }
  0xa4   : > { %6312 = vmatmul.mubr.bf16.gmra.mrb[24].mxu0 %v5569_v36  ;;  %v5278_v36 = vcombine.low %v7303_v47, %v7314_v54  ;;  %v1284_v5 = vrot.slane %v1282_v1, 4  ;;  %v6807_v47 = vld [vmem:[%s8795_s1 + $0x1c8] sm:$0xff]   ;;  %v5294_v54 = vrot.slane %v1231_v19, 9  ;;  %v7674_v59 = vsel %vm7284_vm5, %v5292_v17, %v1282_v1  ;;  %v5653_v19 = vld [vmem:[%s7006_s10 + $0x1c] sm:$0xf] }
  0xa5   : > { %6104 = vmatmul.mubr.bf16.gmra.mrb[8].mxu1 %v5273_v34  ;;  %6315 = vmatprep.mubr.bf16.mxu0 %v5570_v33  ;;  %v1310_v34 = vrot.slane %v7562_v58, 5  ;;  %v1291_v33 = vrot.slane %v1289_v7, 4  ;;  %v5295_v58 = vrot.slane %v1232_v61, 9  ;;  %v1324_v1 = vrot.slane %v7588_v0, 5  ;;  %v6809_v0 = vld [vmem:[%s7006_s10 + $0x48] sm:$0xff]  }
  0xa6   : > { %6107 = vmatprep.mubr.bf16.mxu1 %v5274_v20  ;;  %6136 = vmatpush3.bf16.msra.mxu1 %v6799_v32  ;;  %v1303_v32 = vrot.slane %v7557_v51, 5  ;;  %v1233_v51 = vld [vmem:[%s7006_s10 + $0x30] sm:$0xe]  ;;  %v5281_v20 = vcombine.low %v7386_v31, %v7395_v48  ;;  %v7682_v25 = vsel %vm7284_vm5, %v1284_v5, %v1285_v24  ;;  %v7690_v63 = vsel %vm7284_vm5, %v5294_v54, %v1296_v13  ;;  %v1235_v13 = vld [vmem:[%s7006_s10 + $0x48] sm:$0xe] }
  0xa7   : > { %6137 = vmatprep.subr.bf16.mxu1 %v6805_v23  ;;  %v5296_v50 = vrot.slane %v1233_v51, 9  ;;  %v1312_v52 = vrot.slane %v1310_v34, 4  ;;  %v3789_v5 = vshrl.u32 %v5652_v10, 16  ;;  %v3802_v51 = vshrl.u32 %v5653_v19, 16  ;;  %v6818_v48 = vld [vmem:[%s7006_s10 + $0x6c] sm:$0xff]  }
  0xa8   : > { %v1305_v42 = vrot.slane %v1303_v32, 4  ;;  %v7702_v24 = vsel %vm7284_vm5, %v5295_v58, %v1303_v32  ;;  %v6885_v32 = vld [vmem:[%s7006_s10 + $0x44] sm:$0x1]  ;;  %v5298_v54 = vrot.slane %v1235_v13, 9  ;;  %v5656_v13 = vld [vmem:[%s7006_s10 + $0x28] sm:$0xf] }
  0xa9   : > { %v7712_v61 = vsel %vm7284_vm5, %v5296_v50, %v1310_v34  ;;  %v1320_v17 = vrot.slane %v6885_v32, 5  ;;  %v5654_v50 = vld [vmem:[%s7006_s10 + $0x20] sm:$0x1]  ;;  %v1237_v32 = vld [vmem:[%s7006_s10 + $0x60] sm:$0xe] }
  0xaa   : > { %6138 = vmatpush3.bf16.msra.mxu1 %v6805_v23  ;;  %v5282_v23 = vcombine.low %v7420_v27, %v7423_v29 }
  0xab   : > { %6139 = vmatprep.subr.bf16.mxu1 %v6811_v49 }
  0xac   : > { %6316 = vmatmul.mubr.bf16.gmra.mrb[28].mxu0 %v5571_v53  ;;  %v6884_v53 = vld [vmem:[%s7006_s10 + $0x38] sm:$0x1] }
  0xad   : > { %6108 = vmatmul.mubr.bf16.gmra.mrb[12].mxu1 %v5275_v4  ;;  %6335 = vmatprep.mubr.bf16.mxu0 %v6797_v22  ;;  %v1313_v45 = vrot.slane %v6884_v53, 5  ;;  %v1234_v4 = vld [vmem:[%s7006_s10 + $0x3c] sm:$0xe]  ;;  %v1317_v22 = vrot.slane %v7583_v30, 5  ;;  %v7678_v30 = vsel %vm7284_vm5, %v5293_v21, %v1289_v7  ;;  %v3792_v21 = vshll.u32 %v5652_v10, 16  ;;  %v6823_v53 = vld [vmem:[%s8795_s1 + $0x1e0] sm:$0xff]  }
  0xae   : > { %6111 = vmatprep.mubr.bf16.mxu1 %v5276_v55  ;;  %6140 = vmatpush3.bf16.msra.mxu1 %v6811_v49  ;;  %v1306_v49 = vrot.slane %v6883_v43, 5  ;;  %v7665_v55 = vrot.slane %v2385_v8, 5  ;;  %v6806_v7 = vld [vmem:[%s7006_s10 + $0x3c] sm:$0xff]   ;;  %v7698_v8 = vsel %vm7284_vm5, %v1298_v46, %v1299_v39  ;;  %v1326_v46 = vrot.slane %v1324_v1, 4  ;;  %v5658_v43 = vld [vmem:[%s7006_s10 + $0x30] sm:$0xf] }
  0xaf   : > { %6141 = vmatprep.subr.bf16.mxu1 %v6817_v56  ;;  %v1327_v39 = vrot.slane %v6886_v38, 5  ;;  %v3791_v10 = vrot.slane %v3789_v5, 4 }
  0xb0   : > { %8816 = vst [vmem:[#allocation2_spill] sm:$0xff] %v7665_v55 }
  0xb2   : > { %6142 = vmatpush3.bf16.msra.mxu1 %v6817_v56  ;;  %v6813_v56 = vld [vmem:[%s8795_s1 + $0x1d0] sm:$0xff]  }
  0xb3   : > { %6175 = vmatprep.subr.bf16.mxu1 %v7631_v60 }
  0xb4   : > { %6336 = vmatmul.mubr.bf16.vlgmr.msra.gmra.mrb[0].mxu0 %v6800_v6  ;;  %v7686_v6 = vsel %vm7284_vm5, %v1291_v33, %v1292_v35  ;;  %v7706_v35 = vsel %vm7284_vm5, %v1305_v42, %v1306_v49  ;;  %v3798_v33 = vshll.u32 %v5653_v19, 16  ;;  %v3794_v19 = vrot.slane %v3792_v21, 5  ;;  %v1238_v21 = vld [vmem:[%s7006_s10 + $0x6c] sm:$0xe] }
  0xb5   : > { %6112 = vmatmul.mubr.bf16.gmra.mrb[16].mxu1 %v5277_v62  ;;  %6368 = vmatpush3.bf16.msra.mxu0 %v7470_v44  ;;  %v5297_v62 = vrot.slane %v1234_v4, 9  ;;  %v5301_v58 = vrot.slane %v1238_v21, 9 }
  0xb6   : > { %6115 = vmatprep.mubr.bf16.mxu1 %v5278_v36  ;;  %6339 = vmatprep.mubr.bf16.mxu0 %v6803_v18  ;;  %v7716_v36 = vsel %vm7284_vm5, %v1312_v52, %v1313_v45  ;;  %v1319_v18 = vrot.slane %v1317_v22, 4  ;;  %v5655_v52 = vld [vmem:[%s7006_s10 + $0x24] sm:$0xf]  ;;  %v3826_v45 = vshrl.u32 %v5656_v13, 16 }
  0xb7   : > { %6369 = vmatprep.subr.bf16.mxu0 %v6807_v47  ;;  %v7733_v49 = vsel %vm7284_vm5, %v5297_v62, %v1317_v22  ;;  %v7750_v22 = vld [vmem:[%s7006_s10 + $0x54] sm:$0xe]  ;;  %v3804_v62 = vrot.slane %v3802_v51, 4  ;;  %v3813_v38 = vshrl.u32 %v5655_v52, 16  ;;  %v3816_v28 = vshll.u32 %v5655_v52, 16 }
  0xb8   : > { %v7747_v4 = vsel %vm7284_vm5, %v1319_v18, %v1320_v17  ;;  %v3808_v17 = vshll.u32 %v5654_v50, 16  ;;  %v5299_v5 = vrot.slane %v7750_v22, 9  ;;  %v6827_v50 = vld [vmem:[%s8795_s1 + $0x1e8] sm:$0xff]   ;;  %v1333_v52 = vrot.slane %v1331_v16, 4 }
  0xb9   : > { %6370 = vmatpush3.bf16.msra.mxu0 %v6807_v47  ;;  %v6819_v47 = vld [vmem:[%s8795_s1 + $0x1d8] sm:$0xff]   ;;  %v3795_v22 = vor.u32 %v3794_v19, %v3791_v10  ;;  %v3815_v34 = vrot.slane %v3813_v38, 4  ;;  %v3818_v44 = vrot.slane %v3816_v28, 5  ;;  %v6891_v10 = vld [vmem:[%s7006_s10 + $0x74] sm:$0x1]  ;;  %v3828_v28 = vrot.slane %v3826_v45, 4 }
  0xba   : > { %6371 = vmatprep.subr.bf16.mxu0 %v6813_v56  ;;  %v7788_v42 = vrot.slane %v3808_v17, 5  ;;  %v1348_v19 = vrot.slane %v6891_v10, 5  ;;  %v3837_v38 = vshrl.u32 %v5658_v43, 16  ;;  %v7813_v27 = vsel %vm7284_vm5, %v5299_v5, %v1331_v16 }
  0xbb   : > { %v3796_v21 = vrot.slane %v3795_v22, 4 }
  0xbc   : > { %6340 = vmatmul.mubr.bf16.gmra.mrb[4].mxu0 %v6806_v7  ;;  %v7760_v7 = vrot.slane %v3798_v33, 5  ;;  %v6889_v33 = vld [vmem:[%s7006_s10 + $0x70] sm:$0xf] }
  0xbd   : > { %6116 = vmatmul.mubr.bf16.gmra.mrb[20].mxu1 %v5279_v15  ;;  %6343 = vmatprep.mubr.bf16.mxu0 %v6809_v0  ;;  %v1338_v15 = vrot.slane %v7754_v40, 5  ;;  %v6888_v0 = vld [vmem:[%s7006_s10 + $0x5c] sm:$0x1]  ;;  %v1345_v51 = vrot.slane %v6889_v33, 5 }
  0xbe   : > { %6119 = vmatprep.mubr.bf16.mxu1 %v5280_v26  ;;  %6372 = vmatpush3.bf16.msra.mxu0 %v6813_v56  ;;  %v1334_v18 = vrot.slane %v6888_v0, 5  ;;  %v7769_v26 = vsel %vm7284_vm5, %v5298_v54, %v1324_v1  ;;  %v7773_v56 = vsel %vm7284_vm5, %v1326_v46, %v1327_v39  ;;  %v6890_v1 = vld [vmem:[%s7006_s10 + $0x68] sm:$0x1]  ;;  %v3822_v0 = vshll.u32 %v5656_v13, 16  ;;  %v6835_v40 = vld [vmem:[%s8795_s1 + $0x1f8] sm:$0xff]  }
  0xbf   : > { %6373 = vmatprep.subr.bf16.mxu0 %v6819_v47  ;;  %v1341_v54 = vrot.slane %v6890_v1, 5  ;;  %v5300_v46 = vrot.slane %v1237_v32, 9  ;;  %v1340_v39 = vrot.slane %v1338_v15, 4  ;;  %v3805_v33 = vor.u32 %v3804_v62, %v7760_v7  ;;  %v5659_v1 = vld [vmem:[%s7006_s10 + $0x34] sm:$0xf] }
  0xc0   : > { %v1347_v32 = vrot.slane %v1345_v51, 4  ;;  %v5657_v62 = vld [vmem:[%s7006_s10 + $0x2c] sm:$0x1]  ;;  %v7800_v17 = vrot.slane %v3822_v0, 5  ;;  %v3846_v13 = vshll.u32 %v5659_v1, 16  ;;  %v3850_v31 = vshrl.u32 %v5659_v1, 16 }
  0xc1   : > { %v3806_v10 = vrot.slane %v3805_v33, 4  ;;  %v7817_v29 = vsel %vm7284_vm5, %v1333_v52, %v1334_v18  ;;  %v7824_v45 = vsel %vm7284_vm5, %v5300_v46, %v1338_v15  ;;  %v7828_v14 = vsel %vm7284_vm5, %v1340_v39, %v1341_v54  ;;  %v1239_v18 = vld [vmem:[%s7006_s10 + $0x78] sm:$0xe] }
  0xc2   : > { %6374 = vmatpush3.bf16.msra.mxu0 %v6819_v47  ;;  %v7832_v16 = vsel %vm7284_vm5, %v5301_v58, %v1345_v51  ;;  %v7842_v15 = vsel %vm7284_vm5, %v1347_v32, %v1348_v19  ;;  %v3829_v5 = vor.u32 %v3828_v28, %v7800_v17  ;;  %v3839_v52 = vrot.slane %v3837_v38, 4  ;;  %v5661_v58 = vld [vmem:[%s7006_s10 + $0x3c] sm:$0xf]  ;;  %v5662_v51 = vld [vmem:[%s7006_s10 + $0x40] sm:$0xf] }
  0xc3   : > { %6375 = vmatprep.subr.bf16.mxu0 %v6823_v53  ;;  %v3801_v0 = vsel %vm7038_vm2, %v3796_v21, %v7760_v7  ;;  %v3811_v46 = vsel %vm7038_vm2, %v3806_v10, %v7788_v42  ;;  %v7853_v39 = vrot.slane %v3846_v13, 5  ;;  %v3852_v22 = vrot.slane %v3850_v31, 4  ;;  %v6893_v19 = vld [vmem:[%s7006_s10 + $0x80] sm:$0x1]  ;;  %v8012_v47 = vld [vmem:[%s7006_s10 + $0x68] sm:$0x1] }
  0xc4   : > { %6344 = vmatmul.mubr.bf16.gmra.mrb[8].mxu0 %v6812_v2  ;;  %v3840_v2 = vshll.u32 %v5658_v43, 16  ;;  %v3832_v43 = vshll.u32 %v5657_v62, 16  ;;  %v5302_v32 = vrot.slane %v1239_v18, 9  ;;  %v1240_v62 = vld [vmem:[%s7006_s10 + $0x84] sm:$0xe]  ;;  %v3861_v28 = vshrl.u32 %v5661_v58, 16 }
  0xc5   : > { %6120 = vmatmul.mubr.bf16.gmra.mrb[24].mxu1 %v5281_v20  ;;  %6347 = vmatprep.mubr.bf16.mxu0 %v6815_v3  ;;  %v6831_v20 = vld [vmem:[%s8795_s1 + $0x1f0] sm:$0xff]   ;;  %v6892_v3 = vld [vmem:[%s7006_s10 + $0x7c] sm:$0xf]  ;;  %v3864_v7 = vshll.u32 %v5661_v58, 16  ;;  %v3870_v38 = vshll.u32 %v5662_v51, 16  ;;  %v8817_v42 = vcombine.low %v7443_v41, %v7448_v12  ;;  %v7864_v13 = vrot.slane %v3829_v5, 4 }
  0xc6   : > { %6123 = vmatprep.mubr.bf16.mxu1 %v5282_v23  ;;  %6376 = vmatpush3.bf16.msra.mxu0 %v6823_v53  ;;  %v3819_v23 = vor.u32 %v3818_v44, %v3815_v34  ;;  %v6820_v53 = vld [vmem:[%s7006_s10 + $0x78] sm:$0xff]   ;;  %v1352_v44 = vrot.slane %v6892_v3, 5  ;;  %v3842_v54 = vrot.slane %v3840_v2, 5  ;;  %v7857_v1 = vrot.slane %v3832_v43, 5  ;;  %v7869_v21 = vld [vmem:[%s8795_s1 + $0x200] sm:$0xff]   ;;  %8825 = vst [vmem:[#allocation5_spill] sm:$0xff] %v8012_v47 }
  0xc7   : > { %6377 = vmatprep.subr.bf16.mxu0 %v6827_v50  ;;  %v5660_v34 = vld [vmem:[%s7006_s10 + $0x38] sm:$0x1]  ;;  %v3874_v2 = vshrl.u32 %v5662_v51, 16  ;;  %v6822_v43 = vld [vmem:[%s7006_s10 + $0x84] sm:$0xff]   ;;  %v3853_v12 = vor.u32 %v3852_v22, %v7853_v39  ;;  %v3866_v58 = vrot.slane %v3864_v7, 5  ;;  %v7891_v51 = vrot.slane %v3870_v38, 5 }
  0xc8   : > { %v7855_v33 = vrot.slane %v3819_v23, 4  ;;  %v1354_v10 = vrot.slane %v1352_v44, 4  ;;  %v3843_v31 = vor.u32 %v3842_v54, %v3839_v52  ;;  %v8818_v23 = vcombine.low %v7674_v59, %v7682_v25  ;;  %v6894_v18 = vld [vmem:[%s7006_s10 + $0x88] sm:$0xf]  ;;  %v5663_v5 = vld [vmem:[%s7006_s10 + $0x44] sm:$0x1] }
  0xc9   : > { %v1359_v3 = vrot.slane %v6894_v18, 5  ;;  %v7882_v59 = vcombine.low %v3801_v0, %v3811_v46  ;;  %v5664_v52 = vld [vmem:[%s7006_s10 + $0x48] sm:$0xf]  ;;  %v3863_v54 = vrot.slane %v3861_v28, 4  ;;  %v3876_v22 = vrot.slane %v3874_v2, 4 }
  0xca   : > { %6378 = vmatpush3.bf16.msra.mxu0 %v6827_v50  ;;  %v1355_v50 = vrot.slane %v6893_v19, 5  ;;  %v6824_v19 = vld [vmem:[%s7006_s10 + $0x90] sm:$0xff]   ;;  %v3825_v0 = vsel %vm7038_vm2, %v7855_v33, %v7800_v17  ;;  %v3844_v46 = vrot.slane %v3843_v31, 4  ;;  %v3835_v28 = vsel %vm7038_vm2, %v7864_v13, %v7857_v1  ;;  %v7913_v33 = vld [vmem:[%s7006_s10 + $0x58] sm:$0xf]  ;;  %v6825_v31 = vld [vmem:[%s8795_s1 + $0xc8] sm:$0xff]  }
  0xcb   : > { %6379 = vmatprep.subr.bf16.mxu0 %v6831_v20  ;;  %v3854_v38 = vrot.slane %v3853_v12, 4  ;;  %v1361_v2 = vrot.slane %v1359_v3, 4  ;;  %v5667_v17 = vld [vmem:[%s7006_s10 + $0x54] sm:$0xf]  ;;  %v3880_v1 = vshll.u32 %v5663_v5, 16  ;;  %v3885_v13 = vshrl.u32 %v5664_v52, 16 }
  0xcc   : > { %6348 = vmatmul.mubr.bf16.gmra.mrb[12].mxu0 %v6818_v48  ;;  %v3856_v48 = vshll.u32 %v5660_v34, 16  ;;  %v7909_v7 = vsel %vm7284_vm5, %v1354_v10, %v1355_v50  ;;  %v3888_v50 = vshll.u32 %v5664_v52, 16  ;;  %v3867_v10 = vor.u32 %v3866_v58, %v3863_v54  ;;  %v6826_v54 = vld [vmem:[%s7006_s10 + $0x9c] sm:$0xff]   ;;  %v6900_v41 = vld [vmem:[%s7006_s10 + $0xac] sm:$0xf] }
  0xcd   : > { %6124 = vmatmul.mubr.bf16.gmra.mrb[28].mxu1 %v8817_v42  ;;  %6351 = vmatprep.mubr.bf16.mxu0 %v6820_v53  ;;  %v5303_v53 = vrot.slane %v1240_v62, 9  ;;  %v6895_v42 = vld [vmem:[%s7006_s10 + $0x8c] sm:$0x1]  ;;  %v3918_v5 = vshll.u32 %v7913_v33, 16  ;;  %v8820_v52 = vcombine.low %v7690_v63, %v7698_v8  ;;  %v7949_v63 = vld [vmem:[%s7006_s10 + $0x50] sm:$0x1] }
  0xce   : > { %6143 = vmatprep.mubr.bf16.mxu1 %v8818_v23  ;;  %6380 = vmatpush3.bf16.msra.mxu0 %v6831_v20  ;;  %v7888_v20 = vsel %vm7284_vm5, %v5302_v32, %v1352_v44  ;;  %v3858_v62 = vrot.slane %v3856_v48, 5  ;;  %v1362_v23 = vrot.slane %v6895_v42, 5  ;;  %v1241_v44 = vld [vmem:[%s7006_s10 + $0x90] sm:$0xe]  ;;  %v7901_v32 = vld [vmem:[%s7006_s10 + $0x4c] sm:$0xf]  ;;  %v3877_v48 = vor.u32 %v3876_v22, %v7891_v51 }
  0xcf   : > { %6381 = vmatprep.subr.bf16.mxu0 %v6835_v40  ;;  %v3894_v12 = vshll.u32 %v7901_v32, 16  ;;  %v3898_v18 = vshrl.u32 %v7901_v32, 16  ;;  %v8819_v42 = vcombine.low %v7678_v30, %v7686_v6  ;;  %v6829_v30 = vld [vmem:[%s8795_s1 + $0xd0] sm:$0xff]   ;;  %v3849_v6 = vsel %vm7038_vm2, %v3844_v46, %v7853_v39  ;;  %v6828_v8 = vld [vmem:[%s7006_s10 + $0xa8] sm:$0xff]   ;;  %v7956_v39 = vld [vmem:[%s7006_s10 + $0x5c] sm:$0x1] }
  0xd0   : > { %v3859_v58 = vsel %vm7038_vm2, %v3854_v38, %v3858_v62  ;;  %v5304_v22 = vrot.slane %v1241_v44, 9  ;;  %v3890_v25 = vrot.slane %v3888_v50, 5  ;;  %8821 = vst [vmem:[#allocation3_spill] sm:$0xff] %v7956_v39  ;;  %v3868_v46 = vrot.slane %v3867_v10, 4 }
  0xd1   : > { %v3878_v62 = vrot.slane %v3877_v48, 4  ;;  %v7958_v38 = vrot.slane %v3894_v12, 5  ;;  %v7960_v34 = vrot.slane %v3918_v5, 5  ;;  %v7965_v50 = vcombine.low %v3825_v0, %v3835_v28  ;;  %v5670_v28 = vld [vmem:[%s7006_s10 + $0x60] sm:$0xf] }
  0xd2   : > { %6382 = vmatpush3.bf16.msra.mxu0 %v6835_v40  ;;  %v7921_v40 = vsel %vm7284_vm5, %v5303_v53, %v1359_v3  ;;  %v3909_v53 = vshrl.u32 %v5667_v17, 16  ;;  %v3912_v3 = vshll.u32 %v5667_v17, 16  ;;  %v6896_v17 = vld [vmem:[%s7006_s10 + $0x94] sm:$0xf]  ;;  %v7969_v48 = vcombine.low %v3849_v6, %v3859_v58 }
  0xd3   : > { %6415 = vmatprep.subr.bf16.mxu0 %v7869_v21  ;;  %v3904_v0 = vshll.u32 %v7949_v63, 16  ;;  %v3873_v6 = vsel %vm7038_vm2, %v3868_v46, %v7891_v51  ;;  %v8824_v46 = vcombine.low %v7712_v61, %v7716_v36 }
  0xd4   : > { %6352 = vmatmul.mubr.bf16.gmra.mrb[16].mxu0 %v6822_v43  ;;  %v3922_v43 = vshrl.u32 %v7913_v33, 16  ;;  %v3911_v44 = vrot.slane %v3909_v53, 4  ;;  %v6897_v53 = vld [vmem:[%s7006_s10 + $0x98] sm:$0x1] }
  0xd5   : > { %6144 = vmatmul.mubr.bf16.vlgmr.msra.gmra.mrb[0].mxu1 %v8819_v42  ;;  %6355 = vmatprep.mubr.bf16.mxu0 %v6824_v19  ;;  %v7952_v19 = vrot.slane %v3880_v1, 5  ;;  %v1366_v42 = vrot.slane %v6896_v17, 5  ;;  %v6898_v17 = vld [vmem:[%s7006_s10 + $0xa0] sm:$0xf]  ;;  %v3906_v36 = vrot.slane %v3904_v0, 5 }
  0xd6   : > { %6176 = vmatpush3.bf16.msra.mxu1 %v7631_v60  ;;  %6147 = vmatprep.mubr.bf16.mxu1 %v8820_v52  ;;  %v7946_v60 = vsel %vm7284_vm5, %v1361_v2, %v1362_v23  ;;  %v3887_v52 = vrot.slane %v3885_v13, 4  ;;  %v3900_v23 = vrot.slane %v3898_v18, 4  ;;  %v3914_v2 = vrot.slane %v3912_v3, 5  ;;  %v6833_v13 = vld [vmem:[%s8795_s1 + $0xd8] sm:$0xff]  }
  0xd7   : > { %6177 = vmatprep.subr.bf16.mxu1 %v6825_v31  ;;  %v3924_v1 = vrot.slane %v3922_v43, 4  ;;  %v1242_v18 = vld [vmem:[%s7006_s10 + $0x9c] sm:$0xe]  ;;  %v1369_v3 = vrot.slane %v6897_v53, 5  ;;  %v7982_v43 = vld [vmem:[%s7006_s10 + $0x64] sm:$0xf] }
  0xd8   : > { %v3891_v5 = vor.u32 %v3890_v25, %v3887_v52  ;;  %8822 = vst [vmem:[#allocation4_spill] sm:$0xff] %v7982_v43  ;;  %v3901_v58 = vor.u32 %v3900_v23, %v7958_v38  ;;  %v1373_v12 = vrot.slane %v6898_v17, 5  ;;  %v8823_v25 = vcombine.low %v7702_v24, %v7706_v35  ;;  %v6830_v23 = vld [vmem:[%s7006_s10 + $0xb4] sm:$0xff]   ;;  %v6836_v24 = vld [vmem:[%s8795_s1 + $0xe0] sm:$0xff]   ;;  %v5673_v17 = vld [vmem:[%s7006_s10 + $0x6c] sm:$0xf] }
  0xd9   : > { %v1368_v52 = vrot.slane %v1366_v42, 4  ;;  %v3915_v53 = vor.u32 %v3914_v2, %v3911_v44  ;;  %v3925_v51 = vor.u32 %v3924_v1, %v7960_v34  ;;  %v3933_v35 = vshrl.u32 %v5670_v28, 16  ;;  %v6899_v2 = vld [vmem:[%s7006_s10 + $0xa4] sm:$0x1] }
  0xda   : > { %6178 = vmatpush3.bf16.msra.mxu1 %v6825_v31  ;;  %v7976_v31 = vsel %vm7284_vm5, %v5304_v22, %v1366_v42  ;;  %v3928_v22 = vshll.u32 %v7956_v39, 16  ;;  %v3946_v42 = vshrl.u32 %v7982_v43, 16  ;;  %v3892_v61 = vrot.slane %v3891_v5, 4  ;;  %v8151_v39 = vld [vmem:[%s7006_s10 + $0x98] sm:$0x1] }
  0xdb   : > { %6179 = vmatprep.subr.bf16.mxu1 %v6829_v30  ;;  %v5305_v44 = vrot.slane %v1242_v18, 9  ;;  %v1376_v1 = vrot.slane %v6899_v2, 5  ;;  %v3916_v5 = vrot.slane %v3915_v53, 4  ;;  %v3926_v18 = vrot.slane %v3925_v51, 4  ;;  %8838 = vst [vmem:[#allocation14_spill] sm:$0xff] %v8151_v39 }
  0xdc   : > { %6356 = vmatmul.mubr.bf16.gmra.mrb[20].mxu0 %v6826_v54  ;;  %v3883_v54 = vsel %vm7038_vm2, %v3878_v62, %v7952_v19  ;;  %v3942_v19 = vshll.u32 %v7982_v43, 16  ;;  %v6832_v62 = vld [vmem:[%s7006_s10 + $0xc0] sm:$0xff]   ;;  %v3930_v10 = vrot.slane %v3928_v22, 5  ;;  %v8018_v43 = vsel %vm7284_vm5, %v1368_v52, %v1369_v3 }
  0xdd   : > { %6148 = vmatmul.mubr.bf16.gmra.mrb[4].mxu1 %v8823_v25  ;;  %6359 = vmatprep.mubr.bf16.mxu0 %v6828_v8  ;;  %v3936_v8 = vshll.u32 %v5670_v28, 16  ;;  %v3902_v25 = vrot.slane %v3901_v58, 4  ;;  %v1380_v28 = vrot.slane %v6900_v41, 5  ;;  %v8014_v55 = vcombine.low %v3873_v6, %v3883_v54  ;;  %v6838_v41 = vld [vmem:[%s8795_s1 + $0xe8] sm:$0xff]  }
  0xde   : > { %6151 = vmatprep.mubr.bf16.mxu1 %v8824_v46  ;;  %6180 = vmatpush3.bf16.msra.mxu1 %v6829_v30  ;;  %v1243_v30 = vld [vmem:[%s7006_s10 + $0xa8] sm:$0xe]  ;;  %v1375_v46 = vrot.slane %v1373_v12, 4  ;;  %v3935_v0 = vrot.slane %v3933_v35, 4  ;;  %v8020_v58 = vrot.slane %v3942_v19, 5  ;;  %v3948_v22 = vrot.slane %v3946_v42, 4 }
  0xdf   : > { %6181 = vmatprep.subr.bf16.mxu1 %v6833_v13  ;;  %v3938_v2 = vrot.slane %v3936_v8, 5  ;;  %v3897_v3 = vsel %vm7038_vm2, %v3892_v61, %v7958_v38  ;;  %v8030_v6 = vsel %vm7284_vm5, %v5305_v44, %v1373_v12  ;;  %v3957_v54 = vshrl.u32 %v5673_v17, 16  ;;  %v6901_v38 = vld [vmem:[%s7006_s10 + $0xb0] sm:$0x1]  ;;  %v1244_v19 = vld [vmem:[%s7006_s10 + $0xb4] sm:$0xe] }
  0xe0   : > { %v3960_v52 = vshll.u32 %v5673_v17, 16  ;;  %v3907_v53 = vsel %vm7038_vm2, %v3902_v25, %v3906_v36  ;;  %v8039_v51 = vsel %vm7284_vm5, %v1375_v46, %v1376_v1  ;;  %v5306_v35 = vrot.slane %v1243_v30, 9  ;;  %v8061_v30 = vld [vmem:[%s7006_s10 + $0x74] sm:$0x1]  ;;  %v6902_v25 = vld [vmem:[%s7006_s10 + $0xb8] sm:$0xf] }
  0xe1   : > { %v1383_v8 = vrot.slane %v6901_v38, 5  ;;  %v8827_v12 = vcombine.low %v7733_v49, %v7747_v4  ;;  %v3921_v42 = vsel %vm7038_vm2, %v3916_v5, %v7960_v34  ;;  %v3931_v61 = vsel %vm7038_vm2, %v3926_v18, %v3930_v10  ;;  %v6834_v4 = vld [vmem:[%s7006_s10 + $0xcc] sm:$0xff]   ;;  %8829 = vst [vmem:[#allocation7_spill] sm:$0xff] %v8061_v30  ;;  %v5679_v38 = vld [vmem:[%s7006_s10 + $0x84] sm:$0xf] }
  0xe2   : > { %6182 = vmatpush3.bf16.msra.mxu1 %v6833_v13  ;;  %v8033_v13 = vld [vmem:[%s7006_s10 + $0x70] sm:$0xf]  ;;  %v1382_v36 = vrot.slane %v1380_v28, 4  ;;  %v3952_v44 = vshll.u32 %v8012_v47, 16  ;;  %v8828_v49 = vcombine.low %v7769_v26, %v7773_v56  ;;  %v3949_v1 = vor.u32 %v3948_v22, %v8020_v58  ;;  %v8078_v22 = vld [vmem:[%s7006_s10 + $0x7c] sm:$0xf] }
  0xe3   : > { %6183 = vmatprep.subr.bf16.mxu1 %v6836_v24  ;;  %8826 = vst [vmem:[#allocation6_spill] sm:$0xff] %v8033_v13  ;;  %v3966_v34 = vshll.u32 %v8033_v13, 16  ;;  %v3970_v10 = vshrl.u32 %v8033_v13, 16  ;;  %v5307_v17 = vrot.slane %v1244_v19, 9  ;;  %v1387_v46 = vrot.slane %v6902_v25, 5  ;;  %8830 = vst [vmem:[#allocation8_spill] sm:$0xff] %v8078_v22 }
  0xe4   : > { %6360 = vmatmul.mubr.bf16.gmra.mrb[24].mxu0 %v6830_v23  ;;  %v6840_v23 = vld [vmem:[%s8795_s1 + $0xf0] sm:$0xff]   ;;  %v3959_v26 = vrot.slane %v3957_v54, 4  ;;  %v3962_v56 = vrot.slane %v3960_v52, 5  ;;  %v8069_v18 = vcombine.low %v3897_v3, %v3907_v53  ;;  %v8081_v19 = vcombine.low %v3921_v42, %v3931_v61  ;;  %v6903_v3 = vld [vmem:[%s7006_s10 + $0xbc] sm:$0x1] }
  0xe5   : > { %6152 = vmatmul.mubr.bf16.gmra.mrb[8].mxu1 %v8827_v12  ;;  %6363 = vmatprep.mubr.bf16.mxu0 %v6832_v62  ;;  %v3939_v62 = vor.u32 %v3938_v2, %v3935_v0  ;;  %v8075_v2 = vsel %vm7284_vm5, %v5306_v35, %v1380_v28  ;;  %v8085_v54 = vsel %vm7284_vm5, %v1382_v36, %v1383_v8  ;;  %v8087_v52 = vrot.slane %v3952_v44, 5  ;;  %v6842_v12 = vld [vmem:[%s8795_s1 + $0xf8] sm:$0xff]   ;;  %v8094_v28 = vld [vmem:[%s7006_s10 + $0x88] sm:$0xf] }
  0xe6   : > { %6155 = vmatprep.mubr.bf16.mxu1 %v8828_v49  ;;  %6184 = vmatpush3.bf16.msra.mxu1 %v6836_v24  ;;  %v5676_v24 = vld [vmem:[%s7006_s10 + $0x78] sm:$0xf]  ;;  %v1390_v53 = vrot.slane %v6903_v3, 5  ;;  %8831 = vst [vmem:[#allocation9_spill] sm:$0xff] %v8094_v28  ;;  %v8098_v42 = vrot.slane %v3949_v1, 4  ;;  %v8100_v61 = vrot.slane %v3966_v34, 5  ;;  %v8104_v36 = vsel %vm7284_vm5, %v5307_v17, %v1387_v46 }
  0xe7   : > { %6185 = vmatprep.subr.bf16.mxu1 %v6838_v41  ;;  %v8096_v35 = vrot.slane %v3939_v62, 4  ;;  %v3972_v8 = vrot.slane %v3970_v10, 4  ;;  %v1389_v44 = vrot.slane %v1387_v46, 4  ;;  %v3963_v49 = vor.u32 %v3962_v56, %v3959_v26  ;;  %v5682_v3 = vld [vmem:[%s7006_s10 + $0x90] sm:$0xf] }
  0xe8   : > { %v3976_v25 = vshll.u32 %v8061_v30, 16  ;;  %v3984_v0 = vshll.u32 %v5676_v24, 16  ;;  %v3990_v62 = vshll.u32 %v8078_v22, 16  ;;  %v3994_v1 = vshrl.u32 %v8078_v22, 16  ;;  %v8111_v34 = vld [vmem:[%s7006_s10 + $0x94] sm:$0xf] }
  0xe9   : > { %8832 = vst [vmem:[#allocation10_spill] sm:$0xff] %v8111_v34  ;;  %v8833_v10 = vcombine.low %v7813_v27, %v7817_v29  ;;  %v4005_v17 = vshrl.u32 %v5679_v38, 16  ;;  %v4008_v46 = vshll.u32 %v5679_v38, 16  ;;  %v4018_v26 = vshrl.u32 %v8094_v28, 16  ;;  %v5685_v38 = vld [vmem:[%s7006_s10 + $0x9c] sm:$0xf] }
  0xea   : > { %6186 = vmatpush3.bf16.msra.mxu1 %v6838_v41  ;;  %v3981_v41 = vshrl.u32 %v5676_v24, 16  ;;  %v8834_v56 = vcombine.low %v7824_v45, %v7828_v14  ;;  %v3973_v29 = vor.u32 %v3972_v8, %v8100_v61  ;;  %v4032_v24 = vshll.u32 %v5682_v3, 16  ;;  %v8133_v45 = vld [vmem:[%s7006_s10 + $0x80] sm:$0x1] }
  0xeb   : > { %6187 = vmatprep.subr.bf16.mxu1 %v6840_v23  ;;  %v8130_v5 = vrot.slane %v3976_v25, 5  ;;  %8835 = vst [vmem:[#allocation11_spill] sm:$0xff] %v8133_v45  ;;  %v4038_v14 = vshll.u32 %v8111_v34, 16  ;;  %v3986_v27 = vrot.slane %v3984_v0, 5  ;;  %v3996_v8 = vrot.slane %v3994_v1, 4 }
  0xec   : > { %6364 = vmatmul.mubr.bf16.gmra.mrb[28].mxu0 %v6834_v4  ;;  %v4014_v4 = vshll.u32 %v8094_v28, 16  ;;  %v8137_v28 = vrot.slane %v3990_v62, 5  ;;  %v8143_v22 = vld [vmem:[%s7006_s10 + $0xa0] sm:$0xf]  ;;  %v4007_v25 = vrot.slane %v4005_v17, 4  ;;  %v4010_v30 = vrot.slane %v4008_v46, 5 }
  0xed   : > { %6156 = vmatmul.mubr.bf16.gmra.mrb[12].mxu1 %v8833_v10  ;;  %6383 = vmatprep.mubr.bf16.mxu0 %v7882_v59  ;;  %v4029_v59 = vshrl.u32 %v5682_v3, 16  ;;  %v8128_v10 = vrot.slane %v3963_v49, 4  ;;  %v8140_v3 = vld [vmem:[%s7006_s10 + $0x8c] sm:$0x1]  ;;  %8837 = vst [vmem:[#allocation13_spill] sm:$0xff] %v8143_v22  ;;  %v4020_v47 = vrot.slane %v4018_v26, 4  ;;  %v8160_v62 = vsel %vm7284_vm5, %v1389_v44, %v1390_v53 }
  0xee   : > { %6159 = vmatprep.mubr.bf16.mxu1 %v8834_v56  ;;  %6188 = vmatpush3.bf16.msra.mxu1 %v6840_v23  ;;  %v4042_v23 = vshrl.u32 %v8111_v34, 16  ;;  %v3983_v56 = vrot.slane %v3981_v41, 4  ;;  %8836 = vst [vmem:[#allocation12_spill] sm:$0xff] %v8140_v3  ;;  %v6839_v49 = vld [vmem:[%s8795_s1 + $0x208] sm:$0xff]   ;;  %v8148_v13 = vrot.slane %v4014_v4, 5  ;;  %v4034_v34 = vrot.slane %v4032_v24, 5 }
  0xef   : > { %6189 = vmatprep.subr.bf16.mxu1 %v6842_v12  ;;  %v5688_v41 = vld [vmem:[%s7006_s10 + $0xa8] sm:$0xf]  ;;  %v4031_v1 = vrot.slane %v4029_v59, 4  ;;  %v8165_v17 = vld [vmem:[%s8795_s1 + $0x100] sm:$0xff]   ;;  %v8168_v46 = vrot.slane %v4038_v14, 5  ;;  %v4053_v26 = vshrl.u32 %v5685_v38, 16  ;;  %v8840_v24 = vcombine.low %v7832_v16, %v7842_v15 }
  0xf0   : > { %8839 = vst [vmem:[#allocation15_spill] sm:$0xff] %v8165_v17  ;;  %v4044_v4 = vrot.slane %v4042_v23, 4  ;;  %v4056_v0 = vshll.u32 %v5685_v38, 16  ;;  %v8171_v53 = vrot.slane %v3973_v29, 4  ;;  %v4062_v44 = vshll.u32 %v8143_v22, 16  ;;  %v6841_v16 = vld [vmem:[%s8795_s1 + $0x210] sm:$0xff]  }
  0xf1   : > { %v4066_v59 = vshrl.u32 %v8143_v22, 16  ;;  %v3987_v14 = vor.u32 %v3986_v27, %v3983_v56  ;;  %v3997_v38 = vor.u32 %v3996_v8, %v8137_v28  ;;  %v4011_v23 = vor.u32 %v4010_v30, %v4007_v25  ;;  %v8183_v29 = vld [vmem:[%s7006_s10 + $0xac] sm:$0xf]  ;;  %v8196_v25 = vld [vmem:[%s7006_s10 + $0xa4] sm:$0x1] }
  0xf2   : > { %6190 = vmatpush3.bf16.msra.mxu1 %v6842_v12  ;;  %v4000_v12 = vshll.u32 %v8133_v45, 16  ;;  %8841 = vst [vmem:[#allocation16_spill] sm:$0xff] %v8183_v29  ;;  %v4021_v15 = vor.u32 %v4020_v47, %v8148_v13  ;;  %v4077_v27 = vshrl.u32 %v5688_v41, 16  ;;  %v4080_v30 = vshll.u32 %v5688_v41, 16 }
  0xf3   : > { %6463 = vmatprep.subr.bf16.mxu1 %v8165_v17  ;;  %v8842_v17 = vcombine.low %v7888_v20, %v7909_v7  ;;  %v4035_v56 = vor.u32 %v4034_v34, %v4031_v1  ;;  %v4045_v8 = vor.u32 %v4044_v4, %v8168_v46  ;;  %v4055_v20 = vrot.slane %v4053_v26, 4 }
  0xf4   : > { %6384 = vmatmul.mubr.bf16.vlgmr.msra.gmra.mrb[0].mxu0 %v7965_v50  ;;  %v4024_v50 = vshll.u32 %v8140_v3, 16  ;;  %v4058_v7 = vrot.slane %v4056_v0, 5  ;;  %v4090_v22 = vshrl.u32 %v8183_v29, 16  ;;  %v3988_v47 = vrot.slane %v3987_v14, 4  ;;  %v6843_v0 = vld [vmem:[%s8795_s1 + $0x218] sm:$0xff]  }
  0xf5   : > { %6160 = vmatmul.mubr.bf16.gmra.mrb[16].mxu1 %v8840_v24  ;;  %6416 = vmatpush3.bf16.msra.mxu0 %v7869_v21  ;;  %v4048_v21 = vshll.u32 %v8151_v39, 16  ;;  %v4086_v24 = vshll.u32 %v8183_v29, 16  ;;  %v3998_v39 = vrot.slane %v3997_v38, 4  ;;  %v4002_v3 = vrot.slane %v4000_v12, 5 }
  0xf6   : > { %6163 = vmatprep.mubr.bf16.mxu1 %v8842_v17  ;;  %6387 = vmatprep.mubr.bf16.mxu0 %v7969_v48  ;;  %v8198_v17 = vrot.slane %v4062_v44, 5  ;;  %v4068_v48 = vrot.slane %v4066_v59, 4  ;;  %v4026_v41 = vrot.slane %v4024_v50, 5  ;;  %v4012_v34 = vrot.slane %v4011_v23, 4 }
  0xf7   : > { %6417 = vmatprep.subr.bf16.mxu0 %v6839_v49  ;;  %v4022_v1 = vrot.slane %v4021_v15, 4  ;;  %v4079_v4 = vrot.slane %v4077_v27, 4  ;;  %v4082_v45 = vrot.slane %v4080_v30, 5  ;;  %v4036_v26 = vrot.slane %v4035_v56, 4  ;;  %v8264_v27 = vld [vmem:[%s7006_s10 + $0xbc] sm:$0x1] }
  0xf8   : > { %v4050_v44 = vrot.slane %v4048_v21, 5  ;;  %v4059_v59 = vor.u32 %v4058_v7, %v4055_v20  ;;  %v4072_v29 = vshll.u32 %v8196_v25, 16  ;;  %v4069_v12 = vor.u32 %v4068_v48, %v8198_v17  ;;  %v8231_v21 = vld [vmem:[%s7006_s10 + $0xb0] sm:$0x1] }
  0xf9   : > { %6418 = vmatpush3.bf16.msra.mxu0 %v6839_v49  ;;  %v4046_v49 = vrot.slane %v4045_v8, 4  ;;  %v8208_v14 = vrot.slane %v4086_v24, 5  ;;  %v4092_v38 = vrot.slane %v4090_v22, 4  ;;  %v8843_v23 = vor.u32 %v7616_v57, %v7614_v11 }
  0xfa   : > { %6419 = vmatprep.subr.bf16.mxu0 %v6841_v16  ;;  %v8844_v15 = vcombine.low %v7921_v40, %v7946_v60  ;;  %v3979_v22 = vsel %vm7038_vm2, %v8171_v53, %v8130_v5  ;;  %v3993_v57 = vsel %vm7038_vm2, %v3988_v47, %v8137_v28  ;;  %v8845_v40 = vcombine.low %v7976_v31, %v8018_v43  ;;  %v6846_v31 = vld [vmem:[%s8795_s1 + $0x220] sm:$0xff]  }
  0xfb   : > { %v8213_v50 = vrot.slane %v8843_v23, 4  ;;  %v4003_v60 = vsel %vm7038_vm2, %v3998_v39, %v4002_v3  ;;  %v4083_v5 = vor.u32 %v4082_v45, %v4079_v4  ;;  %v4027_v28 = vsel %vm7038_vm2, %v4022_v1, %v4026_v41  ;;  %v5744_v41 = vld [vmem:[%s7006_s10 + $0x48] sm:$0xe] }
  0xfc   : > { %6388 = vmatmul.mubr.bf16.gmra.mrb[4].mxu0 %v8014_v55  ;;  %v3969_v55 = vsel %vm7038_vm2, %v8128_v10, %v8100_v61  ;;  %v5691_v61 = vld [vmem:[%s7006_s10 + $0xb4] sm:$0xf]  ;;  %v8243_v10 = vld [vmem:[%s7006_s10 + $0xb8] sm:$0xf]  ;;  %v4041_v39 = vsel %vm7038_vm2, %v4036_v26, %v8168_v46  ;;  %v8253_v43 = vrot.slane %v4059_v59, 4  ;;  %v8255_v3 = vrot.slane %v4072_v29, 5 }
  0xfd   : > { %6164 = vmatmul.mubr.bf16.gmra.mrb[20].mxu1 %v8844_v15  ;;  %6391 = vmatprep.mubr.bf16.mxu0 %v8069_v18  ;;  %v4017_v18 = vsel %vm7038_vm2, %v4012_v34, %v8148_v13  ;;  %v4051_v13 = vsel %vm7038_vm2, %v4046_v49, %v4050_v44  ;;  %v8259_v45 = vrot.slane %v4069_v12, 4  ;;  %v4093_v53 = vor.u32 %v4092_v38, %v8208_v14  ;;  %v5745_v26 = vld [vmem:[%s7006_s10 + $0x54] sm:$0xe] }
  0xfe   : > { %6167 = vmatprep.mubr.bf16.mxu1 %v8845_v40  ;;  %6420 = vmatpush3.bf16.msra.mxu0 %v6841_v16  ;;  %v4096_v16 = vshll.u32 %v8231_v21, 16  ;;  %v8846_v46 = vsel %vm7038_vm2, %v8098_v42, %v8087_v52  ;;  %v8847_v29 = vsel %vm7038_vm2, %v8096_v35, %v8020_v58  ;;  %v4101_v56 = vshrl.u32 %v5691_v61, 16 }
  0xff   : > { %6421 = vmatprep.subr.bf16.mxu0 %v6843_v0  ;;  %v5722_v30 = vcombine.low %v8847_v29, %v8846_v46  ;;  %v4104_v8 = vshll.u32 %v5691_v61, 16  ;;  %v4110_v20 = vshll.u32 %v8243_v10, 16  ;;  %v5338_v7 = vcombine.low %v8075_v2, %v8085_v54  ;;  %v6849_v2 = vld [vmem:[%s8795_s1 + $0x228] sm:$0xff]   ;;  %v5694_v54 = vld [vmem:[%s7006_s10 + $0xc0] sm:$0xf]  ;;  %v8851_v29 = vld [vmem:[#allocation5_spill] sm:$0xff] }
 0x100   : > { %v5339_v48 = vcombine.low %v8104_v36, %v8160_v62  ;;  %v5723_v24 = vcombine.low %v3969_v55, %v3979_v22  ;;  %v8281_v52 = vrot.slane %v4083_v5, 4  ;;  %v5724_v42 = vcombine.low %v3993_v57, %v4003_v60 }
 0x101   : > { %v8283_v58 = vcombine.low %v4017_v18, %v4027_v28  ;;  %v8285_v35 = vcombine.low %v4041_v39, %v4051_v13  ;;  %v4065_v47 = vsel %vm7038_vm2, %v8253_v43, %v8198_v17  ;;  %v4075_v34 = vsel %vm7038_vm2, %v8259_v45, %v8255_v3  ;;  %v5747_v28 = vld [vmem:[%s7006_s10 + $0x6c] sm:$0xe] }
 0x102   : > { %6422 = vmatpush3.bf16.msra.mxu0 %v6843_v0  ;;  %v8301_v1 = vrot.slane %v4093_v53, 4  ;;  %v8303_v4 = vrot.slane %v4096_v16, 5  ;;  %v4114_v0 = vshrl.u32 %v8243_v10, 16  ;;  %v8848_v44 = vcombine.low %v8030_v6, %v8039_v51  ;;  %v6852_v6 = vld [vmem:[%s8795_s1 + $0x230] sm:$0xff]   ;;  %v8325_v51 = vld [vmem:[%s7006_s10 + $0xc4] sm:$0xf] }
 0x103   : > { %6423 = vmatprep.subr.bf16.mxu0 %v6846_v31  ;;  %v8310_v59 = vrot.slane %v4101_v56, 4  ;;  %v8314_v49 = vrot.slane %v4110_v20, 5  ;;  %v4120_v12 = vshll.u32 %v8264_v27, 16  ;;  %v4089_v38 = vsel %vm7038_vm2, %v8281_v52, %v8208_v14  ;;  %v5746_v14 = vld [vmem:[%s7006_s10 + $0x60] sm:$0xe]  ;;  %v8849_v39 = vld [vmem:[#allocation3_spill] sm:$0xff] }
 0x104   : > { %6392 = vmatmul.mubr.bf16.gmra.mrb[8].mxu0 %v8081_v19  ;;  %v8312_v19 = vrot.slane %v4104_v8, 5  ;;  %v4125_v23 = vshrl.u32 %v5694_v54, 16  ;;  %v5760_v15 = vrot.slane %v5744_v41, 9  ;;  %v4588_v55 = vrot.slane %v7901_v32, 5  ;;  %v6844_v13 = vld [vmem:[%s7006_s10 + $0xc] sm:$0xff]   ;;  %v6855_v56 = vld [vmem:[%s8795_s1 + $0x238] sm:$0xff]  }
 0x105   : > { %6168 = vmatmul.mubr.bf16.gmra.mrb[24].mxu1 %v8848_v44  ;;  %6395 = vmatprep.mubr.bf16.mxu0 %v5722_v30  ;;  %v4128_v22 = vshll.u32 %v5694_v54, 16  ;;  %v4591_v57 = vrot.slane %v7949_v63, 5  ;;  %v5761_v40 = vrot.slane %v5745_v26, 9  ;;  %v4595_v60 = vrot.slane %v7913_v33, 5  ;;  %v8850_v16 = vld [vmem:[#allocation4_spill] sm:$0xff]  ;;  %v8852_v52 = vld [vmem:[#allocation6_spill] sm:$0xff] }
 0x106   : > { %6171 = vmatprep.mubr.bf16.mxu1 %v5338_v7  ;;  %6424 = vmatpush3.bf16.msra.mxu0 %v6846_v31  ;;  %v4099_v18 = vsel %vm7038_vm2, %v8301_v1, %v8303_v4  ;;  %v8335_v5 = vrot.slane %v4114_v0, 4  ;;  %v8339_v61 = vsel %vm7284_vm5, %v5760_v15, %v4588_v55  ;;  %v4590_v32 = vrot.slane %v4588_v55, 4  ;;  %v8853_v4 = vld [vmem:[#allocation7_spill] sm:$0xff] }
 0x107   : > { %6425 = vmatprep.subr.bf16.mxu0 %v6849_v2  ;;  %v4134_v31 = vshll.u32 %v8325_v51, 16  ;;  %v8345_v63 = vsel %vm7284_vm5, %v5761_v40, %v4595_v60  ;;  %v4597_v33 = vrot.slane %v4595_v60, 4  ;;  %v4598_v3 = vrot.slane %v8849_v39, 5  ;;  %v8376_v26 = vld [vmem:[%s7006_s10 + $0xc8] sm:$0x1]  ;;  %v6845_v40 = vld [vmem:[%s7006_s10 + $0x18] sm:$0xff]  }
 0x108   : > { %v8351_v45 = vsel %vm7284_vm5, %v4590_v32, %v4591_v57  ;;  %v5762_v53 = vrot.slane %v5746_v14, 9  ;;  %v4602_v46 = vrot.slane %v8850_v16, 5  ;;  %v4605_v30 = vrot.slane %v8851_v29, 5  ;;  %v6847_v39 = vld [vmem:[%s7006_s10 + $0x24] sm:$0xff]  }
 0x109   : > { %v5792_v8 = vcombine.low %v8339_v61, %v8351_v45  ;;  %v8362_v20 = vsel %vm7284_vm5, %v4597_v33, %v4598_v3  ;;  %v5763_v7 = vrot.slane %v5747_v28, 9  ;;  %v4612_v0 = vrot.slane %v8853_v4, 5  ;;  %v8855_v28 = vld [vmem:[#allocation11_spill] sm:$0xff]  ;;  %v5453_v61 = vld [vmem:[%s7006_s10 + $0x90] sm:$0xf] }
 0x10a   : > { %6426 = vmatpush3.bf16.msra.mxu0 %v6849_v2  ;;  %v4609_v2 = vrot.slane %v8852_v52, 5  ;;  %v5793_v54 = vcombine.low %v8345_v63, %v8362_v20  ;;  %v8369_v41 = vsel %vm7284_vm5, %v5762_v53, %v4602_v46  ;;  %v4604_v1 = vrot.slane %v4602_v46, 4  ;;  %v8856_v53 = vld [vmem:[#allocation2_spill] sm:$0xff]  ;;  %v6861_v45 = vld [vmem:[%s7006_s10 + $0xa8] sm:$0xff]  }
 0x10b   : > { %6427 = vmatprep.subr.bf16.mxu0 %v6852_v6  ;;  %v8378_v44 = vrot.slane %v4125_v23, 4  ;;  %v8391_v36 = vcombine.low %v4065_v47, %v4075_v34  ;;  %v4107_v62 = vor.u32 %v8312_v19, %v8310_v59  ;;  %v5748_v23 = vld [vmem:[%s7006_s10 + $0x78] sm:$0xe]  ;;  %v8403_v57 = vrot.slane %v4120_v12, 5  ;;  %v5697_v12 = vld [vmem:[%s7006_s10 + $0xcc] sm:$0xf] }
 0x10c   : > { %6396 = vmatmul.mubr.bf16.gmra.mrb[12].mxu0 %v5723_v24  ;;  %v8380_v24 = vrot.slane %v4128_v22, 5  ;;  %v8384_v15 = vsel %vm7284_vm5, %v5763_v7, %v4609_v2  ;;  %v4611_v55 = vrot.slane %v4609_v2, 4  ;;  %v8401_v22 = vcombine.low %v4089_v38, %v4099_v18  ;;  %v5447_v47 = vld [vmem:[%s7006_s10 + $0x78] sm:$0xf]  ;;  %v8854_v18 = vld [vmem:[#allocation8_spill] sm:$0xff] }
 0x10d   : > { %6172 = vmatmul.mubr.bf16.gmra.mrb[28].mxu1 %v5339_v48  ;;  %6399 = vmatprep.mubr.bf16.mxu0 %v5724_v42  ;;  %v4138_v48 = vshrl.u32 %v8325_v51, 16  ;;  %v8398_v42 = vsel %vm7284_vm5, %v4604_v1, %v4605_v30  ;;  %v4117_v34 = vor.u32 %v8335_v5, %v8314_v49  ;;  %v8414_v59 = vrot.slane %v4134_v31, 5  ;;  %v8428_v31 = vld [vmem:[%s7006_s10 + $0xd0] sm:$0xf]  ;;  %v8857_v1 = vld [vmem:[#allocation9_spill] sm:$0xff] }
 0x10e   : > { %6191 = vmatprep.mubr.bf16.mxu1 %v6844_v13  ;;  %6428 = vmatpush3.bf16.msra.mxu0 %v6852_v6  ;;  %v5794_v17 = vcombine.low %v8369_v41, %v8398_v42  ;;  %v8409_v43 = vsel %vm7284_vm5, %v4611_v55, %v4612_v0  ;;  %v4144_v19 = vshll.u32 %v8376_v26, 16  ;;  %v5749_v6 = vld [vmem:[%s7006_s10 + $0x84] sm:$0xe]  ;;  %v4131_v60 = vor.u32 %v8380_v24, %v8378_v44  ;;  %v8858_v24 = vld [vmem:[#allocation12_spill] sm:$0xff]  ;;  %v6925_v63 = vld [vmem:[%s7006_s10 + $0x8c] sm:$0x1] }
 0x10f   : > { %6429 = vmatprep.subr.bf16.mxu0 %v6855_v56  ;;  %v5795_v38 = vcombine.low %v8384_v15, %v8409_v43  ;;  %v5764_v14 = vrot.slane %v5748_v23, 9  ;;  %v4616_v32 = vrot.slane %v8854_v18, 5  ;;  %v4619_v33 = vrot.slane %v8855_v28, 5 }
 0x110   : > { %v4140_v5 = vrot.slane %v4138_v48, 4  ;;  %v2366_v3 = vshrl.u32 %v5447_v47, 16  ;;  %v2369_v13 = vshll.u32 %v5447_v47, 16  ;;  %v2388_v16 = vsel %vm7038_vm2, %v8213_v50, %v8856_v53 }
 0x111   : > { %v4149_v46 = vshrl.u32 %v5697_v12, 16  ;;  %v8436_v29 = vsel %vm7284_vm5, %v5764_v14, %v4616_v32  ;;  %v4618_v30 = vrot.slane %v4616_v32, 4  ;;  %v5765_v7 = vrot.slane %v5749_v6, 9  ;;  %v6905_v6 = vld [vmem:[%s8795_s1 + $0x108] sm:$0xff]  }
 0x112   : > { %6430 = vmatpush3.bf16.msra.mxu0 %v6855_v56  ;;  %v4152_v52 = vshll.u32 %v5697_v12, 16  ;;  %v2368_v2 = vrot.slane %v2366_v3, 4  ;;  %v2371_v56 = vrot.slane %v2369_v13, 5  ;;  %v4623_v4 = vrot.slane %v8857_v1, 5  ;;  %v5750_v12 = vld [vmem:[%s7006_s10 + $0x90] sm:$0xe] }
 0x113   : > { %v4158_v50 = vshll.u32 %v8428_v31, 16  ;;  %v4162_v0 = vshrl.u32 %v8428_v31, 16  ;;  %v8445_v44 = vsel %vm7284_vm5, %v4618_v30, %v4619_v33  ;;  %v4626_v55 = vrot.slane %v8858_v24, 5  ;;  %v6848_v3 = vld [vmem:[%s7006_s10 + $0x30] sm:$0xff]  }
 0x114   : > { %6400 = vmatmul.mubr.bf16.gmra.mrb[16].mxu0 %v8283_v58  ;;  %v8859_v58 = vld [vmem:[#allocation15_spill] sm:$0xff]  ;;  %v4141_v48 = vor.u32 %v4140_v5, %v8414_v59  ;;  %v2372_v23 = vor.u32 %v2371_v56, %v2368_v2  ;;  %v4625_v47 = vrot.slane %v4623_v4, 4  ;;  %v4118_v14 = vrot.slane %v4117_v34, 4  ;;  %v8466_v13 = vld [vmem:[%s7006_s10 + $0xd4] sm:$0x1]  ;;  %v8860_v2 = vld [vmem:[#allocation10_spill] sm:$0xff] }
 0x115   : > { %6192 = vmatmul.mubr.bf16.vlgmr.msra.gmra.mrb[0].mxu1 %v6845_v40  ;;  %6403 = vmatprep.mubr.bf16.mxu0 %v8285_v35  ;;  %v5796_v35 = vcombine.low %v8436_v29, %v8445_v44  ;;  %v4108_v40 = vrot.slane %v4107_v62, 4  ;;  %v4146_v18 = vrot.slane %v4144_v19, 5  ;;  %v8458_v32 = vsel %vm7284_vm5, %v5765_v7, %v4623_v4  ;;  %v6850_v19 = vld [vmem:[%s7006_s10 + $0x3c] sm:$0xff]   ;;  %v6906_v1 = vld [vmem:[%s8795_s1 + $0x110] sm:$0xff]  }
 0x116   : > { %6471 = vmatpush3.bf16.msra.mxu1 %v8859_v58  ;;  %6195 = vmatprep.mubr.bf16.mxu1 %v6847_v39  ;;  %v4151_v28 = vrot.slane %v4149_v46, 4  ;;  %v4154_v33 = vrot.slane %v4152_v52, 5  ;;  %v2373_v39 = vrot.slane %v2372_v23, 4  ;;  %v8462_v5 = vsel %vm7284_vm5, %v4625_v47, %v4626_v55  ;;  %v6907_v47 = vld [vmem:[%s7006_s10 + $0x1c] sm:$0xf] }
 0x117   : > { %6464 = vmatprep.subr.bf16.mxu1 %v6905_v6  ;;  %v8468_v53 = vrot.slane %v4158_v50, 5  ;;  %v4164_v30 = vrot.slane %v4162_v0, 4  ;;  %v5797_v62 = vcombine.low %v8458_v32, %v8462_v5  ;;  %v5766_v34 = vrot.slane %v5750_v12, 9 }
 0x118   : > { %v4132_v7 = vrot.slane %v4131_v60, 4  ;;  %v4142_v46 = vrot.slane %v4141_v48, 4  ;;  %v2378_v52 = vsel %vm7038_vm2, %v2373_v39, %v7614_v11  ;;  %v4630_v56 = vrot.slane %v8860_v2, 5  ;;  %v8861_v11 = vld [vmem:[#allocation14_spill] sm:$0xff]  ;;  %v6851_v39 = vld [vmem:[%s7006_s10 + $0x48] sm:$0xff]  }
 0x119   : > { %v4113_v4 = vsel %vm7038_vm2, %v4108_v40, %v8314_v49  ;;  %v4123_v60 = vsel %vm7038_vm2, %v4118_v14, %v8403_v57  ;;  %v8486_v50 = vcombine.low %v2378_v52, %v2388_v16  ;;  %v4633_v0 = vrot.slane %v8861_v11, 5  ;;  %v5740_v57 = vld [vmem:[%s7006_s10 + $0x18] sm:$0xe]  ;;  %v5751_v16 = vld [vmem:[%s7006_s10 + $0x9c] sm:$0xe] }
 0x11a   : > { %6472 = vmatpush3.bf16.msra.mxu1 %v6905_v6  ;;  %v4155_v24 = vor.u32 %v4154_v33, %v4151_v28  ;;  %v4168_v55 = vshll.u32 %v8466_v13, 16  ;;  %v8493_v58 = vsel %vm7284_vm5, %v5766_v34, %v4630_v56  ;;  %v4632_v48 = vrot.slane %v4630_v56, 4  ;;  %v6908_v40 = vld [vmem:[%s8795_s1 + $0x118] sm:$0xff]   ;;  %v6909_v2 = vld [vmem:[%s7006_s10 + $0x20] sm:$0x1] }
 0x11b   : > { %6465 = vmatprep.subr.bf16.mxu1 %v6906_v1  ;;  %v4165_v49 = vor.u32 %v4164_v30, %v8468_v53  ;;  %v4147_v23 = vsel %vm7038_vm2, %v4142_v46, %v4146_v18  ;;  %v4560_v12 = vrot.slane %v6907_v47, 5  ;;  %v5729_v6 = vcombine.low %v4113_v4, %v4123_v60  ;;  %v8862_v34 = vld [vmem:[#allocation13_spill] sm:$0xff]  ;;  %v5752_v11 = vld [vmem:[%s7006_s10 + $0xa8] sm:$0xe] }
 0x11c   : > { %6404 = vmatmul.mubr.bf16.gmra.mrb[20].mxu0 %v8391_v36  ;;  %v4137_v36 = vsel %vm7038_vm2, %v4132_v7, %v8414_v59  ;;  %v4156_v14 = vrot.slane %v4155_v24, 4  ;;  %v4170_v28 = vrot.slane %v4168_v55, 5  ;;  %v5756_v18 = vrot.slane %v5740_v57, 9  ;;  %v6853_v46 = vld [vmem:[%s7006_s10 + $0x54] sm:$0xff]   ;;  %v5741_v55 = vld [vmem:[%s7006_s10 + $0x24] sm:$0xe] }
 0x11d   : > { %6196 = vmatmul.mubr.bf16.gmra.mrb[4].mxu1 %v6848_v3  ;;  %6407 = vmatprep.mubr.bf16.mxu0 %v8401_v22  ;;  %v8507_v22 = vsel %vm7284_vm5, %v4632_v48, %v4633_v0  ;;  %v5767_v33 = vrot.slane %v5751_v16, 9  ;;  %v5730_v3 = vcombine.low %v4137_v36, %v4147_v23  ;;  %v4166_v30 = vrot.slane %v4165_v49, 4  ;;  %v6911_v48 = vld [vmem:[%s7006_s10 + $0x28] sm:$0xf]  ;;  %v6912_v36 = vld [vmem:[%s7006_s10 + $0x34] sm:$0xf] }
 0x11e   : > { %6199 = vmatprep.mubr.bf16.mxu1 %v6850_v19  ;;  %6473 = vmatpush3.bf16.msra.mxu1 %v6906_v1  ;;  %v5798_v59 = vcombine.low %v8493_v58, %v8507_v22  ;;  %v4637_v19 = vrot.slane %v8862_v34, 5  ;;  %v4640_v7 = vrot.slane %v8196_v25, 5  ;;  %v4562_v52 = vrot.slane %v4560_v12, 4  ;;  %v6910_v1 = vld [vmem:[%s8795_s1 + $0x120] sm:$0xff]  }
 0x11f   : > { %6466 = vmatprep.subr.bf16.mxu1 %v6908_v40  ;;  %v4563_v56 = vrot.slane %v6909_v2, 5  ;;  %v4561_v25 = vsel %vm7284_vm5, %v5756_v18, %v4560_v12  ;;  %v4161_v0 = vsel %vm7038_vm2, %v4156_v14, %v8468_v53  ;;  %v4171_v24 = vsel %vm7038_vm2, %v4166_v30, %v4170_v28  ;;  %v5742_v12 = vld [vmem:[%s7006_s10 + $0x30] sm:$0xe]  ;;  %v6854_v30 = vld [vmem:[%s7006_s10 + $0x60] sm:$0xff]  }
 0x120   : > { %v8524_v4 = vsel %vm7284_vm5, %v5767_v33, %v4637_v19  ;;  %v4639_v60 = vrot.slane %v4637_v19, 4  ;;  %v4567_v49 = vrot.slane %v6911_v48, 5  ;;  %v4574_v23 = vrot.slane %v6912_v36, 5  ;;  %v6914_v33 = vld [vmem:[%s7006_s10 + $0x2c] sm:$0x1] }
 0x121   : > { %v4564_v16 = vsel %vm7284_vm5, %v4562_v52, %v4563_v56  ;;  %v5768_v47 = vrot.slane %v5752_v11, 9  ;;  %v5731_v28 = vcombine.low %v4161_v0, %v4171_v24  ;;  %v5757_v18 = vrot.slane %v5741_v55, 9  ;;  %v6856_v52 = vld [vmem:[%s7006_s10 + $0x6c] sm:$0xff]   ;;  %v5753_v11 = vld [vmem:[%s7006_s10 + $0xb4] sm:$0xe] }
 0x122   : > { %6474 = vmatpush3.bf16.msra.mxu1 %v6908_v40  ;;  %v8538_v57 = vsel %vm7284_vm5, %v4639_v60, %v4640_v7  ;;  %v8863_v40 = vld [vmem:[#allocation16_spill] sm:$0xff]  ;;  %v5788_v34 = vcombine.low %v4561_v25, %v4564_v16  ;;  %v4569_v19 = vrot.slane %v4567_v49, 4  ;;  %v5758_v2 = vrot.slane %v5742_v12, 9  ;;  %v5743_v0 = vld [vmem:[%s7006_s10 + $0x3c] sm:$0xe] }
 0x123   : > { %6467 = vmatprep.subr.bf16.mxu1 %v6910_v1  ;;  %v5799_v53 = vcombine.low %v8524_v4, %v8538_v57  ;;  %v4644_v14 = vrot.slane %v8863_v40, 5  ;;  %v4576_v56 = vrot.slane %v4574_v23, 4  ;;  %v6916_v24 = vld [vmem:[%s7006_s10 + $0x40] sm:$0xf]  ;;  %v4568_v48 = vsel %vm7284_vm5, %v5757_v18, %v4567_v49  ;;  %v6918_v18 = vld [vmem:[%s7006_s10 + $0x44] sm:$0x1] }
 0x124   : > { %6408 = vmatmul.mubr.bf16.gmra.mrb[24].mxu0 %v5729_v6  ;;  %v6913_v6 = vld [vmem:[%s8795_s1 + $0x128] sm:$0xff]   ;;  %v4581_v55 = vrot.slane %v6916_v24, 5  ;;  %v4651_v12 = vrot.slane %v8243_v10, 5  ;;  %v4575_v49 = vsel %vm7284_vm5, %v5758_v2, %v4574_v23  ;;  %v6919_v10 = vld [vmem:[%s8795_s1 + $0x138] sm:$0xff]   ;;  %v5754_v23 = vld [vmem:[%s7006_s10 + $0xc0] sm:$0xe] }
 0x125   : > { %6200 = vmatmul.mubr.bf16.gmra.mrb[8].mxu1 %v6851_v39  ;;  %6411 = vmatprep.mubr.bf16.mxu0 %v5730_v3  ;;  %v4570_v39 = vrot.slane %v6914_v33, 5  ;;  %v4647_v3 = vrot.slane %v8231_v21, 5  ;;  %v8555_v7 = vsel %vm7284_vm5, %v5768_v47, %v4644_v14  ;;  %v6917_v21 = vld [vmem:[%s8795_s1 + $0x130] sm:$0xff]   ;;  %v5769_v47 = vrot.slane %v5753_v11, 9 }
 0x126   : > { %6203 = vmatprep.mubr.bf16.mxu1 %v6853_v46  ;;  %6475 = vmatpush3.bf16.msra.mxu1 %v6910_v1  ;;  %v4646_v46 = vrot.slane %v4644_v14, 4  ;;  %v6915_v1 = vld [vmem:[%s7006_s10 + $0x38] sm:$0x1]  ;;  %v5759_v14 = vrot.slane %v5743_v0, 9  ;;  %v4584_v33 = vrot.slane %v6918_v18, 5  ;;  %v4658_v11 = vrot.slane %v8325_v51, 5 }
 0x127   : > { %6468 = vmatprep.subr.bf16.mxu1 %v6913_v6  ;;  %v4577_v60 = vrot.slane %v6915_v1, 5  ;;  %v4571_v36 = vsel %vm7284_vm5, %v4569_v19, %v4570_v39  ;;  %v4653_v39 = vrot.slane %v4651_v12, 4  ;;  %v5444_v19 = vld [vmem:[%s7006_s10 + $0x6c] sm:$0xf]  ;;  %v6859_v18 = vld [vmem:[%s7006_s10 + $0x90] sm:$0xff]   ;;  %v2409_v20 = vshll.u32 %v6925_v63, 16 }
 0x128   : > { %v8567_v25 = vsel %vm7284_vm5, %v4646_v46, %v4647_v3  ;;  %v5789_v3 = vcombine.low %v4568_v48, %v4571_v36  ;;  %v4582_v1 = vsel %vm7284_vm5, %v5759_v14, %v4581_v55  ;;  %v2342_v0 = vshrl.u32 %v5444_v19, 16  ;;  %v5755_v51 = vld [vmem:[%s7006_s10 + $0xcc] sm:$0xe] }
 0x129   : > { %v5800_v16 = vcombine.low %v8555_v7, %v8567_v25  ;;  %v4578_v40 = vsel %vm7284_vm5, %v4576_v56, %v4577_v60  ;;  %v5770_v56 = vrot.slane %v5754_v23, 9  ;;  %v2345_v24 = vshll.u32 %v5444_v19, 16 }
 0x12a   : > { %6476 = vmatpush3.bf16.msra.mxu1 %v6913_v6  ;;  %v4654_v6 = vrot.slane %v8264_v27, 5  ;;  %v8587_v27 = vsel %vm7284_vm5, %v5769_v47, %v4651_v12  ;;  %v4661_v36 = vrot.slane %v8376_v26, 5  ;;  %v4660_v12 = vrot.slane %v4658_v11, 4 }
 0x12b   : > { %6469 = vmatprep.subr.bf16.mxu1 %v6917_v21  ;;  %v2347_v26 = vrot.slane %v2345_v24, 5  ;;  %v4668_v23 = vrot.slane %v8466_v13, 5 }
 0x12c   : > { %6412 = vmatmul.mubr.bf16.gmra.mrb[28].mxu0 %v5731_v28  ;;  %v4583_v28 = vrot.slane %v4581_v55, 4  ;;  %v8594_v46 = vsel %vm7284_vm5, %v4653_v39, %v4654_v6  ;;  %v8608_v55 = vsel %vm7284_vm5, %v5770_v56, %v4658_v11  ;;  %v4665_v39 = vrot.slane %v8428_v31, 5  ;;  %v6921_v56 = vld [vmem:[%s7006_s10 + $0x74] sm:$0x1] }
 0x12d   : > { %6204 = vmatmul.mubr.bf16.gmra.mrb[12].mxu1 %v6854_v30  ;;  %6431 = vmatprep.mubr.bf16.mxu0 %v5788_v34  ;;  %v6857_v30 = vld [vmem:[%s7006_s10 + $0x78] sm:$0xff]   ;;  %v5790_v34 = vcombine.low %v4575_v49, %v4578_v40  ;;  %v5801_v2 = vcombine.low %v8587_v27, %v8594_v46  ;;  %v8613_v49 = vsel %vm7284_vm5, %v4660_v12, %v4661_v36  ;;  %v2344_v40 = vrot.slane %v2342_v0, 4  ;;  %v6922_v0 = vld [vmem:[%s7006_s10 + $0x88] sm:$0xf] }
 0x12e   : > { %6207 = vmatprep.mubr.bf16.mxu1 %v6856_v52  ;;  %6477 = vmatpush3.bf16.msra.mxu1 %v6917_v21  ;;  %v6858_v52 = vld [vmem:[%s7006_s10 + $0x84] sm:$0xff]   ;;  %v4585_v60 = vsel %vm7284_vm5, %v4583_v28, %v4584_v33  ;;  %v6920_v21 = vld [vmem:[%s7006_s10 + $0x70] sm:$0xf]  ;;  %v5802_v28 = vcombine.low %v8608_v55, %v8613_v49  ;;  %v4667_v19 = vrot.slane %v4665_v39, 4  ;;  %v2399_v24 = vshll.u32 %v6922_v0, 16 }
 0x12f   : > { %6470 = vmatprep.subr.bf16.mxu1 %v6919_v10  ;;  %v2351_v48 = vshll.u32 %v6920_v21, 16  ;;  %v2355_v47 = vshrl.u32 %v6920_v21, 16  ;;  %v5791_v6 = vcombine.low %v4582_v1, %v4585_v60  ;;  %v2361_v1 = vshll.u32 %v6921_v56, 16 }
 0x130   : > { %v8635_v11 = vsel %vm7284_vm5, %v4667_v19, %v4668_v23  ;;  %v2403_v21 = vshrl.u32 %v6922_v0, 16  ;;  %v6924_v19 = vld [vmem:[%s7006_s10 + $0xa0] sm:$0xf] }
 0x131   : > { %v8615_v14 = vrot.slane %v2351_v48, 5  ;;  %v2357_v33 = vrot.slane %v2355_v47, 4  ;;  %v2451_v56 = vshrl.u32 %v6924_v19, 16 }
 0x132   : > { %6478 = vmatpush3.bf16.msra.mxu1 %v6919_v10  ;;  %v5771_v10 = vrot.slane %v5755_v51, 9 }
 0x133   : > { %v2358_v31 = vor.u32 %v2357_v33, %v8615_v14  ;;  %v2417_v33 = vshll.u32 %v5453_v61, 16 }
 0x134   : > { %6432 = vmatmul.mubr.bf16.vlgmr.msra.gmra.mrb[0].mxu0 %v5789_v3  ;;  %v6860_v3 = vld [vmem:[%s7006_s10 + $0x9c] sm:$0xff]  }
 0x135   : > { %6208 = vmatmul.mubr.bf16.gmra.mrb[16].mxu1 %v6857_v30  ;;  %6435 = vmatprep.mubr.bf16.mxu0 %v5790_v34  ;;  %v5450_v30 = vld [vmem:[%s7006_s10 + $0x84] sm:$0xf]  ;;  %v8626_v34 = vsel %vm7284_vm5, %v5771_v10, %v4665_v39  ;;  %v2359_v47 = vrot.slane %v2358_v31, 4  ;;  %v6923_v10 = vld [vmem:[%s7006_s10 + $0x94] sm:$0xf]  ;;  %v2419_v0 = vrot.slane %v2417_v33, 5 }
 0x136   : > { %6211 = vmatprep.mubr.bf16.mxu1 %v6858_v52  ;;  %v2348_v52 = vor.u32 %v2347_v26, %v2344_v40  ;;  %v2390_v13 = vshrl.u32 %v5450_v30, 16  ;;  %v2393_v60 = vshll.u32 %v5450_v30, 16  ;;  %v5803_v48 = vcombine.low %v8626_v34, %v8635_v11 }
 0x137   : > { %v8644_v40 = vrot.slane %v2399_v24, 5  ;;  %v2405_v26 = vrot.slane %v2403_v21, 4  ;;  %v2423_v39 = vshll.u32 %v6923_v10, 16  ;;  %v2427_v23 = vshrl.u32 %v6923_v10, 16  ;;  %v6927_v10 = vld [vmem:[%s7006_s10 + $0xa4] sm:$0x1] }
 0x138   : > { %v2349_v36 = vrot.slane %v2348_v52, 4  ;;  %v2392_v12 = vrot.slane %v2390_v13, 4  ;;  %v2395_v51 = vrot.slane %v2393_v60, 5  ;;  %v2447_v52 = vshll.u32 %v6924_v19, 16  ;;  %v6928_v19 = vld [vmem:[%s7006_s10 + $0xac] sm:$0xf] }
 0x139   : > { %v2406_v13 = vor.u32 %v2405_v26, %v8644_v40  ;;  %v8661_v41 = vrot.slane %v2423_v39, 5  ;;  %v2429_v42 = vrot.slane %v2427_v23, 4  ;;  %v2453_v21 = vrot.slane %v2451_v56, 4  ;;  %v5462_v23 = vld [vmem:[%s7006_s10 + $0xb4] sm:$0xf] }
 0x13a   : > { %v2457_v39 = vshll.u32 %v6927_v10, 16  ;;  %v2475_v15 = vshrl.u32 %v6928_v19, 16  ;;  %v2489_v63 = vshll.u32 %v5462_v23, 16 }
 0x13b   : > { %v2430_v26 = vor.u32 %v2429_v42, %v8661_v41 }
 0x13c   : > { %6436 = vmatmul.mubr.bf16.gmra.mrb[4].mxu0 %v5791_v6  ;;  %v5456_v6 = vld [vmem:[%s7006_s10 + $0x9c] sm:$0xf] }
 0x13d   : > { %6212 = vmatmul.mubr.bf16.gmra.mrb[20].mxu1 %v6859_v18  ;;  %6439 = vmatprep.mubr.bf16.mxu0 %v5792_v8  ;;  %v2363_v8 = vrot.slane %v2361_v1, 5  ;;  %v2414_v18 = vshrl.u32 %v5453_v61, 16  ;;  %v2441_v30 = vshll.u32 %v5456_v6, 16  ;;  %v2354_v1 = vsel %vm7038_vm2, %v2349_v36, %v8615_v14  ;;  %v6863_v61 = vld [vmem:[%s7006_s10 + $0xc0] sm:$0xff]  }
 0x13e   : > { %6215 = vmatprep.mubr.bf16.mxu1 %v6860_v3  ;;  %v2438_v3 = vshrl.u32 %v5456_v6, 16  ;;  %v8663_v14 = vrot.slane %v2447_v52, 5  ;;  %v2471_v52 = vshll.u32 %v6928_v19, 16 }
 0x13f   : > { %v2364_v31 = vsel %vm7038_vm2, %v2359_v47, %v2363_v8  ;;  %v2416_v60 = vrot.slane %v2414_v18, 4  ;;  %v2443_v24 = vrot.slane %v2441_v30, 5  ;;  %v2411_v8 = vrot.slane %v2409_v20, 5  ;;  %v6929_v20 = vld [vmem:[%s7006_s10 + $0xb8] sm:$0xf] }
 0x140   : > { %v2407_v47 = vrot.slane %v2406_v13, 4  ;;  %v2454_v33 = vor.u32 %v2453_v21, %v8663_v14  ;;  %v2495_v29 = vshll.u32 %v6929_v20, 16  ;;  %v2499_v44 = vshrl.u32 %v6929_v20, 16 }
 0x142   : > { %v2455_v13 = vrot.slane %v2454_v33, 4 }
 0x144   : > { %6440 = vmatmul.mubr.bf16.gmra.mrb[8].mxu0 %v5793_v54  ;;  %v2396_v54 = vor.u32 %v2395_v51, %v2392_v12  ;;  %v2420_v12 = vor.u32 %v2419_v0, %v2416_v60  ;;  %v6926_v51 = vld [vmem:[%s7006_s10 + $0x98] sm:$0x1]  ;;  %v2459_v60 = vrot.slane %v2457_v39, 5 }
 0x145   : > { %6216 = vmatmul.mubr.bf16.gmra.mrb[24].mxu1 %v6861_v45  ;;  %6443 = vmatprep.mubr.bf16.mxu0 %v5794_v17  ;;  %v2440_v17 = vrot.slane %v2438_v3, 4  ;;  %v5492_v45 = vcombine.low %v2354_v1, %v2364_v31  ;;  %v2433_v6 = vshll.u32 %v6926_v51, 16  ;;  %v2486_v31 = vshrl.u32 %v5462_v23, 16 }
 0x146   : > { %6219 = vmatprep.mubr.bf16.mxu1 %v6862_v9  ;;  %v2397_v36 = vrot.slane %v2396_v54, 4  ;;  %v5459_v9 = vld [vmem:[%s7006_s10 + $0xa8] sm:$0xf]  ;;  %v2421_v56 = vrot.slane %v2420_v12, 4  ;;  %v2460_v32 = vsel %vm7038_vm2, %v2455_v13, %v2459_v60 }
 0x147   : > { %v2444_v18 = vor.u32 %v2443_v24, %v2440_v17  ;;  %v2462_v3 = vshrl.u32 %v5459_v9, 16  ;;  %v2465_v30 = vshll.u32 %v5459_v9, 16  ;;  %v2435_v1 = vrot.slane %v2433_v6, 5 }
 0x148   : > { %v2402_v43 = vsel %vm7038_vm2, %v2397_v36, %v8644_v40  ;;  %v2473_v17 = vrot.slane %v2471_v52, 5  ;;  %v2477_v24 = vrot.slane %v2475_v15, 4  ;;  %v2488_v21 = vrot.slane %v2486_v31, 4  ;;  %v5465_v36 = vld [vmem:[%s7006_s10 + $0xc0] sm:$0xf] }
 0x149   : > { %v2445_v54 = vrot.slane %v2444_v18, 4  ;;  %v2464_v0 = vrot.slane %v2462_v3, 4  ;;  %v2467_v42 = vrot.slane %v2465_v30, 5  ;;  %v2510_v9 = vshrl.u32 %v5465_v36, 16  ;;  %v6931_v18 = vld [vmem:[%s7006_s10 + $0xc4] sm:$0xf] }
 0x14a   : > { %v2519_v33 = vshll.u32 %v6931_v18, 16 }
 0x14b   : > { %v2450_v51 = vsel %vm7038_vm2, %v2445_v54, %v8663_v14  ;;  %v2468_v5 = vor.u32 %v2467_v42, %v2464_v0  ;;  %v2523_v14 = vshrl.u32 %v6931_v18, 16  ;;  %v2512_v19 = vrot.slane %v2510_v9, 4 }
 0x14c   : > { %6444 = vmatmul.mubr.bf16.gmra.mrb[12].mxu0 %v5795_v38  ;;  %v2412_v38 = vsel %vm7038_vm2, %v2407_v47, %v2411_v8  ;;  %v2501_v8 = vrot.slane %v2499_v44, 4  ;;  %v2426_v47 = vsel %vm7038_vm2, %v2421_v56, %v8661_v41  ;;  %v6930_v41 = vld [vmem:[%s7006_s10 + $0xb0] sm:$0x1]  ;;  %v5496_v58 = vcombine.low %v2450_v51, %v2460_v32  ;;  %v6933_v44 = vld [vmem:[%s7006_s10 + $0xc8] sm:$0x1] }
 0x14d   : > { %6220 = vmatmul.mubr.bf16.gmra.mrb[28].mxu1 %v6863_v61  ;;  %6447 = vmatprep.mubr.bf16.mxu0 %v5796_v35  ;;  %v2431_v35 = vrot.slane %v2430_v26, 4  ;;  %v5494_v40 = vcombine.low %v2402_v43, %v2412_v38  ;;  %v2491_v61 = vrot.slane %v2489_v63, 5  ;;  %v2481_v6 = vshll.u32 %v6930_v41, 16 }
 0x14e   : > { %6255 = vmatprep.mubr.bf16.mxu1 %v5492_v45  ;;  %v2497_v45 = vrot.slane %v2495_v29, 5  ;;  %v2513_v26 = vshll.u32 %v5465_v36, 16  ;;  %v2469_v22 = vrot.slane %v2468_v5, 4  ;;  %v2521_v15 = vrot.slane %v2519_v33, 5 }
 0x14f   : > { %v2436_v12 = vsel %vm7038_vm2, %v2431_v35, %v2435_v1  ;;  %v2492_v10 = vor.u32 %v2491_v61, %v2488_v21  ;;  %v2483_v30 = vrot.slane %v2481_v6, 5  ;;  %v2525_v43 = vrot.slane %v2523_v14, 4 }
 0x150   : > { %v2502_v39 = vor.u32 %v2501_v8, %v2497_v45  ;;  %v5495_v3 = vcombine.low %v2426_v47, %v2436_v12  ;;  %v2515_v52 = vrot.slane %v2513_v26, 5  ;;  %v2474_v31 = vsel %vm7038_vm2, %v2469_v22, %v2473_v17 }
 0x151   : > { %v2493_v38 = vrot.slane %v2492_v10, 4  ;;  %v2526_v29 = vor.u32 %v2525_v43, %v2521_v15  ;;  %v2529_v35 = vshll.u32 %v6933_v44, 16 }
 0x152   : > { %v2503_v56 = vrot.slane %v2502_v39, 4  ;;  %v2516_v20 = vor.u32 %v2515_v52, %v2512_v19 }
 0x153   : > { %v2498_v4 = vsel %vm7038_vm2, %v2493_v38, %v2497_v45  ;;  %v2531_v54 = vrot.slane %v2529_v35, 5 }
 0x154   : > { %6448 = vmatmul.mubr.bf16.gmra.mrb[16].mxu0 %v5797_v62  ;;  %v2478_v62 = vor.u32 %v2477_v24, %v2473_v17  ;;  %v2517_v25 = vrot.slane %v2516_v20, 4 }
 0x155   : > { %6256 = vmatmul.mubr.bf16.vlgmr.msra.gmra.mrb[16].mxu1 %v8486_v50  ;;  %6451 = vmatprep.mubr.bf16.mxu0 %v5798_v59  ;;  %v6932_v50 = vld [vmem:[%s7006_s10 + $0xbc] sm:$0x1]  ;;  %s5814_s10 = sshll.u32 %s8865_s13, 8 }
 0x156   : > { %6259 = vmatprep.mubr.bf16.mxu1 %v5494_v40  ;;  %v2505_v23 = vshll.u32 %v6932_v50, 16  ;;  %v2479_v59 = vrot.slane %v2478_v62, 4  ;;  %v2522_v13 = vsel %vm7038_vm2, %v2517_v25, %v2521_v15  ;;  %s8748_s8 = scalar_lea.vmem %s8796_s2, %s5814_s10 }
 0x158   : > { %v2507_v1 = vrot.slane %v2505_v23, 5  ;;  %v2484_v63 = vsel %vm7038_vm2, %v2479_v59, %v2483_v30 }
 0x15a   : > { %v2508_v57 = vsel %vm7038_vm2, %v2503_v56, %v2507_v1 }
 0x15b   : > { %v5498_v7 = vcombine.low %v2498_v4, %v2508_v57 }
 0x15c   : > { %6452 = vmatmul.mubr.bf16.gmra.mrb[20].mxu0 %v5799_v53  ;;  %v5497_v53 = vcombine.low %v2474_v31, %v2484_v63 }
 0x15d   : > { %6260 = vmatmul.mubr.bf16.gmra.mrb[20].mxu1 %v5495_v3  ;;  %6455 = vmatprep.mubr.bf16.mxu0 %v5800_v16  ;;  %v2527_v16 = vrot.slane %v2526_v29, 4 }
 0x15e   : > { %6263 = vmatprep.mubr.bf16.mxu1 %v5496_v58 }
 0x15f   : > { %v2532_v60 = vsel %vm7038_vm2, %v2527_v16, %v2531_v54 }
 0x160   : > { %v5499_v0 = vcombine.low %v2522_v13, %v2532_v60 }
 0x164   : > { %6456 = vmatmul.mubr.bf16.gmra.mrb[24].mxu0 %v5801_v2 }
 0x165   : > { %6264 = vmatmul.mubr.bf16.gmra.mrb[24].mxu1 %v5497_v53  ;;  %6459 = vmatprep.mubr.bf16.mxu0 %v5802_v28 }
 0x166   : > { %6267 = vmatprep.mubr.bf16.mxu1 %v5498_v7 }
 0x16c   : > { %6460 = vmatmul.mubr.bf16.gmra.mrb[28].mxu0 %v5803_v48 }
 0x16d   : > { %6268 = vmatmul.mubr.bf16.gmra.mrb[28].mxu1 %v5499_v0 }
 0x1e8   : > { %v6193_v27 = vpop.f32.mrb[0].mxu1 }
 0x1e9   : > { %v1942_v46 = vpop.f32.mrb[1].mxu1 }
 0x1ea   : > { %v6194_v2 = vpop.f32.mrb[2].mxu1 }
 0x1eb   : > { %v1945_v42 = vpop.f32.mrb[3].mxu1 }
 0x1f0   : > { %v6197_v55 = vpop.f32.mrb[4].mxu1 }
 0x1f1   : > { %v1958_v49 = vpop.f32.mrb[5].mxu1 }
 0x1f2   : > { %v6198_v28 = vpop.f32.mrb[6].mxu1 }
 0x1f3   : > { %v1961_v17 = vpop.f32.mrb[7].mxu1 }
 0x1f8   : > { %v6201_v24 = vpop.f32.mrb[8].mxu1 }
 0x1f9   : > { %v1974_v40 = vpop.f32.mrb[9].mxu1 }
 0x1fa   : > { %v6202_v21 = vpop.f32.mrb[10].mxu1 }
 0x1fb   : > { %v8734_v37 = vpop.f32.mrb[11].mxu1 }
 0x200   : > { %v8736_v61 = vpop.f32.mrb[12].mxu1 }
 0x201   : > { %v8738_v45 = vpop.f32.mrb[13].mxu1 }
 0x202   : > { %v8740_v34 = vpop.f32.mrb[14].mxu1 }
 0x203   : > { %v8742_v11 = vpop.f32.mrb[15].mxu1 }
 0x207   : > { %v6433_v48 = vpop.f32.mrb[0].mxu0 }
 0x208   : > { %v6479_v8 = vadd.f32 %v6433_v48, %v6193_v27  ;;  %v4833_v36 = vpop.f32.mrb[1].mxu0 }
 0x209   : > { %v6480_v47 = vadd.f32 %v4833_v36, %v1942_v46  ;;  %v6434_v12 = vpop.f32.mrb[2].mxu0 }
 0x20a   : > { %4994 = vst [vmem:[%s8748_s8 + $0x10] sm:$0xff] %v6479_v8  ;;  %v6481_v51 = vadd.f32 %v6434_v12, %v6194_v2  ;;  %v4836_v32 = vpop.f32.mrb[3].mxu0  ;;  %v5063_v9 = vmul.f32 %v6479_v8, %v6479_v8 }
 0x20b   : > { %4992 = vst [vmem:[%s8748_s8] sm:$0xff] %v6480_v47  ;;  %v6482_v5 = vadd.f32 %v4836_v32, %v1945_v42  ;;  %v5061_v62 = vmul.f32 %v6480_v47, %v6480_v47 }
 0x20c   : > { %4995 = vst [vmem:[%s8748_s8 + $0x18] sm:$0xff] %v6481_v51  ;;  %v5064_v39 = vmul.f32 %v6481_v51, %v6481_v51 }
 0x20d   : > { %4993 = vst [vmem:[%s8748_s8 + $0x8] sm:$0xff] %v6482_v5  ;;  %v5024_v41 = vadd.f32 %v6482_v5, %v6480_v47  ;;  %v5062_v6 = vmul.f32 %v6482_v5, %v6482_v5 }
 0x20f   : > { %v5025_v26 = vadd.f32 %v6479_v8, %v5024_v41  ;;  %v5093_v18 = vadd.f32 %v5062_v6, %v5061_v62  ;;  %v6437_v33 = vpop.f32.mrb[4].mxu0 }
 0x210   : > { %v6483_v14 = vadd.f32 %v6437_v33, %v6197_v55  ;;  %v4849_v10 = vpop.f32.mrb[5].mxu0 }
 0x211   : > { %v5094_v50 = vadd.f32 %v5093_v18, %v5063_v9  ;;  %v6484_v23 = vadd.f32 %v4849_v10, %v1958_v49  ;;  %v5026_v3 = vadd.f32 %v6481_v51, %v5025_v26  ;;  %v6438_v58 = vpop.f32.mrb[6].mxu0 }
 0x212   : > { %4998 = vst [vmem:[%s8748_s8 + $0x30] sm:$0xff] %v6483_v14  ;;  %v6485_v22 = vadd.f32 %v6438_v58, %v6198_v28  ;;  %v4852_v59 = vpop.f32.mrb[7].mxu0  ;;  %v5067_v1 = vmul.f32 %v6483_v14, %v6483_v14 }
 0x213   : > { %4996 = vst [vmem:[%s8748_s8 + $0x20] sm:$0xff] %v6484_v23  ;;  %v5027_v30 = vadd.f32 %v6484_v23, %v5026_v3  ;;  %v5065_v19 = vmul.f32 %v6484_v23, %v6484_v23  ;;  %v5095_v52 = vadd.f32 %v5094_v50, %v5064_v39  ;;  %v6486_v15 = vadd.f32 %v4852_v59, %v1961_v17 }
 0x214   : > { %4999 = vst [vmem:[%s8748_s8 + $0x38] sm:$0xff] %v6485_v22  ;;  %v5068_v35 = vmul.f32 %v6485_v22, %v6485_v22 }
 0x215   : > { %v5096_v43 = vadd.f32 %v5095_v52, %v5065_v19  ;;  %4997 = vst [vmem:[%s8748_s8 + $0x28] sm:$0xff] %v6486_v15  ;;  %v5028_v38 = vadd.f32 %v6486_v15, %v5027_v30  ;;  %v5066_v56 = vmul.f32 %v6486_v15, %v6486_v15 }
 0x217   : > { %v5029_v31 = vadd.f32 %v6483_v14, %v5028_v38  ;;  %v5097_v63 = vadd.f32 %v5096_v43, %v5066_v56  ;;  %v6441_v20 = vpop.f32.mrb[8].mxu0 }
 0x218   : > { %v6487_v29 = vadd.f32 %v6441_v20, %v6201_v24  ;;  %v4865_v44 = vpop.f32.mrb[9].mxu0 }
 0x219   : > { %v5098_v4 = vadd.f32 %v5097_v63, %v5067_v1  ;;  %v6488_v57 = vadd.f32 %v4865_v44, %v1974_v40  ;;  %v5030_v53 = vadd.f32 %v6485_v22, %v5029_v31  ;;  %v6442_v7 = vpop.f32.mrb[10].mxu0 }
 0x21a   : > { %5002 = vst [vmem:[%s8748_s8 + $0x50] sm:$0xff] %v6487_v29  ;;  %v6489_v25 = vadd.f32 %v6442_v7, %v6202_v21  ;;  %v4868_v16 = vpop.f32.mrb[11].mxu0  ;;  %v5071_v42 = vmul.f32 %v6487_v29, %v6487_v29 }
 0x21b   : > { %5000 = vst [vmem:[%s8748_s8 + $0x40] sm:$0xff] %v6488_v57  ;;  %v5031_v54 = vadd.f32 %v6488_v57, %v5030_v53  ;;  %v5069_v13 = vmul.f32 %v6488_v57, %v6488_v57  ;;  %v5099_v60 = vadd.f32 %v5098_v4, %v5068_v35  ;;  %v6490_v0 = vadd.f32 %v4868_v16, %v8734_v37 }
 0x21c   : > { %5003 = vst [vmem:[%s8748_s8 + $0x58] sm:$0xff] %v6489_v25  ;;  %v5072_v40 = vmul.f32 %v6489_v25, %v6489_v25 }
 0x21d   : > { %v5100_v27 = vadd.f32 %v5099_v60, %v5069_v13  ;;  %5001 = vst [vmem:[%s8748_s8 + $0x48] sm:$0xff] %v6490_v0  ;;  %v5032_v46 = vadd.f32 %v6490_v0, %v5031_v54  ;;  %v5070_v2 = vmul.f32 %v6490_v0, %v6490_v0 }
 0x21f   : > { %v5033_v55 = vadd.f32 %v6487_v29, %v5032_v46  ;;  %v5101_v49 = vadd.f32 %v5100_v27, %v5070_v2  ;;  %v6445_v28 = vpop.f32.mrb[12].mxu0 }
 0x220   : > { %v6491_v17 = vadd.f32 %v6445_v28, %v8736_v61  ;;  %v4881_v24 = vpop.f32.mrb[13].mxu0 }
 0x221   : > { %v5102_v21 = vadd.f32 %v5101_v49, %v5071_v42  ;;  %v6492_v37 = vadd.f32 %v4881_v24, %v8738_v45  ;;  %v5034_v48 = vadd.f32 %v6489_v25, %v5033_v55  ;;  %v6446_v8 = vpop.f32.mrb[14].mxu0 }
 0x222   : > { %5006 = vst [vmem:[%s8748_s8 + $0x70] sm:$0xff] %v6491_v17  ;;  %v6493_v36 = vadd.f32 %v6446_v8, %v8740_v34  ;;  %v4884_v47 = vpop.f32.mrb[15].mxu0  ;;  %v5075_v6 = vmul.f32 %v6491_v17, %v6491_v17 }
 0x223   : > { %5004 = vst [vmem:[%s8748_s8 + $0x60] sm:$0xff] %v6492_v37  ;;  %v5035_v12 = vadd.f32 %v6492_v37, %v5034_v48  ;;  %v5073_v51 = vmul.f32 %v6492_v37, %v6492_v37  ;;  %v5103_v32 = vadd.f32 %v5102_v21, %v5072_v40  ;;  %v6494_v5 = vadd.f32 %v4884_v47, %v8742_v11 }
 0x224   : > { %5007 = vst [vmem:[%s8748_s8 + $0x78] sm:$0xff] %v6493_v36  ;;  %v5076_v33 = vmul.f32 %v6493_v36, %v6493_v36 }
 0x225   : > { %v5104_v61 = vadd.f32 %v5103_v32, %v5073_v51  ;;  %5005 = vst [vmem:[%s8748_s8 + $0x68] sm:$0xff] %v6494_v5  ;;  %v5036_v62 = vadd.f32 %v6494_v5, %v5035_v12  ;;  %v5074_v41 = vmul.f32 %v6494_v5, %v6494_v5 }
 0x227   : > { %v5037_v45 = vadd.f32 %v6491_v17, %v5036_v62  ;;  %v5105_v9 = vadd.f32 %v5104_v61, %v5074_v41  ;;  %v6449_v26 = vpop.f32.mrb[16].mxu0 }
 0x228   : > { %v6257_v18 = vpop.f32.mrb[16].mxu1  ;;  %v4897_v34 = vpop.f32.mrb[17].mxu0 }
 0x229   : > { %v5106_v14 = vadd.f32 %v5105_v9, %v5075_v6  ;;  %v6495_v10 = vadd.f32 %v6449_v26, %v6257_v18  ;;  %v2760_v39 = vpop.f32.mrb[17].mxu1  ;;  %v5038_v11 = vadd.f32 %v6493_v36, %v5037_v45  ;;  %v6450_v50 = vpop.f32.mrb[18].mxu0 }
 0x22a   : > { %v6496_v23 = vadd.f32 %v4897_v34, %v2760_v39  ;;  %v6258_v3 = vpop.f32.mrb[18].mxu1  ;;  %v4900_v58 = vpop.f32.mrb[19].mxu0 }
 0x22b   : > { %5010 = vst [vmem:[%s8748_s8 + $0x90] sm:$0xff] %v6495_v10  ;;  %v5107_v22 = vadd.f32 %v5106_v14, %v5076_v33  ;;  %v6497_v59 = vadd.f32 %v6450_v50, %v6258_v3  ;;  %v2763_v30 = vpop.f32.mrb[19].mxu1  ;;  %v5079_v31 = vmul.f32 %v6495_v10, %v6495_v10 }
 0x22c   : > { %5008 = vst [vmem:[%s8748_s8 + $0x80] sm:$0xff] %v6496_v23  ;;  %v5039_v19 = vadd.f32 %v6496_v23, %v5038_v11  ;;  %v5077_v52 = vmul.f32 %v6496_v23, %v6496_v23  ;;  %v6498_v15 = vadd.f32 %v4900_v58, %v2763_v30 }
 0x22d   : > { %5011 = vst [vmem:[%s8748_s8 + $0x98] sm:$0xff] %v6497_v59  ;;  %v5080_v53 = vmul.f32 %v6497_v59, %v6497_v59 }
 0x22e   : > { %v5108_v43 = vadd.f32 %v5107_v22, %v5077_v52  ;;  %5009 = vst [vmem:[%s8748_s8 + $0x88] sm:$0xff] %v6498_v15  ;;  %v5040_v38 = vadd.f32 %v6498_v15, %v5039_v19  ;;  %v5078_v56 = vmul.f32 %v6498_v15, %v6498_v15 }
 0x22f   : > { %v6453_v1 = vpop.f32.mrb[20].mxu0 }
 0x230   : > { %v5041_v63 = vadd.f32 %v6495_v10, %v5040_v38  ;;  %v5109_v20 = vadd.f32 %v5108_v43, %v5078_v56  ;;  %v6261_v29 = vpop.f32.mrb[20].mxu1  ;;  %v4913_v44 = vpop.f32.mrb[21].mxu0 }
 0x231   : > { %v6499_v35 = vadd.f32 %v6453_v1, %v6261_v29  ;;  %v2776_v4 = vpop.f32.mrb[21].mxu1  ;;  %v6454_v57 = vpop.f32.mrb[22].mxu0 }
 0x232   : > { %v5110_v7 = vadd.f32 %v5109_v20, %v5079_v31  ;;  %v6500_v25 = vadd.f32 %v4913_v44, %v2776_v4  ;;  %v5042_v16 = vadd.f32 %v6497_v59, %v5041_v63  ;;  %v6262_v54 = vpop.f32.mrb[22].mxu1  ;;  %v4916_v13 = vpop.f32.mrb[23].mxu0 }
 0x233   : > { %5014 = vst [vmem:[%s8748_s8 + $0xb0] sm:$0xff] %v6499_v35  ;;  %v6501_v60 = vadd.f32 %v6454_v57, %v6262_v54  ;;  %v2779_v0 = vpop.f32.mrb[23].mxu1  ;;  %v5083_v24 = vmul.f32 %v6499_v35, %v6499_v35 }
 0x234   : > { %5012 = vst [vmem:[%s8748_s8 + $0xa0] sm:$0xff] %v6500_v25  ;;  %v5043_v27 = vadd.f32 %v6500_v25, %v5042_v16  ;;  %v5081_v46 = vmul.f32 %v6500_v25, %v6500_v25  ;;  %v5111_v2 = vadd.f32 %v5110_v7, %v5080_v53  ;;  %v6502_v42 = vadd.f32 %v4916_v13, %v2779_v0 }
 0x235   : > { %5015 = vst [vmem:[%s8748_s8 + $0xb8] sm:$0xff] %v6501_v60  ;;  %v5084_v12 = vmul.f32 %v6501_v60, %v6501_v60 }
 0x236   : > { %v5112_v55 = vadd.f32 %v5111_v2, %v5081_v46  ;;  %5013 = vst [vmem:[%s8748_s8 + $0xa8] sm:$0xff] %v6502_v42  ;;  %v5044_v49 = vadd.f32 %v6502_v42, %v5043_v27  ;;  %v5082_v28 = vmul.f32 %v6502_v42, %v6502_v42 }
 0x237   : > { %v6457_v17 = vpop.f32.mrb[24].mxu0 }
 0x238   : > { %v5045_v40 = vadd.f32 %v6499_v35, %v5044_v49  ;;  %v5113_v21 = vadd.f32 %v5112_v55, %v5082_v28  ;;  %v6265_v37 = vpop.f32.mrb[24].mxu1  ;;  %v4929_v48 = vpop.f32.mrb[25].mxu0 }
 0x239   : > { %v6503_v8 = vadd.f32 %v6457_v17, %v6265_v37  ;;  %v2792_v36 = vpop.f32.mrb[25].mxu1  ;;  %v6458_v47 = vpop.f32.mrb[26].mxu0 }
 0x23a   : > { %v5114_v51 = vadd.f32 %v5113_v21, %v5083_v24  ;;  %v6504_v32 = vadd.f32 %v4929_v48, %v2792_v36  ;;  %v5046_v5 = vadd.f32 %v6501_v60, %v5045_v40  ;;  %v6266_v61 = vpop.f32.mrb[26].mxu1  ;;  %v4932_v62 = vpop.f32.mrb[27].mxu0 }
 0x23b   : > { %5018 = vst [vmem:[%s8748_s8 + $0xd0] sm:$0xff] %v6503_v8  ;;  %v6505_v41 = vadd.f32 %v6458_v47, %v6266_v61  ;;  %v2795_v6 = vpop.f32.mrb[27].mxu1  ;;  %v5087_v39 = vmul.f32 %v6503_v8, %v6503_v8 }
 0x23c   : > { %5016 = vst [vmem:[%s8748_s8 + $0xc0] sm:$0xff] %v6504_v32  ;;  %v5047_v45 = vadd.f32 %v6504_v32, %v5046_v5  ;;  %v5085_v9 = vmul.f32 %v6504_v32, %v6504_v32  ;;  %v5115_v26 = vadd.f32 %v5114_v51, %v5084_v12  ;;  %v6506_v18 = vadd.f32 %v4932_v62, %v2795_v6 }
 0x23d   : > { %5019 = vst [vmem:[%s8748_s8 + $0xd8] sm:$0xff] %v6505_v41  ;;  %v5088_v30 = vmul.f32 %v6505_v41, %v6505_v41 }
 0x23e   : > { %v5116_v34 = vadd.f32 %v5115_v26, %v5085_v9  ;;  %5017 = vst [vmem:[%s8748_s8 + $0xc8] sm:$0xff] %v6506_v18  ;;  %v5048_v33 = vadd.f32 %v6506_v18, %v5047_v45  ;;  %v5086_v14 = vmul.f32 %v6506_v18, %v6506_v18 }
 0x23f   : > { %v6461_v10 = vpop.f32.mrb[28].mxu0 }
 0x240   : > { %v5049_v11 = vadd.f32 %v6503_v8, %v5048_v33  ;;  %v5117_v50 = vadd.f32 %v5116_v34, %v5086_v14  ;;  %v6269_v23 = vpop.f32.mrb[28].mxu1  ;;  %v4945_v3 = vpop.f32.mrb[29].mxu0 }
 0x241   : > { %v6507_v58 = vadd.f32 %v6461_v10, %v6269_v23  ;;  %v2808_v22 = vpop.f32.mrb[29].mxu1  ;;  %v6462_v59 = vpop.f32.mrb[30].mxu0 }
 0x242   : > { %v5118_v19 = vadd.f32 %v5117_v50, %v5087_v39  ;;  %v6508_v52 = vadd.f32 %v4945_v3, %v2808_v22  ;;  %v5050_v15 = vadd.f32 %v6505_v41, %v5049_v11  ;;  %v6270_v43 = vpop.f32.mrb[30].mxu1  ;;  %v4948_v38 = vpop.f32.mrb[31].mxu0 }
 0x243   : > { %5022 = vst [vmem:[%s8748_s8 + $0xf0] sm:$0xff] %v6507_v58  ;;  %v6509_v56 = vadd.f32 %v6462_v59, %v6270_v43  ;;  %v2811_v1 = vpop.f32.mrb[31].mxu1  ;;  %v5091_v57 = vmul.f32 %v6507_v58, %v6507_v58 }
 0x244   : > { %5020 = vst [vmem:[%s8748_s8 + $0xe0] sm:$0xff] %v6508_v52  ;;  %v5051_v31 = vadd.f32 %v6508_v52, %v5050_v15  ;;  %v5089_v63 = vmul.f32 %v6508_v52, %v6508_v52  ;;  %v5119_v20 = vadd.f32 %v5118_v19, %v5088_v30  ;;  %v6510_v29 = vadd.f32 %v4948_v38, %v2811_v1 }
 0x245   : > { %5023 = vst [vmem:[%s8748_s8 + $0xf8] sm:$0xff] %v6509_v56  ;;  %v5092_v25 = vmul.f32 %v6509_v56, %v6509_v56 }
 0x246   : > { %v5120_v44 = vadd.f32 %v5119_v20, %v5089_v63  ;;  %5021 = vst [vmem:[%s8748_s8 + $0xe8] sm:$0xff] %v6510_v29  ;;  %v5052_v35 = vadd.f32 %v6510_v29, %v5051_v31  ;;  %v5090_v4 = vmul.f32 %v6510_v29, %v6510_v29 }
 0x248   : > { %v5053_v53 = vadd.f32 %v6507_v58, %v5052_v35  ;;  %v5121_v7 = vadd.f32 %v5120_v44, %v5090_v4 }
 0x24a   : > { %v5054_v16 = vadd.f32 %v6509_v56, %v5053_v53  ;;  %v5122_v54 = vadd.f32 %v5121_v7, %v5091_v57 }
 0x24c   : > { %v5055_v13 = vrot.slane %v5054_v16, 4  ;;  %v5123_v60 = vadd.f32 %v5122_v54, %v5092_v25 }
 0x24e   : > { %v5056_v0 = vadd.f32 %v5055_v13, %v5054_v16  ;;  %v5124_v27 = vrot.slane %v5123_v60, 4 }
 0x250   : > { %v5057_v46 = vrot.slane %v5056_v0, 2  ;;  %v5125_v2 = vadd.f32 %v5124_v27, %v5123_v60 }
 0x252   : > { %v5058_v42 = vadd.f32 %v5057_v46, %v5056_v0  ;;  %v5126_v55 = vrot.slane %v5125_v2, 2 }
 0x254   : > { %v5059_v49 = vrot.slane %v5058_v42, 1  ;;  %v5127_v28 = vadd.f32 %v5126_v55, %v5125_v2 }
 0x256   : > { %v5128_v17 = vrot.slane %v5127_v28, 1  ;;  %v5060_v24 = vadd.f32 %v5059_v49, %v5058_v42 }
 0x258   : > { %v5129_v40 = vadd.f32 %v5128_v17, %v5127_v28 }
 0x25a   : > { %v5131_v21 = vsel %vm5130_vm6, %v5060_v24, %v5129_v40 }
 0x25b   : > { %5132 = vst [vmem:[%s181_s15] sm:$0x3] %v5131_v21 }
 0x25c PF: > { %s14_s12 = sadd.s32 1, %s6940_s12  }
 0x25d   : > { %p11_p4 = scmp.ge.s32.totalorder %s14_s12, 10  }
 0x25f   :  { %13 = sbr.rel (!%p11_p4) target bundleno = 1 (0x1), region = 80 }

</bundles_post_ra>
